<compile_context>
chip_gen: v7x
topology: tpu7x:2x2x1
jax: 0.10.0
libtpu: 0.0.40
codegen_flags: <defaults>
</compile_context>

<pallas_src>
import functools

import jax
import jax.numpy as jnp
import numpy as np
from jax.experimental import pallas as pl
from jax.experimental.pallas import tpu as pltpu

N_LAYERS = 5
# torch.nn.RMSNorm(eps=None) uses torch.finfo(float32).eps for float32 inputs.
RMS_EPS = 1.1920928955078125e-07


def _round_up(x, m):
    return (x + m - 1) // m * m


def _pad_to(a, shape):
    pads = [(0, t - s) for s, t in zip(a.shape, shape)]
    return jnp.pad(a, pads)


def _vmem_budget_bytes():
    """Per-core VMEM capacity with ~15% headroom; conservative fallback."""
    cap = 64 * 1024 * 1024  # v7x per-TC VMEM — safe lower bound for all gens
    try:
        info = pltpu.get_tpu_info()
        c = getattr(info, "vmem_capacity_bytes", None)
        if c:
            cap = int(c)
    except Exception:
        pass
    return int(0.85 * cap)


# ----------------------------------------------------------------------------
# Resident-weights kernel (small sizes): everything fits in VMEM, one grid
# axis over token tiles.
# ----------------------------------------------------------------------------
def _chroma_resident_kernel(x_ref, w_in_ref, b_in_ref, gamma_ref, w1_ref,
                            b1_ref, w2_ref, b2_ref, w_out_ref, b_out_ref,
                            out_ref, *, n_layers, inv_hidden):
    # in_proj (bf16 MXU inputs, f32 accumulation)
    h = jnp.dot(x_ref[...], w_in_ref[...],
                preferred_element_type=jnp.float32) + b_in_ref[...]

    # n_layers of: h = h + PixArtAlphaTextProjection(RMSNorm(h))
    for l in range(n_layers):
        # RMSNorm over the TRUE hidden size (padded lanes of h stay zero).
        ms = jnp.sum(h * h, axis=-1, keepdims=True) * inv_hidden
        y = (h * jax.lax.rsqrt(ms + RMS_EPS) * gamma_ref[l]).astype(jnp.bfloat16)
        t = jnp.dot(y, w1_ref[l], preferred_element_type=jnp.float32) + b1_ref[l]
        t = t * jax.nn.sigmoid(t)  # SiLU
        t = jnp.dot(t.astype(jnp.bfloat16), w2_ref[l],
                    preferred_element_type=jnp.float32) + b2_ref[l]
        h = h + t

    out = jnp.dot(h.astype(jnp.bfloat16), w_out_ref[...],
                  preferred_element_type=jnp.float32) + b_out_ref[...]
    out_ref[...] = out.astype(out_ref.dtype)


# ----------------------------------------------------------------------------
# Streamed-weights kernel (large sizes): grid = (token_tile, layer, chunk).
# h is an f32 VMEM scratch accumulator; W1[:, chunk] / W2[chunk, :] are
# streamed per grid step so each weight byte is read exactly once per token
# tile (one tile for real Chroma token counts).
# ----------------------------------------------------------------------------
def _chroma_streamed_kernel(x_ref, w_in_ref, b_in_ref, gamma_ref, w1_ref,
                            b1_ref, w2_ref, b2_ref, w_out_ref, b_out_ref,
                            out_ref, h_ref, y_ref, *, n_layers, n_chunks,
                            inv_hidden):
    l = pl.program_id(1)
    c = pl.program_id(2)

    @pl.when((l == 0) & (c == 0))
    def _():  # fresh token tile: h = in_proj(x)
        h_ref[...] = (jnp.dot(x_ref[...], w_in_ref[...],
                              preferred_element_type=jnp.float32)
                      + b_in_ref[...])

    @pl.when(c == 0)
    def _():  # start of a layer: y = RMSNorm(h) * gamma ; pre-add b2 residual
        h = h_ref[...]
        ms = jnp.sum(h * h, axis=-1, keepdims=True) * inv_hidden
        y_ref[...] = (h * jax.lax.rsqrt(ms + RMS_EPS)
                      * gamma_ref[0]).astype(jnp.bfloat16)
        h_ref[...] = h + b2_ref[0]  # linear_2 bias added once per layer

    # one hidden chunk of the SiLU MLP: h += SiLU(y @ W1[:,c] + b1[c]) @ W2[c,:]
    t = jnp.dot(y_ref[...], w1_ref[0],
                preferred_element_type=jnp.float32) + b1_ref[0]
    t = t * jax.nn.sigmoid(t)
    h_ref[...] += jnp.dot(t.astype(jnp.bfloat16), w2_ref[0],
                          preferred_element_type=jnp.float32)

    @pl.when((l == n_layers - 1) & (c == n_chunks - 1))
    def _():  # finalize: out_proj
        out = jnp.dot(h_ref[...].astype(jnp.bfloat16), w_out_ref[...],
                      preferred_element_type=jnp.float32) + b_out_ref[...]
        out_ref[...] = out.astype(out_ref.dtype)


def chroma_approximator(x, params, *, block_tokens=256, force_streamed=False,
                        chunk=None):
    """x: (tokens, in_dim) float32. params: dict of pre-transposed weights."""
    out_dtype = x.dtype
    n_tok, in_dim = x.shape
    hidden = params["w_in"].shape[1]
    out_dim = params["w_out"].shape[1]
    n_layers = params["w1"].shape[0]

    # Lane-dense padding (multiples of 128).  Single token block when n_tok is
    # small; 256-row tiles otherwise (full MXU pass on v6e/v7x).
    in_pad = _round_up(in_dim, 128)
    hid_pad = _round_up(hidden, 128)
    out_pad = _round_up(out_dim, 128)
    tm = _round_up(min(n_tok, block_tokens), 8)
    tok_pad = _round_up(n_tok, tm)
    n_tok_tiles = tok_pad // tm

    xp = _pad_to(x, (tok_pad, in_pad)).astype(jnp.bfloat16)
    w_in = _pad_to(params["w_in"], (in_pad, hid_pad)).astype(jnp.bfloat16)
    b_in = _pad_to(params["b_in"], (1, hid_pad)).astype(jnp.float32)
    gamma = _pad_to(params["gamma"], (n_layers, 1, hid_pad)).astype(jnp.float32)
    w1 = _pad_to(params["w1"], (n_layers, hid_pad, hid_pad)).astype(jnp.bfloat16)
    b1 = _pad_to(params["b1"], (n_layers, 1, hid_pad)).astype(jnp.float32)
    w2 = _pad_to(params["w2"], (n_layers, hid_pad, hid_pad)).astype(jnp.bfloat16)
    b2 = _pad_to(params["b2"], (n_layers, 1, hid_pad)).astype(jnp.float32)
    w_out = _pad_to(params["w_out"], (hid_pad, out_pad)).astype(jnp.bfloat16)
    b_out = _pad_to(params["b_out"], (1, out_pad)).astype(jnp.float32)

    budget = _vmem_budget_bytes()
    inv_hidden = 1.0 / float(hidden)

    # Advisory cost model.
    flops = 2 * tok_pad * (in_pad * hid_pad
                           + n_layers * 2 * hid_pad * hid_pad
                           + hid_pad * out_pad)
    transcendentals = tok_pad * n_layers * (hid_pad + 1)  # sigmoid + rsqrt
    weight_bytes = (w_in.size + w1.size + w2.size + w_out.size) * 2
    small_bytes = (b_in.size + gamma.size + b1.size + b2.size + b_out.size) * 4
    bytes_accessed = xp.size * 2 + tok_pad * out_pad * 4 + weight_bytes + small_bytes
    cost = pl.CostEstimate(flops=int(flops), transcendentals=int(transcendentals),
                           bytes_accessed=int(bytes_accessed))

    # VMEM needed to keep everything resident (default pipeline allocates 2
    # buffers per input) + the f32 activation working set (h, y, t, casts).
    resident_need = (2 * weight_bytes + 2 * small_bytes
                     + 2 * tm * in_pad * 2 + 2 * tm * out_pad * 4
                     + 6 * tm * hid_pad * 4)
    use_streamed = force_streamed or resident_need > int(0.7 * budget)

    if not use_streamed:
        const2 = lambda i: (0, 0)
        const3 = lambda i: (0, 0, 0)
        kernel = functools.partial(_chroma_resident_kernel,
                                   n_layers=n_layers, inv_hidden=inv_hidden)
        out_padded = pl.pallas_call(
            kernel,
            out_shape=jax.ShapeDtypeStruct((tok_pad, out_pad), out_dtype),
            grid=(n_tok_tiles,),
            in_specs=[
                pl.BlockSpec((tm, in_pad), lambda i: (i, 0)),                 # x
                pl.BlockSpec((in_pad, hid_pad), const2),                      # w_in
                pl.BlockSpec((1, hid_pad), const2),                           # b_in
                pl.BlockSpec((n_layers, 1, hid_pad), const3),                 # gamma
                pl.BlockSpec((n_layers, hid_pad, hid_pad), const3),           # w1
                pl.BlockSpec((n_layers, 1, hid_pad), const3),                 # b1
                pl.BlockSpec((n_layers, hid_pad, hid_pad), const3),           # w2
                pl.BlockSpec((n_layers, 1, hid_pad), const3),                 # b2
                pl.BlockSpec((hid_pad, out_pad), const2),                     # w_out
                pl.BlockSpec((1, out_pad), const2),                           # b_out
            ],
            out_specs=pl.BlockSpec((tm, out_pad), lambda i: (i, 0)),
            compiler_params=pltpu.CompilerParams(
                # weights are re-fetched per core under megacore sharding, so
                # keep the (tiny / weight-bound) resident path single-core.
                dimension_semantics=("arbitrary",),
                vmem_limit_bytes=int(budget)),
            cost_estimate=cost,
        )(xp, w_in, b_in, gamma, w1, b1, w2, b2, w_out, b_out)
    else:
        if chunk is None:
            # Size the streamed chunk from the per-generation VMEM budget:
            # 2 buffers x (W1 column-chunk + W2 row-chunk) bf16, plus resident
            # w_in/w_out, scratch h/y, x/out tiles, f32 t intermediates.
            fixed = (2 * 2 * (w_in.size + w_out.size)
                     + 2 * 4 * (b_in.size + b_out.size)
                     + 2 * 4 * (2 * hid_pad))                 # gamma + b2 blocks
            scratch_bytes = tm * hid_pad * 4 + tm * hid_pad * 2
            io_bytes = 2 * tm * in_pad * 2 + 2 * tm * out_pad * 4
            avail = budget - fixed - scratch_bytes - io_bytes - (4 << 20)
            per_chunk = 2 * (2 * hid_pad * 2) + 6 * tm + 8    # weights + t + b1
            chunk = max(128, min(512, (avail // per_chunk) // 128 * 128))
        chunk = int(min(chunk, hid_pad))
        while hid_pad % chunk != 0:
            chunk -= 128
        n_chunks = hid_pad // chunk

        kernel = functools.partial(_chroma_streamed_kernel, n_layers=n_layers,
                                   n_chunks=n_chunks, inv_hidden=inv_hidden)
        out_padded = pl.pallas_call(
            kernel,
            out_shape=jax.ShapeDtypeStruct((tok_pad, out_pad), out_dtype),
            grid=(n_tok_tiles, n_layers, n_chunks),
            in_specs=[
                pl.BlockSpec((tm, in_pad), lambda i, l, c: (i, 0)),            # x
                pl.BlockSpec((in_pad, hid_pad), lambda i, l, c: (0, 0)),       # w_in
                pl.BlockSpec((1, hid_pad), lambda i, l, c: (0, 0)),            # b_in
                pl.BlockSpec((1, 1, hid_pad), lambda i, l, c: (l, 0, 0)),      # gamma[l]
                pl.BlockSpec((1, hid_pad, chunk), lambda i, l, c: (l, 0, c)),  # w1[l][:,c]
                pl.BlockSpec((1, 1, chunk), lambda i, l, c: (l, 0, c)),        # b1[l][c]
                pl.BlockSpec((1, chunk, hid_pad), lambda i, l, c: (l, c, 0)),  # w2[l][c,:]
                pl.BlockSpec((1, 1, hid_pad), lambda i, l, c: (l, 0, 0)),      # b2[l]
                pl.BlockSpec((hid_pad, out_pad), lambda i, l, c: (0, 0)),      # w_out
                pl.BlockSpec((1, out_pad), lambda i, l, c: (0, 0)),            # b_out
            ],
            out_specs=pl.BlockSpec((tm, out_pad), lambda i, l, c: (i, 0)),
            scratch_shapes=[pltpu.VMEM((tm, hid_pad), jnp.float32),   # h (residual)
                            pltpu.VMEM((tm, hid_pad), jnp.bfloat16)], # y (normed)
            compiler_params=pltpu.CompilerParams(
                dimension_semantics=("arbitrary", "arbitrary", "arbitrary"),
                vmem_limit_bytes=int(budget)),
            cost_estimate=cost,
        )(xp, w_in, b_in, gamma, w1, b1, w2, b2, w_out, b_out)

    return out_padded[:n_tok, :out_dim]


def init_params(key, in_dim, hidden_dim, out_dim, n_layers=N_LAYERS):
    """Deterministic synthetic parameters (not a checkpoint load)."""
    ks = jax.random.split(key, 10)
    scale = 0.05
    return {
        # pre-transposed Linear weights: (fan_in, fan_out)
        "w_in":  scale * jax.random.normal(ks[0], (in_dim, hidden_dim), jnp.float32),
        "b_in":  scale * jax.random.normal(ks[1], (1, hidden_dim), jnp.float32),
        "gamma": 1.0 + scale * jax.random.normal(ks[2], (n_layers, 1, hidden_dim), jnp.float32),
        "w1":    scale * jax.random.normal(ks[3], (n_layers, hidden_dim, hidden_dim), jnp.float32),
        "b1":    scale * jax.random.normal(ks[4], (n_layers, 1, hidden_dim), jnp.float32),
        "w2":    scale * jax.random.normal(ks[5], (n_layers, hidden_dim, hidden_dim), jnp.float32),
        "b2":    scale * jax.random.normal(ks[6], (n_layers, 1, hidden_dim), jnp.float32),
        "w_out": scale * jax.random.normal(ks[7], (hidden_dim, out_dim), jnp.float32),
        "b_out": scale * jax.random.normal(ks[8], (1, out_dim), jnp.float32),
    }


def reference_forward(x, p):
    """Pure-JAX f32 reference of the PyTorch forward semantics."""
    h = x @ p["w_in"] + p["b_in"]
    for l in range(p["w1"].shape[0]):
        ms = jnp.mean(h * h, axis=-1, keepdims=True)
        y = h * jax.lax.rsqrt(ms + RMS_EPS) * p["gamma"][l]
        t = y @ p["w1"][l] + p["b1"][l]
        t = t * jax.nn.sigmoid(t)
        t = t @ p["w2"][l] + p["b2"][l]
        h = h + t
    return h @ p["w_out"] + p["b_out"]


if __name__ == "__main__":
    tokens, in_dim, hidden_dim, out_dim = 256, 16, 32, 48

    key = jax.random.PRNGKey(0)
    kx, kp = jax.random.split(key)
    x = jax.random.normal(kx, (tokens, in_dim), jnp.float32)

    # Path 1: resident-weights kernel (auto-selected at these toy sizes).
    params = init_params(kp, in_dim, hidden_dim, out_dim)
    out = jax.block_until_ready(chroma_approximator(x, params))
    ref = reference_forward(x, params)
    assert out.shape == (tokens, out_dim)
    np.testing.assert_allclose(np.asarray(out), np.asarray(ref),
                               rtol=2e-2, atol=2e-2)

    # Path 2: streamed-weights kernel (the real-size path), forced at a small
    # shape that still exercises >1 hidden chunk and >1 token tile.
    hidden2 = 200  # pads to 256 -> 2 chunks of 128
    params2 = init_params(kp, in_dim, hidden2, out_dim)
    out2 = jax.block_until_ready(
        chroma_approximator(x, params2, block_tokens=128,
                            force_streamed=True, chunk=128))
    ref2 = reference_forward(x, params2)
    assert out2.shape == (tokens, out_dim)
    np.testing.assert_allclose(np.asarray(out2), np.asarray(ref2),
                               rtol=2e-2, atol=2e-2)

    print("KERNEL_OK")
</pallas_src>

<mosaic_0001>
module attributes {stable_mosaic.version = 11 : i64} {
  func.func @_chroma_resident_kernel(%arg0: i32, %arg1: memref<256x128xbf16, #tpu.memory_space<vmem>>, %arg2: memref<128x128xbf16, #tpu.memory_space<vmem>>, %arg3: memref<1x128xf32, #tpu.memory_space<vmem>>, %arg4: memref<5x1x128xf32, #tpu.memory_space<vmem>>, %arg5: memref<5x128x128xbf16, #tpu.memory_space<vmem>>, %arg6: memref<5x1x128xf32, #tpu.memory_space<vmem>>, %arg7: memref<5x128x128xbf16, #tpu.memory_space<vmem>>, %arg8: memref<5x1x128xf32, #tpu.memory_space<vmem>>, %arg9: memref<128x128xbf16, #tpu.memory_space<vmem>>, %arg10: memref<1x128xf32, #tpu.memory_space<vmem>>, %arg11: memref<256x128xf32, #tpu.memory_space<vmem>>) attributes {dimension_semantics = [#tpu.dimension_semantics<arbitrary>], iteration_bounds = array<i64: 1>, scalar_prefetch = 0 : i64, scratch_operands = 0 : i64, tpu.core_type = #tpu.core_type<tc>, window_params = [{transform_indices = @transform_0, window_bounds = array<i64: 256, 128>}, {pipeline_mode = #tpu.pipeline_mode<synchronous>, transform_indices = @transform_1, window_bounds = array<i64: 128, 128>}, {pipeline_mode = #tpu.pipeline_mode<synchronous>, transform_indices = @transform_2, window_bounds = array<i64: 1, 128>}, {pipeline_mode = #tpu.pipeline_mode<synchronous>, transform_indices = @transform_3, window_bounds = array<i64: 5, 1, 128>}, {pipeline_mode = #tpu.pipeline_mode<synchronous>, transform_indices = @transform_4, window_bounds = array<i64: 5, 128, 128>}, {pipeline_mode = #tpu.pipeline_mode<synchronous>, transform_indices = @transform_5, window_bounds = array<i64: 5, 1, 128>}, {pipeline_mode = #tpu.pipeline_mode<synchronous>, transform_indices = @transform_6, window_bounds = array<i64: 5, 128, 128>}, {pipeline_mode = #tpu.pipeline_mode<synchronous>, transform_indices = @transform_7, window_bounds = array<i64: 5, 1, 128>}, {pipeline_mode = #tpu.pipeline_mode<synchronous>, transform_indices = @transform_8, window_bounds = array<i64: 128, 128>}, {pipeline_mode = #tpu.pipeline_mode<synchronous>, transform_indices = @transform_9, window_bounds = array<i64: 1, 128>}, {transform_indices = @transform_10, window_bounds = array<i64: 256, 128>}]} {
    %c0 = arith.constant 0 : index
    %c0_0 = arith.constant 0 : index
    %0 = vector.load %arg1[%c0, %c0_0] : memref<256x128xbf16, #tpu.memory_space<vmem>>, vector<256x128xbf16>
    %c0_1 = arith.constant 0 : index
    %c0_2 = arith.constant 0 : index
    %1 = vector.load %arg2[%c0_1, %c0_2] : memref<128x128xbf16, #tpu.memory_space<vmem>>, vector<128x128xbf16>
    %cst = arith.constant dense<0.000000e+00> : vector<256x128xf32>
    %2 = tpu.matmul %0, %1, %cst {dimension_numbers = #tpu.dot_dimension_numbers<[1], [0], [0], [1], [0, 0, 1, 1], [], []>} : vector<256x128xbf16>, vector<128x128xbf16>, vector<256x128xf32> -> vector<256x128xf32>
    %c0_3 = arith.constant 0 : index
    %c0_4 = arith.constant 0 : index
    %3 = vector.load %arg3[%c0_3, %c0_4] : memref<1x128xf32, #tpu.memory_space<vmem>>, vector<1x128xf32>
    %4 = vector.broadcast %3 : vector<1x128xf32> to vector<256x128xf32>
    %5 = arith.addf %2, %4 : vector<256x128xf32>
    %6 = arith.mulf %5, %5 : vector<256x128xf32>
    %cst_5 = arith.constant dense<0.000000e+00> : vector<256xf32>
    %7 = vector.multi_reduction <add>, %6, %cst_5 [1] : vector<256x128xf32> to vector<256xf32>
    %8 = vector.shape_cast %7 : vector<256xf32> to vector<256x1xf32>
    %cst_6 = arith.constant 3.125000e-02 : f32
    %9 = vector.broadcast %cst_6 : f32 to vector<256x1xf32>
    %10 = arith.mulf %8, %9 : vector<256x1xf32>
    %cst_7 = arith.constant 1.1920929E-7 : f32
    %11 = vector.broadcast %cst_7 : f32 to vector<256x1xf32>
    %12 = arith.addf %10, %11 : vector<256x1xf32>
    %13 = math.rsqrt %12 : vector<256x1xf32>
    %14 = vector.broadcast %13 : vector<256x1xf32> to vector<256x128xf32>
    %15 = arith.mulf %5, %14 : vector<256x128xf32>
    %c0_8 = arith.constant 0 : index
    %c0_9 = arith.constant 0 : index
    %c0_10 = arith.constant 0 : index
    %16 = vector.load %arg4[%c0_8, %c0_9, %c0_10] : memref<5x1x128xf32, #tpu.memory_space<vmem>>, vector<1x1x128xf32>
    %17 = vector.shape_cast %16 : vector<1x1x128xf32> to vector<1x128xf32>
    %18 = vector.broadcast %17 : vector<1x128xf32> to vector<256x128xf32>
    %19 = arith.mulf %15, %18 : vector<256x128xf32>
    %20 = arith.truncf %19 : vector<256x128xf32> to vector<256x128xbf16>
    %c0_11 = arith.constant 0 : index
    %c0_12 = arith.constant 0 : index
    %c0_13 = arith.constant 0 : index
    %21 = vector.load %arg5[%c0_11, %c0_12, %c0_13] : memref<5x128x128xbf16, #tpu.memory_space<vmem>>, vector<1x128x128xbf16>
    %22 = vector.shape_cast %21 : vector<1x128x128xbf16> to vector<128x128xbf16>
    %cst_14 = arith.constant dense<0.000000e+00> : vector<256x128xf32>
    %23 = tpu.matmul %20, %22, %cst_14 {dimension_numbers = #tpu.dot_dimension_numbers<[1], [0], [0], [1], [0, 0, 1, 1], [], []>} : vector<256x128xbf16>, vector<128x128xbf16>, vector<256x128xf32> -> vector<256x128xf32>
    %c0_15 = arith.constant 0 : index
    %c0_16 = arith.constant 0 : index
    %c0_17 = arith.constant 0 : index
    %24 = vector.load %arg6[%c0_15, %c0_16, %c0_17] : memref<5x1x128xf32, #tpu.memory_space<vmem>>, vector<1x1x128xf32>
    %25 = vector.shape_cast %24 : vector<1x1x128xf32> to vector<1x128xf32>
    %26 = vector.broadcast %25 : vector<1x128xf32> to vector<256x128xf32>
    %27 = arith.addf %23, %26 : vector<256x128xf32>
    %28 = arith.negf %27 : vector<256x128xf32>
    %29 = math.exp %28 : vector<256x128xf32>
    %cst_18 = arith.constant 1.000000e+00 : f32
    %30 = vector.broadcast %cst_18 : f32 to vector<256x128xf32>
    %31 = arith.addf %30, %29 : vector<256x128xf32>
    %32 = arith.divf %30, %31 : vector<256x128xf32>
    %33 = arith.mulf %27, %32 : vector<256x128xf32>
    %34 = arith.truncf %33 : vector<256x128xf32> to vector<256x128xbf16>
    %c0_19 = arith.constant 0 : index
    %c0_20 = arith.constant 0 : index
    %c0_21 = arith.constant 0 : index
    %35 = vector.load %arg7[%c0_19, %c0_20, %c0_21] : memref<5x128x128xbf16, #tpu.memory_space<vmem>>, vector<1x128x128xbf16>
    %36 = vector.shape_cast %35 : vector<1x128x128xbf16> to vector<128x128xbf16>
    %cst_22 = arith.constant dense<0.000000e+00> : vector<256x128xf32>
    %37 = tpu.matmul %34, %36, %cst_22 {dimension_numbers = #tpu.dot_dimension_numbers<[1], [0], [0], [1], [0, 0, 1, 1], [], []>} : vector<256x128xbf16>, vector<128x128xbf16>, vector<256x128xf32> -> vector<256x128xf32>
    %c0_23 = arith.constant 0 : index
    %c0_24 = arith.constant 0 : index
    %c0_25 = arith.constant 0 : index
    %38 = vector.load %arg8[%c0_23, %c0_24, %c0_25] : memref<5x1x128xf32, #tpu.memory_space<vmem>>, vector<1x1x128xf32>
    %39 = vector.shape_cast %38 : vector<1x1x128xf32> to vector<1x128xf32>
    %40 = vector.broadcast %39 : vector<1x128xf32> to vector<256x128xf32>
    %41 = arith.addf %37, %40 : vector<256x128xf32>
    %42 = arith.addf %5, %41 : vector<256x128xf32>
    %43 = arith.mulf %42, %42 : vector<256x128xf32>
    %cst_26 = arith.constant dense<0.000000e+00> : vector<256xf32>
    %44 = vector.multi_reduction <add>, %43, %cst_26 [1] : vector<256x128xf32> to vector<256xf32>
    %45 = vector.shape_cast %44 : vector<256xf32> to vector<256x1xf32>
    %cst_27 = arith.constant 3.125000e-02 : f32
    %46 = vector.broadcast %cst_27 : f32 to vector<256x1xf32>
    %47 = arith.mulf %45, %46 : vector<256x1xf32>
    %cst_28 = arith.constant 1.1920929E-7 : f32
    %48 = vector.broadcast %cst_28 : f32 to vector<256x1xf32>
    %49 = arith.addf %47, %48 : vector<256x1xf32>
    %50 = math.rsqrt %49 : vector<256x1xf32>
    %51 = vector.broadcast %50 : vector<256x1xf32> to vector<256x128xf32>
    %52 = arith.mulf %42, %51 : vector<256x128xf32>
    %c1 = arith.constant 1 : index
    %c0_29 = arith.constant 0 : index
    %c0_30 = arith.constant 0 : index
    %53 = vector.load %arg4[%c1, %c0_29, %c0_30] : memref<5x1x128xf32, #tpu.memory_space<vmem>>, vector<1x1x128xf32>
    %54 = vector.shape_cast %53 : vector<1x1x128xf32> to vector<1x128xf32>
    %55 = vector.broadcast %54 : vector<1x128xf32> to vector<256x128xf32>
    %56 = arith.mulf %52, %55 : vector<256x128xf32>
    %57 = arith.truncf %56 : vector<256x128xf32> to vector<256x128xbf16>
    %c1_31 = arith.constant 1 : index
    %c0_32 = arith.constant 0 : index
    %c0_33 = arith.constant 0 : index
    %58 = vector.load %arg5[%c1_31, %c0_32, %c0_33] : memref<5x128x128xbf16, #tpu.memory_space<vmem>>, vector<1x128x128xbf16>
    %59 = vector.shape_cast %58 : vector<1x128x128xbf16> to vector<128x128xbf16>
    %cst_34 = arith.constant dense<0.000000e+00> : vector<256x128xf32>
    %60 = tpu.matmul %57, %59, %cst_34 {dimension_numbers = #tpu.dot_dimension_numbers<[1], [0], [0], [1], [0, 0, 1, 1], [], []>} : vector<256x128xbf16>, vector<128x128xbf16>, vector<256x128xf32> -> vector<256x128xf32>
    %c1_35 = arith.constant 1 : index
    %c0_36 = arith.constant 0 : index
    %c0_37 = arith.constant 0 : index
    %61 = vector.load %arg6[%c1_35, %c0_36, %c0_37] : memref<5x1x128xf32, #tpu.memory_space<vmem>>, vector<1x1x128xf32>
    %62 = vector.shape_cast %61 : vector<1x1x128xf32> to vector<1x128xf32>
    %63 = vector.broadcast %62 : vector<1x128xf32> to vector<256x128xf32>
    %64 = arith.addf %60, %63 : vector<256x128xf32>
    %65 = arith.negf %64 : vector<256x128xf32>
    %66 = math.exp %65 : vector<256x128xf32>
    %cst_38 = arith.constant 1.000000e+00 : f32
    %67 = vector.broadcast %cst_38 : f32 to vector<256x128xf32>
    %68 = arith.addf %67, %66 : vector<256x128xf32>
    %69 = arith.divf %67, %68 : vector<256x128xf32>
    %70 = arith.mulf %64, %69 : vector<256x128xf32>
    %71 = arith.truncf %70 : vector<256x128xf32> to vector<256x128xbf16>
    %c1_39 = arith.constant 1 : index
    %c0_40 = arith.constant 0 : index
    %c0_41 = arith.constant 0 : index
    %72 = vector.load %arg7[%c1_39, %c0_40, %c0_41] : memref<5x128x128xbf16, #tpu.memory_space<vmem>>, vector<1x128x128xbf16>
    %73 = vector.shape_cast %72 : vector<1x128x128xbf16> to vector<128x128xbf16>
    %cst_42 = arith.constant dense<0.000000e+00> : vector<256x128xf32>
    %74 = tpu.matmul %71, %73, %cst_42 {dimension_numbers = #tpu.dot_dimension_numbers<[1], [0], [0], [1], [0, 0, 1, 1], [], []>} : vector<256x128xbf16>, vector<128x128xbf16>, vector<256x128xf32> -> vector<256x128xf32>
    %c1_43 = arith.constant 1 : index
    %c0_44 = arith.constant 0 : index
    %c0_45 = arith.constant 0 : index
    %75 = vector.load %arg8[%c1_43, %c0_44, %c0_45] : memref<5x1x128xf32, #tpu.memory_space<vmem>>, vector<1x1x128xf32>
    %76 = vector.shape_cast %75 : vector<1x1x128xf32> to vector<1x128xf32>
    %77 = vector.broadcast %76 : vector<1x128xf32> to vector<256x128xf32>
    %78 = arith.addf %74, %77 : vector<256x128xf32>
    %79 = arith.addf %42, %78 : vector<256x128xf32>
    %80 = arith.mulf %79, %79 : vector<256x128xf32>
    %cst_46 = arith.constant dense<0.000000e+00> : vector<256xf32>
    %81 = vector.multi_reduction <add>, %80, %cst_46 [1] : vector<256x128xf32> to vector<256xf32>
    %82 = vector.shape_cast %81 : vector<256xf32> to vector<256x1xf32>
    %cst_47 = arith.constant 3.125000e-02 : f32
    %83 = vector.broadcast %cst_47 : f32 to vector<256x1xf32>
    %84 = arith.mulf %82, %83 : vector<256x1xf32>
    %cst_48 = arith.constant 1.1920929E-7 : f32
    %85 = vector.broadcast %cst_48 : f32 to vector<256x1xf32>
    %86 = arith.addf %84, %85 : vector<256x1xf32>
    %87 = math.rsqrt %86 : vector<256x1xf32>
    %88 = vector.broadcast %87 : vector<256x1xf32> to vector<256x128xf32>
    %89 = arith.mulf %79, %88 : vector<256x128xf32>
    %c2 = arith.constant 2 : index
    %c0_49 = arith.constant 0 : index
    %c0_50 = arith.constant 0 : index
    %90 = vector.load %arg4[%c2, %c0_49, %c0_50] : memref<5x1x128xf32, #tpu.memory_space<vmem>>, vector<1x1x128xf32>
    %91 = vector.shape_cast %90 : vector<1x1x128xf32> to vector<1x128xf32>
    %92 = vector.broadcast %91 : vector<1x128xf32> to vector<256x128xf32>
    %93 = arith.mulf %89, %92 : vector<256x128xf32>
    %94 = arith.truncf %93 : vector<256x128xf32> to vector<256x128xbf16>
    %c2_51 = arith.constant 2 : index
    %c0_52 = arith.constant 0 : index
    %c0_53 = arith.constant 0 : index
    %95 = vector.load %arg5[%c2_51, %c0_52, %c0_53] : memref<5x128x128xbf16, #tpu.memory_space<vmem>>, vector<1x128x128xbf16>
    %96 = vector.shape_cast %95 : vector<1x128x128xbf16> to vector<128x128xbf16>
    %cst_54 = arith.constant dense<0.000000e+00> : vector<256x128xf32>
    %97 = tpu.matmul %94, %96, %cst_54 {dimension_numbers = #tpu.dot_dimension_numbers<[1], [0], [0], [1], [0, 0, 1, 1], [], []>} : vector<256x128xbf16>, vector<128x128xbf16>, vector<256x128xf32> -> vector<256x128xf32>
    %c2_55 = arith.constant 2 : index
    %c0_56 = arith.constant 0 : index
    %c0_57 = arith.constant 0 : index
    %98 = vector.load %arg6[%c2_55, %c0_56, %c0_57] : memref<5x1x128xf32, #tpu.memory_space<vmem>>, vector<1x1x128xf32>
    %99 = vector.shape_cast %98 : vector<1x1x128xf32> to vector<1x128xf32>
    %100 = vector.broadcast %99 : vector<1x128xf32> to vector<256x128xf32>
    %101 = arith.addf %97, %100 : vector<256x128xf32>
    %102 = arith.negf %101 : vector<256x128xf32>
    %103 = math.exp %102 : vector<256x128xf32>
    %cst_58 = arith.constant 1.000000e+00 : f32
    %104 = vector.broadcast %cst_58 : f32 to vector<256x128xf32>
    %105 = arith.addf %104, %103 : vector<256x128xf32>
    %106 = arith.divf %104, %105 : vector<256x128xf32>
    %107 = arith.mulf %101, %106 : vector<256x128xf32>
    %108 = arith.truncf %107 : vector<256x128xf32> to vector<256x128xbf16>
    %c2_59 = arith.constant 2 : index
    %c0_60 = arith.constant 0 : index
    %c0_61 = arith.constant 0 : index
    %109 = vector.load %arg7[%c2_59, %c0_60, %c0_61] : memref<5x128x128xbf16, #tpu.memory_space<vmem>>, vector<1x128x128xbf16>
    %110 = vector.shape_cast %109 : vector<1x128x128xbf16> to vector<128x128xbf16>
    %cst_62 = arith.constant dense<0.000000e+00> : vector<256x128xf32>
    %111 = tpu.matmul %108, %110, %cst_62 {dimension_numbers = #tpu.dot_dimension_numbers<[1], [0], [0], [1], [0, 0, 1, 1], [], []>} : vector<256x128xbf16>, vector<128x128xbf16>, vector<256x128xf32> -> vector<256x128xf32>
    %c2_63 = arith.constant 2 : index
    %c0_64 = arith.constant 0 : index
    %c0_65 = arith.constant 0 : index
    %112 = vector.load %arg8[%c2_63, %c0_64, %c0_65] : memref<5x1x128xf32, #tpu.memory_space<vmem>>, vector<1x1x128xf32>
    %113 = vector.shape_cast %112 : vector<1x1x128xf32> to vector<1x128xf32>
    %114 = vector.broadcast %113 : vector<1x128xf32> to vector<256x128xf32>
    %115 = arith.addf %111, %114 : vector<256x128xf32>
    %116 = arith.addf %79, %115 : vector<256x128xf32>
    %117 = arith.mulf %116, %116 : vector<256x128xf32>
    %cst_66 = arith.constant dense<0.000000e+00> : vector<256xf32>
    %118 = vector.multi_reduction <add>, %117, %cst_66 [1] : vector<256x128xf32> to vector<256xf32>
    %119 = vector.shape_cast %118 : vector<256xf32> to vector<256x1xf32>
    %cst_67 = arith.constant 3.125000e-02 : f32
    %120 = vector.broadcast %cst_67 : f32 to vector<256x1xf32>
    %121 = arith.mulf %119, %120 : vector<256x1xf32>
    %cst_68 = arith.constant 1.1920929E-7 : f32
    %122 = vector.broadcast %cst_68 : f32 to vector<256x1xf32>
    %123 = arith.addf %121, %122 : vector<256x1xf32>
    %124 = math.rsqrt %123 : vector<256x1xf32>
    %125 = vector.broadcast %124 : vector<256x1xf32> to vector<256x128xf32>
    %126 = arith.mulf %116, %125 : vector<256x128xf32>
    %c3 = arith.constant 3 : index
    %c0_69 = arith.constant 0 : index
    %c0_70 = arith.constant 0 : index
    %127 = vector.load %arg4[%c3, %c0_69, %c0_70] : memref<5x1x128xf32, #tpu.memory_space<vmem>>, vector<1x1x128xf32>
    %128 = vector.shape_cast %127 : vector<1x1x128xf32> to vector<1x128xf32>
    %129 = vector.broadcast %128 : vector<1x128xf32> to vector<256x128xf32>
    %130 = arith.mulf %126, %129 : vector<256x128xf32>
    %131 = arith.truncf %130 : vector<256x128xf32> to vector<256x128xbf16>
    %c3_71 = arith.constant 3 : index
    %c0_72 = arith.constant 0 : index
    %c0_73 = arith.constant 0 : index
    %132 = vector.load %arg5[%c3_71, %c0_72, %c0_73] : memref<5x128x128xbf16, #tpu.memory_space<vmem>>, vector<1x128x128xbf16>
    %133 = vector.shape_cast %132 : vector<1x128x128xbf16> to vector<128x128xbf16>
    %cst_74 = arith.constant dense<0.000000e+00> : vector<256x128xf32>
    %134 = tpu.matmul %131, %133, %cst_74 {dimension_numbers = #tpu.dot_dimension_numbers<[1], [0], [0], [1], [0, 0, 1, 1], [], []>} : vector<256x128xbf16>, vector<128x128xbf16>, vector<256x128xf32> -> vector<256x128xf32>
    %c3_75 = arith.constant 3 : index
    %c0_76 = arith.constant 0 : index
    %c0_77 = arith.constant 0 : index
    %135 = vector.load %arg6[%c3_75, %c0_76, %c0_77] : memref<5x1x128xf32, #tpu.memory_space<vmem>>, vector<1x1x128xf32>
    %136 = vector.shape_cast %135 : vector<1x1x128xf32> to vector<1x128xf32>
    %137 = vector.broadcast %136 : vector<1x128xf32> to vector<256x128xf32>
    %138 = arith.addf %134, %137 : vector<256x128xf32>
    %139 = arith.negf %138 : vector<256x128xf32>
    %140 = math.exp %139 : vector<256x128xf32>
    %cst_78 = arith.constant 1.000000e+00 : f32
    %141 = vector.broadcast %cst_78 : f32 to vector<256x128xf32>
    %142 = arith.addf %141, %140 : vector<256x128xf32>
    %143 = arith.divf %141, %142 : vector<256x128xf32>
    %144 = arith.mulf %138, %143 : vector<256x128xf32>
    %145 = arith.truncf %144 : vector<256x128xf32> to vector<256x128xbf16>
    %c3_79 = arith.constant 3 : index
    %c0_80 = arith.constant 0 : index
    %c0_81 = arith.constant 0 : index
    %146 = vector.load %arg7[%c3_79, %c0_80, %c0_81] : memref<5x128x128xbf16, #tpu.memory_space<vmem>>, vector<1x128x128xbf16>
    %147 = vector.shape_cast %146 : vector<1x128x128xbf16> to vector<128x128xbf16>
    %cst_82 = arith.constant dense<0.000000e+00> : vector<256x128xf32>
    %148 = tpu.matmul %145, %147, %cst_82 {dimension_numbers = #tpu.dot_dimension_numbers<[1], [0], [0], [1], [0, 0, 1, 1], [], []>} : vector<256x128xbf16>, vector<128x128xbf16>, vector<256x128xf32> -> vector<256x128xf32>
    %c3_83 = arith.constant 3 : index
    %c0_84 = arith.constant 0 : index
    %c0_85 = arith.constant 0 : index
    %149 = vector.load %arg8[%c3_83, %c0_84, %c0_85] : memref<5x1x128xf32, #tpu.memory_space<vmem>>, vector<1x1x128xf32>
    %150 = vector.shape_cast %149 : vector<1x1x128xf32> to vector<1x128xf32>
    %151 = vector.broadcast %150 : vector<1x128xf32> to vector<256x128xf32>
    %152 = arith.addf %148, %151 : vector<256x128xf32>
    %153 = arith.addf %116, %152 : vector<256x128xf32>
    %154 = arith.mulf %153, %153 : vector<256x128xf32>
    %cst_86 = arith.constant dense<0.000000e+00> : vector<256xf32>
    %155 = vector.multi_reduction <add>, %154, %cst_86 [1] : vector<256x128xf32> to vector<256xf32>
    %156 = vector.shape_cast %155 : vector<256xf32> to vector<256x1xf32>
    %cst_87 = arith.constant 3.125000e-02 : f32
    %157 = vector.broadcast %cst_87 : f32 to vector<256x1xf32>
    %158 = arith.mulf %156, %157 : vector<256x1xf32>
    %cst_88 = arith.constant 1.1920929E-7 : f32
    %159 = vector.broadcast %cst_88 : f32 to vector<256x1xf32>
    %160 = arith.addf %158, %159 : vector<256x1xf32>
    %161 = math.rsqrt %160 : vector<256x1xf32>
    %162 = vector.broadcast %161 : vector<256x1xf32> to vector<256x128xf32>
    %163 = arith.mulf %153, %162 : vector<256x128xf32>
    %c4 = arith.constant 4 : index
    %c0_89 = arith.constant 0 : index
    %c0_90 = arith.constant 0 : index
    %164 = vector.load %arg4[%c4, %c0_89, %c0_90] : memref<5x1x128xf32, #tpu.memory_space<vmem>>, vector<1x1x128xf32>
    %165 = vector.shape_cast %164 : vector<1x1x128xf32> to vector<1x128xf32>
    %166 = vector.broadcast %165 : vector<1x128xf32> to vector<256x128xf32>
    %167 = arith.mulf %163, %166 : vector<256x128xf32>
    %168 = arith.truncf %167 : vector<256x128xf32> to vector<256x128xbf16>
    %c4_91 = arith.constant 4 : index
    %c0_92 = arith.constant 0 : index
    %c0_93 = arith.constant 0 : index
    %169 = vector.load %arg5[%c4_91, %c0_92, %c0_93] : memref<5x128x128xbf16, #tpu.memory_space<vmem>>, vector<1x128x128xbf16>
    %170 = vector.shape_cast %169 : vector<1x128x128xbf16> to vector<128x128xbf16>
    %cst_94 = arith.constant dense<0.000000e+00> : vector<256x128xf32>
    %171 = tpu.matmul %168, %170, %cst_94 {dimension_numbers = #tpu.dot_dimension_numbers<[1], [0], [0], [1], [0, 0, 1, 1], [], []>} : vector<256x128xbf16>, vector<128x128xbf16>, vector<256x128xf32> -> vector<256x128xf32>
    %c4_95 = arith.constant 4 : index
    %c0_96 = arith.constant 0 : index
    %c0_97 = arith.constant 0 : index
    %172 = vector.load %arg6[%c4_95, %c0_96, %c0_97] : memref<5x1x128xf32, #tpu.memory_space<vmem>>, vector<1x1x128xf32>
    %173 = vector.shape_cast %172 : vector<1x1x128xf32> to vector<1x128xf32>
    %174 = vector.broadcast %173 : vector<1x128xf32> to vector<256x128xf32>
    %175 = arith.addf %171, %174 : vector<256x128xf32>
    %176 = arith.negf %175 : vector<256x128xf32>
    %177 = math.exp %176 : vector<256x128xf32>
    %cst_98 = arith.constant 1.000000e+00 : f32
    %178 = vector.broadcast %cst_98 : f32 to vector<256x128xf32>
    %179 = arith.addf %178, %177 : vector<256x128xf32>
    %180 = arith.divf %178, %179 : vector<256x128xf32>
    %181 = arith.mulf %175, %180 : vector<256x128xf32>
    %182 = arith.truncf %181 : vector<256x128xf32> to vector<256x128xbf16>
    %c4_99 = arith.constant 4 : index
    %c0_100 = arith.constant 0 : index
    %c0_101 = arith.constant 0 : index
    %183 = vector.load %arg7[%c4_99, %c0_100, %c0_101] : memref<5x128x128xbf16, #tpu.memory_space<vmem>>, vector<1x128x128xbf16>
    %184 = vector.shape_cast %183 : vector<1x128x128xbf16> to vector<128x128xbf16>
    %cst_102 = arith.constant dense<0.000000e+00> : vector<256x128xf32>
    %185 = tpu.matmul %182, %184, %cst_102 {dimension_numbers = #tpu.dot_dimension_numbers<[1], [0], [0], [1], [0, 0, 1, 1], [], []>} : vector<256x128xbf16>, vector<128x128xbf16>, vector<256x128xf32> -> vector<256x128xf32>
    %c4_103 = arith.constant 4 : index
    %c0_104 = arith.constant 0 : index
    %c0_105 = arith.constant 0 : index
    %186 = vector.load %arg8[%c4_103, %c0_104, %c0_105] : memref<5x1x128xf32, #tpu.memory_space<vmem>>, vector<1x1x128xf32>
    %187 = vector.shape_cast %186 : vector<1x1x128xf32> to vector<1x128xf32>
    %188 = vector.broadcast %187 : vector<1x128xf32> to vector<256x128xf32>
    %189 = arith.addf %185, %188 : vector<256x128xf32>
    %190 = arith.addf %153, %189 : vector<256x128xf32>
    %191 = arith.truncf %190 : vector<256x128xf32> to vector<256x128xbf16>
    %c0_106 = arith.constant 0 : index
    %c0_107 = arith.constant 0 : index
    %192 = vector.load %arg9[%c0_106, %c0_107] : memref<128x128xbf16, #tpu.memory_space<vmem>>, vector<128x128xbf16>
    %cst_108 = arith.constant dense<0.000000e+00> : vector<256x128xf32>
    %193 = tpu.matmul %191, %192, %cst_108 {dimension_numbers = #tpu.dot_dimension_numbers<[1], [0], [0], [1], [0, 0, 1, 1], [], []>} : vector<256x128xbf16>, vector<128x128xbf16>, vector<256x128xf32> -> vector<256x128xf32>
    %c0_109 = arith.constant 0 : index
    %c0_110 = arith.constant 0 : index
    %194 = vector.load %arg10[%c0_109, %c0_110] : memref<1x128xf32, #tpu.memory_space<vmem>>, vector<1x128xf32>
    %195 = vector.broadcast %194 : vector<1x128xf32> to vector<256x128xf32>
    %196 = arith.addf %193, %195 : vector<256x128xf32>
    %c0_111 = arith.constant 0 : index
    %c0_112 = arith.constant 0 : index
    %197 = vector.load %arg11[%c0_111, %c0_112] : memref<256x128xf32, #tpu.memory_space<vmem>>, vector<256x128xf32>
    tpu.vector_store %arg11[%c0_111, %c0_112], %196 {strides = array<i32>} : memref<256x128xf32, #tpu.memory_space<vmem>>, vector<256x128xf32>,
    return
  }
  func.func @transform_0(%arg0: i32) -> (i32, i32) {
    %c0_i32 = arith.constant 0 : i32
    %c0_i32_0 = arith.constant 0 : i32
    return %arg0, %c0_i32 : i32, i32
  }
  func.func @transform_1(%arg0: i32) -> (i32, i32) {
    %c0_i32 = arith.constant 0 : i32
    %c0_i32_0 = arith.constant 0 : i32
    %c0_i32_1 = arith.constant 0 : i32
    return %c0_i32, %c0_i32_0 : i32, i32
  }
  func.func @transform_2(%arg0: i32) -> (i32, i32) {
    %c0_i32 = arith.constant 0 : i32
    %c0_i32_0 = arith.constant 0 : i32
    %c0_i32_1 = arith.constant 0 : i32
    return %c0_i32, %c0_i32_0 : i32, i32
  }
  func.func @transform_3(%arg0: i32) -> (i32, i32, i32) {
    %c0_i32 = arith.constant 0 : i32
    %c0_i32_0 = arith.constant 0 : i32
    %c0_i32_1 = arith.constant 0 : i32
    %c0_i32_2 = arith.constant 0 : i32
    return %c0_i32, %c0_i32_0, %c0_i32_1 : i32, i32, i32
  }
  func.func @transform_4(%arg0: i32) -> (i32, i32, i32) {
    %c0_i32 = arith.constant 0 : i32
    %c0_i32_0 = arith.constant 0 : i32
    %c0_i32_1 = arith.constant 0 : i32
    %c0_i32_2 = arith.constant 0 : i32
    return %c0_i32, %c0_i32_0, %c0_i32_1 : i32, i32, i32
  }
  func.func @transform_5(%arg0: i32) -> (i32, i32, i32) {
    %c0_i32 = arith.constant 0 : i32
    %c0_i32_0 = arith.constant 0 : i32
    %c0_i32_1 = arith.constant 0 : i32
    %c0_i32_2 = arith.constant 0 : i32
    return %c0_i32, %c0_i32_0, %c0_i32_1 : i32, i32, i32
  }
  func.func @transform_6(%arg0: i32) -> (i32, i32, i32) {
    %c0_i32 = arith.constant 0 : i32
    %c0_i32_0 = arith.constant 0 : i32
    %c0_i32_1 = arith.constant 0 : i32
    %c0_i32_2 = arith.constant 0 : i32
    return %c0_i32, %c0_i32_0, %c0_i32_1 : i32, i32, i32
  }
  func.func @transform_7(%arg0: i32) -> (i32, i32, i32) {
    %c0_i32 = arith.constant 0 : i32
    %c0_i32_0 = arith.constant 0 : i32
    %c0_i32_1 = arith.constant 0 : i32
    %c0_i32_2 = arith.constant 0 : i32
    return %c0_i32, %c0_i32_0, %c0_i32_1 : i32, i32, i32
  }
  func.func @transform_8(%arg0: i32) -> (i32, i32) {
    %c0_i32 = arith.constant 0 : i32
    %c0_i32_0 = arith.constant 0 : i32
    %c0_i32_1 = arith.constant 0 : i32
    return %c0_i32, %c0_i32_0 : i32, i32
  }
  func.func @transform_9(%arg0: i32) -> (i32, i32) {
    %c0_i32 = arith.constant 0 : i32
    %c0_i32_0 = arith.constant 0 : i32
    %c0_i32_1 = arith.constant 0 : i32
    return %c0_i32, %c0_i32_0 : i32, i32
  }
  func.func @transform_10(%arg0: i32) -> (i32, i32) {
    %c0_i32 = arith.constant 0 : i32
    %c0_i32_0 = arith.constant 0 : i32
    return %arg0, %c0_i32 : i32, i32
  }
}

</mosaic_0001>

<bundles_post_ra>
// kernel: tpu_custom_call.1
= control target key start
LH: loop header
LB: loop body
LE: loop exit
PB: predicated region body
PF: predicated region fallthrough
CT: control target
= control target key end

     0   :  { %15 = vsyncpa [#allocation3], 0  ;;  %s10661_s0 = inlined_call_operand.hbm [shape: bf16[256,128], index: 0, kind: input, shape index: {}]   ;;  %s10662_s1 = inlined_call_operand.hbm [shape: bf16[128,128], index: 1, kind: input, shape index: {}]   ;;  %s10663_s2 = inlined_call_operand.hbm [shape: f32[1,128], index: 2, kind: input, shape index: {}]   ;;  %s10664_s3 = inlined_call_operand.vmem [shape: f32[5,1,128], index: 3, kind: input, shape index: {}]   ;;  %s10665_s4 = inlined_call_operand.hbm [shape: bf16[5,128,128], index: 4, kind: input, shape index: {}]   ;;  %s10666_s5 = inlined_call_operand.vmem [shape: f32[5,1,128], index: 5, kind: input, shape index: {}]   ;;  %s10667_s6 = inlined_call_operand.hbm [shape: bf16[5,128,128], index: 6, kind: input, shape index: {}]   ;;  %s10668_s7 = inlined_call_operand.vmem [shape: f32[5,1,128], index: 7, kind: input, shape index: {}]   ;;  %s10669_s8 = inlined_call_operand.hbm [shape: bf16[128,128], index: 8, kind: input, shape index: {}]   ;;  %s10670_s9 = inlined_call_operand.vmem [shape: f32[1,128], index: 9, kind: input, shape index: {}]   ;;  %s10671_s10 = inlined_call_operand.hbm [shape: f32[256,128], index: 10, kind: output, shape index: {}]  }
   0x1   :  { %16 = vsyncpa [#allocation6], 0 }
   0x2   :  { %17 = vsyncpa [#allocation9], 0 }
   0x3   :  { %18 = vsyncpa [#allocation12], 0 }
   0x4   :  { %19 = vsyncpa [#allocation4], 0  ;;  %s8284_s13 = smov [#allocation5]   ;;  %s8285_s15 = smov [#allocation8]  }
   0x5   :  { %s37_s14 = sshll.u32 %s8284_s13, 4  ;;  %s61_s16 = sshll.u32 %s8285_s15, 4  ;;  %s38_s14 = int_to_ptr.vmem [resolvable:$true] %s37_s14  ;;  %s8350_s16 = int_to_ptr.vmem [resolvable:$true] %s61_s16 }
   0x6   :  { %s8120_s19 = scalar_lea.hbm %s10662_s1, 1024 }
   0x7   :  { %p8121_p0 = scmp.ne.s32.totalorder %s10662_s1, %s8120_s19  ;;  %p8124_p1 = scmp.lt.u32.totalorder %s8120_s19, %s10662_s1 }
   0x9   :  { %p8126_p2 = pnand %p8124_p1, %p8121_p0 }
   0xb   :  { %8129 = shalt.err (!%p8126_p2)
}
   0xc   :  { %s8130_s24 = scalar_lea.vmem %s38_s14, 1024  ;;  %p8135_p4 = scmp.lt.s32.totalorder %s38_s14, %s38_s14 }
   0xd   :  { %p8131_p3 = scmp.ne.s32.totalorder %s38_s14, %s8130_s24  ;;  %p8136_p5 = scmp.lt.s32.totalorder %s8130_s24, %s8130_s24 }
   0xf   :  { %p8137_p6 = por %p8136_p5, %p8135_p4 }
  0x11   :  { %p8138_p7 = pnand %p8137_p6, %p8131_p3 }
  0x13   :  { %8141 = shalt.err (!%p8138_p7)
}
  0x14   :  { %s8286_s25 = smov 64   ;;  %s8287_s26 = smov 4  }
  0x15   :  { %43 = dma.hbm_to_vmem [thread:$0]  %s10662_s1, 1024, %s38_s14, [#allocation6], %s8286_s25, %s8286_s25, %s8287_s26  }
  0x16   :  { %s8142_s11 = scalar_lea.hbm %s10665_s4, 5120 }
  0x17   :  { %p8143_p8 = scmp.ne.s32.totalorder %s10665_s4, %s8142_s11  ;;  %p8146_p9 = scmp.lt.u32.totalorder %s8142_s11, %s10665_s4 }
  0x19   :  { %p8148_p10 = pnand %p8146_p9, %p8143_p8 }
  0x1b   :  { %8151 = shalt.err (!%p8148_p10)
}
  0x1c   :  { %s8152_s18 = scalar_lea.vmem %s8350_s16, 5120  ;;  %p8157_p12 = scmp.lt.s32.totalorder %s8350_s16, %s8350_s16 }
  0x1d   :  { %p8153_p11 = scmp.ne.s32.totalorder %s8350_s16, %s8152_s18  ;;  %p8158_p13 = scmp.lt.s32.totalorder %s8152_s18, %s8152_s18 }
  0x1f   :  { %p8159_p0 = por %p8158_p13, %p8157_p12 }
  0x21   :  { %p8160_p1 = pnand %p8159_p0, %p8153_p11 }
  0x23   :  { %8163 = shalt.err (!%p8160_p1)
}
  0x24   :  { %67 = dma.hbm_to_vmem [thread:$0]  %s10665_s4, 5120, %s8350_s16, [#allocation9], %s8286_s25, %s8286_s25, %s8287_s26  }
  0x25   :  { %s8288_s19 = smov [#allocation2]   ;;  %s8289_s21 = smov [#allocation7]  }
  0x26   :  { %s25_s20 = sshll.u32 %s8288_s19, 4  ;;  %s50_s22 = sshll.u32 %s8289_s21, 4  ;;  %s26_s20 = int_to_ptr.vmem [resolvable:$true] %s25_s20  ;;  %s51_s22 = int_to_ptr.vmem [resolvable:$true] %s50_s22 }
  0x27   :  { %s8164_s27 = scalar_lea.hbm %s10661_s0, 2048 }
  0x28   :  { %p8165_p2 = scmp.ne.s32.totalorder %s10661_s0, %s8164_s27  ;;  %p8168_p3 = scmp.lt.u32.totalorder %s8164_s27, %s10661_s0 }
  0x2a   :  { %p8170_p4 = pnand %p8168_p3, %p8165_p2 }
  0x2c   :  { %8173 = shalt.err (!%p8170_p4)
}
  0x2d   :  { %s8174_s4 = scalar_lea.vmem %s26_s20, 2048  ;;  %p8179_p6 = scmp.lt.s32.totalorder %s26_s20, %s26_s20 }
  0x2e   :  { %p8175_p5 = scmp.ne.s32.totalorder %s26_s20, %s8174_s4  ;;  %p8180_p7 = scmp.lt.s32.totalorder %s8174_s4, %s8174_s4 }
  0x30   :  { %p8181_p8 = por %p8180_p7, %p8179_p6 }
  0x32   :  { %p8182_p9 = pnand %p8181_p8, %p8175_p5 }
  0x34   :  { %8185 = shalt.err (!%p8182_p9)
}
  0x35   :  { %31 = dma.hbm_to_vmem [thread:$0]  %s10661_s0, 2048, %s26_s20, [#allocation3], %s8286_s25, %s8286_s25, %s8287_s26  }
  0x36   :  { %s8186_s17 = scalar_lea.hbm %s10663_s2, 16 }
  0x37   :  { %p8187_p10 = scmp.ne.s32.totalorder %s10663_s2, %s8186_s17  ;;  %p8190_p11 = scmp.lt.u32.totalorder %s8186_s17, %s10663_s2 }
  0x39   :  { %p8192_p12 = pnand %p8190_p11, %p8187_p10 }
  0x3b   :  { %8195 = shalt.err (!%p8192_p12)
}
  0x3c   :  { %s8196_s21 = scalar_lea.vmem %s51_s22, 16  ;;  %s8200_s23 = scalar_lea.vmem %s51_s22, 32 }
  0x3d   :  { %p8197_p13 = scmp.ne.s32.totalorder %s51_s22, %s8196_s21  ;;  %p8201_p0 = scmp.lt.s32.totalorder %s51_s22, %s51_s22 }
  0x3e   :  { %p8202_p1 = scmp.lt.s32.totalorder %s8200_s23, %s8196_s21 }
  0x40   :  { %p8203_p2 = por %p8202_p1, %p8201_p0 }
  0x42   :  { %p8204_p3 = pnand %p8203_p2, %p8197_p13 }
  0x44   :  { %8207 = shalt.err (!%p8204_p3)
}
  0x45   :  { %53 = dma.hbm_to_vmem [thread:$0]  %s10663_s2, 16, %s51_s22, [#allocation6]  }
  0x46   :  { %s8290_s24 = smov [#allocation10]   ;;  %s8291_s28 = smov [#allocation11]  }
  0x47   :  { %s75_s27 = sshll.u32 %s8290_s24, 4  ;;  %s89_s29 = sshll.u32 %s8291_s28, 4  ;;  %s76_s27 = int_to_ptr.vmem [resolvable:$true] %s75_s27  ;;  %s8414_s29 = int_to_ptr.vmem [resolvable:$true] %s89_s29 }
  0x48   :  { %s8208_s4 = scalar_lea.hbm %s10667_s6, 5120 }
  0x49   :  { %p8209_p4 = scmp.ne.s32.totalorder %s10667_s6, %s8208_s4  ;;  %p8212_p5 = scmp.lt.u32.totalorder %s8208_s4, %s10667_s6 }
  0x4b   :  { %p8214_p6 = pnand %p8212_p5, %p8209_p4 }
  0x4d   :  { %8217 = shalt.err (!%p8214_p6)
}
  0x4e   :  { %s8218_s2 = scalar_lea.vmem %s76_s27, 5120  ;;  %p8223_p8 = scmp.lt.s32.totalorder %s76_s27, %s76_s27 }
  0x4f   :  { %p8219_p7 = scmp.ne.s32.totalorder %s76_s27, %s8218_s2  ;;  %p8224_p9 = scmp.lt.s32.totalorder %s8218_s2, %s8218_s2 }
  0x51   :  { %p8225_p10 = por %p8224_p9, %p8223_p8 }
  0x53   :  { %p8226_p11 = pnand %p8225_p10, %p8219_p7 }
  0x55   :  { %8229 = shalt.err (!%p8226_p11)
}
  0x56   :  { %81 = dma.hbm_to_vmem [thread:$0]  %s10667_s6, 5120, %s76_s27, [#allocation9], %s8286_s25, %s8286_s25, %s8287_s26  }
  0x57   :  { %s8230_s14 = scalar_lea.hbm %s10669_s8, 1024 }
  0x58   :  { %p8231_p12 = scmp.ne.s32.totalorder %s10669_s8, %s8230_s14  ;;  %p8234_p13 = scmp.lt.u32.totalorder %s8230_s14, %s10669_s8 }
  0x5a   :  { %p8236_p0 = pnand %p8234_p13, %p8231_p12 }
  0x5c   :  { %8239 = shalt.err (!%p8236_p0)
}
  0x5d   :  { %s8240_s20 = scalar_lea.vmem %s8414_s29, 1024  ;;  %p8245_p2 = scmp.lt.s32.totalorder %s8414_s29, %s8414_s29 }
  0x5e   :  { %p8241_p1 = scmp.ne.s32.totalorder %s8414_s29, %s8240_s20  ;;  %p8246_p3 = scmp.lt.s32.totalorder %s8240_s20, %s8240_s20 }
  0x60   :  { %p8247_p4 = por %p8246_p3, %p8245_p2 }
  0x62   :  { %p8248_p5 = pnand %p8247_p4, %p8241_p1 }
  0x64   :  { %8251 = shalt.err (!%p8248_p5)
}
  0x65   :  { %95 = dma.hbm_to_vmem [thread:$0]  %s10669_s8, 1024, %s8414_s29, [#allocation12], %s8286_s25, %s8286_s25, %s8287_s26  }
  0x66   :  { %8274 = dma.done.wait [#allocation3], 2048  }
  0x67   :  { %8275 = vsyncadd [#allocation3], 4294965248 }
  0x68   :  { %8276 = dma.done.wait [#allocation6], 1040  }
  0x69   :  { %8277 = vsyncadd [#allocation6], 4294966256 }
  0x6a   :  { %8278 = dma.done.wait [#allocation9], 10240  }
  0x6b   :  { %8279 = vsyncadd [#allocation9], 4294957056 }
  0x6c   :  { %8280 = dma.done.wait [#allocation12], 1024  }
  0x6d   :  { %8281 = vsyncadd [#allocation12], 4294966272  ;;  %v7048_v0 = vld [vmem:[#allocation5] sm:$0xff]   ;;  %v7049_v1 = vld [vmem:[#allocation5 + $0x8] sm:$0xff]  }
  0x6e   :  { %6461 = vmatprep.subr.bf16.mxu0 %v7048_v0  ;;  %v7050_v2 = vld [vmem:[#allocation5 + $0x10] sm:$0xff]   ;;  %v7051_v3 = vld [vmem:[#allocation5 + $0x18] sm:$0xff]   ;;  %v7056_v4 = vld [vmem:[#allocation2] sm:$0xff]  }
  0x6f   :  { %6462 = vmatpush3.bf16.msra.mxu0 %v7048_v0  ;;  %6477 = vmatprep.mubr.bf16.mxu0 %v7056_v4  ;;  %v7052_v5 = vld [vmem:[#allocation5 + $0x20] sm:$0xff]   ;;  %v7053_v6 = vld [vmem:[#allocation5 + $0x28] sm:$0xff]   ;;  %v7054_v7 = vld [vmem:[#allocation5 + $0x30] sm:$0xff]  }
  0x70   :  { %6463 = vmatprep.subr.bf16.mxu0 %v7049_v1  ;;  %v7055_v8 = vld [vmem:[#allocation5 + $0x38] sm:$0xff]   ;;  %v7057_v9 = vld [vmem:[#allocation2 + $0x8] sm:$0xff]   ;;  %v7058_v10 = vld [vmem:[#allocation2 + $0x10] sm:$0xff]  }
  0x71   :  { %v7059_v11 = vld [vmem:[#allocation2 + $0x18] sm:$0xff]   ;;  %v7060_v12 = vld [vmem:[#allocation2 + $0x20] sm:$0xff]   ;;  %v7061_v13 = vld [vmem:[#allocation2 + $0x28] sm:$0xff]  }
  0x72   :  { %v7062_v14 = vld [vmem:[#allocation2 + $0x30] sm:$0xff]   ;;  %v7063_v15 = vld [vmem:[#allocation2 + $0x38] sm:$0xff]   ;;  %v7064_v16 = vld [vmem:[#allocation2 + $0x40] sm:$0xff]  }
  0x73   :  { %6464 = vmatpush3.bf16.msra.mxu0 %v7049_v1  ;;  %v7065_v17 = vld [vmem:[#allocation2 + $0x48] sm:$0xff]   ;;  %v7066_v18 = vld [vmem:[#allocation2 + $0x50] sm:$0xff]   ;;  %v7067_v19 = vld [vmem:[#allocation2 + $0x58] sm:$0xff]  }
  0x74   :  { %6465 = vmatprep.subr.bf16.mxu0 %v7050_v2  ;;  %v7068_v20 = vld [vmem:[#allocation2 + $0x60] sm:$0xff]   ;;  %v7069_v21 = vld [vmem:[#allocation2 + $0x68] sm:$0xff]   ;;  %v7070_v22 = vld [vmem:[#allocation2 + $0x70] sm:$0xff]  }
  0x75   :  { %v7071_v23 = vld [vmem:[#allocation2 + $0x78] sm:$0xff]   ;;  %v7072_v24 = vld [vmem:[#allocation8] sm:$0xff]   ;;  %v7073_v25 = vld [vmem:[#allocation8 + $0x8] sm:$0xff]  }
  0x76   :  { %6509 = vmatprep.subr.bf16.mxu1 %v7072_v24  ;;  %v8451_v26 = vld [vmem:[#allocation7] ss:$0 sm:$0xff]  ;;  %v7074_v59 = vld [vmem:[#allocation8 + $0x10] sm:$0xff]  }
  0x77   :  { %6466 = vmatpush3.bf16.msra.mxu0 %v7050_v2  ;;  %6510 = vmatpush3.bf16.msra.mxu1 %v7072_v24  ;;  %v7075_v0 = vld [vmem:[#allocation8 + $0x18] sm:$0xff]  }
  0x78   :  { %6467 = vmatprep.subr.bf16.mxu0 %v7051_v3  ;;  %6511 = vmatprep.subr.bf16.mxu1 %v7073_v25 }
  0x7b   :  { %6468 = vmatpush3.bf16.msra.mxu0 %v7051_v3  ;;  %6512 = vmatpush3.bf16.msra.mxu1 %v7073_v25 }
  0x7c   :  { %6469 = vmatprep.subr.bf16.mxu0 %v7052_v5  ;;  %6513 = vmatprep.subr.bf16.mxu1 %v7074_v59 }
  0x7f   :  { %6470 = vmatpush3.bf16.msra.mxu0 %v7052_v5  ;;  %6514 = vmatpush3.bf16.msra.mxu1 %v7074_v59 }
  0x80   :  { %6471 = vmatprep.subr.bf16.mxu0 %v7053_v6  ;;  %6515 = vmatprep.subr.bf16.mxu1 %v7075_v0 }
  0x83   :  { %6472 = vmatpush3.bf16.msra.mxu0 %v7053_v6  ;;  %6516 = vmatpush3.bf16.msra.mxu1 %v7075_v0 }
  0x84   :  { %6473 = vmatprep.subr.bf16.mxu0 %v7054_v7 }
  0x87   :  { %6474 = vmatpush3.bf16.msra.mxu0 %v7054_v7 }
  0x88   :  { %6475 = vmatprep.subr.bf16.mxu0 %v7055_v8 }
  0x8b   :  { %6476 = vmatpush3.bf16.msra.mxu0 %v7055_v8 }
  0x8e   :  { %6478 = vmatmul.mubr.bf16.vlgmr.msra.gmra.mrb[0].mxu0 %v7057_v9  ;;  %v7076_v9 = vld [vmem:[#allocation8 + $0x20] sm:$0xff]  }
  0x8f   :  { %6481 = vmatprep.mubr.bf16.mxu0 %v7058_v10  ;;  %6517 = vmatprep.subr.bf16.mxu1 %v7076_v9 }
  0x90   :  { %6518 = vmatpush3.bf16.msra.mxu1 %v7076_v9 }
  0x96   :  { %6482 = vmatmul.mubr.bf16.gmra.mrb[4].mxu0 %v7059_v11 }
  0x97   :  { %6485 = vmatprep.mubr.bf16.mxu0 %v7060_v12 }
  0x9e   :  { %6486 = vmatmul.mubr.bf16.gmra.mrb[8].mxu0 %v7061_v13 }
  0x9f   :  { %6489 = vmatprep.mubr.bf16.mxu0 %v7062_v14  ;;  %v7077_v14 = vld [vmem:[#allocation8 + $0x28] sm:$0xff]  }
  0xa0   :  { %6519 = vmatprep.subr.bf16.mxu1 %v7077_v14 }
  0xa1   :  { %6520 = vmatpush3.bf16.msra.mxu1 %v7077_v14 }
  0xa6   :  { %6490 = vmatmul.mubr.bf16.gmra.mrb[12].mxu0 %v7063_v15 }
  0xa7   :  { %6493 = vmatprep.mubr.bf16.mxu0 %v7064_v16 }
  0xae   :  { %6494 = vmatmul.mubr.bf16.gmra.mrb[16].mxu0 %v7065_v17 }
  0xaf   :  { %6497 = vmatprep.mubr.bf16.mxu0 %v7066_v18 }
  0xb6   :  { %6498 = vmatmul.mubr.bf16.gmra.mrb[20].mxu0 %v7067_v19 }
  0xb7   :  { %6501 = vmatprep.mubr.bf16.mxu0 %v7068_v20 }
  0xbe   :  { %6502 = vmatmul.mubr.bf16.gmra.mrb[24].mxu0 %v7069_v21 }
  0xbf   :  { %6505 = vmatprep.mubr.bf16.mxu0 %v7070_v22 }
  0xc6   :  { %6506 = vmatmul.mubr.bf16.gmra.mrb[28].mxu0 %v7071_v23  ;;  %v7078_v23 = vld [vmem:[#allocation8 + $0x30] sm:$0xff]  }
  0xc7   :  { %6521 = vmatprep.subr.bf16.mxu1 %v7078_v23 }
  0xc8   :  { %6522 = vmatpush3.bf16.msra.mxu1 %v7078_v23  ;;  %v7083_v23 = vld [vmem:[#allocation10 + $0x18] sm:$0xff]  }
 0x161   :  { %v6479_v27 = vpop.f32.mrb[0].mxu0 }
 0x162   :  { %v8454_v28 = vadd.f32 %v6479_v27, %v8451_v26  ;;  %v350_v29 = vpop.f32.mrb[1].mxu0 }
 0x163   :  { %v8457_v30 = vadd.f32 %v8451_v26, %v350_v29  ;;  %v6480_v31 = vpop.f32.mrb[2].mxu0 }
 0x164   :  { %v8460_v32 = vadd.f32 %v6480_v31, %v8451_v26  ;;  %v353_v33 = vpop.f32.mrb[3].mxu0  ;;  %v479_v34 = vmul.f32 %v8454_v28, %v8454_v28  ;;  %v7079_v31 = vld [vmem:[#allocation8 + $0x38] sm:$0xff]  }
 0x165   :  { %v8465_v35 = vadd.f32 %v8451_v26, %v353_v33  ;;  %v477_v36 = vmul.f32 %v8457_v30, %v8457_v30  ;;  %6523 = vmatprep.subr.bf16.mxu1 %v7079_v31 }
 0x166   :  { %513 = vadd.xlane.f32.xlu1 %v479_v34  ;;  %v480_v37 = vmul.f32 %v8460_v32, %v8460_v32  ;;  %6524 = vmatpush3.bf16.msra.mxu1 %v7079_v31 }
 0x167   :  { %509 = vadd.xlane.f32.xlu0 %v477_v36  ;;  %v478_v39 = vmul.f32 %v8465_v35, %v8465_v35 }
 0x169   :  { %v6483_v38 = vpop.f32.mrb[4].mxu0 }
 0x16a   :  { %515 = vadd.xlane.f32.xlu1 %v480_v37  ;;  %v366_v40 = vpop.f32.mrb[5].mxu0  ;;  %v8477_v44 = vadd.f32 %v6483_v38, %v8451_v26 }
 0x16b   :  { %v8474_v41 = vadd.f32 %v8451_v26, %v366_v40  ;;  %v6484_v42 = vpop.f32.mrb[6].mxu0  ;;  %511 = vadd.xlane.f32.xlu0 %v478_v39 }
 0x16c   :  { %v369_v43 = vpop.f32.mrb[7].mxu0  ;;  %v8485_v47 = vadd.f32 %v6484_v42, %v8451_v26  ;;  %v483_v50 = vmul.f32 %v8477_v44, %v8477_v44 }
 0x16d   :  { %v8480_v45 = vadd.f32 %v8451_v26, %v369_v43  ;;  %v481_v46 = vmul.f32 %v8474_v41, %v8474_v41 }
 0x16e   :  { %v484_v54 = vmul.f32 %v8485_v47, %v8485_v47 }
 0x16f   :  { %517 = vadd.xlane.f32.xlu0 %v481_v46  ;;  %v482_v48 = vmul.f32 %v8480_v45, %v8480_v45 }
 0x171   :  { %v6487_v49 = vpop.f32.mrb[8].mxu0  ;;  %519 = vadd.xlane.f32.xlu1 %v482_v48 }
 0x172   :  { %v382_v51 = vpop.f32.mrb[9].mxu0  ;;  %v8497_v56 = vadd.f32 %v6487_v49, %v8451_v26 }
 0x173   :  { %v8492_v52 = vadd.f32 %v8451_v26, %v382_v51  ;;  %v6488_v53 = vpop.f32.mrb[10].mxu0  ;;  %521 = vadd.xlane.f32.xlu0 %v483_v50 }
 0x174   :  { %v385_v55 = vpop.f32.mrb[11].mxu0  ;;  %v8505_v60 = vadd.f32 %v6488_v53, %v8451_v26  ;;  %v487_v63 = vmul.f32 %v8497_v56, %v8497_v56 }
 0x175   :  { %v8500_v57 = vadd.f32 %v8451_v26, %v385_v55  ;;  %523 = vadd.xlane.f32.xlu1 %v484_v54  ;;  %v485_v58 = vmul.f32 %v8492_v52, %v8492_v52 }
 0x176   :  { %v488_v4 = vmul.f32 %v8505_v60, %v8505_v60 }
 0x177   :  { %525 = vadd.xlane.f32.xlu0 %v485_v58  ;;  %v486_v61 = vmul.f32 %v8500_v57, %v8500_v57 }
 0x179   :  { %v6491_v62 = vpop.f32.mrb[12].mxu0  ;;  %527 = vadd.xlane.f32.xlu1 %v486_v61 }
 0x17a   :  { %v398_v1 = vpop.f32.mrb[13].mxu0  ;;  %v8517_v6 = vadd.f32 %v6491_v62, %v8451_v26 }
 0x17b   :  { %v8512_v2 = vadd.f32 %v8451_v26, %v398_v1  ;;  %v6492_v3 = vpop.f32.mrb[14].mxu0  ;;  %529 = vadd.xlane.f32.xlu0 %v487_v63 }
 0x17c   :  { %v401_v5 = vpop.f32.mrb[15].mxu0  ;;  %v8525_v10 = vadd.f32 %v6492_v3, %v8451_v26  ;;  %v491_v13 = vmul.f32 %v8517_v6, %v8517_v6 }
 0x17d   :  { %v8520_v7 = vadd.f32 %v8451_v26, %v401_v5  ;;  %531 = vadd.xlane.f32.xlu1 %v488_v4  ;;  %v489_v8 = vmul.f32 %v8512_v2, %v8512_v2 }
 0x17e   :  { %v492_v18 = vmul.f32 %v8525_v10, %v8525_v10 }
 0x17f   :  { %533 = vadd.xlane.f32.xlu0 %v489_v8  ;;  %v490_v11 = vmul.f32 %v8520_v7, %v8520_v7 }
 0x181   :  { %v6495_v12 = vpop.f32.mrb[16].mxu0  ;;  %535 = vadd.xlane.f32.xlu1 %v490_v11 }
 0x182   :  { %v414_v15 = vpop.f32.mrb[17].mxu0  ;;  %v8537_v20 = vadd.f32 %v6495_v12, %v8451_v26 }
 0x183   :  { %v8532_v16 = vadd.f32 %v8451_v26, %v414_v15  ;;  %v6496_v17 = vpop.f32.mrb[18].mxu0  ;;  %537 = vadd.xlane.f32.xlu0 %v491_v13 }
 0x184   :  { %v417_v19 = vpop.f32.mrb[19].mxu0  ;;  %v8545_v24 = vadd.f32 %v6496_v17, %v8451_v26  ;;  %v495_v29 = vmul.f32 %v8537_v20, %v8537_v20 }
 0x185   :  { %v8540_v21 = vadd.f32 %v8451_v26, %v417_v19  ;;  %539 = vadd.xlane.f32.xlu1 %v492_v18  ;;  %v493_v22 = vmul.f32 %v8532_v16, %v8532_v16  ;;  %v7080_v19 = vld [vmem:[#allocation10] sm:$0xff]  }
 0x186   :  { %v496_v37 = vmul.f32 %v8545_v24, %v8545_v24  ;;  %6557 = vmatprep.subr.bf16.mxu0 %v7080_v19 }
 0x187   :  { %541 = vadd.xlane.f32.xlu0 %v493_v22  ;;  %v494_v25 = vmul.f32 %v8540_v21, %v8540_v21  ;;  %v7081_v22 = vld [vmem:[#allocation10 + $0x8] sm:$0xff]   ;;  %6558 = vmatpush3.bf16.msra.mxu0 %v7080_v19 }
 0x188   :  { %6559 = vmatprep.subr.bf16.mxu0 %v7081_v22 }
 0x189   :  { %v6499_v27 = vpop.f32.mrb[20].mxu0  ;;  %543 = vadd.xlane.f32.xlu1 %v494_v25 }
 0x18a   :  { %v430_v33 = vpop.f32.mrb[21].mxu0  ;;  %v8557_v39 = vadd.f32 %v6499_v27, %v8451_v26 }
 0x18b   :  { %v8552_v34 = vadd.f32 %v8451_v26, %v430_v33  ;;  %v6500_v36 = vpop.f32.mrb[22].mxu0  ;;  %545 = vadd.xlane.f32.xlu0 %v495_v29  ;;  %6560 = vmatpush3.bf16.msra.mxu0 %v7081_v22 }
 0x18c   :  { %v433_v38 = vpop.f32.mrb[23].mxu0  ;;  %v8565_v43 = vadd.f32 %v6500_v36, %v8451_v26  ;;  %v499_v49 = vmul.f32 %v8557_v39, %v8557_v39 }
 0x18d   :  { %v8560_v40 = vadd.f32 %v8451_v26, %v433_v38  ;;  %547 = vadd.xlane.f32.xlu1 %v496_v37  ;;  %v497_v42 = vmul.f32 %v8552_v34, %v8552_v34 }
 0x18e   :  { %v500_v54 = vmul.f32 %v8565_v43, %v8565_v43 }
 0x18f   :  { %549 = vadd.xlane.f32.xlu0 %v497_v42  ;;  %v498_v46 = vmul.f32 %v8560_v40, %v8560_v40 }
 0x191   :  { %v6503_v48 = vpop.f32.mrb[24].mxu0  ;;  %551 = vadd.xlane.f32.xlu1 %v498_v46 }
 0x192   :  { %v446_v50 = vpop.f32.mrb[25].mxu0  ;;  %v8577_v58 = vadd.f32 %v6503_v48, %v8451_v26 }
 0x193   :  { %v8572_v51 = vadd.f32 %v8451_v26, %v446_v50  ;;  %v6504_v53 = vpop.f32.mrb[26].mxu0  ;;  %553 = vadd.xlane.f32.xlu0 %v499_v49 }
 0x194   :  { %v449_v55 = vpop.f32.mrb[27].mxu0  ;;  %v8585_v62 = vadd.f32 %v6504_v53, %v8451_v26  ;;  %v503_v1 = vmul.f32 %v8577_v58, %v8577_v58 }
 0x195   :  { %v8580_v59 = vadd.f32 %v8451_v26, %v449_v55  ;;  %555 = vadd.xlane.f32.xlu1 %v500_v54  ;;  %v501_v61 = vmul.f32 %v8572_v51, %v8572_v51 }
 0x196   :  { %10697 = vst [vmem:[#allocation19_spill] sm:$0xff] %v8585_v62  ;;  %v504_v8 = vmul.f32 %v8585_v62, %v8585_v62 }
 0x197   :  { %557 = vadd.xlane.f32.xlu0 %v501_v61  ;;  %v502_v63 = vmul.f32 %v8580_v59, %v8580_v59 }
 0x199   :  { %v6507_v0 = vpop.f32.mrb[28].mxu0  ;;  %559 = vadd.xlane.f32.xlu1 %v502_v63 }
 0x19a   :  { %v462_v3 = vpop.f32.mrb[29].mxu0  ;;  %v8597_v11 = vadd.f32 %v6507_v0, %v8451_v26 }
 0x19b   :  { %v8592_v4 = vadd.f32 %v8451_v26, %v462_v3  ;;  %v6508_v5 = vpop.f32.mrb[30].mxu0  ;;  %561 = vadd.xlane.f32.xlu0 %v503_v1 }
 0x19c   :  { %v465_v9 = vpop.f32.mrb[31].mxu0  ;;  %10699 = vst [vmem:[#allocation21_spill] sm:$0xff] %v8597_v11  ;;  %v8605_v14 = vadd.f32 %v6508_v5, %v8451_v26  ;;  %v507_v17 = vmul.f32 %v8597_v11, %v8597_v11 }
 0x19d   :  { %10698 = vst [vmem:[#allocation20_spill] sm:$0xff] %v8592_v4  ;;  %v8600_v12 = vadd.f32 %v8451_v26, %v465_v9  ;;  %563 = vadd.xlane.f32.xlu1 %v504_v8  ;;  %v505_v13 = vmul.f32 %v8592_v4, %v8592_v4  ;;  %v7082_v26 = vld [vmem:[#allocation10 + $0x10] sm:$0xff]  }
 0x19e   :  { %10701 = vst [vmem:[#allocation23_spill] sm:$0xff] %v8605_v14  ;;  %v508_v18 = vmul.f32 %v8605_v14, %v8605_v14  ;;  %6561 = vmatprep.subr.bf16.mxu0 %v7082_v26 }
 0x19f   :  { %10700 = vst [vmem:[#allocation22_spill] sm:$0xff] %v8600_v12  ;;  %565 = vadd.xlane.f32.xlu0 %v505_v13  ;;  %v506_v15 = vmul.f32 %v8600_v12, %v8600_v12  ;;  %6562 = vmatpush3.bf16.msra.mxu0 %v7082_v26 }
 0x1a0   :  { %6563 = vmatprep.subr.bf16.mxu0 %v7083_v23 }
 0x1a1   :  { %567 = vadd.xlane.f32.xlu1 %v506_v15 }
 0x1a3   :  { %569 = vadd.xlane.f32.xlu0 %v507_v17  ;;  %6564 = vmatpush3.bf16.msra.mxu0 %v7083_v23 }
 0x1a5   :  { %571 = vadd.xlane.f32.xlu1 %v508_v18 }
 0x1f3   :  { %v514_v25 = vpop.xlane.xlu1 %513 }
 0x1f4   :  { %v575_v27 = vmul.f32 0.03125, %v514_v25  ;;  %v510_v29 = vpop.xlane.xlu0 %509 }
 0x1f5   :  { %v573_v31 = vmul.f32 0.03125, %v510_v29 }
 0x1f6   :  { %v607_v33 = vadd.f32 1.1920929e-07, %v575_v27 }
 0x1f7   :  { %v605_v36 = vadd.f32 1.1920929e-07, %v573_v31  ;;  %v516_v37 = vpop.xlane.xlu1 %515  ;;  %v8618_v31 = vld [vmem:[%s10664_s3] ss:$0 sm:$0xff] }
 0x1f8   :  { %7160 = vrsqrt.f32 %v607_v33  ;;  %v576_v38 = vmul.f32 0.03125, %v516_v37  ;;  %v512_v42 = vpop.xlane.xlu0 %511 }
 0x1f9   :  { %7162 = vrsqrt.f32 %v605_v36  ;;  %v574_v46 = vmul.f32 0.03125, %v512_v42 }
 0x1fa   :  { %v608_v48 = vadd.f32 1.1920929e-07, %v576_v38 }
 0x1fb   :  { %v606_v49 = vadd.f32 1.1920929e-07, %v574_v46 }
 0x1fc   :  { %7164 = vrsqrt.f32 %v608_v48  ;;  %v518_v50 = vpop.xlane.xlu0 %517 }
 0x1fd   :  { %7166 = vrsqrt.f32 %v606_v49  ;;  %v577_v53 = vmul.f32 0.03125, %v518_v50 }
 0x1fe   :  { %v520_v54 = vpop.xlane.xlu1 %519 }
 0x1ff   :  { %v609_v55 = vadd.f32 1.1920929e-07, %v577_v53  ;;  %v578_v61 = vmul.f32 0.03125, %v520_v54 }
 0x200   :  { %v522_v63 = vpop.xlane.xlu0 %521 }
 0x201   :  { %7168 = vrsqrt.f32 %v609_v55  ;;  %v610_v0 = vadd.f32 1.1920929e-07, %v578_v61  ;;  %v579_v1 = vmul.f32 0.03125, %v522_v63 }
 0x202   :  { %v7161_v3 = vpop.eup %7160  ;;  %v524_v5 = vpop.xlane.xlu1 %523 }
 0x203   :  { %v7163_v8 = vpop.eup %7162  ;;  %7170 = vrsqrt.f32 %v610_v0  ;;  %v611_v9 = vadd.f32 1.1920929e-07, %v579_v1  ;;  %v580_v13 = vmul.f32 0.03125, %v524_v5  ;;  %v671_v23 = vmul.f32 %v7161_v3, %v8454_v28 }
 0x204   :  { %v526_v15 = vpop.xlane.xlu0 %525  ;;  %v669_v26 = vmul.f32 %v7163_v8, %v8457_v30 }
 0x205   :  { %7172 = vrsqrt.f32 %v611_v9  ;;  %v612_v17 = vadd.f32 1.1920929e-07, %v580_v13  ;;  %v581_v18 = vmul.f32 0.03125, %v526_v15  ;;  %v710_v61 = vmul.f32 %v8618_v31, %v671_v23 }
 0x206   :  { %v7165_v19 = vpop.eup %7164  ;;  %v528_v22 = vpop.xlane.xlu1 %527  ;;  %v708_v49 = vmul.f32 %v8618_v31, %v669_v26 }
 0x207   :  { %v7167_v25 = vpop.eup %7166  ;;  %7174 = vrsqrt.f32 %v612_v17  ;;  %v613_v27 = vadd.f32 1.1920929e-07, %v581_v18  ;;  %v582_v29 = vmul.f32 0.03125, %v528_v22  ;;  %v672_v33 = vmul.f32 %v7165_v19, %v8460_v32 }
 0x208   :  { %v530_v36 = vpop.xlane.xlu0 %529  ;;  %v670_v37 = vmul.f32 %v7167_v25, %v8465_v35 }
 0x209   :  { %7176 = vrsqrt.f32 %v613_v27  ;;  %v614_v38 = vadd.f32 1.1920929e-07, %v582_v29  ;;  %v583_v42 = vmul.f32 0.03125, %v530_v36  ;;  %v711_v46 = vmul.f32 %v8618_v31, %v672_v33 }
 0x20a   :  { %v532_v48 = vpop.xlane.xlu1 %531  ;;  %v709_v50 = vmul.f32 %v8618_v31, %v670_v37 }
 0x20b   :  { %v7169_v53 = vpop.eup %7168  ;;  %7178 = vrsqrt.f32 %v614_v38  ;;  %v615_v54 = vadd.f32 1.1920929e-07, %v583_v42  ;;  %v584_v55 = vmul.f32 0.03125, %v532_v48  ;;  %v741_v9 = vpack.c.bf16 %v711_v46, %v710_v61 }
 0x20c   :  { %v534_v63 = vpop.xlane.xlu0 %533  ;;  %v740_v0 = vpack.c.bf16 %v709_v50, %v708_v49  ;;  %v673_v1 = vmul.f32 %v7169_v53, %v8474_v41 }
 0x20d   :  { %v7171_v3 = vpop.eup %7170  ;;  %7180 = vrsqrt.f32 %v615_v54  ;;  %v616_v5 = vadd.f32 1.1920929e-07, %v584_v55  ;;  %v585_v8 = vmul.f32 0.03125, %v534_v63 }
 0x20e   :  { %v536_v13 = vpop.xlane.xlu1 %535  ;;  %6525 = vmatprep.mubr.bf16.mxu1 %v740_v0  ;;  %v674_v15 = vmul.f32 %v7171_v3, %v8480_v45  ;;  %v712_v26 = vmul.f32 %v8618_v31, %v673_v1 }
 0x20f   :  { %v7173_v17 = vpop.eup %7172  ;;  %7182 = vrsqrt.f32 %v616_v5  ;;  %v617_v18 = vadd.f32 1.1920929e-07, %v585_v8  ;;  %v586_v19 = vmul.f32 0.03125, %v536_v13  ;;  %6526 = vmatmul.mubr.bf16.vlgmr.msra.gmra.mrb[0].mxu1 %v741_v9 }
 0x210   :  { %v538_v22 = vpop.xlane.xlu0 %537  ;;  %v713_v23 = vmul.f32 %v8618_v31, %v674_v15  ;;  %v675_v25 = vmul.f32 %v7173_v17, %v8477_v44 }
 0x211   :  { %v7175_v27 = vpop.eup %7174  ;;  %7184 = vrsqrt.f32 %v617_v18  ;;  %v618_v29 = vadd.f32 1.1920929e-07, %v586_v19  ;;  %v587_v33 = vmul.f32 0.03125, %v538_v22 }
 0x212   :  { %v540_v36 = vpop.xlane.xlu1 %539  ;;  %v742_v37 = vpack.c.bf16 %v713_v23, %v712_v26  ;;  %v676_v38 = vmul.f32 %v7175_v27, %v8485_v47  ;;  %v714_v50 = vmul.f32 %v8618_v31, %v675_v25 }
 0x213   :  { %v7177_v42 = vpop.eup %7176  ;;  %7186 = vrsqrt.f32 %v618_v29  ;;  %v619_v46 = vadd.f32 1.1920929e-07, %v587_v33  ;;  %v588_v48 = vmul.f32 0.03125, %v540_v36 }
 0x214   :  { %6529 = vmatprep.mubr.bf16.mxu1 %v742_v37  ;;  %v542_v49 = vpop.xlane.xlu0 %541  ;;  %v715_v53 = vmul.f32 %v8618_v31, %v676_v38  ;;  %v677_v54 = vmul.f32 %v7177_v42, %v8492_v52 }
 0x215   :  { %v7179_v55 = vpop.eup %7178  ;;  %7188 = vrsqrt.f32 %v619_v46  ;;  %v620_v61 = vadd.f32 1.1920929e-07, %v588_v48  ;;  %v589_v63 = vmul.f32 0.03125, %v542_v49 }
 0x216   :  { %v544_v0 = vpop.xlane.xlu1 %543  ;;  %v743_v1 = vpack.c.bf16 %v715_v53, %v714_v50  ;;  %v678_v3 = vmul.f32 %v7179_v55, %v8500_v57  ;;  %v716_v15 = vmul.f32 %v8618_v31, %v677_v54 }
 0x217   :  { %v7181_v5 = vpop.eup %7180  ;;  %7190 = vrsqrt.f32 %v620_v61  ;;  %v621_v8 = vadd.f32 1.1920929e-07, %v589_v63  ;;  %v590_v9 = vmul.f32 0.03125, %v544_v0 }
 0x218   :  { %6530 = vmatmul.mubr.bf16.gmra.mrb[4].mxu1 %v743_v1  ;;  %v546_v13 = vpop.xlane.xlu0 %545  ;;  %v717_v17 = vmul.f32 %v8618_v31, %v678_v3  ;;  %v679_v18 = vmul.f32 %v7181_v5, %v8497_v56 }
 0x219   :  { %v7183_v19 = vpop.eup %7182  ;;  %7192 = vrsqrt.f32 %v621_v8  ;;  %v622_v22 = vadd.f32 1.1920929e-07, %v590_v9  ;;  %v591_v26 = vmul.f32 0.03125, %v546_v13 }
 0x21a   :  { %v548_v23 = vpop.xlane.xlu1 %547  ;;  %v744_v25 = vpack.c.bf16 %v717_v17, %v716_v15  ;;  %v680_v27 = vmul.f32 %v7183_v19, %v8505_v60  ;;  %v718_v38 = vmul.f32 %v8618_v31, %v679_v18 }
 0x21b   :  { %v7185_v29 = vpop.eup %7184  ;;  %7194 = vrsqrt.f32 %v622_v22  ;;  %v623_v33 = vadd.f32 1.1920929e-07, %v591_v26  ;;  %v592_v36 = vmul.f32 0.03125, %v548_v23 }
 0x21c   :  { %6533 = vmatprep.mubr.bf16.mxu1 %v744_v25  ;;  %v550_v37 = vpop.xlane.xlu0 %549  ;;  %v719_v42 = vmul.f32 %v8618_v31, %v680_v27  ;;  %v681_v46 = vmul.f32 %v7185_v29, %v8512_v2 }
 0x21d   :  { %v7187_v48 = vpop.eup %7186  ;;  %7196 = vrsqrt.f32 %v623_v33  ;;  %v624_v49 = vadd.f32 1.1920929e-07, %v592_v36  ;;  %v593_v50 = vmul.f32 0.03125, %v550_v37 }
 0x21e   :  { %v552_v53 = vpop.xlane.xlu1 %551  ;;  %v745_v54 = vpack.c.bf16 %v719_v42, %v718_v38  ;;  %v682_v55 = vmul.f32 %v7187_v48, %v8520_v7  ;;  %v720_v3 = vmul.f32 %v8618_v31, %v681_v46 }
 0x21f   :  { %v7189_v61 = vpop.eup %7188  ;;  %7198 = vrsqrt.f32 %v624_v49  ;;  %v625_v63 = vadd.f32 1.1920929e-07, %v593_v50  ;;  %v594_v0 = vmul.f32 0.03125, %v552_v53 }
 0x220   :  { %6534 = vmatmul.mubr.bf16.gmra.mrb[8].mxu1 %v745_v54  ;;  %v554_v1 = vpop.xlane.xlu0 %553  ;;  %v721_v5 = vmul.f32 %v8618_v31, %v682_v55  ;;  %v683_v8 = vmul.f32 %v7189_v61, %v8517_v6 }
 0x221   :  { %v7191_v9 = vpop.eup %7190  ;;  %7200 = vrsqrt.f32 %v625_v63  ;;  %v626_v13 = vadd.f32 1.1920929e-07, %v594_v0  ;;  %v595_v15 = vmul.f32 0.03125, %v554_v1 }
 0x222   :  { %v556_v17 = vpop.xlane.xlu1 %555  ;;  %v746_v18 = vpack.c.bf16 %v721_v5, %v720_v3  ;;  %v684_v19 = vmul.f32 %v7191_v9, %v8525_v10  ;;  %v722_v27 = vmul.f32 %v8618_v31, %v683_v8 }
 0x223   :  { %v7193_v22 = vpop.eup %7192  ;;  %7202 = vrsqrt.f32 %v626_v13  ;;  %v627_v26 = vadd.f32 1.1920929e-07, %v595_v15  ;;  %v596_v23 = vmul.f32 0.03125, %v556_v17 }
 0x224   :  { %6537 = vmatprep.mubr.bf16.mxu1 %v746_v18  ;;  %v558_v25 = vpop.xlane.xlu0 %557  ;;  %v723_v29 = vmul.f32 %v8618_v31, %v684_v19  ;;  %v685_v33 = vmul.f32 %v7193_v22, %v8532_v16 }
 0x225   :  { %v7195_v36 = vpop.eup %7194  ;;  %7204 = vrsqrt.f32 %v627_v26  ;;  %v628_v37 = vadd.f32 1.1920929e-07, %v596_v23  ;;  %v597_v38 = vmul.f32 0.03125, %v558_v25 }
 0x226   :  { %v560_v42 = vpop.xlane.xlu1 %559  ;;  %v747_v46 = vpack.c.bf16 %v723_v29, %v722_v27  ;;  %v686_v48 = vmul.f32 %v7195_v36, %v8540_v21  ;;  %v724_v55 = vmul.f32 %v8618_v31, %v685_v33 }
 0x227   :  { %v7197_v49 = vpop.eup %7196  ;;  %7206 = vrsqrt.f32 %v628_v37  ;;  %v629_v50 = vadd.f32 1.1920929e-07, %v597_v38  ;;  %v598_v53 = vmul.f32 0.03125, %v560_v42 }
 0x228   :  { %6538 = vmatmul.mubr.bf16.gmra.mrb[12].mxu1 %v747_v46  ;;  %v562_v54 = vpop.xlane.xlu0 %561  ;;  %v725_v61 = vmul.f32 %v8618_v31, %v686_v48  ;;  %v687_v63 = vmul.f32 %v7197_v49, %v8537_v20 }
 0x229   :  { %v7199_v0 = vpop.eup %7198  ;;  %7208 = vrsqrt.f32 %v629_v50  ;;  %v630_v1 = vadd.f32 1.1920929e-07, %v598_v53  ;;  %v599_v3 = vmul.f32 0.03125, %v562_v54 }
 0x22a   :  { %v564_v5 = vpop.xlane.xlu1 %563  ;;  %v748_v8 = vpack.c.bf16 %v725_v61, %v724_v55  ;;  %v688_v9 = vmul.f32 %v7199_v0, %v8545_v24  ;;  %v726_v19 = vmul.f32 %v8618_v31, %v687_v63 }
 0x22b   :  { %v7201_v13 = vpop.eup %7200  ;;  %7210 = vrsqrt.f32 %v630_v1  ;;  %v631_v15 = vadd.f32 1.1920929e-07, %v599_v3  ;;  %v600_v17 = vmul.f32 0.03125, %v564_v5 }
 0x22c   :  { %6541 = vmatprep.mubr.bf16.mxu1 %v748_v8  ;;  %v566_v18 = vpop.xlane.xlu0 %565  ;;  %v727_v22 = vmul.f32 %v8618_v31, %v688_v9  ;;  %v689_v26 = vmul.f32 %v7201_v13, %v8552_v34 }
 0x22d   :  { %v7203_v23 = vpop.eup %7202  ;;  %7212 = vrsqrt.f32 %v631_v15  ;;  %v632_v25 = vadd.f32 1.1920929e-07, %v600_v17  ;;  %v601_v27 = vmul.f32 0.03125, %v566_v18 }
 0x22e   :  { %v568_v29 = vpop.xlane.xlu1 %567  ;;  %v749_v33 = vpack.c.bf16 %v727_v22, %v726_v19  ;;  %v690_v36 = vmul.f32 %v7203_v23, %v8560_v40  ;;  %v728_v48 = vmul.f32 %v8618_v31, %v689_v26 }
 0x22f   :  { %v7205_v37 = vpop.eup %7204  ;;  %7214 = vrsqrt.f32 %v632_v25  ;;  %v633_v38 = vadd.f32 1.1920929e-07, %v601_v27  ;;  %v602_v42 = vmul.f32 0.03125, %v568_v29 }
 0x230   :  { %6542 = vmatmul.mubr.bf16.gmra.mrb[16].mxu1 %v749_v33  ;;  %v570_v46 = vpop.xlane.xlu0 %569  ;;  %v729_v49 = vmul.f32 %v8618_v31, %v690_v36  ;;  %v691_v50 = vmul.f32 %v7205_v37, %v8557_v39 }
 0x231   :  { %v7207_v53 = vpop.eup %7206  ;;  %7216 = vrsqrt.f32 %v633_v38  ;;  %v634_v54 = vadd.f32 1.1920929e-07, %v602_v42  ;;  %v603_v55 = vmul.f32 0.03125, %v570_v46 }
 0x232   :  { %v572_v61 = vpop.xlane.xlu1 %571  ;;  %v750_v63 = vpack.c.bf16 %v729_v49, %v728_v48  ;;  %v692_v0 = vmul.f32 %v7207_v53, %v8565_v43  ;;  %v730_v8 = vmul.f32 %v8618_v31, %v691_v50 }
 0x233   :  { %v7209_v1 = vpop.eup %7208  ;;  %7218 = vrsqrt.f32 %v634_v54  ;;  %v635_v3 = vadd.f32 1.1920929e-07, %v603_v55  ;;  %v604_v5 = vmul.f32 0.03125, %v572_v61 }
 0x234   :  { %6545 = vmatprep.mubr.bf16.mxu1 %v750_v63  ;;  %v731_v9 = vmul.f32 %v8618_v31, %v692_v0  ;;  %v693_v13 = vmul.f32 %v7209_v1, %v8572_v51 }
 0x235   :  { %v7211_v15 = vpop.eup %7210  ;;  %7220 = vrsqrt.f32 %v635_v3  ;;  %v636_v17 = vadd.f32 1.1920929e-07, %v604_v5 }
 0x236   :  { %v751_v18 = vpack.c.bf16 %v731_v9, %v730_v8  ;;  %v694_v19 = vmul.f32 %v7211_v15, %v8580_v59  ;;  %v732_v26 = vmul.f32 %v8618_v31, %v693_v13  ;;  %v7084_v8 = vld [vmem:[#allocation10 + $0x20] sm:$0xff]   ;;  %v7085_v9 = vld [vmem:[#allocation10 + $0x28] sm:$0xff]   ;;  %v7086_v13 = vld [vmem:[#allocation10 + $0x30] sm:$0xff]  }
 0x237   :  { %v7213_v22 = vpop.eup %7212  ;;  %7222 = vrsqrt.f32 %v636_v17  ;;  %6565 = vmatprep.subr.bf16.mxu0 %v7084_v8  ;;  %v7087_v15 = vld [vmem:[#allocation10 + $0x38] sm:$0xff]  }
 0x238   :  { %6546 = vmatmul.mubr.bf16.gmra.mrb[20].mxu1 %v751_v18  ;;  %v733_v23 = vmul.f32 %v8618_v31, %v694_v19  ;;  %v695_v25 = vmul.f32 %v7213_v22, %v8577_v58  ;;  %6566 = vmatpush3.bf16.msra.mxu0 %v7084_v8  ;;  %v8685_v17 = vld [vmem:[%s10666_s5] ss:$0 sm:$0xff] }
 0x239   :  { %v7215_v27 = vpop.eup %7214  ;;  %6567 = vmatprep.subr.bf16.mxu0 %v7085_v9 }
 0x23a   :  { %v752_v29 = vpack.c.bf16 %v733_v23, %v732_v26  ;;  %v696_v33 = vmul.f32 %v7215_v27, %v8585_v62  ;;  %v734_v37 = vmul.f32 %v8618_v31, %v695_v25 }
 0x23b   :  { %v7217_v36 = vpop.eup %7216 }
 0x23c   :  { %6549 = vmatprep.mubr.bf16.mxu1 %v752_v29  ;;  %v735_v38 = vmul.f32 %v8618_v31, %v696_v33  ;;  %v697_v42 = vmul.f32 %v7217_v36, %v8592_v4  ;;  %6568 = vmatpush3.bf16.msra.mxu0 %v7085_v9 }
 0x23d   :  { %v7219_v46 = vpop.eup %7218  ;;  %6569 = vmatprep.subr.bf16.mxu0 %v7086_v13 }
 0x23e   :  { %v753_v48 = vpack.c.bf16 %v735_v38, %v734_v37  ;;  %v698_v49 = vmul.f32 %v7219_v46, %v8600_v12  ;;  %v736_v53 = vmul.f32 %v8618_v31, %v697_v42 }
 0x23f   :  { %v7221_v50 = vpop.eup %7220 }
 0x240   :  { %6550 = vmatmul.mubr.bf16.gmra.mrb[24].mxu1 %v753_v48  ;;  %v737_v54 = vmul.f32 %v8618_v31, %v698_v49  ;;  %v699_v55 = vmul.f32 %v7221_v50, %v8597_v11  ;;  %6570 = vmatpush3.bf16.msra.mxu0 %v7086_v13 }
 0x241   :  { %v7223_v61 = vpop.eup %7222  ;;  %6571 = vmatprep.subr.bf16.mxu0 %v7087_v15 }
 0x242   :  { %v754_v63 = vpack.c.bf16 %v737_v54, %v736_v53  ;;  %v700_v0 = vmul.f32 %v7223_v61, %v8605_v14  ;;  %v738_v1 = vmul.f32 %v8618_v31, %v699_v55 }
 0x244   :  { %6553 = vmatprep.mubr.bf16.mxu1 %v754_v63  ;;  %v739_v3 = vmul.f32 %v8618_v31, %v700_v0  ;;  %6572 = vmatpush3.bf16.msra.mxu0 %v7087_v15 }
 0x246   :  { %v755_v5 = vpack.c.bf16 %v739_v3, %v738_v1 }
 0x248   :  { %6554 = vmatmul.mubr.bf16.gmra.mrb[28].mxu1 %v755_v5 }
 0x2e2   :  { %v6527_v31 = vpop.f32.mrb[0].mxu1 }
 0x2e3   :  { %v8688_v18 = vadd.f32 %v6527_v31, %v8685_v17  ;;  %v861_v19 = vpop.f32.mrb[1].mxu1 }
 0x2e4   :  { %v8691_v22 = vadd.f32 %v8685_v17, %v861_v19  ;;  %v6528_v26 = vpop.f32.mrb[2].mxu1 }
 0x2e5   :  { %v5909_v23 = vmul.f32 -1.442695, %v8688_v18  ;;  %v8695_v25 = vadd.f32 %v6528_v26, %v8685_v17  ;;  %v864_v27 = vpop.f32.mrb[3].mxu1 }
 0x2e6   :  { %v5907_v29 = vmul.f32 -1.442695, %v8691_v22  ;;  %v8699_v33 = vadd.f32 %v8685_v17, %v864_v27 }
 0x2e7   :  { %7224 = vpow2.f32 %v5909_v23  ;;  %v5910_v36 = vmul.f32 -1.442695, %v8695_v25 }
 0x2e8   :  { %7226 = vpow2.f32 %v5907_v29  ;;  %v5908_v37 = vmul.f32 -1.442695, %v8699_v33 }
 0x2e9   :  { %7228 = vpow2.f32 %v5910_v36 }
 0x2ea   :  { %7230 = vpow2.f32 %v5908_v37 }
 0x2eb   :  { %v6531_v38 = vpop.f32.mrb[4].mxu1 }
 0x2ec   :  { %v8704_v42 = vadd.f32 %v6531_v38, %v8685_v17  ;;  %v877_v46 = vpop.f32.mrb[5].mxu1 }
 0x2ed   :  { %v8707_v48 = vadd.f32 %v8685_v17, %v877_v46  ;;  %v6532_v49 = vpop.f32.mrb[6].mxu1 }
 0x2ee   :  { %v5913_v50 = vmul.f32 -1.442695, %v8704_v42  ;;  %v8711_v53 = vadd.f32 %v6532_v49, %v8685_v17  ;;  %v880_v54 = vpop.f32.mrb[7].mxu1 }
 0x2ef   :  { %v5911_v55 = vmul.f32 -1.442695, %v8707_v48  ;;  %v8715_v61 = vadd.f32 %v8685_v17, %v880_v54 }
 0x2f0   :  { %7232 = vpow2.f32 %v5913_v50  ;;  %v5914_v63 = vmul.f32 -1.442695, %v8711_v53 }
 0x2f1   :  { %v7225_v0 = vpop.eup %7224  ;;  %7234 = vpow2.f32 %v5911_v55  ;;  %v5912_v1 = vmul.f32 -1.442695, %v8715_v61 }
 0x2f2   :  { %v7227_v3 = vpop.eup %7226  ;;  %v1086_v5 = vadd.f32 1.0, %v7225_v0  ;;  %7236 = vpow2.f32 %v5914_v63 }
 0x2f3   :  { %v7229_v8 = vpop.eup %7228  ;;  %v1084_v9 = vadd.f32 1.0, %v7227_v3  ;;  %7238 = vpow2.f32 %v5912_v1  ;;  %v6535_v13 = vpop.f32.mrb[8].mxu1 }
 0x2f4   :  { %v7231_v15 = vpop.eup %7230  ;;  %7240 = vrcp.f32 %v1086_v5  ;;  %v1087_v31 = vadd.f32 1.0, %v7229_v8  ;;  %v8720_v19 = vadd.f32 %v6535_v13, %v8685_v17  ;;  %v893_v26 = vpop.f32.mrb[9].mxu1 }
 0x2f5   :  { %7242 = vrcp.f32 %v1084_v9  ;;  %v1085_v23 = vadd.f32 1.0, %v7231_v15  ;;  %v8723_v27 = vadd.f32 %v8685_v17, %v893_v26  ;;  %v6536_v29 = vpop.f32.mrb[10].mxu1 }
 0x2f6   :  { %7244 = vrcp.f32 %v1087_v31  ;;  %v5917_v36 = vmul.f32 -1.442695, %v8720_v19  ;;  %v8727_v37 = vadd.f32 %v6536_v29, %v8685_v17  ;;  %v896_v38 = vpop.f32.mrb[11].mxu1 }
 0x2f7   :  { %7246 = vrcp.f32 %v1085_v23  ;;  %v5915_v46 = vmul.f32 -1.442695, %v8723_v27  ;;  %v8731_v49 = vadd.f32 %v8685_v17, %v896_v38 }
 0x2f8   :  { %7248 = vpow2.f32 %v5917_v36  ;;  %v5918_v50 = vmul.f32 -1.442695, %v8727_v37 }
 0x2f9   :  { %7250 = vpow2.f32 %v5915_v46  ;;  %v5916_v54 = vmul.f32 -1.442695, %v8731_v49 }
 0x2fa   :  { %v7233_v55 = vpop.eup %7232  ;;  %7252 = vpow2.f32 %v5918_v50 }
 0x2fb   :  { %v7235_v63 = vpop.eup %7234  ;;  %v1090_v0 = vadd.f32 1.0, %v7233_v55  ;;  %7254 = vpow2.f32 %v5916_v54  ;;  %v6539_v1 = vpop.f32.mrb[12].mxu1 }
 0x2fc   :  { %v7237_v3 = vpop.eup %7236  ;;  %v1088_v5 = vadd.f32 1.0, %v7235_v63  ;;  %v8736_v8 = vadd.f32 %v6539_v1, %v8685_v17  ;;  %v909_v9 = vpop.f32.mrb[13].mxu1 }
 0x2fd   :  { %v7239_v13 = vpop.eup %7238  ;;  %7256 = vrcp.f32 %v1090_v0  ;;  %v1091_v15 = vadd.f32 1.0, %v7237_v3  ;;  %v8739_v31 = vadd.f32 %v8685_v17, %v909_v9  ;;  %v6540_v26 = vpop.f32.mrb[14].mxu1 }
 0x2fe   :  { %v7241_v23 = vpop.eup %7240  ;;  %7258 = vrcp.f32 %v1088_v5  ;;  %v1089_v29 = vadd.f32 1.0, %v7239_v13  ;;  %v5921_v36 = vmul.f32 -1.442695, %v8736_v8  ;;  %v8743_v38 = vadd.f32 %v6540_v26, %v8685_v17  ;;  %v912_v46 = vpop.f32.mrb[15].mxu1 }
 0x2ff   :  { %v7243_v50 = vpop.eup %7242  ;;  %7260 = vrcp.f32 %v1091_v15  ;;  %v5919_v54 = vmul.f32 -1.442695, %v8739_v31  ;;  %v8747_v55 = vadd.f32 %v8685_v17, %v912_v46  ;;  %v1182_v3 = vmul.f32 %v7241_v23, %v8688_v18 }
 0x300   :  { %v7245_v63 = vpop.eup %7244  ;;  %7262 = vrcp.f32 %v1089_v29  ;;  %v5922_v0 = vmul.f32 -1.442695, %v8743_v38  ;;  %v1180_v15 = vmul.f32 %v7243_v50, %v8691_v22 }
 0x301   :  { %v7247_v1 = vpop.eup %7246  ;;  %v1183_v5 = vmul.f32 %v7245_v63, %v8695_v25  ;;  %7264 = vpow2.f32 %v5921_v36  ;;  %v5920_v9 = vmul.f32 -1.442695, %v8747_v55 }
 0x302   :  { %v7249_v13 = vpop.eup %7248  ;;  %v1181_v26 = vmul.f32 %v7247_v1, %v8699_v33  ;;  %7266 = vpow2.f32 %v5919_v54 }
 0x303   :  { %v7251_v46 = vpop.eup %7250  ;;  %v1213_v14 = vpack.c.bf16 %v1183_v5, %v1182_v3  ;;  %v1094_v12 = vadd.f32 1.0, %v7249_v13  ;;  %7268 = vpow2.f32 %v5922_v0  ;;  %v6543_v29 = vpop.f32.mrb[16].mxu1 }
 0x304   :  { %v7253_v11 = vpop.eup %7252  ;;  %v1092_v4 = vadd.f32 1.0, %v7251_v46  ;;  %7270 = vpow2.f32 %v5920_v9  ;;  %v8756_v18 = vadd.f32 %v6543_v29, %v8685_v17  ;;  %v925_v25 = vpop.f32.mrb[17].mxu1  ;;  %v1212_v23 = vpack.c.bf16 %v1181_v26, %v1180_v15 }
 0x305   :  { %v7255_v36 = vpop.eup %7254  ;;  %7272 = vrcp.f32 %v1094_v12  ;;  %v1095_v63 = vadd.f32 1.0, %v7253_v11  ;;  %v8759_v22 = vadd.f32 %v8685_v17, %v925_v25  ;;  %v6544_v33 = vpop.f32.mrb[18].mxu1 }
 0x306   :  { %7274 = vrcp.f32 %v1092_v4  ;;  %v1093_v50 = vadd.f32 1.0, %v7255_v36  ;;  %v5925_v54 = vmul.f32 -1.442695, %v8756_v18  ;;  %v8763_v0 = vadd.f32 %v6544_v33, %v8685_v17  ;;  %v928_v1 = vpop.f32.mrb[19].mxu1  ;;  %6573 = vmatprep.mubr.bf16.mxu0 %v1212_v23 }
 0x307   :  { %v7257_v3 = vpop.eup %7256  ;;  %7276 = vrcp.f32 %v1095_v63  ;;  %v5923_v5 = vmul.f32 -1.442695, %v8759_v22  ;;  %v8767_v12 = vadd.f32 %v8685_v17, %v928_v1  ;;  %6574 = vmatmul.mubr.bf16.vlgmr.msra.gmra.mrb[32].mxu0 %v1213_v14 }
 0x308   :  { %v7259_v11 = vpop.eup %7258  ;;  %7278 = vrcp.f32 %v1093_v50  ;;  %v5926_v4 = vmul.f32 -1.442695, %v8763_v0  ;;  %v1186_v26 = vmul.f32 %v7257_v3, %v8704_v42 }
 0x309   :  { %v7261_v9 = vpop.eup %7260  ;;  %7280 = vpow2.f32 %v5925_v54  ;;  %v5924_v13 = vmul.f32 -1.442695, %v8767_v12  ;;  %v1184_v25 = vmul.f32 %v7259_v11, %v8707_v48 }
 0x30a   :  { %v7263_v15 = vpop.eup %7262  ;;  %v1187_v46 = vmul.f32 %v7261_v9, %v8711_v53  ;;  %7282 = vpow2.f32 %v5923_v5 }
 0x30b   :  { %v7265_v29 = vpop.eup %7264  ;;  %v1185_v23 = vmul.f32 %v7263_v15, %v8715_v61  ;;  %7284 = vpow2.f32 %v5926_v4  ;;  %v6547_v14 = vpop.f32.mrb[20].mxu1 }
 0x30c   :  { %v7267_v36 = vpop.eup %7266  ;;  %v1098_v63 = vadd.f32 1.0, %v7265_v29  ;;  %7286 = vpow2.f32 %v5924_v13  ;;  %v8776_v33 = vadd.f32 %v6547_v14, %v8685_v17  ;;  %v941_v50 = vpop.f32.mrb[21].mxu1  ;;  %v1215_v54 = vpack.c.bf16 %v1187_v46, %v1186_v26 }
 0x30d   :  { %v7269_v1 = vpop.eup %7268  ;;  %v1096_v42 = vadd.f32 1.0, %v7267_v36  ;;  %v8779_v53 = vadd.f32 %v8685_v17, %v941_v50  ;;  %v6548_v3 = vpop.f32.mrb[22].mxu1  ;;  %v1214_v5 = vpack.c.bf16 %v1185_v23, %v1184_v25 }
 0x30e   :  { %v7271_v48 = vpop.eup %7270  ;;  %7288 = vrcp.f32 %v1098_v63  ;;  %v1099_v61 = vadd.f32 1.0, %v7269_v1  ;;  %v5929_v11 = vmul.f32 -1.442695, %v8776_v33  ;;  %v8783_v4 = vadd.f32 %v6548_v3, %v8685_v17  ;;  %v944_v9 = vpop.f32.mrb[23].mxu1 }
 0x30f   :  { %v7273_v13 = vpop.eup %7272  ;;  %7290 = vrcp.f32 %v1096_v42  ;;  %v1097_v15 = vadd.f32 1.0, %v7271_v48  ;;  %v5927_v26 = vmul.f32 -1.442695, %v8779_v53  ;;  %v8787_v46 = vadd.f32 %v8685_v17, %v944_v9  ;;  %6577 = vmatprep.mubr.bf16.mxu0 %v1214_v5 }
 0x310   :  { %v7275_v29 = vpop.eup %7274  ;;  %7292 = vrcp.f32 %v1099_v61  ;;  %v5930_v25 = vmul.f32 -1.442695, %v8783_v4  ;;  %6578 = vmatmul.mubr.bf16.gmra.mrb[36].mxu0 %v1215_v54  ;;  %v1190_v63 = vmul.f32 %v7273_v13, %v8720_v19 }
 0x311   :  { %v7277_v23 = vpop.eup %7276  ;;  %7294 = vrcp.f32 %v1097_v15  ;;  %v5928_v14 = vmul.f32 -1.442695, %v8787_v46  ;;  %v1188_v42 = vmul.f32 %v7275_v29, %v8723_v27 }
 0x312   :  { %v7279_v36 = vpop.eup %7278  ;;  %v1191_v50 = vmul.f32 %v7277_v23, %v8727_v37  ;;  %7296 = vpow2.f32 %v5929_v11 }
 0x313   :  { %v7281_v1 = vpop.eup %7280  ;;  %v1189_v3 = vmul.f32 %v7279_v36, %v8731_v49  ;;  %7298 = vpow2.f32 %v5927_v26  ;;  %v6551_v5 = vpop.f32.mrb[24].mxu1 }
 0x314   :  { %v7283_v48 = vpop.eup %7282  ;;  %v1102_v61 = vadd.f32 1.0, %v7281_v1  ;;  %7300 = vpow2.f32 %v5930_v25  ;;  %v8796_v54 = vadd.f32 %v6551_v5, %v8685_v17  ;;  %v957_v9 = vpop.f32.mrb[25].mxu1  ;;  %v1217_v15 = vpack.c.bf16 %v1191_v50, %v1190_v63 }
 0x315   :  { %v7285_v62 = vpop.eup %7284  ;;  %v1100_v19 = vadd.f32 1.0, %v7283_v48  ;;  %7302 = vpow2.f32 %v5928_v14  ;;  %v8799_v37 = vadd.f32 %v8685_v17, %v957_v9  ;;  %v6552_v11 = vpop.f32.mrb[26].mxu1  ;;  %v1216_v27 = vpack.c.bf16 %v1189_v3, %v1188_v42 }
 0x316   :  { %v7287_v13 = vpop.eup %7286  ;;  %7304 = vrcp.f32 %v1102_v61  ;;  %v1103_v49 = vadd.f32 1.0, %v7285_v62  ;;  %v5933_v26 = vmul.f32 -1.442695, %v8796_v54  ;;  %v8803_v29 = vadd.f32 %v6552_v11, %v8685_v17  ;;  %v960_v25 = vpop.f32.mrb[27].mxu1 }
 0x317   :  { %7306 = vrcp.f32 %v1100_v19  ;;  %v1101_v23 = vadd.f32 1.0, %v7287_v13  ;;  %v5931_v36 = vmul.f32 -1.442695, %v8799_v37  ;;  %v8807_v14 = vadd.f32 %v8685_v17, %v960_v25  ;;  %6581 = vmatprep.mubr.bf16.mxu0 %v1216_v27 }
 0x318   :  { %v7289_v63 = vpop.eup %7288  ;;  %7308 = vrcp.f32 %v1103_v49  ;;  %v5934_v50 = vmul.f32 -1.442695, %v8803_v29  ;;  %6582 = vmatmul.mubr.bf16.gmra.mrb[40].mxu0 %v1217_v15 }
 0x319   :  { %v7291_v62 = vpop.eup %7290  ;;  %7310 = vrcp.f32 %v1101_v23  ;;  %v5932_v1 = vmul.f32 -1.442695, %v8807_v14  ;;  %v1194_v5 = vmul.f32 %v7289_v63, %v8736_v8 }
 0x31a   :  { %v7293_v42 = vpop.eup %7292  ;;  %7312 = vpow2.f32 %v5933_v26  ;;  %v1192_v19 = vmul.f32 %v7291_v62, %v8739_v31 }
 0x31b   :  { %v7295_v3 = vpop.eup %7294  ;;  %v1195_v48 = vmul.f32 %v7293_v42, %v8743_v38  ;;  %7314 = vpow2.f32 %v5931_v36  ;;  %v6555_v61 = vpop.f32.mrb[28].mxu1 }
 0x31c   :  { %v7297_v9 = vpop.eup %7296  ;;  %v1193_v11 = vmul.f32 %v7295_v3, %v8747_v55  ;;  %7316 = vpow2.f32 %v5934_v50  ;;  %v8816_v15 = vadd.f32 %v6555_v61, %v8685_v17  ;;  %v973_v27 = vpop.f32.mrb[29].mxu1 }
 0x31d   :  { %v7299_v13 = vpop.eup %7298  ;;  %v1106_v49 = vadd.f32 1.0, %v7297_v9  ;;  %7318 = vpow2.f32 %v5932_v1  ;;  %v8819_v26 = vadd.f32 %v8685_v17, %v973_v27  ;;  %v6556_v8 = vpop.f32.mrb[30].mxu1  ;;  %v1219_v38 = vpack.c.bf16 %v1195_v48, %v1194_v5 }
 0x31e   :  { %v7301_v25 = vpop.eup %7300  ;;  %v1104_v23 = vadd.f32 1.0, %v7299_v13  ;;  %v8822_v36 = vadd.f32 %v6556_v8, %v8685_v17  ;;  %v976_v31 = vpop.f32.mrb[31].mxu1  ;;  %v1218_v55 = vpack.c.bf16 %v1193_v11, %v1192_v19  ;;  %v5937_v62 = vmul.f32 -1.442695, %v8816_v15 }
 0x31f   :  { %v7303_v63 = vpop.eup %7302  ;;  %7320 = vrcp.f32 %v1106_v49  ;;  %v1107_v50 = vadd.f32 1.0, %v7301_v25  ;;  %v8826_v42 = vadd.f32 %v8685_v17, %v976_v31  ;;  %v5935_v5 = vmul.f32 -1.442695, %v8819_v26 }
 0x320   :  { %v7305_v1 = vpop.eup %7304  ;;  %7322 = vrcp.f32 %v1104_v23  ;;  %v1105_v3 = vadd.f32 1.0, %v7303_v63  ;;  %6585 = vmatprep.mubr.bf16.mxu0 %v1218_v55  ;;  %v5938_v61 = vmul.f32 -1.442695, %v8822_v36 }
 0x321   :  { %v7307_v48 = vpop.eup %7306  ;;  %7324 = vrcp.f32 %v1107_v50  ;;  %6586 = vmatmul.mubr.bf16.gmra.mrb[44].mxu0 %v1219_v38  ;;  %v5936_v19 = vmul.f32 -1.442695, %v8826_v42  ;;  %v1198_v27 = vmul.f32 %v7305_v1, %v8756_v18 }
 0x322   :  { %v7309_v9 = vpop.eup %7308  ;;  %7326 = vrcp.f32 %v1105_v3  ;;  %v1196_v49 = vmul.f32 %v7307_v48, %v8759_v22 }
 0x323   :  { %v7311_v11 = vpop.eup %7310  ;;  %v1199_v17 = vmul.f32 %v7309_v9, %v8763_v0  ;;  %7328 = vpow2.f32 %v5937_v62 }
 0x324   :  { %v7313_v13 = vpop.eup %7312  ;;  %v1197_v8 = vmul.f32 %v7311_v11, %v8767_v12  ;;  %7330 = vpow2.f32 %v5935_v5 }
 0x325   :  { %v7315_v25 = vpop.eup %7314  ;;  %v1110_v23 = vadd.f32 1.0, %v7313_v13  ;;  %7332 = vpow2.f32 %v5938_v61  ;;  %v1221_v38 = vpack.c.bf16 %v1199_v17, %v1198_v27 }
 0x326   :  { %v7317_v31 = vpop.eup %7316  ;;  %v1108_v55 = vadd.f32 1.0, %v7315_v25  ;;  %7334 = vpow2.f32 %v5936_v19  ;;  %v1220_v63 = vpack.c.bf16 %v1197_v8, %v1196_v49 }
 0x327   :  { %v7319_v50 = vpop.eup %7318  ;;  %7336 = vrcp.f32 %v1110_v23  ;;  %v1111_v18 = vadd.f32 1.0, %v7317_v31 }
 0x328   :  { %7338 = vrcp.f32 %v1108_v55  ;;  %v1109_v0 = vadd.f32 1.0, %v7319_v50  ;;  %6589 = vmatprep.mubr.bf16.mxu0 %v1220_v63 }
 0x329   :  { %v7321_v62 = vpop.eup %7320  ;;  %7340 = vrcp.f32 %v1111_v18  ;;  %6590 = vmatmul.mubr.bf16.gmra.mrb[48].mxu0 %v1221_v38 }
 0x32a   :  { %v7323_v22 = vpop.eup %7322  ;;  %7342 = vrcp.f32 %v1109_v0  ;;  %v1202_v3 = vmul.f32 %v7321_v62, %v8776_v33 }
 0x32b   :  { %v7325_v12 = vpop.eup %7324  ;;  %v1200_v61 = vmul.f32 %v7323_v22, %v8779_v53 }
 0x32c   :  { %v7327_v1 = vpop.eup %7326  ;;  %v1203_v5 = vmul.f32 %v7325_v12, %v8783_v4 }
 0x32d   :  { %v7329_v48 = vpop.eup %7328  ;;  %v1201_v9 = vmul.f32 %v7327_v1, %v8787_v46 }
 0x32e   :  { %v7331_v19 = vpop.eup %7330  ;;  %v1114_v11 = vadd.f32 1.0, %v7329_v48  ;;  %v1223_v27 = vpack.c.bf16 %v1203_v5, %v1202_v3  ;;  %v7089_v48 = vld [vmem:[#allocation8 + $0x48] sm:$0xff]  }
 0x32f   :  { %v7333_v17 = vpop.eup %7332  ;;  %v1112_v13 = vadd.f32 1.0, %v7331_v19  ;;  %v1222_v49 = vpack.c.bf16 %v1201_v9, %v1200_v61  ;;  %v7090_v61 = vld [vmem:[#allocation8 + $0x50] sm:$0xff]   ;;  %v7091_v9 = vld [vmem:[#allocation8 + $0x58] sm:$0xff]  }
 0x330   :  { %v7335_v8 = vpop.eup %7334  ;;  %7344 = vrcp.f32 %v1114_v11  ;;  %v1115_v25 = vadd.f32 1.0, %v7333_v17 }
 0x331   :  { %v7337_v23 = vpop.eup %7336  ;;  %7346 = vrcp.f32 %v1112_v13  ;;  %v1113_v38 = vadd.f32 1.0, %v7335_v8  ;;  %6593 = vmatprep.mubr.bf16.mxu0 %v1222_v49 }
 0x332   :  { %v7339_v33 = vpop.eup %7338  ;;  %7348 = vrcp.f32 %v1115_v25  ;;  %6594 = vmatmul.mubr.bf16.gmra.mrb[52].mxu0 %v1223_v27  ;;  %v1206_v46 = vmul.f32 %v7337_v23, %v8796_v54 }
 0x333   :  { %v7341_v4 = vpop.eup %7340  ;;  %7350 = vrcp.f32 %v1113_v38  ;;  %v1204_v55 = vmul.f32 %v7339_v33, %v8799_v37 }
 0x334   :  { %v7343_v53 = vpop.eup %7342  ;;  %v1207_v31 = vmul.f32 %v7341_v4, %v8803_v29 }
 0x335   :  { %v1205_v63 = vmul.f32 %v7343_v53, %v8807_v14  ;;  %v7088_v14 = vld [vmem:[#allocation8 + $0x40] sm:$0xff]  }
 0x336   :  { %v1225_v50 = vpack.c.bf16 %v1207_v31, %v1206_v46  ;;  %6605 = vmatprep.subr.bf16.mxu1 %v7088_v14 }
 0x337   :  { %v1224_v18 = vpack.c.bf16 %v1205_v63, %v1204_v55  ;;  %6606 = vmatpush3.bf16.msra.mxu1 %v7088_v14 }
 0x338   :  { %6607 = vmatprep.subr.bf16.mxu1 %v7089_v48 }
 0x339   :  { %6597 = vmatprep.mubr.bf16.mxu0 %v1224_v18 }
 0x33a   :  { %v7345_v0 = vpop.eup %7344  ;;  %6598 = vmatmul.mubr.bf16.gmra.mrb[56].mxu0 %v1225_v50 }
 0x33b   :  { %v7347_v62 = vpop.eup %7346  ;;  %v1210_v1 = vmul.f32 %v7345_v0, %v8816_v15  ;;  %6608 = vmatpush3.bf16.msra.mxu1 %v7089_v48  ;;  %v7092_v15 = vld [vmem:[#allocation8 + $0x60] sm:$0xff]  }
 0x33c   :  { %v7349_v22 = vpop.eup %7348  ;;  %v1208_v54 = vmul.f32 %v7347_v62, %v8819_v26  ;;  %6609 = vmatprep.subr.bf16.mxu1 %v7090_v61  ;;  %v8850_v26 = vld [vmem:[%s10668_s7] ss:$0 sm:$0xff] }
 0x33d   :  { %v7351_v12 = vpop.eup %7350  ;;  %v1211_v3 = vmul.f32 %v7349_v22, %v8822_v36 }
 0x33e   :  { %v1209_v29 = vmul.f32 %v7351_v12, %v8826_v42 }
 0x33f   :  { %v1227_v5 = vpack.c.bf16 %v1211_v3, %v1210_v1  ;;  %6610 = vmatpush3.bf16.msra.mxu1 %v7090_v61 }
 0x340   :  { %v1226_v37 = vpack.c.bf16 %v1209_v29, %v1208_v54  ;;  %6611 = vmatprep.subr.bf16.mxu1 %v7091_v9 }
 0x342   :  { %6601 = vmatprep.mubr.bf16.mxu0 %v1226_v37 }
 0x343   :  { %6602 = vmatmul.mubr.bf16.gmra.mrb[60].mxu0 %v1227_v5  ;;  %6612 = vmatpush3.bf16.msra.mxu1 %v7091_v9 }
 0x344   :  { %6613 = vmatprep.subr.bf16.mxu1 %v7092_v15 }
 0x347   :  { %6614 = vmatpush3.bf16.msra.mxu1 %v7092_v15 }
 0x3da   :  { %v6575_v36 = vpop.f32.mrb[32].mxu0 }
 0x3db   :  { %v1333_v42 = vpop.f32.mrb[33].mxu0  ;;  %v1342_v19 = vadd.f32 %v6575_v36, %v8850_v26 }
 0x3dc   :  { %v1334_v11 = vadd.f32 %v8850_v26, %v1333_v42  ;;  %v6576_v27 = vpop.f32.mrb[34].mxu0 }
 0x3dd   :  { %v1336_v17 = vpop.f32.mrb[35].mxu0  ;;  %v1345_v49 = vadd.f32 %v6576_v27, %v8850_v26  ;;  %v8860_v25 = vadd.f32 %v1342_v19, %v8454_v28 }
 0x3de   :  { %v8855_v13 = vadd.f32 %v1334_v11, %v8457_v30  ;;  %v1337_v8 = vadd.f32 %v8850_v26, %v1336_v17  ;;  %v7093_v17 = vld [vmem:[#allocation8 + $0x68] sm:$0xff]  }
 0x3df   :  { %v8868_v33 = vadd.f32 %v1345_v49, %v8460_v32  ;;  %v1494_v28 = vmul.f32 %v8860_v25, %v8860_v25  ;;  %6615 = vmatprep.subr.bf16.mxu1 %v7093_v17 }
 0x3e0   :  { %v8863_v23 = vadd.f32 %v1337_v8, %v8465_v35  ;;  %v1492_v38 = vmul.f32 %v8855_v13, %v8855_v13  ;;  %6616 = vmatpush3.bf16.msra.mxu1 %v7093_v17 }
 0x3e1   :  { %v1495_v32 = vmul.f32 %v8868_v33, %v8868_v33 }
 0x3e2   :  { %1524 = vadd.xlane.f32.xlu0 %v1492_v38  ;;  %v1493_v30 = vmul.f32 %v8863_v23, %v8863_v23 }
 0x3e3   :  { %v6579_v4 = vpop.f32.mrb[36].mxu0 }
 0x3e4   :  { %1526 = vadd.xlane.f32.xlu1 %v1493_v30  ;;  %v1349_v53 = vpop.f32.mrb[37].mxu0  ;;  %v1358_v46 = vadd.f32 %v6579_v4, %v8850_v26 }
 0x3e5   :  { %v1350_v35 = vadd.f32 %v8850_v26, %v1349_v53  ;;  %v6580_v31 = vpop.f32.mrb[38].mxu0 }
 0x3e6   :  { %1528 = vadd.xlane.f32.xlu0 %v1494_v28  ;;  %v1352_v55 = vpop.f32.mrb[39].mxu0  ;;  %v1361_v50 = vadd.f32 %v6580_v31, %v8850_v26  ;;  %v8884_v0 = vadd.f32 %v1358_v46, %v8477_v44 }
 0x3e7   :  { %v8879_v63 = vadd.f32 %v1350_v35, %v8474_v41  ;;  %v1353_v18 = vadd.f32 %v8850_v26, %v1352_v55 }
 0x3e8   :  { %1530 = vadd.xlane.f32.xlu1 %v1495_v32  ;;  %v8892_v12 = vadd.f32 %v1361_v50, %v8485_v47 }
 0x3e9   :  { %v8887_v62 = vadd.f32 %v1353_v18, %v8480_v45  ;;  %v1496_v22 = vmul.f32 %v8879_v63, %v8879_v63  ;;  %v1498_v45 = vmul.f32 %v8884_v0, %v8884_v0 }
 0x3ea   :  { %v1499_v48 = vmul.f32 %v8892_v12, %v8892_v12 }
 0x3eb   :  { %1532 = vadd.xlane.f32.xlu0 %v1496_v22  ;;  %v6583_v41 = vpop.f32.mrb[40].mxu0  ;;  %v1497_v1 = vmul.f32 %v8887_v62, %v8887_v62 }
 0x3ec   :  { %v1365_v3 = vpop.f32.mrb[41].mxu0  ;;  %v1374_v54 = vadd.f32 %v6583_v41, %v8850_v26 }
 0x3ed   :  { %v1366_v44 = vadd.f32 %v8850_v26, %v1365_v3  ;;  %1534 = vadd.xlane.f32.xlu1 %v1497_v1  ;;  %v6584_v29 = vpop.f32.mrb[42].mxu0 }
 0x3ee   :  { %v1368_v5 = vpop.f32.mrb[43].mxu0  ;;  %v1377_v47 = vadd.f32 %v6584_v29, %v8850_v26  ;;  %v8908_v61 = vadd.f32 %v1374_v54, %v8497_v56  ;;  %v7094_v29 = vld [vmem:[#allocation8 + $0x70] sm:$0xff]  }
 0x3ef   :  { %v8901_v37 = vadd.f32 %v1366_v44, %v8492_v52  ;;  %v1369_v14 = vadd.f32 %v8850_v26, %v1368_v5  ;;  %1536 = vadd.xlane.f32.xlu0 %v1498_v45  ;;  %6617 = vmatprep.subr.bf16.mxu1 %v7094_v29 }
 0x3f0   :  { %v8916_v52 = vadd.f32 %v1377_v47, %v8505_v60  ;;  %v1502_v56 = vmul.f32 %v8908_v61, %v8908_v61  ;;  %6618 = vmatpush3.bf16.msra.mxu1 %v7094_v29 }
 0x3f1   :  { %v8911_v9 = vadd.f32 %v1369_v14, %v8500_v57  ;;  %1538 = vadd.xlane.f32.xlu1 %v1499_v48  ;;  %v1500_v15 = vmul.f32 %v8901_v37, %v8901_v37 }
 0x3f2   :  { %v1503_v60 = vmul.f32 %v8916_v52, %v8916_v52 }
 0x3f3   :  { %1540 = vadd.xlane.f32.xlu0 %v1500_v15  ;;  %v1501_v36 = vmul.f32 %v8911_v9, %v8911_v9 }
 0x3f4   :  { %v6587_v42 = vpop.f32.mrb[44].mxu0 }
 0x3f5   :  { %v1381_v19 = vpop.f32.mrb[45].mxu0  ;;  %1542 = vadd.xlane.f32.xlu1 %v1501_v36  ;;  %v1390_v57 = vadd.f32 %v6587_v42, %v8850_v26 }
 0x3f6   :  { %v1382_v11 = vadd.f32 %v8850_v26, %v1381_v19  ;;  %v6588_v27 = vpop.f32.mrb[46].mxu0 }
 0x3f7   :  { %v1384_v49 = vpop.f32.mrb[47].mxu0  ;;  %1544 = vadd.xlane.f32.xlu0 %v1502_v56  ;;  %v1393_v38 = vadd.f32 %v6588_v27, %v8850_v26  ;;  %v8932_v4 = vadd.f32 %v1390_v57, %v8517_v6 }
 0x3f8   :  { %v8927_v8 = vadd.f32 %v1382_v11, %v8512_v2  ;;  %v1385_v30 = vadd.f32 %v8850_v26, %v1384_v49 }
 0x3f9   :  { %1546 = vadd.xlane.f32.xlu1 %v1503_v60  ;;  %v8940_v46 = vadd.f32 %v1393_v38, %v8525_v10 }
 0x3fa   :  { %v8935_v53 = vadd.f32 %v1385_v30, %v8520_v7  ;;  %v1504_v28 = vmul.f32 %v8927_v8, %v8927_v8  ;;  %v1506_v7 = vmul.f32 %v8932_v4, %v8932_v4 }
 0x3fb   :  { %v1507_v41 = vmul.f32 %v8940_v46, %v8940_v46 }
 0x3fc   :  { %1548 = vadd.xlane.f32.xlu0 %v1504_v28  ;;  %v6591_v2 = vpop.f32.mrb[48].mxu0  ;;  %v1505_v35 = vmul.f32 %v8935_v53, %v8935_v53 }
 0x3fd   :  { %v1397_v31 = vpop.f32.mrb[49].mxu0  ;;  %v1406_v55 = vadd.f32 %v6591_v2, %v8850_v26 }
 0x3fe   :  { %v1398_v6 = vadd.f32 %v8850_v26, %v1397_v31  ;;  %1550 = vadd.xlane.f32.xlu1 %v1505_v35  ;;  %v6592_v32 = vpop.f32.mrb[50].mxu0 }
 0x3ff   :  { %v1400_v50 = vpop.f32.mrb[51].mxu0  ;;  %v1409_v10 = vadd.f32 %v6592_v32, %v8850_v26  ;;  %v8956_v1 = vadd.f32 %v1406_v55, %v8537_v20 }
 0x400   :  { %v8949_v18 = vadd.f32 %v1398_v6, %v8532_v16  ;;  %v1401_v22 = vadd.f32 %v8850_v26, %v1400_v50  ;;  %1552 = vadd.xlane.f32.xlu0 %v1506_v7 }
 0x401   :  { %v8964_v16 = vadd.f32 %v1409_v10, %v8545_v24  ;;  %v1510_v20 = vmul.f32 %v8956_v1, %v8956_v1  ;;  %v7095_v24 = vld [vmem:[#allocation8 + $0x78] sm:$0xff]  }
 0x402   :  { %v8959_v3 = vadd.f32 %v1401_v22, %v8540_v21  ;;  %1554 = vadd.xlane.f32.xlu1 %v1507_v41  ;;  %v1508_v54 = vmul.f32 %v8949_v18, %v8949_v18  ;;  %6619 = vmatprep.subr.bf16.mxu1 %v7095_v24 }
 0x403   :  { %v1511_v15 = vmul.f32 %v8964_v16, %v8964_v16  ;;  %6620 = vmatpush3.bf16.msra.mxu1 %v7095_v24 }
 0x404   :  { %1556 = vadd.xlane.f32.xlu0 %v1508_v54  ;;  %v1509_v44 = vmul.f32 %v8959_v3, %v8959_v3 }
 0x405   :  { %v6595_v45 = vpop.f32.mrb[52].mxu0 }
 0x406   :  { %v1413_v5 = vpop.f32.mrb[53].mxu0  ;;  %1558 = vadd.xlane.f32.xlu1 %v1509_v44  ;;  %v1422_v21 = vadd.f32 %v6595_v45, %v8850_v26  ;;  %v10704_v45 = vld [vmem:[#allocation20_spill] sm:$0xff] }
 0x407   :  { %v1414_v47 = vadd.f32 %v8850_v26, %v1413_v5  ;;  %v6596_v14 = vpop.f32.mrb[54].mxu0 }
 0x408   :  { %v1416_v48 = vpop.f32.mrb[55].mxu0  ;;  %1560 = vadd.xlane.f32.xlu0 %v1510_v20  ;;  %v1425_v42 = vadd.f32 %v6596_v14, %v8850_v26  ;;  %v8980_v56 = vadd.f32 %v1422_v21, %v8557_v39  ;;  %v10706_v21 = vld [vmem:[#allocation21_spill] sm:$0xff]  ;;  %v10708_v14 = vld [vmem:[#allocation22_spill] sm:$0xff] }
 0x409   :  { %v8975_v36 = vadd.f32 %v1414_v47, %v8552_v34  ;;  %v1417_v19 = vadd.f32 %v8850_v26, %v1416_v48 }
 0x40a   :  { %1562 = vadd.xlane.f32.xlu1 %v1511_v15  ;;  %v8988_v27 = vadd.f32 %v1425_v42, %v8565_v43  ;;  %v1514_v38 = vmul.f32 %v8980_v56, %v8980_v56  ;;  %v10710_v15 = vld [vmem:[#allocation23_spill] sm:$0xff] }
 0x40b   :  { %v8983_v57 = vadd.f32 %v1417_v19, %v8560_v40  ;;  %v1512_v11 = vmul.f32 %v8975_v36, %v8975_v36 }
 0x40c   :  { %v1515_v35 = vmul.f32 %v8988_v27, %v8988_v27 }
 0x40d   :  { %1564 = vadd.xlane.f32.xlu0 %v1512_v11  ;;  %v6599_v34 = vpop.f32.mrb[56].mxu0  ;;  %v1513_v17 = vmul.f32 %v8983_v57, %v8983_v57 }
 0x40e   :  { %v1429_v49 = vpop.f32.mrb[57].mxu0  ;;  %v1438_v60 = vadd.f32 %v6599_v34, %v8850_v26  ;;  %v7096_v34 = vld [vmem:[#allocation10 + $0x40] sm:$0xff]  }
 0x40f   :  { %v1430_v39 = vadd.f32 %v8850_v26, %v1429_v49  ;;  %1566 = vadd.xlane.f32.xlu1 %v1513_v17  ;;  %v6600_v40 = vpop.f32.mrb[58].mxu0  ;;  %v7097_v17 = vld [vmem:[#allocation10 + $0x48] sm:$0xff]   ;;  %6653 = vmatprep.subr.bf16.mxu0 %v7096_v34  ;;  %v7098_v49 = vld [vmem:[#allocation10 + $0x50] sm:$0xff]  }
 0x410   :  { %v1432_v30 = vpop.f32.mrb[59].mxu0  ;;  %v1441_v43 = vadd.f32 %v6600_v40, %v8850_v26  ;;  %v9004_v31 = vadd.f32 %v1438_v60, %v8577_v58  ;;  %6654 = vmatpush3.bf16.msra.mxu0 %v7096_v34  ;;  %v7099_v60 = vld [vmem:[#allocation10 + $0x58] sm:$0xff]  }
 0x411   :  { %v8997_v28 = vadd.f32 %v1430_v39, %v8572_v51  ;;  %v1433_v2 = vadd.f32 %v8850_v26, %v1432_v30  ;;  %1568 = vadd.xlane.f32.xlu0 %v1514_v38  ;;  %v10702_v51 = vld [vmem:[#allocation19_spill] sm:$0xff]  ;;  %6655 = vmatprep.subr.bf16.mxu0 %v7097_v17 }
 0x412   :  { %v9012_v32 = vadd.f32 %v1441_v43, %v10702_v51  ;;  %v1518_v58 = vmul.f32 %v9004_v31, %v9004_v31 }
 0x413   :  { %v9007_v55 = vadd.f32 %v1433_v2, %v8580_v59  ;;  %1570 = vadd.xlane.f32.xlu1 %v1515_v35  ;;  %v1516_v6 = vmul.f32 %v8997_v28, %v8997_v28 }
 0x414   :  { %10703 = vst [vmem:[#allocation19_spill] sm:$0xff] %v9012_v32  ;;  %v1519_v29 = vmul.f32 %v9012_v32, %v9012_v32  ;;  %6656 = vmatpush3.bf16.msra.mxu0 %v7097_v17 }
 0x415   :  { %1572 = vadd.xlane.f32.xlu0 %v1516_v6  ;;  %v1517_v7 = vmul.f32 %v9007_v55, %v9007_v55  ;;  %6657 = vmatprep.subr.bf16.mxu0 %v7098_v49 }
 0x416   :  { %v6603_v50 = vpop.f32.mrb[60].mxu0 }
 0x417   :  { %v1454_v10 = vadd.f32 %v6603_v50, %v8850_v26  ;;  %v1445_v22 = vpop.f32.mrb[61].mxu0  ;;  %1574 = vadd.xlane.f32.xlu1 %v1517_v7 }
 0x418   :  { %v1446_v59 = vadd.f32 %v8850_v26, %v1445_v22  ;;  %v6604_v41 = vpop.f32.mrb[62].mxu0  ;;  %6658 = vmatpush3.bf16.msra.mxu0 %v7098_v49  ;;  %v9049_v49 = vld [vmem:[%s10664_s3 + $0x1] ss:$0 sm:$0xff] }
 0x419   :  { %v1457_v54 = vadd.f32 %v6604_v41, %v8850_v26  ;;  %v1448_v44 = vpop.f32.mrb[63].mxu0  ;;  %1576 = vadd.xlane.f32.xlu0 %v1518_v58  ;;  %v9028_v47 = vadd.f32 %v1454_v10, %v10706_v21  ;;  %6659 = vmatprep.subr.bf16.mxu0 %v7099_v60 }
 0x41a   :  { %v9024_v5 = vadd.f32 %v1446_v59, %v10704_v45  ;;  %v1449_v20 = vadd.f32 %v8850_v26, %v1448_v44 }
 0x41b   :  { %1578 = vadd.xlane.f32.xlu1 %v1519_v29  ;;  %10707 = vst [vmem:[#allocation21_spill] sm:$0xff] %v9028_v47  ;;  %v9036_v42 = vadd.f32 %v1457_v54, %v10710_v15  ;;  %v1522_v26 = vmul.f32 %v9028_v47, %v9028_v47 }
 0x41c   :  { %10705 = vst [vmem:[#allocation20_spill] sm:$0xff] %v9024_v5  ;;  %v9031_v24 = vadd.f32 %v1449_v20, %v10708_v14  ;;  %v1520_v48 = vmul.f32 %v9024_v5, %v9024_v5  ;;  %6660 = vmatpush3.bf16.msra.mxu0 %v7099_v60 }
 0x41d   :  { %10711 = vst [vmem:[#allocation23_spill] sm:$0xff] %v9036_v42  ;;  %v1523_v11 = vmul.f32 %v9036_v42, %v9036_v42 }
 0x41e   :  { %10709 = vst [vmem:[#allocation22_spill] sm:$0xff] %v9031_v24  ;;  %1580 = vadd.xlane.f32.xlu0 %v1520_v48  ;;  %v1521_v19 = vmul.f32 %v9031_v24, %v9031_v24 }
 0x420   :  { %1582 = vadd.xlane.f32.xlu1 %v1521_v19 }
 0x422   :  { %1584 = vadd.xlane.f32.xlu0 %v1522_v26 }
 0x424   :  { %1586 = vadd.xlane.f32.xlu1 %v1523_v11 }
 0x46f   :  { %v1525_v39 = vpop.xlane.xlu0 %1524 }
 0x470   :  { %v1588_v40 = vmul.f32 0.03125, %v1525_v39 }
 0x471   :  { %v1527_v38 = vpop.xlane.xlu1 %1526 }
 0x472   :  { %v1620_v30 = vadd.f32 1.1920929e-07, %v1588_v40  ;;  %v1589_v43 = vmul.f32 0.03125, %v1527_v38 }
 0x473   :  { %v1529_v2 = vpop.xlane.xlu0 %1528 }
 0x474   :  { %7352 = vrsqrt.f32 %v1620_v30  ;;  %v1621_v35 = vadd.f32 1.1920929e-07, %v1589_v43  ;;  %v1590_v6 = vmul.f32 0.03125, %v1529_v2 }
 0x475   :  { %v1531_v51 = vpop.xlane.xlu1 %1530 }
 0x476   :  { %7354 = vrsqrt.f32 %v1621_v35  ;;  %v1622_v7 = vadd.f32 1.1920929e-07, %v1590_v6  ;;  %v1591_v50 = vmul.f32 0.03125, %v1531_v51 }
 0x478   :  { %7356 = vrsqrt.f32 %v1622_v7  ;;  %v1623_v10 = vadd.f32 1.1920929e-07, %v1591_v50  ;;  %v1533_v22 = vpop.xlane.xlu0 %1532 }
 0x479   :  { %v1592_v58 = vmul.f32 0.03125, %v1533_v22 }
 0x47a   :  { %7358 = vrsqrt.f32 %v1623_v10  ;;  %v1535_v59 = vpop.xlane.xlu1 %1534 }
 0x47b   :  { %v1624_v41 = vadd.f32 1.1920929e-07, %v1592_v58  ;;  %v1593_v54 = vmul.f32 0.03125, %v1535_v59 }
 0x47c   :  { %v1537_v44 = vpop.xlane.xlu0 %1536 }
 0x47d   :  { %7360 = vrsqrt.f32 %v1624_v41  ;;  %v1625_v29 = vadd.f32 1.1920929e-07, %v1593_v54  ;;  %v1594_v45 = vmul.f32 0.03125, %v1537_v44 }
 0x47e   :  { %v7353_v20 = vpop.eup %7352  ;;  %v1539_v21 = vpop.xlane.xlu1 %1538 }
 0x47f   :  { %7362 = vrsqrt.f32 %v1625_v29  ;;  %v1626_v14 = vadd.f32 1.1920929e-07, %v1594_v45  ;;  %v1595_v48 = vmul.f32 0.03125, %v1539_v21  ;;  %v1684_v26 = vmul.f32 %v7353_v20, %v8855_v13 }
 0x480   :  { %v7355_v15 = vpop.eup %7354  ;;  %v1541_v19 = vpop.xlane.xlu0 %1540 }
 0x481   :  { %7364 = vrsqrt.f32 %v1626_v14  ;;  %v1627_v11 = vadd.f32 1.1920929e-07, %v1595_v48  ;;  %v1596_v34 = vmul.f32 0.03125, %v1541_v19  ;;  %v1685_v17 = vmul.f32 %v7355_v15, %v8863_v23 }
 0x482   :  { %v7357_v60 = vpop.eup %7356  ;;  %v1543_v39 = vpop.xlane.xlu1 %1542  ;;  %v1724_v35 = vmul.f32 %v9049_v49, %v1684_v26 }
 0x483   :  { %v1686_v40 = vmul.f32 %v7357_v60, %v8860_v25  ;;  %7366 = vrsqrt.f32 %v1627_v11  ;;  %v1628_v38 = vadd.f32 1.1920929e-07, %v1596_v34  ;;  %v1597_v30 = vmul.f32 0.03125, %v1543_v39 }
 0x484   :  { %v7359_v43 = vpop.eup %7358  ;;  %v1545_v2 = vpop.xlane.xlu0 %1544  ;;  %v1725_v6 = vmul.f32 %v9049_v49, %v1685_v17 }
 0x485   :  { %v1687_v51 = vmul.f32 %v7359_v43, %v8868_v33  ;;  %7368 = vrsqrt.f32 %v1628_v38  ;;  %v1629_v7 = vadd.f32 1.1920929e-07, %v1597_v30  ;;  %v1598_v50 = vmul.f32 0.03125, %v1545_v2 }
 0x486   :  { %v1547_v10 = vpop.xlane.xlu1 %1546  ;;  %v1756_v22 = vpack.c.bf16 %v1725_v6, %v1724_v35  ;;  %v1726_v58 = vmul.f32 %v9049_v49, %v1686_v40 }
 0x487   :  { %v7361_v59 = vpop.eup %7360  ;;  %7370 = vrsqrt.f32 %v1629_v7  ;;  %v1630_v41 = vadd.f32 1.1920929e-07, %v1598_v50  ;;  %v1599_v54 = vmul.f32 0.03125, %v1547_v10  ;;  %v1727_v44 = vmul.f32 %v9049_v49, %v1687_v51 }
 0x488   :  { %6621 = vmatprep.mubr.bf16.mxu1 %v1756_v22  ;;  %v1688_v29 = vmul.f32 %v7361_v59, %v8879_v63 }
 0x489   :  { %v7363_v45 = vpop.eup %7362  ;;  %7372 = vrsqrt.f32 %v1630_v41  ;;  %v1631_v20 = vadd.f32 1.1920929e-07, %v1599_v54  ;;  %v1549_v21 = vpop.xlane.xlu0 %1548  ;;  %v1757_v14 = vpack.c.bf16 %v1727_v44, %v1726_v58 }
 0x48a   :  { %v1600_v48 = vmul.f32 0.03125, %v1549_v21  ;;  %v1689_v15 = vmul.f32 %v7363_v45, %v8887_v62  ;;  %v1728_v17 = vmul.f32 %v9049_v49, %v1688_v29 }
 0x48b   :  { %v7365_v19 = vpop.eup %7364  ;;  %7374 = vrsqrt.f32 %v1631_v20  ;;  %v1551_v26 = vpop.xlane.xlu1 %1550  ;;  %6622 = vmatmul.mubr.bf16.vlgmr.msra.gmra.mrb[32].mxu1 %v1757_v14 }
 0x48c   :  { %v1632_v11 = vadd.f32 1.1920929e-07, %v1600_v48  ;;  %v1601_v34 = vmul.f32 0.03125, %v1551_v26  ;;  %v1729_v60 = vmul.f32 %v9049_v49, %v1689_v15  ;;  %v1690_v38 = vmul.f32 %v7365_v19, %v8884_v0 }
 0x48d   :  { %v7367_v39 = vpop.eup %7366  ;;  %v1553_v40 = vpop.xlane.xlu0 %1552 }
 0x48e   :  { %7376 = vrsqrt.f32 %v1632_v11  ;;  %v1633_v30 = vadd.f32 1.1920929e-07, %v1601_v34  ;;  %v1602_v43 = vmul.f32 0.03125, %v1553_v40  ;;  %v1758_v2 = vpack.c.bf16 %v1729_v60, %v1728_v17 }
 0x48f   :  { %v7369_v35 = vpop.eup %7368  ;;  %v1555_v6 = vpop.xlane.xlu1 %1554  ;;  %v1691_v51 = vmul.f32 %v7367_v39, %v8892_v12  ;;  %v1730_v59 = vmul.f32 %v9049_v49, %v1690_v38 }
 0x490   :  { %7378 = vrsqrt.f32 %v1633_v30  ;;  %v1634_v7 = vadd.f32 1.1920929e-07, %v1602_v43  ;;  %v1603_v50 = vmul.f32 0.03125, %v1555_v6  ;;  %6625 = vmatprep.mubr.bf16.mxu1 %v1758_v2  ;;  %v1692_v10 = vmul.f32 %v7369_v35, %v8901_v37 }
 0x491   :  { %v7371_v22 = vpop.eup %7370  ;;  %v1557_v58 = vpop.xlane.xlu0 %1556  ;;  %v1731_v41 = vmul.f32 %v9049_v49, %v1691_v51 }
 0x492   :  { %7380 = vrsqrt.f32 %v1634_v7  ;;  %v1635_v54 = vadd.f32 1.1920929e-07, %v1603_v50  ;;  %v1604_v44 = vmul.f32 0.03125, %v1557_v58  ;;  %v1693_v29 = vmul.f32 %v7371_v22, %v8911_v9 }
 0x493   :  { %v7373_v45 = vpop.eup %7372  ;;  %v1559_v20 = vpop.xlane.xlu1 %1558  ;;  %v1759_v21 = vpack.c.bf16 %v1731_v41, %v1730_v59  ;;  %v1732_v14 = vmul.f32 %v9049_v49, %v1692_v10 }
 0x494   :  { %7382 = vrsqrt.f32 %v1635_v54  ;;  %v1636_v48 = vadd.f32 1.1920929e-07, %v1604_v44  ;;  %v1605_v15 = vmul.f32 0.03125, %v1559_v20  ;;  %v1733_v19 = vmul.f32 %v9049_v49, %v1693_v29 }
 0x495   :  { %v7375_v26 = vpop.eup %7374  ;;  %6626 = vmatmul.mubr.bf16.gmra.mrb[36].mxu1 %v1759_v21  ;;  %v1561_v11 = vpop.xlane.xlu0 %1560  ;;  %v1694_v34 = vmul.f32 %v7373_v45, %v8908_v61 }
 0x496   :  { %7384 = vrsqrt.f32 %v1636_v48  ;;  %v1637_v17 = vadd.f32 1.1920929e-07, %v1605_v15  ;;  %v1606_v60 = vmul.f32 0.03125, %v1561_v11  ;;  %v1760_v39 = vpack.c.bf16 %v1733_v19, %v1732_v14 }
 0x497   :  { %v1563_v40 = vpop.xlane.xlu1 %1562  ;;  %v1695_v38 = vmul.f32 %v7375_v26, %v8916_v52  ;;  %v1734_v35 = vmul.f32 %v9049_v49, %v1694_v34 }
 0x498   :  { %v7377_v30 = vpop.eup %7376  ;;  %7386 = vrsqrt.f32 %v1637_v17  ;;  %v1638_v43 = vadd.f32 1.1920929e-07, %v1606_v60  ;;  %v1607_v2 = vmul.f32 0.03125, %v1563_v40  ;;  %6629 = vmatprep.mubr.bf16.mxu1 %v1760_v39 }
 0x499   :  { %v1735_v6 = vmul.f32 %v9049_v49, %v1695_v38  ;;  %v1696_v51 = vmul.f32 %v7377_v30, %v8927_v8 }
 0x49a   :  { %v7379_v7 = vpop.eup %7378  ;;  %7388 = vrsqrt.f32 %v1638_v43  ;;  %v1639_v50 = vadd.f32 1.1920929e-07, %v1607_v2  ;;  %v1565_v10 = vpop.xlane.xlu0 %1564 }
 0x49b   :  { %v1608_v22 = vmul.f32 0.03125, %v1565_v10  ;;  %v1761_v58 = vpack.c.bf16 %v1735_v6, %v1734_v35  ;;  %v1697_v59 = vmul.f32 %v7379_v7, %v8935_v53  ;;  %v1736_v45 = vmul.f32 %v9049_v49, %v1696_v51 }
 0x49c   :  { %v7381_v41 = vpop.eup %7380  ;;  %7390 = vrsqrt.f32 %v1639_v50  ;;  %v1567_v54 = vpop.xlane.xlu1 %1566 }
 0x49d   :  { %v1640_v44 = vadd.f32 1.1920929e-07, %v1608_v22  ;;  %v1609_v29 = vmul.f32 0.03125, %v1567_v54  ;;  %6630 = vmatmul.mubr.bf16.gmra.mrb[40].mxu1 %v1761_v58  ;;  %v1737_v20 = vmul.f32 %v9049_v49, %v1697_v59  ;;  %v1698_v48 = vmul.f32 %v7381_v41, %v8932_v4 }
 0x49e   :  { %v7383_v21 = vpop.eup %7382  ;;  %v1569_v14 = vpop.xlane.xlu0 %1568 }
 0x49f   :  { %7392 = vrsqrt.f32 %v1640_v44  ;;  %v1641_v15 = vadd.f32 1.1920929e-07, %v1609_v29  ;;  %v1610_v19 = vmul.f32 0.03125, %v1569_v14  ;;  %v1762_v26 = vpack.c.bf16 %v1737_v20, %v1736_v45 }
 0x4a0   :  { %v7385_v11 = vpop.eup %7384  ;;  %v1571_v34 = vpop.xlane.xlu1 %1570  ;;  %v1699_v17 = vmul.f32 %v7383_v21, %v8940_v46  ;;  %v1738_v43 = vmul.f32 %v9049_v49, %v1698_v48 }
 0x4a1   :  { %7394 = vrsqrt.f32 %v1641_v15  ;;  %v1642_v60 = vadd.f32 1.1920929e-07, %v1610_v19  ;;  %v1611_v39 = vmul.f32 0.03125, %v1571_v34  ;;  %6633 = vmatprep.mubr.bf16.mxu1 %v1762_v26  ;;  %v1700_v40 = vmul.f32 %v7385_v11, %v8949_v18 }
 0x4a2   :  { %v7387_v38 = vpop.eup %7386  ;;  %v1573_v30 = vpop.xlane.xlu0 %1572  ;;  %v1739_v2 = vmul.f32 %v9049_v49, %v1699_v17 }
 0x4a3   :  { %7396 = vrsqrt.f32 %v1642_v60  ;;  %v1643_v35 = vadd.f32 1.1920929e-07, %v1611_v39  ;;  %v1612_v6 = vmul.f32 0.03125, %v1573_v30  ;;  %v1701_v51 = vmul.f32 %v7387_v38, %v8959_v3 }
 0x4a4   :  { %v7389_v7 = vpop.eup %7388  ;;  %v1575_v50 = vpop.xlane.xlu1 %1574  ;;  %v1763_v10 = vpack.c.bf16 %v1739_v2, %v1738_v43  ;;  %v1740_v22 = vmul.f32 %v9049_v49, %v1700_v40 }
 0x4a5   :  { %7398 = vrsqrt.f32 %v1643_v35  ;;  %v1644_v58 = vadd.f32 1.1920929e-07, %v1612_v6  ;;  %v1613_v59 = vmul.f32 0.03125, %v1575_v50  ;;  %v1741_v41 = vmul.f32 %v9049_v49, %v1701_v51 }
 0x4a6   :  { %v7391_v54 = vpop.eup %7390  ;;  %6634 = vmatmul.mubr.bf16.gmra.mrb[44].mxu1 %v1763_v10  ;;  %v1577_v44 = vpop.xlane.xlu0 %1576  ;;  %v1702_v29 = vmul.f32 %v7389_v7, %v8956_v1 }
 0x4a7   :  { %7400 = vrsqrt.f32 %v1644_v58  ;;  %v1645_v45 = vadd.f32 1.1920929e-07, %v1613_v59  ;;  %v1614_v20 = vmul.f32 0.03125, %v1577_v44  ;;  %v1764_v21 = vpack.c.bf16 %v1741_v41, %v1740_v22 }
 0x4a8   :  { %v1579_v14 = vpop.xlane.xlu1 %1578  ;;  %v1703_v48 = vmul.f32 %v7391_v54, %v8964_v16  ;;  %v1742_v11 = vmul.f32 %v9049_v49, %v1702_v29 }
 0x4a9   :  { %v7393_v15 = vpop.eup %7392  ;;  %7402 = vrsqrt.f32 %v1645_v45  ;;  %v1646_v19 = vadd.f32 1.1920929e-07, %v1614_v20  ;;  %v1615_v26 = vmul.f32 0.03125, %v1579_v14  ;;  %6637 = vmatprep.mubr.bf16.mxu1 %v1764_v21 }
 0x4aa   :  { %v1743_v34 = vmul.f32 %v9049_v49, %v1703_v48  ;;  %v1704_v17 = vmul.f32 %v7393_v15, %v8975_v36 }
 0x4ab   :  { %v7395_v60 = vpop.eup %7394  ;;  %7404 = vrsqrt.f32 %v1646_v19  ;;  %v1647_v39 = vadd.f32 1.1920929e-07, %v1615_v26  ;;  %v1581_v40 = vpop.xlane.xlu0 %1580 }
 0x4ac   :  { %v1616_v38 = vmul.f32 0.03125, %v1581_v40  ;;  %v1765_v30 = vpack.c.bf16 %v1743_v34, %v1742_v11  ;;  %v1705_v43 = vmul.f32 %v7395_v60, %v8983_v57  ;;  %v1744_v7 = vmul.f32 %v9049_v49, %v1704_v17 }
 0x4ad   :  { %v7397_v2 = vpop.eup %7396  ;;  %7406 = vrsqrt.f32 %v1647_v39  ;;  %v1583_v35 = vpop.xlane.xlu1 %1582 }
 0x4ae   :  { %v1648_v6 = vadd.f32 1.1920929e-07, %v1616_v38  ;;  %v1617_v51 = vmul.f32 0.03125, %v1583_v35  ;;  %6638 = vmatmul.mubr.bf16.gmra.mrb[48].mxu1 %v1765_v30  ;;  %v1745_v50 = vmul.f32 %v9049_v49, %v1705_v43  ;;  %v1706_v58 = vmul.f32 %v7397_v2, %v8980_v56 }
 0x4af   :  { %v7399_v10 = vpop.eup %7398  ;;  %v1585_v22 = vpop.xlane.xlu0 %1584 }
 0x4b0   :  { %7408 = vrsqrt.f32 %v1648_v6  ;;  %v1649_v59 = vadd.f32 1.1920929e-07, %v1617_v51  ;;  %v1618_v41 = vmul.f32 0.03125, %v1585_v22  ;;  %v1766_v54 = vpack.c.bf16 %v1745_v50, %v1744_v7 }
 0x4b1   :  { %v7401_v44 = vpop.eup %7400  ;;  %v1587_v29 = vpop.xlane.xlu1 %1586  ;;  %v1707_v45 = vmul.f32 %v7399_v10, %v8988_v27  ;;  %v1746_v15 = vmul.f32 %v9049_v49, %v1706_v58 }
 0x4b2   :  { %7410 = vrsqrt.f32 %v1649_v59  ;;  %v1650_v20 = vadd.f32 1.1920929e-07, %v1618_v41  ;;  %v1619_v21 = vmul.f32 0.03125, %v1587_v29  ;;  %6641 = vmatprep.mubr.bf16.mxu1 %v1766_v54  ;;  %v1708_v14 = vmul.f32 %v7401_v44, %v8997_v28 }
 0x4b3   :  { %v7403_v48 = vpop.eup %7402  ;;  %v1747_v19 = vmul.f32 %v9049_v49, %v1707_v45 }
 0x4b4   :  { %7412 = vrsqrt.f32 %v1650_v20  ;;  %v1651_v26 = vadd.f32 1.1920929e-07, %v1619_v21  ;;  %v1709_v11 = vmul.f32 %v7403_v48, %v9007_v55  ;;  %v1748_v60 = vmul.f32 %v9049_v49, %v1708_v14  ;;  %v7100_v14 = vld [vmem:[#allocation10 + $0x60] sm:$0xff]   ;;  %v7101_v48 = vld [vmem:[#allocation10 + $0x68] sm:$0xff]  }
 0x4b5   :  { %v7405_v34 = vpop.eup %7404  ;;  %v1767_v17 = vpack.c.bf16 %v1747_v19, %v1746_v15  ;;  %6661 = vmatprep.subr.bf16.mxu0 %v7100_v14  ;;  %v7102_v15 = vld [vmem:[#allocation10 + $0x70] sm:$0xff]   ;;  %v7103_v19 = vld [vmem:[#allocation10 + $0x78] sm:$0xff]  }
 0x4b6   :  { %7414 = vrsqrt.f32 %v1651_v26  ;;  %v1749_v39 = vmul.f32 %v9049_v49, %v1709_v11  ;;  %v1710_v40 = vmul.f32 %v7405_v34, %v9004_v31  ;;  %6662 = vmatpush3.bf16.msra.mxu0 %v7100_v14  ;;  %v9116_v26 = vld [vmem:[%s10666_s5 + $0x1] ss:$0 sm:$0xff] }
 0x4b7   :  { %v7407_v38 = vpop.eup %7406  ;;  %6642 = vmatmul.mubr.bf16.gmra.mrb[52].mxu1 %v1767_v17  ;;  %6663 = vmatprep.subr.bf16.mxu0 %v7101_v48 }
 0x4b8   :  { %v1768_v30 = vpack.c.bf16 %v1749_v39, %v1748_v60  ;;  %v1711_v43 = vmul.f32 %v7407_v38, %v9012_v32  ;;  %v1750_v35 = vmul.f32 %v9049_v49, %v1710_v40 }
 0x4ba   :  { %v7409_v2 = vpop.eup %7408  ;;  %6645 = vmatprep.mubr.bf16.mxu1 %v1768_v30  ;;  %v1751_v6 = vmul.f32 %v9049_v49, %v1711_v43  ;;  %6664 = vmatpush3.bf16.msra.mxu0 %v7101_v48 }
 0x4bb   :  { %v1712_v51 = vmul.f32 %v7409_v2, %v9024_v5  ;;  %6665 = vmatprep.subr.bf16.mxu0 %v7102_v15 }
 0x4bc   :  { %v7411_v7 = vpop.eup %7410  ;;  %v1769_v50 = vpack.c.bf16 %v1751_v6, %v1750_v35 }
 0x4bd   :  { %v1713_v10 = vmul.f32 %v7411_v7, %v9031_v24  ;;  %v1752_v58 = vmul.f32 %v9049_v49, %v1712_v51 }
 0x4be   :  { %v7413_v22 = vpop.eup %7412  ;;  %6666 = vmatpush3.bf16.msra.mxu0 %v7102_v15 }
 0x4bf   :  { %6646 = vmatmul.mubr.bf16.gmra.mrb[56].mxu1 %v1769_v50  ;;  %v1753_v59 = vmul.f32 %v9049_v49, %v1713_v10  ;;  %v1714_v41 = vmul.f32 %v7413_v22, %v9028_v47  ;;  %6667 = vmatprep.subr.bf16.mxu0 %v7103_v19 }
 0x4c0   :  { %v7415_v54 = vpop.eup %7414 }
 0x4c1   :  { %v1770_v44 = vpack.c.bf16 %v1753_v59, %v1752_v58  ;;  %v1715_v29 = vmul.f32 %v7415_v54, %v9036_v42  ;;  %v1754_v45 = vmul.f32 %v9049_v49, %v1714_v41 }
 0x4c2   :  { %6668 = vmatpush3.bf16.msra.mxu0 %v7103_v19 }
 0x4c3   :  { %6649 = vmatprep.mubr.bf16.mxu1 %v1770_v44  ;;  %v1755_v20 = vmul.f32 %v9049_v49, %v1715_v29 }
 0x4c5   :  { %v1771_v21 = vpack.c.bf16 %v1755_v20, %v1754_v45 }
 0x4c7   :  { %6650 = vmatmul.mubr.bf16.gmra.mrb[60].mxu1 %v1771_v21 }
 0x55e   :  { %v6623_v49 = vpop.f32.mrb[32].mxu1 }
 0x55f   :  { %v9119_v11 = vadd.f32 %v6623_v49, %v9116_v26  ;;  %v1879_v34 = vpop.f32.mrb[33].mxu1 }
 0x560   :  { %v9122_v17 = vadd.f32 %v9116_v26, %v1879_v34  ;;  %v6624_v60 = vpop.f32.mrb[34].mxu1 }
 0x561   :  { %v5962_v39 = vmul.f32 -1.442695, %v9119_v11  ;;  %v9126_v40 = vadd.f32 %v6624_v60, %v9116_v26  ;;  %v1882_v38 = vpop.f32.mrb[35].mxu1 }
 0x562   :  { %v5960_v30 = vmul.f32 -1.442695, %v9122_v17  ;;  %v9130_v43 = vadd.f32 %v9116_v26, %v1882_v38 }
 0x563   :  { %7416 = vpow2.f32 %v5962_v39  ;;  %v5963_v2 = vmul.f32 -1.442695, %v9126_v40 }
 0x564   :  { %7418 = vpow2.f32 %v5960_v30  ;;  %v5961_v35 = vmul.f32 -1.442695, %v9130_v43 }
 0x565   :  { %7420 = vpow2.f32 %v5963_v2 }
 0x566   :  { %7422 = vpow2.f32 %v5961_v35 }
 0x568   :  { %v6627_v6 = vpop.f32.mrb[36].mxu1 }
 0x569   :  { %v9135_v51 = vadd.f32 %v6627_v6, %v9116_v26  ;;  %v1895_v7 = vpop.f32.mrb[37].mxu1 }
 0x56a   :  { %v9138_v50 = vadd.f32 %v9116_v26, %v1895_v7  ;;  %v6628_v10 = vpop.f32.mrb[38].mxu1 }
 0x56b   :  { %v5966_v22 = vmul.f32 -1.442695, %v9135_v51  ;;  %v9142_v58 = vadd.f32 %v6628_v10, %v9116_v26  ;;  %v1898_v59 = vpop.f32.mrb[39].mxu1 }
 0x56c   :  { %v5964_v41 = vmul.f32 -1.442695, %v9138_v50  ;;  %v9146_v54 = vadd.f32 %v9116_v26, %v1898_v59 }
 0x56d   :  { %v7417_v44 = vpop.eup %7416  ;;  %7424 = vpow2.f32 %v5966_v22  ;;  %v5967_v29 = vmul.f32 -1.442695, %v9142_v58 }
 0x56e   :  { %v7419_v45 = vpop.eup %7418  ;;  %v2104_v20 = vadd.f32 1.0, %v7417_v44  ;;  %7426 = vpow2.f32 %v5964_v41  ;;  %v5965_v19 = vmul.f32 -1.442695, %v9146_v54 }
 0x56f   :  { %v7421_v21 = vpop.eup %7420  ;;  %v2102_v14 = vadd.f32 1.0, %v7419_v45  ;;  %7428 = vpow2.f32 %v5967_v29 }
 0x570   :  { %v7423_v48 = vpop.eup %7422  ;;  %7430 = vrcp.f32 %v2104_v20  ;;  %v2105_v15 = vadd.f32 1.0, %v7421_v21  ;;  %v6631_v49 = vpop.f32.mrb[40].mxu1 }
 0x571   :  { %7432 = vrcp.f32 %v2102_v14  ;;  %v2103_v34 = vadd.f32 1.0, %v7423_v48  ;;  %v9151_v60 = vadd.f32 %v6631_v49, %v9116_v26  ;;  %v1911_v39 = vpop.f32.mrb[41].mxu1 }
 0x572   :  { %7434 = vrcp.f32 %v2105_v15  ;;  %v9154_v38 = vadd.f32 %v9116_v26, %v1911_v39  ;;  %v6632_v30 = vpop.f32.mrb[42].mxu1 }
 0x573   :  { %7436 = vrcp.f32 %v2103_v34  ;;  %v5970_v2 = vmul.f32 -1.442695, %v9151_v60  ;;  %v9158_v35 = vadd.f32 %v6632_v30, %v9116_v26  ;;  %v1914_v6 = vpop.f32.mrb[43].mxu1 }
 0x574   :  { %7438 = vpow2.f32 %v5965_v19  ;;  %v5968_v7 = vmul.f32 -1.442695, %v9154_v38  ;;  %v9162_v10 = vadd.f32 %v9116_v26, %v1914_v6 }
 0x575   :  { %7440 = vpow2.f32 %v5970_v2  ;;  %v5971_v22 = vmul.f32 -1.442695, %v9158_v35 }
 0x576   :  { %7442 = vpow2.f32 %v5968_v7  ;;  %v5969_v59 = vmul.f32 -1.442695, %v9162_v10 }
 0x577   :  { %v7425_v41 = vpop.eup %7424  ;;  %7444 = vpow2.f32 %v5971_v22 }
 0x578   :  { %v7427_v44 = vpop.eup %7426  ;;  %v2108_v29 = vadd.f32 1.0, %v7425_v41  ;;  %7446 = vpow2.f32 %v5969_v59 }
 0x579   :  { %v7429_v45 = vpop.eup %7428  ;;  %v2106_v20 = vadd.f32 1.0, %v7427_v44  ;;  %v6635_v21 = vpop.f32.mrb[44].mxu1 }
 0x57a   :  { %v7431_v14 = vpop.eup %7430  ;;  %7448 = vrcp.f32 %v2108_v29  ;;  %v2109_v48 = vadd.f32 1.0, %v7429_v45  ;;  %v9167_v15 = vadd.f32 %v6635_v21, %v9116_v26  ;;  %v1927_v19 = vpop.f32.mrb[45].mxu1 }
 0x57b   :  { %v7433_v49 = vpop.eup %7432  ;;  %v9170_v34 = vadd.f32 %v9116_v26, %v1927_v19  ;;  %v6636_v39 = vpop.f32.mrb[46].mxu1  ;;  %v2200_v2 = vmul.f32 %v7431_v14, %v9119_v11 }
 0x57c   :  { %v7435_v30 = vpop.eup %7434  ;;  %7450 = vrcp.f32 %v2109_v48  ;;  %v5974_v6 = vmul.f32 -1.442695, %v9167_v15  ;;  %v9175_v7 = vadd.f32 %v6636_v39, %v9116_v26  ;;  %v1930_v22 = vpop.f32.mrb[47].mxu1  ;;  %v2198_v41 = vmul.f32 %v7433_v49, %v9122_v17 }
 0x57d   :  { %v7437_v59 = vpop.eup %7436  ;;  %v2201_v44 = vmul.f32 %v7435_v30, %v9126_v40  ;;  %7452 = vrcp.f32 %v2106_v20  ;;  %v5972_v29 = vmul.f32 -1.442695, %v9170_v34  ;;  %v9183_v14 = vadd.f32 %v9116_v26, %v1930_v22 }
 0x57e   :  { %v7439_v45 = vpop.eup %7438  ;;  %v2199_v21 = vmul.f32 %v7437_v59, %v9130_v43  ;;  %7454 = vpow2.f32 %v5974_v6  ;;  %v5975_v11 = vmul.f32 -1.442695, %v9175_v7 }
 0x57f   :  { %v7441_v48 = vpop.eup %7440  ;;  %v2231_v19 = vpack.c.bf16 %v2201_v44, %v2200_v2  ;;  %v2107_v39 = vadd.f32 1.0, %v7439_v45  ;;  %7456 = vpow2.f32 %v5972_v29  ;;  %v5973_v6 = vmul.f32 -1.442695, %v9183_v14 }
 0x580   :  { %v7443_v42 = vpop.eup %7442  ;;  %v2112_v17 = vadd.f32 1.0, %v7441_v48  ;;  %7458 = vpow2.f32 %v5975_v11  ;;  %v2230_v40 = vpack.c.bf16 %v2199_v21, %v2198_v41 }
 0x581   :  { %v7445_v20 = vpop.eup %7444  ;;  %7460 = vrcp.f32 %v2107_v39  ;;  %v2110_v49 = vadd.f32 1.0, %v7443_v42  ;;  %v6639_v30 = vpop.f32.mrb[48].mxu1 }
 0x582   :  { %v7447_v24 = vpop.eup %7446  ;;  %7462 = vrcp.f32 %v2112_v17  ;;  %v2113_v43 = vadd.f32 1.0, %v7445_v20  ;;  %v9187_v22 = vadd.f32 %v6639_v30, %v9116_v26  ;;  %v1943_v59 = vpop.f32.mrb[49].mxu1  ;;  %6669 = vmatprep.mubr.bf16.mxu0 %v2230_v40 }
 0x583   :  { %7464 = vrcp.f32 %v2110_v49  ;;  %v2111_v2 = vadd.f32 1.0, %v7447_v24  ;;  %v9190_v44 = vadd.f32 %v9116_v26, %v1943_v59  ;;  %v6640_v41 = vpop.f32.mrb[50].mxu1  ;;  %6670 = vmatmul.mubr.bf16.vlgmr.msra.gmra.mrb[64].mxu0 %v2231_v19 }
 0x584   :  { %v7449_v29 = vpop.eup %7448  ;;  %7466 = vrcp.f32 %v2113_v43  ;;  %v5978_v42 = vmul.f32 -1.442695, %v9187_v22  ;;  %v9194_v45 = vadd.f32 %v6640_v41, %v9116_v26  ;;  %v1946_v21 = vpop.f32.mrb[51].mxu1 }
 0x585   :  { %7468 = vrcp.f32 %v2111_v2  ;;  %v5976_v11 = vmul.f32 -1.442695, %v9190_v44  ;;  %v9198_v48 = vadd.f32 %v9116_v26, %v1946_v21  ;;  %v2204_v19 = vmul.f32 %v7449_v29, %v9135_v51 }
 0x586   :  { %v7451_v24 = vpop.eup %7450  ;;  %7470 = vpow2.f32 %v5973_v6  ;;  %v5979_v39 = vmul.f32 -1.442695, %v9194_v45 }
 0x587   :  { %v7453_v17 = vpop.eup %7452  ;;  %v2205_v40 = vmul.f32 %v7451_v24, %v9142_v58  ;;  %7472 = vpow2.f32 %v5978_v42  ;;  %v5977_v20 = vmul.f32 -1.442695, %v9198_v48 }
 0x588   :  { %v7455_v49 = vpop.eup %7454  ;;  %7474 = vpow2.f32 %v5976_v11  ;;  %v2202_v42 = vmul.f32 %v7453_v17, %v9138_v50 }
 0x589   :  { %v7457_v30 = vpop.eup %7456  ;;  %v2116_v43 = vadd.f32 1.0, %v7455_v49  ;;  %7476 = vpow2.f32 %v5979_v39  ;;  %v2233_v59 = vpack.c.bf16 %v2205_v40, %v2204_v19 }
 0x58a   :  { %v7459_v2 = vpop.eup %7458  ;;  %v2114_v41 = vadd.f32 1.0, %v7457_v30  ;;  %7478 = vpow2.f32 %v5977_v20  ;;  %v6643_v6 = vpop.f32.mrb[52].mxu1 }
 0x58b   :  { %v7461_v21 = vpop.eup %7460  ;;  %7480 = vrcp.f32 %v2116_v43  ;;  %v2117_v47 = vadd.f32 1.0, %v7459_v2  ;;  %v9205_v51 = vadd.f32 %v6643_v6, %v9116_v26  ;;  %v1959_v58 = vpop.f32.mrb[53].mxu1 }
 0x58c   :  { %v7463_v29 = vpop.eup %7462  ;;  %v2203_v11 = vmul.f32 %v7461_v21, %v9146_v54  ;;  %v9210_v24 = vadd.f32 %v9116_v26, %v1959_v58  ;;  %v6644_v39 = vpop.f32.mrb[54].mxu1 }
 0x58d   :  { %v7465_v19 = vpop.eup %7464  ;;  %7482 = vrcp.f32 %v2117_v47  ;;  %v5982_v40 = vmul.f32 -1.442695, %v9205_v51  ;;  %v9214_v20 = vadd.f32 %v6644_v39, %v9116_v26  ;;  %v1962_v49 = vpop.f32.mrb[55].mxu1  ;;  %v2208_v2 = vmul.f32 %v7463_v29, %v9151_v60 }
 0x58e   :  { %v7467_v30 = vpop.eup %7466  ;;  %7484 = vrcp.f32 %v2114_v41  ;;  %v5980_v43 = vmul.f32 -1.442695, %v9210_v24  ;;  %v9218_v50 = vadd.f32 %v9116_v26, %v1962_v49  ;;  %v2232_v54 = vpack.c.bf16 %v2203_v11, %v2202_v42 }
 0x58f   :  { %v7469_v17 = vpop.eup %7468  ;;  %v2209_v6 = vmul.f32 %v7467_v30, %v9158_v35  ;;  %7486 = vpow2.f32 %v5982_v40  ;;  %v5983_v47 = vmul.f32 -1.442695, %v9214_v20  ;;  %v2206_v58 = vmul.f32 %v7465_v19, %v9154_v38 }
 0x590   :  { %v7471_v21 = vpop.eup %7470  ;;  %v2207_v39 = vmul.f32 %v7469_v17, %v9162_v10  ;;  %7488 = vpow2.f32 %v5980_v43  ;;  %v5981_v41 = vmul.f32 -1.442695, %v9218_v50  ;;  %6673 = vmatprep.mubr.bf16.mxu0 %v2232_v54 }
 0x591   :  { %v7473_v49 = vpop.eup %7472  ;;  %v2115_v5 = vadd.f32 1.0, %v7471_v21  ;;  %7490 = vpow2.f32 %v5983_v47  ;;  %6674 = vmatmul.mubr.bf16.gmra.mrb[68].mxu0 %v2233_v59  ;;  %v2235_v42 = vpack.c.bf16 %v2209_v6, %v2208_v2 }
 0x592   :  { %v7475_v60 = vpop.eup %7474  ;;  %v2120_v29 = vadd.f32 1.0, %v7473_v49  ;;  %7492 = vpow2.f32 %v5981_v41  ;;  %v6647_v35 = vpop.f32.mrb[56].mxu1  ;;  %v2234_v11 = vpack.c.bf16 %v2207_v39, %v2206_v58 }
 0x593   :  { %v7477_v40 = vpop.eup %7476  ;;  %7494 = vrcp.f32 %v2115_v5  ;;  %v2118_v30 = vadd.f32 1.0, %v7475_v60  ;;  %v9227_v38 = vadd.f32 %v6647_v35, %v9116_v26  ;;  %v1975_v10 = vpop.f32.mrb[57].mxu1 }
 0x594   :  { %v7479_v19 = vpop.eup %7478  ;;  %7496 = vrcp.f32 %v2120_v29  ;;  %v2121_v43 = vadd.f32 1.0, %v7477_v40  ;;  %v9230_v54 = vadd.f32 %v9116_v26, %v1975_v10  ;;  %v6648_v59 = vpop.f32.mrb[58].mxu1  ;;  %6677 = vmatprep.mubr.bf16.mxu0 %v2234_v11 }
 0x595   :  { %v7481_v17 = vpop.eup %7480  ;;  %7498 = vrcp.f32 %v2118_v30  ;;  %v2119_v2 = vadd.f32 1.0, %v7479_v19  ;;  %v5986_v6 = vmul.f32 -1.442695, %v9227_v38  ;;  %v9234_v5 = vadd.f32 %v6648_v59, %v9116_v26  ;;  %v1978_v47 = vpop.f32.mrb[59].mxu1 }
 0x596   :  { %7500 = vrcp.f32 %v2121_v43  ;;  %v5984_v21 = vmul.f32 -1.442695, %v9230_v54  ;;  %v9238_v58 = vadd.f32 %v9116_v26, %v1978_v47  ;;  %v2212_v60 = vmul.f32 %v7481_v17, %v9167_v15 }
 0x597   :  { %v7483_v39 = vpop.eup %7482  ;;  %7502 = vrcp.f32 %v2119_v2  ;;  %v5987_v41 = vmul.f32 -1.442695, %v9234_v5 }
 0x598   :  { %v7485_v49 = vpop.eup %7484  ;;  %v2213_v29 = vmul.f32 %v7483_v39, %v9175_v7  ;;  %7504 = vpow2.f32 %v5986_v6  ;;  %v5985_v35 = vmul.f32 -1.442695, %v9238_v58 }
 0x599   :  { %v7487_v11 = vpop.eup %7486  ;;  %7506 = vpow2.f32 %v5984_v21  ;;  %6678 = vmatmul.mubr.bf16.gmra.mrb[72].mxu0 %v2235_v42  ;;  %v2210_v7 = vmul.f32 %v7485_v49, %v9170_v34 }
 0x59a   :  { %v7489_v40 = vpop.eup %7488  ;;  %v2124_v30 = vadd.f32 1.0, %v7487_v11  ;;  %7508 = vpow2.f32 %v5987_v41  ;;  %v6651_v10 = vpop.f32.mrb[60].mxu1  ;;  %v2237_v19 = vpack.c.bf16 %v2213_v29, %v2212_v60 }
 0x59b   :  { %v7491_v43 = vpop.eup %7490  ;;  %v2122_v59 = vadd.f32 1.0, %v7489_v40  ;;  %7510 = vpow2.f32 %v5985_v35  ;;  %v9245_v2 = vadd.f32 %v6651_v10, %v9116_v26  ;;  %v1991_v15 = vpop.f32.mrb[61].mxu1 }
 0x59c   :  { %v7493_v17 = vpop.eup %7492  ;;  %7512 = vrcp.f32 %v2124_v30  ;;  %v2125_v6 = vadd.f32 1.0, %v7491_v43  ;;  %v9249_v47 = vadd.f32 %v9116_v26, %v1991_v15  ;;  %v6652_v42 = vpop.f32.mrb[62].mxu1 }
 0x59d   :  { %v7495_v21 = vpop.eup %7494  ;;  %7514 = vrcp.f32 %v2122_v59  ;;  %v2123_v39 = vadd.f32 1.0, %v7493_v17  ;;  %v5990_v41 = vmul.f32 -1.442695, %v9245_v2  ;;  %v9253_v60 = vadd.f32 %v6652_v42, %v9116_v26  ;;  %v1994_v29 = vpop.f32.mrb[63].mxu1 }
 0x59e   :  { %v7497_v35 = vpop.eup %7496  ;;  %v2211_v11 = vmul.f32 %v7495_v21, %v9183_v14  ;;  %7516 = vrcp.f32 %v2125_v6  ;;  %v5988_v34 = vmul.f32 -1.442695, %v9249_v47  ;;  %v9258_v49 = vadd.f32 %v9116_v26, %v1994_v29 }
 0x59f   :  { %v7499_v40 = vpop.eup %7498  ;;  %7518 = vrcp.f32 %v2123_v39  ;;  %v5991_v30 = vmul.f32 -1.442695, %v9253_v60  ;;  %v2216_v17 = vmul.f32 %v7497_v35, %v9187_v22 }
 0x5a0   :  { %v7501_v10 = vpop.eup %7500  ;;  %7520 = vpow2.f32 %v5990_v41  ;;  %v5989_v43 = vmul.f32 -1.442695, %v9258_v49  ;;  %v2236_v59 = vpack.c.bf16 %v2211_v11, %v2210_v7  ;;  %v2214_v42 = vmul.f32 %v7499_v40, %v9190_v44 }
 0x5a1   :  { %v7503_v15 = vpop.eup %7502  ;;  %v2217_v14 = vmul.f32 %v7501_v10, %v9194_v45  ;;  %7522 = vpow2.f32 %v5988_v34 }
 0x5a2   :  { %v7505_v6 = vpop.eup %7504  ;;  %v2215_v26 = vmul.f32 %v7503_v15, %v9198_v48  ;;  %7524 = vpow2.f32 %v5991_v30  ;;  %6681 = vmatprep.mubr.bf16.mxu0 %v2236_v59 }
 0x5a3   :  { %v7507_v21 = vpop.eup %7506  ;;  %v2128_v39 = vadd.f32 1.0, %v7505_v6  ;;  %7526 = vpow2.f32 %v5989_v43  ;;  %6682 = vmatmul.mubr.bf16.gmra.mrb[76].mxu0 %v2237_v19  ;;  %v2239_v41 = vpack.c.bf16 %v2217_v14, %v2216_v17 }
 0x5a4   :  { %v7509_v29 = vpop.eup %7508  ;;  %v2126_v7 = vadd.f32 1.0, %v7507_v21  ;;  %v2238_v11 = vpack.c.bf16 %v2215_v26, %v2214_v42 }
 0x5a5   :  { %v7511_v32 = vpop.eup %7510  ;;  %7528 = vrcp.f32 %v2128_v39  ;;  %v2129_v22 = vadd.f32 1.0, %v7509_v29 }
 0x5a6   :  { %v7513_v45 = vpop.eup %7512  ;;  %7530 = vrcp.f32 %v2126_v7  ;;  %v2127_v35 = vadd.f32 1.0, %v7511_v32  ;;  %6685 = vmatprep.mubr.bf16.mxu0 %v2238_v11 }
 0x5a7   :  { %v7515_v44 = vpop.eup %7514  ;;  %7532 = vrcp.f32 %v2129_v22  ;;  %v2220_v40 = vmul.f32 %v7513_v45, %v9205_v51 }
 0x5a8   :  { %v7517_v48 = vpop.eup %7516  ;;  %7534 = vrcp.f32 %v2127_v35  ;;  %v2218_v10 = vmul.f32 %v7515_v44, %v9210_v24 }
 0x5a9   :  { %v7519_v34 = vpop.eup %7518  ;;  %v2221_v19 = vmul.f32 %v7517_v48, %v9214_v20 }
 0x5aa   :  { %v7521_v30 = vpop.eup %7520  ;;  %v2219_v43 = vmul.f32 %v7519_v34, %v9218_v50 }
 0x5ab   :  { %v7523_v59 = vpop.eup %7522  ;;  %v2132_v15 = vadd.f32 1.0, %v7521_v30  ;;  %6686 = vmatmul.mubr.bf16.gmra.mrb[80].mxu0 %v2239_v41  ;;  %v2241_v17 = vpack.c.bf16 %v2221_v19, %v2220_v40  ;;  %v7105_v30 = vld [vmem:[#allocation8 + $0x88] sm:$0xff]  }
 0x5ac   :  { %v7525_v32 = vpop.eup %7524  ;;  %v2130_v14 = vadd.f32 1.0, %v7523_v59  ;;  %v2240_v6 = vpack.c.bf16 %v2219_v43, %v2218_v10  ;;  %v7106_v10 = vld [vmem:[#allocation8 + $0x90] sm:$0xff]  }
 0x5ad   :  { %v7527_v42 = vpop.eup %7526  ;;  %7536 = vrcp.f32 %v2132_v15  ;;  %v2133_v26 = vadd.f32 1.0, %v7525_v32 }
 0x5ae   :  { %7538 = vrcp.f32 %v2130_v14  ;;  %v2131_v21 = vadd.f32 1.0, %v7527_v42  ;;  %6689 = vmatprep.mubr.bf16.mxu0 %v2240_v6 }
 0x5af   :  { %v7529_v51 = vpop.eup %7528  ;;  %7540 = vrcp.f32 %v2133_v26 }
 0x5b0   :  { %v7531_v20 = vpop.eup %7530  ;;  %7542 = vrcp.f32 %v2131_v21  ;;  %v2224_v50 = vmul.f32 %v7529_v51, %v9227_v38 }
 0x5b1   :  { %v7533_v24 = vpop.eup %7532  ;;  %v2222_v29 = vmul.f32 %v7531_v20, %v9230_v54 }
 0x5b2   :  { %v7535_v39 = vpop.eup %7534  ;;  %v2225_v41 = vmul.f32 %v7533_v24, %v9234_v5 }
 0x5b3   :  { %v2223_v7 = vmul.f32 %v7535_v39, %v9238_v58  ;;  %6690 = vmatmul.mubr.bf16.gmra.mrb[84].mxu0 %v2241_v17  ;;  %v7104_v58 = vld [vmem:[#allocation8 + $0x80] sm:$0xff]  }
 0x5b4   :  { %v2243_v11 = vpack.c.bf16 %v2225_v41, %v2224_v50  ;;  %6701 = vmatprep.subr.bf16.mxu1 %v7104_v58 }
 0x5b5   :  { %v2242_v22 = vpack.c.bf16 %v2223_v7, %v2222_v29  ;;  %6702 = vmatpush3.bf16.msra.mxu1 %v7104_v58 }
 0x5b6   :  { %6703 = vmatprep.subr.bf16.mxu1 %v7105_v30 }
 0x5b7   :  { %v7537_v45 = vpop.eup %7536  ;;  %6693 = vmatprep.mubr.bf16.mxu0 %v2242_v22 }
 0x5b8   :  { %v7539_v35 = vpop.eup %7538  ;;  %v2228_v34 = vmul.f32 %v7537_v45, %v9245_v2  ;;  %v7107_v2 = vld [vmem:[#allocation8 + $0x98] sm:$0xff]  }
 0x5b9   :  { %v7541_v44 = vpop.eup %7540  ;;  %v2226_v38 = vmul.f32 %v7539_v35, %v9249_v47  ;;  %6704 = vmatpush3.bf16.msra.mxu1 %v7105_v30  ;;  %v9281_v47 = vld [vmem:[%s10668_s7 + $0x1] ss:$0 sm:$0xff] }
 0x5ba   :  { %v7543_v48 = vpop.eup %7542  ;;  %v2229_v40 = vmul.f32 %v7541_v44, %v9253_v60  ;;  %6705 = vmatprep.subr.bf16.mxu1 %v7106_v10  ;;  %v7108_v60 = vld [vmem:[#allocation8 + $0xa0] sm:$0xff]  }
 0x5bb   :  { %v2227_v5 = vmul.f32 %v7543_v48, %v9258_v49  ;;  %6694 = vmatmul.mubr.bf16.gmra.mrb[88].mxu0 %v2243_v11 }
 0x5bc   :  { %v2245_v54 = vpack.c.bf16 %v2229_v40, %v2228_v34 }
 0x5bd   :  { %v2244_v19 = vpack.c.bf16 %v2227_v5, %v2226_v38  ;;  %6706 = vmatpush3.bf16.msra.mxu1 %v7106_v10 }
 0x5be   :  { %6707 = vmatprep.subr.bf16.mxu1 %v7107_v2 }
 0x5bf   :  { %6697 = vmatprep.mubr.bf16.mxu0 %v2244_v19 }
 0x5c1   :  { %6708 = vmatpush3.bf16.msra.mxu1 %v7107_v2 }
 0x5c2   :  { %6709 = vmatprep.subr.bf16.mxu1 %v7108_v60 }
 0x5c3   :  { %6698 = vmatmul.mubr.bf16.gmra.mrb[92].mxu0 %v2245_v54 }
 0x5c5   :  { %6710 = vmatpush3.bf16.msra.mxu1 %v7108_v60 }
 0x656   :  { %v6671_v49 = vpop.f32.mrb[64].mxu0 }
 0x657   :  { %v2353_v43 = vpop.f32.mrb[65].mxu0  ;;  %v2362_v59 = vadd.f32 %v6671_v49, %v9281_v47 }
 0x658   :  { %v2354_v15 = vadd.f32 %v9281_v47, %v2353_v43  ;;  %v6672_v17 = vpop.f32.mrb[66].mxu0 }
 0x659   :  { %v2356_v32 = vpop.f32.mrb[67].mxu0  ;;  %v2365_v6 = vadd.f32 %v6672_v17, %v9281_v47  ;;  %v9291_v26 = vadd.f32 %v2362_v59, %v8860_v25 }
 0x65a   :  { %v9286_v14 = vadd.f32 %v2354_v15, %v8855_v13  ;;  %v2357_v42 = vadd.f32 %v9281_v47, %v2356_v32 }
 0x65b   :  { %v9299_v20 = vadd.f32 %v2365_v6, %v8868_v33  ;;  %v2514_v24 = vmul.f32 %v9291_v26, %v9291_v26 }
 0x65c   :  { %v9294_v21 = vadd.f32 %v2357_v42, %v8863_v23  ;;  %v2512_v51 = vmul.f32 %v9286_v14, %v9286_v14 }
 0x65d   :  { %v2515_v25 = vmul.f32 %v9299_v20, %v9299_v20 }
 0x65e   :  { %2544 = vadd.xlane.f32.xlu0 %v2512_v51  ;;  %v2513_v13 = vmul.f32 %v9294_v21, %v9294_v21 }
 0x660   :  { %2546 = vadd.xlane.f32.xlu1 %v2513_v13 }
 0x662   :  { %2548 = vadd.xlane.f32.xlu0 %v2514_v24 }
 0x664   :  { %v6675_v23 = vpop.f32.mrb[68].mxu0  ;;  %2550 = vadd.xlane.f32.xlu1 %v2515_v25 }
 0x665   :  { %v2369_v39 = vpop.f32.mrb[69].mxu0  ;;  %v2378_v50 = vadd.f32 %v6675_v23, %v9281_v47 }
 0x666   :  { %v2370_v33 = vadd.f32 %v9281_v47, %v2369_v39  ;;  %v6676_v41 = vpop.f32.mrb[70].mxu0 }
 0x667   :  { %v2372_v29 = vpop.f32.mrb[71].mxu0  ;;  %v2381_v11 = vadd.f32 %v6676_v41, %v9281_v47  ;;  %v9315_v45 = vadd.f32 %v2378_v50, %v8884_v0 }
 0x668   :  { %v9310_v7 = vadd.f32 %v2370_v33, %v8879_v63  ;;  %v2373_v22 = vadd.f32 %v9281_v47, %v2372_v29 }
 0x669   :  { %v9323_v48 = vadd.f32 %v2381_v11, %v8892_v12 }
 0x66a   :  { %v9318_v35 = vadd.f32 %v2373_v22, %v8887_v62  ;;  %v2516_v44 = vmul.f32 %v9310_v7, %v9310_v7  ;;  %v2518_v62 = vmul.f32 %v9315_v45, %v9315_v45 }
 0x66b   :  { %v2519_v30 = vmul.f32 %v9323_v48, %v9323_v48 }
 0x66c   :  { %2552 = vadd.xlane.f32.xlu0 %v2516_v44  ;;  %v6679_v34 = vpop.f32.mrb[72].mxu0  ;;  %v2517_v63 = vmul.f32 %v9318_v35, %v9318_v35 }
 0x66d   :  { %v2385_v40 = vpop.f32.mrb[73].mxu0  ;;  %v2394_v38 = vadd.f32 %v6679_v34, %v9281_v47 }
 0x66e   :  { %v2386_v0 = vadd.f32 %v9281_v47, %v2385_v40  ;;  %2554 = vadd.xlane.f32.xlu1 %v2517_v63  ;;  %v6680_v5 = vpop.f32.mrb[74].mxu0 }
 0x66f   :  { %v2388_v54 = vpop.f32.mrb[75].mxu0  ;;  %v2397_v12 = vadd.f32 %v6680_v5, %v9281_v47  ;;  %v9339_v10 = vadd.f32 %v2394_v38, %v8908_v61 }
 0x670   :  { %v9332_v19 = vadd.f32 %v2386_v0, %v8901_v37  ;;  %v2389_v58 = vadd.f32 %v9281_v47, %v2388_v54  ;;  %2556 = vadd.xlane.f32.xlu0 %v2518_v62  ;;  %v7109_v37 = vld [vmem:[#allocation8 + $0xa8] sm:$0xff]  }
 0x671   :  { %v9347_v49 = vadd.f32 %v2397_v12, %v8916_v52  ;;  %6711 = vmatprep.subr.bf16.mxu1 %v7109_v37  ;;  %v2522_v61 = vmul.f32 %v9339_v10, %v9339_v10 }
 0x672   :  { %v9342_v2 = vadd.f32 %v2389_v58, %v8911_v9  ;;  %2558 = vadd.xlane.f32.xlu1 %v2519_v30  ;;  %v2520_v60 = vmul.f32 %v9332_v19, %v9332_v19  ;;  %6712 = vmatpush3.bf16.msra.mxu1 %v7109_v37  ;;  %v7111_v30 = vld [vmem:[#allocation8 + $0xb8] sm:$0xff]  }
 0x673   :  { %v2523_v52 = vmul.f32 %v9347_v49, %v9347_v49 }
 0x674   :  { %2560 = vadd.xlane.f32.xlu0 %v2520_v60  ;;  %v2521_v43 = vmul.f32 %v9342_v2, %v9342_v2 }
 0x676   :  { %v6683_v59 = vpop.f32.mrb[76].mxu0  ;;  %2562 = vadd.xlane.f32.xlu1 %v2521_v43 }
 0x677   :  { %v2401_v9 = vpop.f32.mrb[77].mxu0  ;;  %v2410_v15 = vadd.f32 %v6683_v59, %v9281_v47 }
 0x678   :  { %v2402_v17 = vadd.f32 %v9281_v47, %v2401_v9  ;;  %v6684_v32 = vpop.f32.mrb[78].mxu0  ;;  %2564 = vadd.xlane.f32.xlu0 %v2522_v61 }
 0x679   :  { %v2404_v6 = vpop.f32.mrb[79].mxu0  ;;  %v2413_v51 = vadd.f32 %v6684_v32, %v9281_v47  ;;  %v9363_v24 = vadd.f32 %v2410_v15, %v8932_v4 }
 0x67a   :  { %v9358_v42 = vadd.f32 %v2402_v17, %v8927_v8  ;;  %v2405_v13 = vadd.f32 %v9281_v47, %v2404_v6  ;;  %2566 = vadd.xlane.f32.xlu1 %v2523_v52 }
 0x67b   :  { %v9371_v39 = vadd.f32 %v2413_v51, %v8940_v46  ;;  %v7110_v46 = vld [vmem:[#allocation8 + $0xb0] sm:$0xff]  }
 0x67c   :  { %v9366_v25 = vadd.f32 %v2405_v13, %v8935_v53  ;;  %v2524_v23 = vmul.f32 %v9358_v42, %v9358_v42  ;;  %v2526_v53 = vmul.f32 %v9363_v24, %v9363_v24  ;;  %6713 = vmatprep.subr.bf16.mxu1 %v7110_v46 }
 0x67d   :  { %v2527_v63 = vmul.f32 %v9371_v39, %v9371_v39  ;;  %6714 = vmatpush3.bf16.msra.mxu1 %v7110_v46 }
 0x67e   :  { %2568 = vadd.xlane.f32.xlu0 %v2524_v23  ;;  %v6687_v8 = vpop.f32.mrb[80].mxu0  ;;  %v2525_v50 = vmul.f32 %v9366_v25, %v9366_v25  ;;  %6715 = vmatprep.subr.bf16.mxu1 %v7111_v30 }
 0x67f   :  { %v2417_v33 = vpop.f32.mrb[81].mxu0  ;;  %v2426_v41 = vadd.f32 %v6687_v8, %v9281_v47 }
 0x680   :  { %v2418_v4 = vadd.f32 %v9281_v47, %v2417_v33  ;;  %2570 = vadd.xlane.f32.xlu1 %v2525_v50  ;;  %v6688_v29 = vpop.f32.mrb[82].mxu0 }
 0x681   :  { %v2429_v11 = vadd.f32 %v6688_v29, %v9281_v47  ;;  %v2420_v22 = vpop.f32.mrb[83].mxu0  ;;  %v9387_v40 = vadd.f32 %v2426_v41, %v8956_v1  ;;  %6716 = vmatpush3.bf16.msra.mxu1 %v7111_v30 }
 0x682   :  { %v9381_v44 = vadd.f32 %v2418_v4, %v8949_v18  ;;  %v2421_v34 = vadd.f32 %v9281_v47, %v2420_v22  ;;  %2572 = vadd.xlane.f32.xlu0 %v2526_v53 }
 0x683   :  { %v9395_v18 = vadd.f32 %v2429_v11, %v8964_v16  ;;  %v2530_v58 = vmul.f32 %v9387_v40, %v9387_v40 }
 0x684   :  { %v9390_v38 = vadd.f32 %v2421_v34, %v8959_v3  ;;  %2574 = vadd.xlane.f32.xlu1 %v2527_v63  ;;  %v2528_v0 = vmul.f32 %v9381_v44, %v9381_v44 }
 0x685   :  { %v2531_v16 = vmul.f32 %v9395_v18, %v9395_v18 }
 0x686   :  { %2576 = vadd.xlane.f32.xlu0 %v2528_v0  ;;  %v6691_v5 = vpop.f32.mrb[84].mxu0  ;;  %v2529_v62 = vmul.f32 %v9390_v38, %v9390_v38  ;;  %v10716_v0 = vld [vmem:[#allocation20_spill] sm:$0xff] }
 0x687   :  { %v2433_v54 = vpop.f32.mrb[85].mxu0  ;;  %v2442_v1 = vadd.f32 %v6691_v5, %v9281_v47 }
 0x688   :  { %v2434_v12 = vadd.f32 %v9281_v47, %v2433_v54  ;;  %2578 = vadd.xlane.f32.xlu1 %v2529_v62  ;;  %v6692_v3 = vpop.f32.mrb[86].mxu0 }
 0x689   :  { %v2436_v60 = vpop.f32.mrb[87].mxu0  ;;  %v2445_v43 = vadd.f32 %v6692_v3, %v9281_v47  ;;  %v9411_v61 = vadd.f32 %v2442_v1, %v8980_v56 }
 0x68a   :  { %v9406_v37 = vadd.f32 %v2434_v12, %v8975_v36  ;;  %v2437_v59 = vadd.f32 %v9281_v47, %v2436_v60  ;;  %2580 = vadd.xlane.f32.xlu0 %v2530_v58  ;;  %v10718_v12 = vld [vmem:[#allocation21_spill] sm:$0xff]  ;;  %v10720_v58 = vld [vmem:[#allocation22_spill] sm:$0xff] }
 0x68b   :  { %v9419_v36 = vadd.f32 %v2445_v43, %v8988_v27  ;;  %v2534_v51 = vmul.f32 %v9411_v61, %v9411_v61 }
 0x68c   :  { %v9414_v9 = vadd.f32 %v2437_v59, %v8983_v57  ;;  %2582 = vadd.xlane.f32.xlu1 %v2531_v16  ;;  %v2532_v15 = vmul.f32 %v9406_v37, %v9406_v37  ;;  %v10722_v16 = vld [vmem:[#allocation23_spill] sm:$0xff] }
 0x68d   :  { %v2535_v50 = vmul.f32 %v9419_v36, %v9419_v36 }
 0x68e   :  { %2584 = vadd.xlane.f32.xlu0 %v2532_v15  ;;  %v6695_v17 = vpop.f32.mrb[88].mxu0  ;;  %v2533_v32 = vmul.f32 %v9414_v9, %v9414_v9 }
 0x68f   :  { %v2449_v52 = vpop.f32.mrb[89].mxu0  ;;  %v2458_v6 = vadd.f32 %v6695_v17, %v9281_v47  ;;  %v7112_v17 = vld [vmem:[#allocation10 + $0x80] sm:$0xff]  }
 0x690   :  { %v2450_v56 = vadd.f32 %v9281_v47, %v2449_v52  ;;  %2586 = vadd.xlane.f32.xlu1 %v2533_v32  ;;  %v6696_v57 = vpop.f32.mrb[90].mxu0  ;;  %v7113_v32 = vld [vmem:[#allocation10 + $0x88] sm:$0xff]   ;;  %6749 = vmatprep.subr.bf16.mxu0 %v7112_v17  ;;  %v7114_v52 = vld [vmem:[#allocation10 + $0x90] sm:$0xff]  }
 0x691   :  { %v2452_v13 = vpop.f32.mrb[91].mxu0  ;;  %v2461_v27 = vadd.f32 %v6696_v57, %v9281_v47  ;;  %v9435_v33 = vadd.f32 %v2458_v6, %v9004_v31  ;;  %6750 = vmatpush3.bf16.msra.mxu0 %v7112_v17  ;;  %v7115_v6 = vld [vmem:[#allocation10 + $0x98] sm:$0xff]  }
 0x692   :  { %v9428_v23 = vadd.f32 %v2450_v56, %v8997_v28  ;;  %v2453_v8 = vadd.f32 %v9281_v47, %v2452_v13  ;;  %2588 = vadd.xlane.f32.xlu0 %v2534_v51  ;;  %v10714_v28 = vld [vmem:[#allocation19_spill] sm:$0xff]  ;;  %6751 = vmatprep.subr.bf16.mxu0 %v7113_v32 }
 0x693   :  { %10712 = vst [vmem:[#allocation24_spill] sm:$0xff] %v9435_v33  ;;  %v9443_v29 = vadd.f32 %v2461_v27, %v10714_v28  ;;  %v2538_v34 = vmul.f32 %v9435_v33, %v9435_v33 }
 0x694   :  { %v9438_v41 = vadd.f32 %v2453_v8, %v9007_v55  ;;  %2590 = vadd.xlane.f32.xlu1 %v2535_v50  ;;  %v2536_v4 = vmul.f32 %v9428_v23, %v9428_v23 }
 0x695   :  { %10715 = vst [vmem:[#allocation19_spill] sm:$0xff] %v9443_v29  ;;  %v2539_v1 = vmul.f32 %v9443_v29, %v9443_v29  ;;  %6752 = vmatpush3.bf16.msra.mxu0 %v7113_v32 }
 0x696   :  { %10713 = vst [vmem:[#allocation25_spill] sm:$0xff] %v9438_v41  ;;  %2592 = vadd.xlane.f32.xlu0 %v2536_v4  ;;  %v6699_v53 = vpop.f32.mrb[92].mxu0  ;;  %v2537_v11 = vmul.f32 %v9438_v41, %v9438_v41  ;;  %6753 = vmatprep.subr.bf16.mxu0 %v7114_v52 }
 0x697   :  { %v2465_v22 = vpop.f32.mrb[93].mxu0  ;;  %v2474_v46 = vadd.f32 %v6699_v53, %v9281_v47 }
 0x698   :  { %v2466_v31 = vadd.f32 %v9281_v47, %v2465_v22  ;;  %2594 = vadd.xlane.f32.xlu1 %v2537_v11  ;;  %v6700_v55 = vpop.f32.mrb[94].mxu0 }
 0x699   :  { %v2468_v63 = vpop.f32.mrb[95].mxu0  ;;  %v2477_v62 = vadd.f32 %v6700_v55, %v9281_v47  ;;  %v9459_v3 = vadd.f32 %v2474_v46, %v10718_v12  ;;  %6754 = vmatpush3.bf16.msra.mxu0 %v7114_v52 }
 0x69a   :  { %v9452_v5 = vadd.f32 %v2466_v31, %v10716_v0  ;;  %v2469_v54 = vadd.f32 %v9281_v47, %v2468_v63  ;;  %2596 = vadd.xlane.f32.xlu0 %v2538_v34  ;;  %6755 = vmatprep.subr.bf16.mxu0 %v7115_v6 }
 0x69b   :  { %10719 = vst [vmem:[#allocation21_spill] sm:$0xff] %v9459_v3  ;;  %v9467_v43 = vadd.f32 %v2477_v62, %v10722_v16  ;;  %v2542_v59 = vmul.f32 %v9459_v3, %v9459_v3 }
 0x69c   :  { %10717 = vst [vmem:[#allocation20_spill] sm:$0xff] %v9452_v5  ;;  %v9462_v30 = vadd.f32 %v2469_v54, %v10720_v58  ;;  %2598 = vadd.xlane.f32.xlu1 %v2539_v1  ;;  %v2540_v60 = vmul.f32 %v9452_v5, %v9452_v5  ;;  %v9479_v1 = vld [vmem:[%s10664_s3 + $0x2] ss:$0 sm:$0xff] }
 0x69d   :  { %10723 = vst [vmem:[#allocation23_spill] sm:$0xff] %v9467_v43  ;;  %v2543_v15 = vmul.f32 %v9467_v43, %v9467_v43  ;;  %6756 = vmatpush3.bf16.msra.mxu0 %v7115_v6 }
 0x69e   :  { %10721 = vst [vmem:[#allocation22_spill] sm:$0xff] %v9462_v30  ;;  %2600 = vadd.xlane.f32.xlu0 %v2540_v60  ;;  %v2541_v47 = vmul.f32 %v9462_v30, %v9462_v30 }
 0x6a0   :  { %2602 = vadd.xlane.f32.xlu1 %v2541_v47 }
 0x6a2   :  { %2604 = vadd.xlane.f32.xlu0 %v2542_v59 }
 0x6a4   :  { %2606 = vadd.xlane.f32.xlu1 %v2543_v15 }
 0x6eb   :  { %v2545_v56 = vpop.xlane.xlu0 %2544 }
 0x6ec   :  { %v2608_v57 = vmul.f32 0.03125, %v2545_v56 }
 0x6ed   :  { %v2547_v51 = vpop.xlane.xlu1 %2546 }
 0x6ee   :  { %v2640_v13 = vadd.f32 1.1920929e-07, %v2608_v57  ;;  %v2609_v27 = vmul.f32 0.03125, %v2547_v51 }
 0x6ef   :  { %v2549_v8 = vpop.xlane.xlu0 %2548 }
 0x6f0   :  { %7544 = vrsqrt.f32 %v2640_v13  ;;  %v2641_v50 = vadd.f32 1.1920929e-07, %v2609_v27  ;;  %v2610_v4 = vmul.f32 0.03125, %v2549_v8 }
 0x6f1   :  { %v2551_v28 = vpop.xlane.xlu1 %2550 }
 0x6f2   :  { %7546 = vrsqrt.f32 %v2641_v50  ;;  %v2642_v53 = vadd.f32 1.1920929e-07, %v2610_v4  ;;  %v2611_v11 = vmul.f32 0.03125, %v2551_v28 }
 0x6f4   :  { %7548 = vrsqrt.f32 %v2642_v53  ;;  %v2643_v22 = vadd.f32 1.1920929e-07, %v2611_v11 }
 0x6f6   :  { %7550 = vrsqrt.f32 %v2643_v22 }
 0x6f9   :  { %v2553_v46 = vpop.xlane.xlu0 %2552 }
 0x6fa   :  { %v7545_v31 = vpop.eup %7544  ;;  %v2612_v55 = vmul.f32 0.03125, %v2553_v46 }
 0x6fb   :  { %v2555_v34 = vpop.xlane.xlu1 %2554  ;;  %v2704_v63 = vmul.f32 %v7545_v31, %v9286_v14 }
 0x6fc   :  { %v7547_v0 = vpop.eup %7546  ;;  %v2644_v62 = vadd.f32 1.1920929e-07, %v2612_v55  ;;  %v2613_v54 = vmul.f32 0.03125, %v2555_v34 }
 0x6fd   :  { %v2557_v12 = vpop.xlane.xlu0 %2556  ;;  %v2705_v58 = vmul.f32 %v7547_v0, %v9294_v21  ;;  %v2744_v17 = vmul.f32 %v9479_v1, %v2704_v63 }
 0x6fe   :  { %v7549_v60 = vpop.eup %7548  ;;  %7552 = vrsqrt.f32 %v2644_v62  ;;  %v2645_v16 = vadd.f32 1.1920929e-07, %v2613_v54  ;;  %v2614_v47 = vmul.f32 0.03125, %v2557_v12 }
 0x6ff   :  { %v2706_v59 = vmul.f32 %v7549_v60, %v9291_v26  ;;  %v2559_v15 = vpop.xlane.xlu1 %2558  ;;  %v2745_v32 = vmul.f32 %v9479_v1, %v2705_v58 }
 0x700   :  { %v7551_v52 = vpop.eup %7550  ;;  %7554 = vrsqrt.f32 %v2645_v16  ;;  %v2646_v6 = vadd.f32 1.1920929e-07, %v2614_v47  ;;  %v2615_v56 = vmul.f32 0.03125, %v2559_v15 }
 0x701   :  { %v2707_v57 = vmul.f32 %v7551_v52, %v9299_v20  ;;  %v2561_v51 = vpop.xlane.xlu0 %2560  ;;  %v2776_v13 = vpack.c.bf16 %v2745_v32, %v2744_v17  ;;  %v2746_v4 = vmul.f32 %v9479_v1, %v2706_v59 }
 0x702   :  { %7556 = vrsqrt.f32 %v2646_v6  ;;  %v2647_v27 = vadd.f32 1.1920929e-07, %v2615_v56  ;;  %v2616_v8 = vmul.f32 0.03125, %v2561_v51 }
 0x703   :  { %v2563_v50 = vpop.xlane.xlu1 %2562  ;;  %6717 = vmatprep.mubr.bf16.mxu1 %v2776_v13  ;;  %v2747_v28 = vmul.f32 %v9479_v1, %v2707_v57 }
 0x704   :  { %7558 = vrsqrt.f32 %v2647_v27  ;;  %v2648_v53 = vadd.f32 1.1920929e-07, %v2616_v8  ;;  %v2617_v11 = vmul.f32 0.03125, %v2563_v50 }
 0x705   :  { %v2565_v22 = vpop.xlane.xlu0 %2564  ;;  %v2777_v46 = vpack.c.bf16 %v2747_v28, %v2746_v4 }
 0x706   :  { %7560 = vrsqrt.f32 %v2648_v53  ;;  %v2649_v31 = vadd.f32 1.1920929e-07, %v2617_v11  ;;  %v2618_v55 = vmul.f32 0.03125, %v2565_v22 }
 0x707   :  { %v2567_v34 = vpop.xlane.xlu1 %2566  ;;  %6718 = vmatmul.mubr.bf16.vlgmr.msra.gmra.mrb[64].mxu1 %v2777_v46 }
 0x708   :  { %v7553_v63 = vpop.eup %7552  ;;  %7562 = vrsqrt.f32 %v2649_v31  ;;  %v2650_v0 = vadd.f32 1.1920929e-07, %v2618_v55  ;;  %v2619_v62 = vmul.f32 0.03125, %v2567_v34 }
 0x709   :  { %v2708_v54 = vmul.f32 %v7553_v63, %v9310_v7 }
 0x70a   :  { %v7555_v12 = vpop.eup %7554  ;;  %7564 = vrsqrt.f32 %v2650_v0  ;;  %v2651_v58 = vadd.f32 1.1920929e-07, %v2619_v62 }
 0x70b   :  { %v2569_v60 = vpop.xlane.xlu0 %2568  ;;  %v2709_v16 = vmul.f32 %v7555_v12, %v9318_v35  ;;  %v2748_v17 = vmul.f32 %v9479_v1, %v2708_v54 }
 0x70c   :  { %v7557_v47 = vpop.eup %7556  ;;  %7566 = vrsqrt.f32 %v2651_v58  ;;  %v2620_v59 = vmul.f32 0.03125, %v2569_v60 }
 0x70d   :  { %v2571_v15 = vpop.xlane.xlu1 %2570  ;;  %v2749_v32 = vmul.f32 %v9479_v1, %v2709_v16  ;;  %v2710_v52 = vmul.f32 %v7557_v47, %v9315_v45 }
 0x70e   :  { %v7559_v6 = vpop.eup %7558  ;;  %v2652_v56 = vadd.f32 1.1920929e-07, %v2620_v59  ;;  %v2621_v57 = vmul.f32 0.03125, %v2571_v15 }
 0x70f   :  { %v2573_v51 = vpop.xlane.xlu0 %2572  ;;  %v2778_v13 = vpack.c.bf16 %v2749_v32, %v2748_v17  ;;  %v2711_v27 = vmul.f32 %v7559_v6, %v9323_v48  ;;  %v2750_v53 = vmul.f32 %v9479_v1, %v2710_v52 }
 0x710   :  { %v7561_v8 = vpop.eup %7560  ;;  %7568 = vrsqrt.f32 %v2652_v56  ;;  %v2653_v50 = vadd.f32 1.1920929e-07, %v2621_v57  ;;  %v2622_v4 = vmul.f32 0.03125, %v2573_v51 }
 0x711   :  { %v2575_v28 = vpop.xlane.xlu1 %2574  ;;  %6721 = vmatprep.mubr.bf16.mxu1 %v2778_v13  ;;  %v2751_v11 = vmul.f32 %v9479_v1, %v2711_v27  ;;  %v2712_v22 = vmul.f32 %v7561_v8, %v9332_v19 }
 0x712   :  { %v7563_v46 = vpop.eup %7562  ;;  %7570 = vrsqrt.f32 %v2653_v50  ;;  %v2654_v31 = vadd.f32 1.1920929e-07, %v2622_v4  ;;  %v2623_v55 = vmul.f32 0.03125, %v2575_v28 }
 0x713   :  { %v2577_v34 = vpop.xlane.xlu0 %2576  ;;  %v2779_v63 = vpack.c.bf16 %v2751_v11, %v2750_v53  ;;  %v2713_v0 = vmul.f32 %v7563_v46, %v9342_v2  ;;  %v2752_v60 = vmul.f32 %v9479_v1, %v2712_v22 }
 0x714   :  { %v7565_v62 = vpop.eup %7564  ;;  %7572 = vrsqrt.f32 %v2654_v31  ;;  %v2655_v54 = vadd.f32 1.1920929e-07, %v2623_v55  ;;  %v2624_v12 = vmul.f32 0.03125, %v2577_v34 }
 0x715   :  { %v2579_v58 = vpop.xlane.xlu1 %2578  ;;  %6722 = vmatmul.mubr.bf16.gmra.mrb[68].mxu1 %v2779_v63  ;;  %v2753_v16 = vmul.f32 %v9479_v1, %v2713_v0  ;;  %v2714_v47 = vmul.f32 %v7565_v62, %v9339_v10 }
 0x716   :  { %v7567_v59 = vpop.eup %7566  ;;  %7574 = vrsqrt.f32 %v2655_v54  ;;  %v2656_v15 = vadd.f32 1.1920929e-07, %v2624_v12  ;;  %v2625_v17 = vmul.f32 0.03125, %v2579_v58 }
 0x717   :  { %v2581_v32 = vpop.xlane.xlu0 %2580  ;;  %v2780_v52 = vpack.c.bf16 %v2753_v16, %v2752_v60  ;;  %v2715_v6 = vmul.f32 %v7567_v59, %v9347_v49  ;;  %v2754_v13 = vmul.f32 %v9479_v1, %v2714_v47 }
 0x718   :  { %7576 = vrsqrt.f32 %v2656_v15  ;;  %v2657_v56 = vadd.f32 1.1920929e-07, %v2625_v17  ;;  %v2626_v57 = vmul.f32 0.03125, %v2581_v32 }
 0x719   :  { %v2583_v51 = vpop.xlane.xlu1 %2582  ;;  %6725 = vmatprep.mubr.bf16.mxu1 %v2780_v52  ;;  %v2755_v27 = vmul.f32 %v9479_v1, %v2715_v6 }
 0x71a   :  { %v7569_v8 = vpop.eup %7568  ;;  %7578 = vrsqrt.f32 %v2657_v56  ;;  %v2658_v50 = vadd.f32 1.1920929e-07, %v2626_v57  ;;  %v2627_v4 = vmul.f32 0.03125, %v2583_v51 }
 0x71b   :  { %v2585_v28 = vpop.xlane.xlu0 %2584  ;;  %v2781_v53 = vpack.c.bf16 %v2755_v27, %v2754_v13  ;;  %v2716_v11 = vmul.f32 %v7569_v8, %v9358_v42 }
 0x71c   :  { %v7571_v22 = vpop.eup %7570  ;;  %7580 = vrsqrt.f32 %v2658_v50  ;;  %v2659_v46 = vadd.f32 1.1920929e-07, %v2627_v4  ;;  %v2628_v31 = vmul.f32 0.03125, %v2585_v28 }
 0x71d   :  { %v2587_v55 = vpop.xlane.xlu1 %2586  ;;  %6726 = vmatmul.mubr.bf16.gmra.mrb[72].mxu1 %v2781_v53  ;;  %v2717_v34 = vmul.f32 %v7571_v22, %v9366_v25  ;;  %v2756_v12 = vmul.f32 %v9479_v1, %v2716_v11 }
 0x71e   :  { %v7573_v63 = vpop.eup %7572  ;;  %7582 = vrsqrt.f32 %v2659_v46  ;;  %v2660_v0 = vadd.f32 1.1920929e-07, %v2628_v31  ;;  %v2629_v62 = vmul.f32 0.03125, %v2587_v55 }
 0x71f   :  { %v2589_v54 = vpop.xlane.xlu0 %2588  ;;  %v2757_v58 = vmul.f32 %v9479_v1, %v2717_v34  ;;  %v2718_v60 = vmul.f32 %v7573_v63, %v9363_v24 }
 0x720   :  { %v7575_v16 = vpop.eup %7574  ;;  %7584 = vrsqrt.f32 %v2660_v0  ;;  %v2661_v47 = vadd.f32 1.1920929e-07, %v2629_v62  ;;  %v2630_v59 = vmul.f32 0.03125, %v2589_v54 }
 0x721   :  { %v2591_v15 = vpop.xlane.xlu1 %2590  ;;  %v2782_v17 = vpack.c.bf16 %v2757_v58, %v2756_v12  ;;  %v2719_v32 = vmul.f32 %v7575_v16, %v9371_v39  ;;  %v2758_v51 = vmul.f32 %v9479_v1, %v2718_v60 }
 0x722   :  { %v7577_v52 = vpop.eup %7576  ;;  %7586 = vrsqrt.f32 %v2661_v47  ;;  %v2662_v6 = vadd.f32 1.1920929e-07, %v2630_v59  ;;  %v2631_v56 = vmul.f32 0.03125, %v2591_v15 }
 0x723   :  { %6729 = vmatprep.mubr.bf16.mxu1 %v2782_v17  ;;  %v2593_v57 = vpop.xlane.xlu0 %2592  ;;  %v2759_v13 = vmul.f32 %v9479_v1, %v2719_v32  ;;  %v2720_v27 = vmul.f32 %v7577_v52, %v9381_v44 }
 0x724   :  { %v7579_v8 = vpop.eup %7578  ;;  %7588 = vrsqrt.f32 %v2662_v6  ;;  %v2663_v50 = vadd.f32 1.1920929e-07, %v2631_v56  ;;  %v2632_v4 = vmul.f32 0.03125, %v2593_v57 }
 0x725   :  { %v2595_v28 = vpop.xlane.xlu1 %2594  ;;  %v2783_v53 = vpack.c.bf16 %v2759_v13, %v2758_v51  ;;  %v2721_v11 = vmul.f32 %v7579_v8, %v9390_v38  ;;  %v2760_v34 = vmul.f32 %v9479_v1, %v2720_v27 }
 0x726   :  { %v7581_v22 = vpop.eup %7580  ;;  %7590 = vrsqrt.f32 %v2663_v50  ;;  %v2664_v46 = vadd.f32 1.1920929e-07, %v2632_v4  ;;  %v2633_v31 = vmul.f32 0.03125, %v2595_v28 }
 0x727   :  { %6730 = vmatmul.mubr.bf16.gmra.mrb[76].mxu1 %v2783_v53  ;;  %v2597_v55 = vpop.xlane.xlu0 %2596  ;;  %v2761_v63 = vmul.f32 %v9479_v1, %v2721_v11  ;;  %v2722_v0 = vmul.f32 %v7581_v22, %v9387_v40 }
 0x728   :  { %v7583_v62 = vpop.eup %7582  ;;  %7592 = vrsqrt.f32 %v2664_v46  ;;  %v2665_v54 = vadd.f32 1.1920929e-07, %v2633_v31  ;;  %v2634_v12 = vmul.f32 0.03125, %v2597_v55 }
 0x729   :  { %v2599_v58 = vpop.xlane.xlu1 %2598  ;;  %v2784_v60 = vpack.c.bf16 %v2761_v63, %v2760_v34  ;;  %v2723_v16 = vmul.f32 %v7583_v62, %v9395_v18  ;;  %v2762_v32 = vmul.f32 %v9479_v1, %v2722_v0 }
 0x72a   :  { %v7585_v47 = vpop.eup %7584  ;;  %7594 = vrsqrt.f32 %v2665_v54  ;;  %v2666_v59 = vadd.f32 1.1920929e-07, %v2634_v12  ;;  %v2635_v15 = vmul.f32 0.03125, %v2599_v58 }
 0x72b   :  { %6733 = vmatprep.mubr.bf16.mxu1 %v2784_v60  ;;  %v2601_v17 = vpop.xlane.xlu0 %2600  ;;  %v2763_v52 = vmul.f32 %v9479_v1, %v2723_v16  ;;  %v2724_v6 = vmul.f32 %v7585_v47, %v9406_v37 }
 0x72c   :  { %v7587_v56 = vpop.eup %7586  ;;  %7596 = vrsqrt.f32 %v2666_v59  ;;  %v2667_v57 = vadd.f32 1.1920929e-07, %v2635_v15  ;;  %v2636_v51 = vmul.f32 0.03125, %v2601_v17 }
 0x72d   :  { %v2603_v13 = vpop.xlane.xlu1 %2602  ;;  %v2785_v27 = vpack.c.bf16 %v2763_v52, %v2762_v32  ;;  %v2725_v8 = vmul.f32 %v7587_v56, %v9414_v9  ;;  %v2764_v11 = vmul.f32 %v9479_v1, %v2724_v6 }
 0x72e   :  { %v7589_v50 = vpop.eup %7588  ;;  %7598 = vrsqrt.f32 %v2667_v57  ;;  %v2668_v4 = vadd.f32 1.1920929e-07, %v2636_v51  ;;  %v2637_v28 = vmul.f32 0.03125, %v2603_v13 }
 0x72f   :  { %6734 = vmatmul.mubr.bf16.gmra.mrb[80].mxu1 %v2785_v27  ;;  %v2605_v53 = vpop.xlane.xlu0 %2604  ;;  %v2765_v22 = vmul.f32 %v9479_v1, %v2725_v8  ;;  %v2726_v46 = vmul.f32 %v7589_v50, %v9411_v61 }
 0x730   :  { %v7591_v31 = vpop.eup %7590  ;;  %7600 = vrsqrt.f32 %v2668_v4  ;;  %v2669_v55 = vadd.f32 1.1920929e-07, %v2637_v28  ;;  %v2638_v34 = vmul.f32 0.03125, %v2605_v53 }
 0x731   :  { %v2607_v63 = vpop.xlane.xlu1 %2606  ;;  %v2786_v0 = vpack.c.bf16 %v2765_v22, %v2764_v11  ;;  %v2727_v62 = vmul.f32 %v7591_v31, %v9419_v36  ;;  %v2766_v60 = vmul.f32 %v9479_v1, %v2726_v46 }
 0x732   :  { %v7593_v54 = vpop.eup %7592  ;;  %7602 = vrsqrt.f32 %v2669_v55  ;;  %v2670_v12 = vadd.f32 1.1920929e-07, %v2638_v34  ;;  %v2639_v58 = vmul.f32 0.03125, %v2607_v63 }
 0x733   :  { %6737 = vmatprep.mubr.bf16.mxu1 %v2786_v0  ;;  %v2767_v16 = vmul.f32 %v9479_v1, %v2727_v62  ;;  %v2728_v47 = vmul.f32 %v7593_v54, %v9428_v23 }
 0x734   :  { %v7595_v59 = vpop.eup %7594  ;;  %7604 = vrsqrt.f32 %v2670_v12  ;;  %v2671_v15 = vadd.f32 1.1920929e-07, %v2639_v58 }
 0x735   :  { %v2787_v17 = vpack.c.bf16 %v2767_v16, %v2766_v60  ;;  %v2729_v32 = vmul.f32 %v7595_v59, %v9438_v41  ;;  %v2768_v6 = vmul.f32 %v9479_v1, %v2728_v47  ;;  %v7116_v60 = vld [vmem:[#allocation10 + $0xa0] sm:$0xff]   ;;  %v7117_v16 = vld [vmem:[#allocation10 + $0xa8] sm:$0xff]   ;;  %v7118_v47 = vld [vmem:[#allocation10 + $0xb0] sm:$0xff]  }
 0x736   :  { %v7597_v52 = vpop.eup %7596  ;;  %7606 = vrsqrt.f32 %v2671_v15  ;;  %6757 = vmatprep.subr.bf16.mxu0 %v7116_v60  ;;  %v7119_v59 = vld [vmem:[#allocation10 + $0xb8] sm:$0xff]   ;;  %v9547_v15 = vld [vmem:[%s10666_s5 + $0x2] ss:$0 sm:$0xff] }
 0x737   :  { %6738 = vmatmul.mubr.bf16.gmra.mrb[84].mxu1 %v2787_v17  ;;  %v2769_v56 = vmul.f32 %v9479_v1, %v2729_v32  ;;  %v2730_v57 = vmul.f32 %v7597_v52, %v9435_v33  ;;  %6758 = vmatpush3.bf16.msra.mxu0 %v7116_v60 }
 0x738   :  { %v7599_v51 = vpop.eup %7598  ;;  %6759 = vmatprep.subr.bf16.mxu0 %v7117_v16 }
 0x739   :  { %v2788_v13 = vpack.c.bf16 %v2769_v56, %v2768_v6  ;;  %v2731_v27 = vmul.f32 %v7599_v51, %v9443_v29  ;;  %v2770_v50 = vmul.f32 %v9479_v1, %v2730_v57 }
 0x73a   :  { %v7601_v8 = vpop.eup %7600 }
 0x73b   :  { %6741 = vmatprep.mubr.bf16.mxu1 %v2788_v13  ;;  %v2771_v4 = vmul.f32 %v9479_v1, %v2731_v27  ;;  %v2732_v28 = vmul.f32 %v7601_v8, %v9452_v5  ;;  %6760 = vmatpush3.bf16.msra.mxu0 %v7117_v16 }
 0x73c   :  { %v7603_v53 = vpop.eup %7602  ;;  %6761 = vmatprep.subr.bf16.mxu0 %v7118_v47 }
 0x73d   :  { %v2789_v11 = vpack.c.bf16 %v2771_v4, %v2770_v50  ;;  %v2733_v22 = vmul.f32 %v7603_v53, %v9462_v30  ;;  %v2772_v31 = vmul.f32 %v9479_v1, %v2732_v28 }
 0x73e   :  { %v7605_v46 = vpop.eup %7604 }
 0x73f   :  { %6742 = vmatmul.mubr.bf16.gmra.mrb[88].mxu1 %v2789_v11  ;;  %v2773_v55 = vmul.f32 %v9479_v1, %v2733_v22  ;;  %v2734_v34 = vmul.f32 %v7605_v46, %v9459_v3  ;;  %6762 = vmatpush3.bf16.msra.mxu0 %v7118_v47 }
 0x740   :  { %v7607_v63 = vpop.eup %7606  ;;  %6763 = vmatprep.subr.bf16.mxu0 %v7119_v59 }
 0x741   :  { %v2790_v0 = vpack.c.bf16 %v2773_v55, %v2772_v31  ;;  %v2735_v62 = vmul.f32 %v7607_v63, %v9467_v43  ;;  %v2774_v54 = vmul.f32 %v9479_v1, %v2734_v34 }
 0x743   :  { %6745 = vmatprep.mubr.bf16.mxu1 %v2790_v0  ;;  %v2775_v12 = vmul.f32 %v9479_v1, %v2735_v62  ;;  %6764 = vmatpush3.bf16.msra.mxu0 %v7119_v59 }
 0x745   :  { %v2791_v58 = vpack.c.bf16 %v2775_v12, %v2774_v54 }
 0x747   :  { %6746 = vmatmul.mubr.bf16.gmra.mrb[92].mxu1 %v2791_v58 }
 0x7da   :  { %v6719_v1 = vpop.f32.mrb[64].mxu1 }
 0x7db   :  { %v9550_v17 = vadd.f32 %v6719_v1, %v9547_v15  ;;  %v2899_v32 = vpop.f32.mrb[65].mxu1 }
 0x7dc   :  { %v9553_v52 = vadd.f32 %v9547_v15, %v2899_v32  ;;  %v6720_v6 = vpop.f32.mrb[66].mxu1 }
 0x7dd   :  { %v6016_v56 = vmul.f32 -1.442695, %v9550_v17  ;;  %v2911_v57 = vadd.f32 %v6720_v6, %v9547_v15  ;;  %v2902_v51 = vpop.f32.mrb[67].mxu1 }
 0x7de   :  { %v6014_v13 = vmul.f32 -1.442695, %v9553_v52  ;;  %v2903_v27 = vadd.f32 %v9547_v15, %v2902_v51 }
 0x7df   :  { %7608 = vpow2.f32 %v6016_v56  ;;  %v6017_v8 = vmul.f32 -1.442695, %v2911_v57 }
 0x7e0   :  { %7610 = vpow2.f32 %v6014_v13  ;;  %v6015_v50 = vmul.f32 -1.442695, %v2903_v27 }
 0x7e1   :  { %7612 = vpow2.f32 %v6017_v8 }
 0x7e2   :  { %7614 = vpow2.f32 %v6015_v50 }
 0x7e8   :  { %v6723_v4 = vpop.f32.mrb[68].mxu1 }
 0x7e9   :  { %v7609_v28 = vpop.eup %7608  ;;  %v9560_v53 = vadd.f32 %v6723_v4, %v9547_v15  ;;  %v2915_v11 = vpop.f32.mrb[69].mxu1 }
 0x7ea   :  { %v7611_v22 = vpop.eup %7610  ;;  %v3124_v46 = vadd.f32 1.0, %v7609_v28  ;;  %v9563_v31 = vadd.f32 %v9547_v15, %v2915_v11  ;;  %v6724_v55 = vpop.f32.mrb[70].mxu1 }
 0x7eb   :  { %v7613_v34 = vpop.eup %7612  ;;  %v3122_v63 = vadd.f32 1.0, %v7611_v22  ;;  %v9566_v0 = vadd.f32 %v6724_v55, %v9547_v15  ;;  %v2918_v62 = vpop.f32.mrb[71].mxu1  ;;  %v6020_v58 = vmul.f32 -1.442695, %v9560_v53 }
 0x7ec   :  { %v7615_v54 = vpop.eup %7614  ;;  %7616 = vrcp.f32 %v3124_v46  ;;  %v3125_v12 = vadd.f32 1.0, %v7613_v34  ;;  %v9570_v60 = vadd.f32 %v9547_v15, %v2918_v62  ;;  %v6018_v47 = vmul.f32 -1.442695, %v9563_v31 }
 0x7ed   :  { %7618 = vrcp.f32 %v3122_v63  ;;  %v3123_v16 = vadd.f32 1.0, %v7615_v54  ;;  %v6021_v59 = vmul.f32 -1.442695, %v9566_v0 }
 0x7ee   :  { %7620 = vrcp.f32 %v3125_v12  ;;  %v6019_v1 = vmul.f32 -1.442695, %v9570_v60 }
 0x7ef   :  { %7622 = vrcp.f32 %v3123_v16 }
 0x7f0   :  { %7624 = vpow2.f32 %v6020_v58  ;;  %v6727_v32 = vpop.f32.mrb[72].mxu1 }
 0x7f1   :  { %7626 = vpow2.f32 %v6018_v47  ;;  %v9576_v6 = vadd.f32 %v6727_v32, %v9547_v15  ;;  %v2931_v56 = vpop.f32.mrb[73].mxu1 }
 0x7f2   :  { %7628 = vpow2.f32 %v6021_v59  ;;  %v9579_v51 = vadd.f32 %v9547_v15, %v2931_v56  ;;  %v6728_v13 = vpop.f32.mrb[74].mxu1 }
 0x7f3   :  { %7630 = vpow2.f32 %v6019_v1  ;;  %v6024_v8 = vmul.f32 -1.442695, %v9576_v6  ;;  %v9583_v50 = vadd.f32 %v6728_v13, %v9547_v15  ;;  %v2934_v4 = vpop.f32.mrb[75].mxu1 }
 0x7f4   :  { %v6022_v28 = vmul.f32 -1.442695, %v9579_v51  ;;  %v9587_v11 = vadd.f32 %v9547_v15, %v2934_v4 }
 0x7f5   :  { %7632 = vpow2.f32 %v6024_v8  ;;  %v6025_v22 = vmul.f32 -1.442695, %v9583_v50 }
 0x7f6   :  { %v7617_v46 = vpop.eup %7616  ;;  %7634 = vpow2.f32 %v6022_v28  ;;  %v6023_v55 = vmul.f32 -1.442695, %v9587_v11 }
 0x7f7   :  { %v7619_v34 = vpop.eup %7618  ;;  %7636 = vpow2.f32 %v6025_v22  ;;  %v3220_v54 = vmul.f32 %v7617_v46, %v9550_v17 }
 0x7f8   :  { %v7621_v63 = vpop.eup %7620  ;;  %7638 = vpow2.f32 %v6023_v55  ;;  %v3218_v16 = vmul.f32 %v7619_v34, %v9553_v52 }
 0x7f9   :  { %v7623_v62 = vpop.eup %7622  ;;  %v3221_v12 = vmul.f32 %v7621_v63, %v2911_v57 }
 0x7fa   :  { %v7625_v58 = vpop.eup %7624  ;;  %v3219_v47 = vmul.f32 %v7623_v62, %v2903_v27  ;;  %v6731_v59 = vpop.f32.mrb[76].mxu1 }
 0x7fb   :  { %v7627_v1 = vpop.eup %7626  ;;  %v3251_v32 = vpack.c.bf16 %v3221_v12, %v3220_v54  ;;  %v3128_v56 = vadd.f32 1.0, %v7625_v58  ;;  %v9594_v13 = vadd.f32 %v6731_v59, %v9547_v15  ;;  %v2947_v8 = vpop.f32.mrb[77].mxu1 }
 0x7fc   :  { %v7629_v4 = vpop.eup %7628  ;;  %v3126_v28 = vadd.f32 1.0, %v7627_v1  ;;  %v6732_v22 = vpop.f32.mrb[78].mxu1  ;;  %v3250_v55 = vpack.c.bf16 %v3219_v47, %v3218_v16  ;;  %v9598_v27 = vadd.f32 %v9547_v15, %v2947_v8 }
 0x7fd   :  { %v7631_v43 = vpop.eup %7630  ;;  %7640 = vrcp.f32 %v3128_v56  ;;  %v3129_v17 = vadd.f32 1.0, %v7629_v4  ;;  %v6028_v57 = vmul.f32 -1.442695, %v9594_v13  ;;  %v2950_v46 = vpop.f32.mrb[79].mxu1  ;;  %v9601_v63 = vadd.f32 %v6732_v22, %v9547_v15 }
 0x7fe   :  { %7642 = vrcp.f32 %v3126_v28  ;;  %v3127_v52 = vadd.f32 1.0, %v7631_v43  ;;  %6765 = vmatprep.mubr.bf16.mxu0 %v3250_v55  ;;  %v9604_v12 = vadd.f32 %v9547_v15, %v2950_v46  ;;  %v6026_v59 = vmul.f32 -1.442695, %v9598_v27 }
 0x7ff   :  { %v7633_v34 = vpop.eup %7632  ;;  %7644 = vrcp.f32 %v3129_v17  ;;  %6766 = vmatmul.mubr.bf16.vlgmr.msra.gmra.mrb[96].mxu0 %v3251_v32  ;;  %v6029_v8 = vmul.f32 -1.442695, %v9601_v63 }
 0x800   :  { %v7635_v62 = vpop.eup %7634  ;;  %7646 = vrcp.f32 %v3127_v52  ;;  %v3132_v54 = vadd.f32 1.0, %v7633_v34  ;;  %v6027_v28 = vmul.f32 -1.442695, %v9604_v12 }
 0x801   :  { %v7637_v58 = vpop.eup %7636  ;;  %v3130_v16 = vadd.f32 1.0, %v7635_v62  ;;  %7648 = vpow2.f32 %v6028_v57 }
 0x802   :  { %v7639_v43 = vpop.eup %7638  ;;  %7650 = vrcp.f32 %v3132_v54  ;;  %v3133_v47 = vadd.f32 1.0, %v7637_v58  ;;  %v6735_v1 = vpop.f32.mrb[80].mxu1 }
 0x803   :  { %7652 = vrcp.f32 %v3130_v16  ;;  %v3131_v56 = vadd.f32 1.0, %v7639_v43  ;;  %v9609_v32 = vadd.f32 %v6735_v1, %v9547_v15  ;;  %v2963_v4 = vpop.f32.mrb[81].mxu1 }
 0x804   :  { %7654 = vrcp.f32 %v3133_v47  ;;  %v9613_v22 = vadd.f32 %v9547_v15, %v2963_v4  ;;  %v6736_v55 = vpop.f32.mrb[82].mxu1 }
 0x805   :  { %7656 = vrcp.f32 %v3131_v56  ;;  %v6032_v17 = vmul.f32 -1.442695, %v9609_v32  ;;  %v9617_v57 = vadd.f32 %v6736_v55, %v9547_v15  ;;  %v2966_v46 = vpop.f32.mrb[83].mxu1 }
 0x806   :  { %7658 = vpow2.f32 %v6026_v59  ;;  %v6030_v52 = vmul.f32 -1.442695, %v9613_v22  ;;  %v9621_v34 = vadd.f32 %v9547_v15, %v2966_v46 }
 0x807   :  { %v7641_v62 = vpop.eup %7640  ;;  %7660 = vpow2.f32 %v6029_v8  ;;  %v6033_v54 = vmul.f32 -1.442695, %v9617_v57 }
 0x808   :  { %v7643_v58 = vpop.eup %7642  ;;  %7662 = vpow2.f32 %v6027_v28  ;;  %v6031_v16 = vmul.f32 -1.442695, %v9621_v34  ;;  %v3224_v1 = vmul.f32 %v7641_v62, %v9560_v53 }
 0x809   :  { %v7645_v43 = vpop.eup %7644  ;;  %7664 = vpow2.f32 %v6032_v17  ;;  %v3222_v55 = vmul.f32 %v7643_v58, %v9563_v31 }
 0x80a   :  { %v7647_v47 = vpop.eup %7646  ;;  %v3225_v59 = vmul.f32 %v7645_v43, %v9566_v0  ;;  %7666 = vpow2.f32 %v6030_v52  ;;  %v6739_v56 = vpop.f32.mrb[84].mxu1 }
 0x80b   :  { %v7649_v4 = vpop.eup %7648  ;;  %v3223_v8 = vmul.f32 %v7647_v47, %v9570_v60  ;;  %7668 = vpow2.f32 %v6033_v54  ;;  %v9630_v46 = vadd.f32 %v6739_v56, %v9547_v15  ;;  %v2979_v28 = vpop.f32.mrb[85].mxu1 }
 0x80c   :  { %v7651_v30 = vpop.eup %7650  ;;  %v3136_v3 = vadd.f32 1.0, %v7649_v4  ;;  %7670 = vpow2.f32 %v6031_v16  ;;  %v9633_v17 = vadd.f32 %v9547_v15, %v2979_v28  ;;  %v6740_v53 = vpop.f32.mrb[86].mxu1  ;;  %v3253_v0 = vpack.c.bf16 %v3225_v59, %v3224_v1 }
 0x80d   :  { %v7653_v52 = vpop.eup %7652  ;;  %v6036_v62 = vmul.f32 -1.442695, %v9630_v46  ;;  %v9637_v31 = vadd.f32 %v6740_v53, %v9547_v15  ;;  %v2982_v60 = vpop.f32.mrb[87].mxu1  ;;  %v3252_v54 = vpack.c.bf16 %v3223_v8, %v3222_v55  ;;  %v3228_v56 = vmul.f32 %v7651_v30, %v9576_v6 }
 0x80e   :  { %v7655_v58 = vpop.eup %7654  ;;  %7672 = vrcp.f32 %v3136_v3  ;;  %v6034_v43 = vmul.f32 -1.442695, %v9633_v17  ;;  %v9641_v47 = vadd.f32 %v9547_v15, %v2982_v60  ;;  %v3226_v28 = vmul.f32 %v7653_v52, %v9579_v51 }
 0x80f   :  { %v7657_v16 = vpop.eup %7656  ;;  %v3229_v1 = vmul.f32 %v7655_v58, %v9583_v50  ;;  %7674 = vpow2.f32 %v6036_v62  ;;  %v6037_v59 = vmul.f32 -1.442695, %v9637_v31  ;;  %6769 = vmatprep.mubr.bf16.mxu0 %v3252_v54 }
 0x810   :  { %v7659_v4 = vpop.eup %7658  ;;  %v3227_v55 = vmul.f32 %v7657_v16, %v9587_v11  ;;  %7676 = vpow2.f32 %v6034_v43  ;;  %v6035_v3 = vmul.f32 -1.442695, %v9641_v47  ;;  %6770 = vmatmul.mubr.bf16.gmra.mrb[100].mxu0 %v3253_v0 }
 0x811   :  { %v7661_v8 = vpop.eup %7660  ;;  %v3134_v53 = vadd.f32 1.0, %v7659_v4  ;;  %7678 = vpow2.f32 %v6037_v59  ;;  %v3255_v60 = vpack.c.bf16 %v3229_v1, %v3228_v56 }
 0x812   :  { %v7663_v30 = vpop.eup %7662  ;;  %v3137_v6 = vadd.f32 1.0, %v7661_v8  ;;  %7680 = vpow2.f32 %v6035_v3  ;;  %v6743_v50 = vpop.f32.mrb[88].mxu1  ;;  %v3254_v62 = vpack.c.bf16 %v3227_v55, %v3226_v28 }
 0x813   :  { %v7665_v58 = vpop.eup %7664  ;;  %7682 = vrcp.f32 %v3134_v53  ;;  %v3135_v54 = vadd.f32 1.0, %v7663_v30  ;;  %v9650_v51 = vadd.f32 %v6743_v50, %v9547_v15  ;;  %v2995_v11 = vpop.f32.mrb[89].mxu1 }
 0x814   :  { %v7667_v52 = vpop.eup %7666  ;;  %7684 = vrcp.f32 %v3137_v6  ;;  %v3140_v43 = vadd.f32 1.0, %v7665_v58  ;;  %v9653_v0 = vadd.f32 %v9547_v15, %v2995_v11  ;;  %v6744_v16 = vpop.f32.mrb[90].mxu1  ;;  %6773 = vmatprep.mubr.bf16.mxu0 %v3254_v62 }
 0x815   :  { %v7669_v56 = vpop.eup %7668  ;;  %7686 = vrcp.f32 %v3135_v54  ;;  %v3138_v1 = vadd.f32 1.0, %v7667_v52  ;;  %v2998_v59 = vpop.f32.mrb[91].mxu1  ;;  %v6040_v55 = vmul.f32 -1.442695, %v9650_v51  ;;  %v9658_v30 = vadd.f32 %v6744_v16, %v9547_v15 }
 0x816   :  { %v7671_v4 = vpop.eup %7670  ;;  %7688 = vrcp.f32 %v3140_v43  ;;  %v3141_v28 = vadd.f32 1.0, %v7669_v56  ;;  %v6038_v8 = vmul.f32 -1.442695, %v9653_v0  ;;  %v9661_v50 = vadd.f32 %v9547_v15, %v2998_v59 }
 0x817   :  { %7690 = vrcp.f32 %v3138_v1  ;;  %v3139_v3 = vadd.f32 1.0, %v7671_v4 }
 0x818   :  { %v7673_v53 = vpop.eup %7672  ;;  %7692 = vrcp.f32 %v3141_v28  ;;  %6774 = vmatmul.mubr.bf16.gmra.mrb[104].mxu0 %v3255_v60  ;;  %v6041_v60 = vmul.f32 -1.442695, %v9658_v30 }
 0x819   :  { %v7675_v6 = vpop.eup %7674  ;;  %7694 = vrcp.f32 %v3139_v3  ;;  %v6039_v3 = vmul.f32 -1.442695, %v9661_v50 }
 0x81a   :  { %v7677_v62 = vpop.eup %7676  ;;  %v3144_v58 = vadd.f32 1.0, %v7675_v6  ;;  %7696 = vpow2.f32 %v6040_v55  ;;  %v6747_v54 = vpop.f32.mrb[92].mxu1 }
 0x81b   :  { %v7679_v11 = vpop.eup %7678  ;;  %v3142_v52 = vadd.f32 1.0, %v7677_v62  ;;  %7698 = vpow2.f32 %v6038_v8  ;;  %v9664_v43 = vadd.f32 %v6747_v54, %v9547_v15  ;;  %v3011_v56 = vpop.f32.mrb[93].mxu1 }
 0x81c   :  { %v7681_v1 = vpop.eup %7680  ;;  %7700 = vrcp.f32 %v3144_v58  ;;  %v3145_v16 = vadd.f32 1.0, %v7679_v11  ;;  %v9668_v4 = vadd.f32 %v9547_v15, %v3011_v56  ;;  %v6748_v59 = vpop.f32.mrb[94].mxu1  ;;  %v3232_v56 = vmul.f32 %v7673_v53, %v9594_v13 }
 0x81d   :  { %v7683_v28 = vpop.eup %7682  ;;  %7702 = vrcp.f32 %v3142_v52  ;;  %v3143_v55 = vadd.f32 1.0, %v7681_v1  ;;  %v9672_v8 = vadd.f32 %v6748_v59, %v9547_v15  ;;  %v3014_v6 = vpop.f32.mrb[95].mxu1  ;;  %v6044_v58 = vmul.f32 -1.442695, %v9664_v43 }
 0x81e   :  { %v7685_v62 = vpop.eup %7684  ;;  %7704 = vrcp.f32 %v3145_v16  ;;  %v9676_v54 = vadd.f32 %v9547_v15, %v3014_v6  ;;  %v6042_v52 = vmul.f32 -1.442695, %v9668_v4  ;;  %v3230_v59 = vmul.f32 %v7683_v28, %v9598_v27 }
 0x81f   :  { %v7687_v11 = vpop.eup %7686  ;;  %v3233_v5 = vmul.f32 %v7685_v62, %v9601_v63  ;;  %7706 = vrcp.f32 %v3143_v55  ;;  %v6045_v16 = vmul.f32 -1.442695, %v9672_v8 }
 0x820   :  { %v7689_v1 = vpop.eup %7688  ;;  %v3231_v29 = vmul.f32 %v7687_v11, %v9604_v12  ;;  %7708 = vpow2.f32 %v6041_v60  ;;  %v6043_v15 = vmul.f32 -1.442695, %v9676_v54 }
 0x821   :  { %v7691_v41 = vpop.eup %7690  ;;  %7710 = vpow2.f32 %v6039_v3  ;;  %v3257_v6 = vpack.c.bf16 %v3233_v5, %v3232_v56  ;;  %v3236_v53 = vmul.f32 %v7689_v1, %v9609_v32 }
 0x822   :  { %v7693_v33 = vpop.eup %7692  ;;  %7712 = vpow2.f32 %v6044_v58  ;;  %v3256_v13 = vpack.c.bf16 %v3231_v29, %v3230_v59  ;;  %v3234_v12 = vmul.f32 %v7691_v41, %v9613_v22 }
 0x823   :  { %v7695_v63 = vpop.eup %7694  ;;  %v3237_v55 = vmul.f32 %v7693_v33, %v9617_v57  ;;  %7714 = vpow2.f32 %v6042_v52 }
 0x824   :  { %v7697_v27 = vpop.eup %7696  ;;  %v3235_v60 = vmul.f32 %v7695_v63, %v9621_v34  ;;  %7716 = vpow2.f32 %v6045_v16  ;;  %6777 = vmatprep.mubr.bf16.mxu0 %v3256_v13 }
 0x825   :  { %v7699_v28 = vpop.eup %7698  ;;  %7718 = vpow2.f32 %v6043_v15  ;;  %6778 = vmatmul.mubr.bf16.gmra.mrb[108].mxu0 %v3257_v6  ;;  %v3259_v5 = vpack.c.bf16 %v3237_v55, %v3236_v53  ;;  %v3148_v58 = vadd.f32 1.0, %v7697_v27 }
 0x826   :  { %v7701_v3 = vpop.eup %7700  ;;  %v3258_v62 = vpack.c.bf16 %v3235_v60, %v3234_v12  ;;  %v3146_v32 = vadd.f32 1.0, %v7699_v28 }
 0x827   :  { %v7703_v29 = vpop.eup %7702  ;;  %v3240_v57 = vmul.f32 %v7701_v3, %v9630_v46  ;;  %7720 = vrcp.f32 %v3148_v58 }
 0x828   :  { %v7705_v11 = vpop.eup %7704  ;;  %6781 = vmatprep.mubr.bf16.mxu0 %v3258_v62  ;;  %v3238_v34 = vmul.f32 %v7703_v29, %v9633_v17  ;;  %7722 = vrcp.f32 %v3146_v32 }
 0x829   :  { %v7707_v33 = vpop.eup %7706  ;;  %v3241_v41 = vmul.f32 %v7705_v11, %v9637_v31 }
 0x82a   :  { %v7709_v22 = vpop.eup %7708  ;;  %v3239_v56 = vmul.f32 %v7707_v33, %v9641_v47 }
 0x82b   :  { %v7711_v52 = vpop.eup %7710  ;;  %v3149_v1 = vadd.f32 1.0, %v7709_v22  ;;  %v3261_v59 = vpack.c.bf16 %v3241_v41, %v3240_v57 }
 0x82c   :  { %v7713_v16 = vpop.eup %7712  ;;  %v3147_v15 = vadd.f32 1.0, %v7711_v52  ;;  %v3260_v6 = vpack.c.bf16 %v3239_v56, %v3238_v34  ;;  %v7122_v52 = vld [vmem:[#allocation8 + $0xd0] sm:$0xff]  }
 0x82d   :  { %v7715_v13 = vpop.eup %7714  ;;  %7724 = vrcp.f32 %v3149_v1  ;;  %v3152_v63 = vadd.f32 1.0, %v7713_v16  ;;  %6782 = vmatmul.mubr.bf16.gmra.mrb[112].mxu0 %v3259_v5 }
 0x82e   :  { %v7717_v46 = vpop.eup %7716  ;;  %7726 = vrcp.f32 %v3147_v15  ;;  %v3150_v31 = vadd.f32 1.0, %v7715_v13  ;;  %6785 = vmatprep.mubr.bf16.mxu0 %v3260_v6 }
 0x82f   :  { %v7719_v53 = vpop.eup %7718  ;;  %7728 = vrcp.f32 %v3152_v63  ;;  %v3153_v17 = vadd.f32 1.0, %v7717_v46 }
 0x830   :  { %7730 = vrcp.f32 %v3150_v31  ;;  %v3151_v47 = vadd.f32 1.0, %v7719_v53 }
 0x831   :  { %7732 = vrcp.f32 %v3153_v17  ;;  %v7721_v55 = vpop.eup %7720 }
 0x832   :  { %7734 = vrcp.f32 %v3151_v47  ;;  %v7723_v27 = vpop.eup %7722  ;;  %v3244_v28 = vmul.f32 %v7721_v55, %v9650_v51 }
 0x833   :  { %v3242_v62 = vmul.f32 %v7723_v27, %v9653_v0  ;;  %v7120_v0 = vld [vmem:[#allocation8 + $0xc0] sm:$0xff]  }
 0x834   :  { %6797 = vmatprep.subr.bf16.mxu1 %v7120_v0 }
 0x835   :  { %6786 = vmatmul.mubr.bf16.gmra.mrb[116].mxu0 %v3261_v59  ;;  %6798 = vmatpush3.bf16.msra.mxu1 %v7120_v0 }
 0x837   :  { %v7725_v12 = vpop.eup %7724 }
 0x838   :  { %v7727_v60 = vpop.eup %7726  ;;  %v3245_v5 = vmul.f32 %v7725_v12, %v9658_v30 }
 0x839   :  { %v7729_v3 = vpop.eup %7728  ;;  %v3243_v29 = vmul.f32 %v7727_v60, %v9661_v50  ;;  %v7121_v50 = vld [vmem:[#allocation8 + $0xc8] sm:$0xff]  }
 0x83a   :  { %v7731_v58 = vpop.eup %7730  ;;  %v3263_v11 = vpack.c.bf16 %v3245_v5, %v3244_v28  ;;  %v3248_v41 = vmul.f32 %v7729_v3, %v9664_v43  ;;  %6799 = vmatprep.subr.bf16.mxu1 %v7121_v50  ;;  %v7123_v43 = vld [vmem:[#allocation8 + $0xd8] sm:$0xff]  }
 0x83b   :  { %v7733_v32 = vpop.eup %7732  ;;  %v3262_v33 = vpack.c.bf16 %v3243_v29, %v3242_v62  ;;  %v3246_v34 = vmul.f32 %v7731_v58, %v9668_v4  ;;  %6800 = vmatpush3.bf16.msra.mxu1 %v7121_v50  ;;  %v7124_v4 = vld [vmem:[#allocation8 + $0xe0] sm:$0xff]  }
 0x83c   :  { %v7735_v57 = vpop.eup %7734  ;;  %v3249_v22 = vmul.f32 %v7733_v32, %v9672_v8  ;;  %6801 = vmatprep.subr.bf16.mxu1 %v7122_v52  ;;  %v9704_v8 = vld [vmem:[%s10668_s7 + $0x2] ss:$0 sm:$0xff] }
 0x83d   :  { %v3247_v51 = vmul.f32 %v7735_v57, %v9676_v54  ;;  %6789 = vmatprep.mubr.bf16.mxu0 %v3262_v33 }
 0x83e   :  { %6790 = vmatmul.mubr.bf16.gmra.mrb[120].mxu0 %v3263_v11  ;;  %v3265_v30 = vpack.c.bf16 %v3249_v22, %v3248_v41 }
 0x83f   :  { %v3264_v56 = vpack.c.bf16 %v3247_v51, %v3246_v34  ;;  %6802 = vmatpush3.bf16.msra.mxu1 %v7122_v52  ;;  %v7125_v51 = vld [vmem:[#allocation8 + $0xe8] sm:$0xff]  }
 0x840   :  { %6803 = vmatprep.subr.bf16.mxu1 %v7123_v43 }
 0x841   :  { %6793 = vmatprep.mubr.bf16.mxu0 %v3264_v56 }
 0x843   :  { %6804 = vmatpush3.bf16.msra.mxu1 %v7123_v43 }
 0x844   :  { %6805 = vmatprep.subr.bf16.mxu1 %v7124_v4 }
 0x846   :  { %6794 = vmatmul.mubr.bf16.gmra.mrb[124].mxu0 %v3265_v30 }
 0x847   :  { %6806 = vmatpush3.bf16.msra.mxu1 %v7124_v4 }
 0x848   :  { %6807 = vmatprep.subr.bf16.mxu1 %v7125_v51 }
 0x84b   :  { %6808 = vmatpush3.bf16.msra.mxu1 %v7125_v51 }
 0x8d2   :  { %v6767_v54 = vpop.f32.mrb[96].mxu0 }
 0x8d3   :  { %v3373_v1 = vpop.f32.mrb[97].mxu0  ;;  %v3382_v59 = vadd.f32 %v6767_v54, %v9704_v8 }
 0x8d4   :  { %v3374_v16 = vadd.f32 %v9704_v8, %v3373_v1  ;;  %v6768_v15 = vpop.f32.mrb[98].mxu0 }
 0x8d5   :  { %v3376_v6 = vpop.f32.mrb[99].mxu0  ;;  %v3385_v63 = vadd.f32 %v6768_v15, %v9704_v8  ;;  %v9714_v31 = vadd.f32 %v3382_v59, %v9291_v26 }
 0x8d6   :  { %v9709_v13 = vadd.f32 %v3374_v16, %v9286_v14  ;;  %v3377_v46 = vadd.f32 %v9704_v8, %v3376_v6 }
 0x8d7   :  { %v9722_v47 = vadd.f32 %v3385_v63, %v9299_v20  ;;  %v3534_v55 = vmul.f32 %v9714_v31, %v9714_v31 }
 0x8d8   :  { %v9717_v53 = vadd.f32 %v3377_v46, %v9294_v21  ;;  %v3532_v17 = vmul.f32 %v9709_v13, %v9709_v13 }
 0x8d9   :  { %v3535_v26 = vmul.f32 %v9722_v47, %v9722_v47 }
 0x8da   :  { %3564 = vadd.xlane.f32.xlu0 %v3532_v17  ;;  %v3533_v14 = vmul.f32 %v9717_v53, %v9717_v53 }
 0x8dc   :  { %3566 = vadd.xlane.f32.xlu1 %v3533_v14 }
 0x8de   :  { %3568 = vadd.xlane.f32.xlu0 %v3534_v55 }
 0x8e0   :  { %3570 = vadd.xlane.f32.xlu1 %v3535_v26  ;;  %v7126_v26 = vld [vmem:[#allocation8 + $0xf0] sm:$0xff]  }
 0x8e1   :  { %6809 = vmatprep.subr.bf16.mxu1 %v7126_v26 }
 0x8e2   :  { %6810 = vmatpush3.bf16.msra.mxu1 %v7126_v26  ;;  %v10724_v26 = vld [vmem:[#allocation24_spill] sm:$0xff] }
 0x8e3   :  { %v6771_v21 = vpop.f32.mrb[100].mxu0 }
 0x8e4   :  { %v3389_v27 = vpop.f32.mrb[101].mxu0  ;;  %v3398_v12 = vadd.f32 %v6771_v21, %v9704_v8 }
 0x8e5   :  { %v3390_v20 = vadd.f32 %v9704_v8, %v3389_v27  ;;  %v6772_v60 = vpop.f32.mrb[102].mxu0 }
 0x8e6   :  { %v3392_v28 = vpop.f32.mrb[103].mxu0  ;;  %v3401_v3 = vadd.f32 %v6772_v60, %v9704_v8  ;;  %v9738_v29 = vadd.f32 %v3398_v12, %v9315_v45 }
 0x8e7   :  { %v9733_v5 = vadd.f32 %v3390_v20, %v9310_v7  ;;  %v3393_v62 = vadd.f32 %v9704_v8, %v3392_v28 }
 0x8e8   :  { %v9746_v32 = vadd.f32 %v3401_v3, %v9323_v48 }
 0x8e9   :  { %v9741_v58 = vadd.f32 %v3393_v62, %v9318_v35  ;;  %v3536_v11 = vmul.f32 %v9733_v5, %v9733_v5  ;;  %v3538_v35 = vmul.f32 %v9738_v29, %v9738_v29 }
 0x8ea   :  { %v3539_v0 = vmul.f32 %v9746_v32, %v9746_v32 }
 0x8eb   :  { %3572 = vadd.xlane.f32.xlu0 %v3536_v11  ;;  %v6775_v33 = vpop.f32.mrb[104].mxu0  ;;  %v3537_v7 = vmul.f32 %v9741_v58, %v9741_v58 }
 0x8ec   :  { %v3405_v57 = vpop.f32.mrb[105].mxu0  ;;  %v3414_v41 = vadd.f32 %v6775_v33, %v9704_v8 }
 0x8ed   :  { %v3406_v45 = vadd.f32 %v9704_v8, %v3405_v57  ;;  %3574 = vadd.xlane.f32.xlu1 %v3537_v7  ;;  %v6776_v22 = vpop.f32.mrb[106].mxu0 }
 0x8ee   :  { %v3408_v34 = vpop.f32.mrb[107].mxu0  ;;  %v3417_v30 = vadd.f32 %v6776_v22, %v9704_v8  ;;  %v9762_v50 = vadd.f32 %v3414_v41, %v9339_v10 }
 0x8ef   :  { %v9755_v48 = vadd.f32 %v3406_v45, %v9332_v19  ;;  %v3409_v56 = vadd.f32 %v9704_v8, %v3408_v34  ;;  %3576 = vadd.xlane.f32.xlu0 %v3538_v35 }
 0x8f0   :  { %v9770_v43 = vadd.f32 %v3417_v30, %v9347_v49  ;;  %v3542_v10 = vmul.f32 %v9762_v50, %v9762_v50 }
 0x8f1   :  { %v9765_v52 = vadd.f32 %v3409_v56, %v9342_v2  ;;  %3578 = vadd.xlane.f32.xlu1 %v3539_v0  ;;  %v3540_v19 = vmul.f32 %v9755_v48, %v9755_v48 }
 0x8f2   :  { %v3543_v2 = vmul.f32 %v9770_v43, %v9770_v43 }
 0x8f3   :  { %3580 = vadd.xlane.f32.xlu0 %v3540_v19  ;;  %v3541_v4 = vmul.f32 %v9765_v52, %v9765_v52 }
 0x8f5   :  { %3582 = vadd.xlane.f32.xlu1 %v3541_v4 }
 0x8f7   :  { %3584 = vadd.xlane.f32.xlu0 %v3542_v10 }
 0x8f8   :  { %v6779_v54 = vpop.f32.mrb[108].mxu0 }
 0x8f9   :  { %v3421_v1 = vpop.f32.mrb[109].mxu0  ;;  %3586 = vadd.xlane.f32.xlu1 %v3543_v2  ;;  %v3430_v59 = vadd.f32 %v6779_v54, %v9704_v8 }
 0x8fa   :  { %v3422_v49 = vadd.f32 %v9704_v8, %v3421_v1  ;;  %v6780_v16 = vpop.f32.mrb[110].mxu0 }
 0x8fb   :  { %v3424_v15 = vpop.f32.mrb[111].mxu0  ;;  %v3433_v63 = vadd.f32 %v6780_v16, %v9704_v8  ;;  %v9786_v17 = vadd.f32 %v3430_v59, %v9363_v24 }
 0x8fc   :  { %v9781_v6 = vadd.f32 %v3422_v49, %v9358_v42  ;;  %v3425_v46 = vadd.f32 %v9704_v8, %v3424_v15 }
 0x8fd   :  { %v9794_v21 = vadd.f32 %v3433_v63, %v9371_v39  ;;  %v3546_v60 = vmul.f32 %v9786_v17, %v9786_v17 }
 0x8fe   :  { %v9789_v14 = vadd.f32 %v3425_v46, %v9366_v25  ;;  %v3544_v55 = vmul.f32 %v9781_v6, %v9781_v6 }
 0x8ff   :  { %v3547_v11 = vmul.f32 %v9794_v21, %v9794_v21 }
 0x900   :  { %3588 = vadd.xlane.f32.xlu0 %v3544_v55  ;;  %v6783_v42 = vpop.f32.mrb[112].mxu0  ;;  %v3545_v27 = vmul.f32 %v9789_v14, %v9789_v14 }
 0x901   :  { %v3437_v12 = vpop.f32.mrb[113].mxu0  ;;  %v3446_v24 = vadd.f32 %v6783_v42, %v9704_v8 }
 0x902   :  { %v3438_v20 = vadd.f32 %v9704_v8, %v3437_v12  ;;  %3590 = vadd.xlane.f32.xlu1 %v3545_v27  ;;  %v6784_v25 = vpop.f32.mrb[114].mxu0  ;;  %v10725_v27 = vld [vmem:[#allocation25_spill] sm:$0xff] }
 0x903   :  { %v3440_v28 = vpop.f32.mrb[115].mxu0  ;;  %v3449_v3 = vadd.f32 %v6784_v25, %v9704_v8  ;;  %v9810_v33 = vadd.f32 %v3446_v24, %v9387_v40 }
 0x904   :  { %v9803_v39 = vadd.f32 %v3438_v20, %v9381_v44  ;;  %v3441_v62 = vadd.f32 %v9704_v8, %v3440_v28  ;;  %3592 = vadd.xlane.f32.xlu0 %v3546_v60  ;;  %v7127_v44 = vld [vmem:[#allocation8 + $0xf8] sm:$0xff]   ;;  %v10727_v20 = vld [vmem:[#allocation19_spill] sm:$0xff] }
 0x905   :  { %v9818_v41 = vadd.f32 %v3449_v3, %v9395_v18  ;;  %6811 = vmatprep.subr.bf16.mxu1 %v7127_v44  ;;  %v3550_v51 = vmul.f32 %v9810_v33, %v9810_v33 }
 0x906   :  { %v9813_v7 = vadd.f32 %v3441_v62, %v9390_v38  ;;  %3594 = vadd.xlane.f32.xlu1 %v3547_v11  ;;  %v3548_v57 = vmul.f32 %v9803_v39, %v9803_v39  ;;  %6812 = vmatpush3.bf16.msra.mxu1 %v7127_v44 }
 0x907   :  { %v3551_v19 = vmul.f32 %v9818_v41, %v9818_v41 }
 0x908   :  { %3596 = vadd.xlane.f32.xlu0 %v3548_v57  ;;  %v6787_v45 = vpop.f32.mrb[116].mxu0  ;;  %v3549_v22 = vmul.f32 %v9813_v7, %v9813_v7 }
 0x909   :  { %v3453_v35 = vpop.f32.mrb[117].mxu0  ;;  %v3462_v40 = vadd.f32 %v6787_v45, %v9704_v8  ;;  %v10729_v45 = vld [vmem:[#allocation20_spill] sm:$0xff] }
 0x90a   :  { %v3454_v38 = vadd.f32 %v9704_v8, %v3453_v35  ;;  %3598 = vadd.xlane.f32.xlu1 %v3549_v22  ;;  %v6788_v34 = vpop.f32.mrb[118].mxu0 }
 0x90b   :  { %v3456_v30 = vpop.f32.mrb[119].mxu0  ;;  %v3465_v56 = vadd.f32 %v6788_v34, %v9704_v8  ;;  %v9834_v4 = vadd.f32 %v3462_v40, %v9411_v61  ;;  %v10731_v34 = vld [vmem:[#allocation21_spill] sm:$0xff] }
 0x90c   :  { %v9827_v18 = vadd.f32 %v3454_v38, %v9406_v37  ;;  %v3457_v0 = vadd.f32 %v9704_v8, %v3456_v30  ;;  %3600 = vadd.xlane.f32.xlu0 %v3550_v51  ;;  %v10733_v30 = vld [vmem:[#allocation22_spill] sm:$0xff] }
 0x90d   :  { %v9842_v37 = vadd.f32 %v3465_v56, %v9419_v36  ;;  %v3554_v61 = vmul.f32 %v9834_v4, %v9834_v4 }
 0x90e   :  { %v9837_v10 = vadd.f32 %v3457_v0, %v9414_v9  ;;  %3602 = vadd.xlane.f32.xlu1 %v3551_v19  ;;  %v3552_v2 = vmul.f32 %v9827_v18, %v9827_v18  ;;  %v10735_v19 = vld [vmem:[#allocation23_spill] sm:$0xff] }
 0x90f   :  { %v3555_v36 = vmul.f32 %v9842_v37, %v9842_v37 }
 0x910   :  { %3604 = vadd.xlane.f32.xlu0 %v3552_v2  ;;  %v3553_v54 = vmul.f32 %v9837_v10, %v9837_v10 }
 0x911   :  { %v6791_v1 = vpop.f32.mrb[120].mxu0 }
 0x912   :  { %v3469_v59 = vpop.f32.mrb[121].mxu0  ;;  %3606 = vadd.xlane.f32.xlu1 %v3553_v54  ;;  %v3478_v9 = vadd.f32 %v6791_v1, %v9704_v8 }
 0x913   :  { %v3470_v49 = vadd.f32 %v9704_v8, %v3469_v59  ;;  %v6792_v16 = vpop.f32.mrb[122].mxu0  ;;  %v7128_v59 = vld [vmem:[#allocation10 + $0xc0] sm:$0xff]  }
 0x914   :  { %v3472_v15 = vpop.f32.mrb[123].mxu0  ;;  %3608 = vadd.xlane.f32.xlu0 %v3554_v61  ;;  %v3481_v46 = vadd.f32 %v6792_v16, %v9704_v8  ;;  %v9858_v42 = vadd.f32 %v3478_v9, %v10724_v26  ;;  %v7129_v61 = vld [vmem:[#allocation10 + $0xc8] sm:$0xff]   ;;  %6845 = vmatprep.subr.bf16.mxu0 %v7128_v59  ;;  %v7130_v9 = vld [vmem:[#allocation10 + $0xd0] sm:$0xff]  }
 0x915   :  { %v9853_v63 = vadd.f32 %v3470_v49, %v9428_v23  ;;  %v3473_v55 = vadd.f32 %v9704_v8, %v3472_v15  ;;  %6846 = vmatpush3.bf16.msra.mxu0 %v7128_v59  ;;  %v7131_v49 = vld [vmem:[#allocation10 + $0xd8] sm:$0xff]  }
 0x916   :  { %3610 = vadd.xlane.f32.xlu1 %v3555_v36  ;;  %v9866_v25 = vadd.f32 %v3481_v46, %v10727_v20  ;;  %v3558_v57 = vmul.f32 %v9858_v42, %v9858_v42  ;;  %6847 = vmatprep.subr.bf16.mxu0 %v7129_v61 }
 0x917   :  { %v9861_v12 = vadd.f32 %v3473_v55, %v10725_v27  ;;  %v3556_v24 = vmul.f32 %v9853_v63, %v9853_v63 }
 0x918   :  { %10728 = vst [vmem:[#allocation25_spill] sm:$0xff] %v9866_v25  ;;  %v3559_v38 = vmul.f32 %v9866_v25, %v9866_v25 }
 0x919   :  { %10726 = vst [vmem:[#allocation24_spill] sm:$0xff] %v9861_v12  ;;  %3612 = vadd.xlane.f32.xlu0 %v3556_v24  ;;  %v6795_v23 = vpop.f32.mrb[124].mxu0  ;;  %v3557_v60 = vmul.f32 %v9861_v12, %v9861_v12  ;;  %6848 = vmatpush3.bf16.msra.mxu0 %v7129_v61 }
 0x91a   :  { %v3485_v28 = vpop.f32.mrb[125].mxu0  ;;  %v3494_v3 = vadd.f32 %v6795_v23, %v9704_v8  ;;  %6849 = vmatprep.subr.bf16.mxu0 %v7130_v9 }
 0x91b   :  { %v3486_v62 = vadd.f32 %v9704_v8, %v3485_v28  ;;  %3614 = vadd.xlane.f32.xlu1 %v3557_v60  ;;  %v6796_v11 = vpop.f32.mrb[126].mxu0 }
 0x91c   :  { %v3488_v44 = vpop.f32.mrb[127].mxu0  ;;  %v3497_v35 = vadd.f32 %v6796_v11, %v9704_v8  ;;  %v9882_v51 = vadd.f32 %v3494_v3, %v10731_v34 }
 0x91d   :  { %v9875_v22 = vadd.f32 %v3486_v62, %v10729_v45  ;;  %v3489_v40 = vadd.f32 %v9704_v8, %v3488_v44  ;;  %3616 = vadd.xlane.f32.xlu0 %v3558_v57  ;;  %6850 = vmatpush3.bf16.msra.mxu0 %v7130_v9 }
 0x91e   :  { %10732 = vst [vmem:[#allocation20_spill] sm:$0xff] %v9882_v51  ;;  %v9890_v2 = vadd.f32 %v3497_v35, %v10735_v19  ;;  %v3562_v54 = vmul.f32 %v9882_v51, %v9882_v51  ;;  %6851 = vmatprep.subr.bf16.mxu0 %v7131_v49  ;;  %v9903_v35 = vld [vmem:[%s10664_s3 + $0x3] ss:$0 sm:$0xff] }
 0x91f   :  { %10730 = vst [vmem:[#allocation19_spill] sm:$0xff] %v9875_v22  ;;  %v9885_v56 = vadd.f32 %v3489_v40, %v10733_v30  ;;  %3618 = vadd.xlane.f32.xlu1 %v3559_v38  ;;  %v3560_v0 = vmul.f32 %v9875_v22, %v9875_v22 }
 0x920   :  { %10736 = vst [vmem:[#allocation22_spill] sm:$0xff] %v9890_v2  ;;  %v3563_v1 = vmul.f32 %v9890_v2, %v9890_v2 }
 0x921   :  { %10734 = vst [vmem:[#allocation21_spill] sm:$0xff] %v9885_v56  ;;  %3620 = vadd.xlane.f32.xlu0 %v3560_v0  ;;  %v3561_v8 = vmul.f32 %v9885_v56, %v9885_v56  ;;  %6852 = vmatpush3.bf16.msra.mxu0 %v7131_v49 }
 0x923   :  { %3622 = vadd.xlane.f32.xlu1 %v3561_v8 }
 0x925   :  { %3624 = vadd.xlane.f32.xlu0 %v3562_v54 }
 0x927   :  { %3626 = vadd.xlane.f32.xlu1 %v3563_v1 }
 0x967   :  { %v3565_v16 = vpop.xlane.xlu0 %3564 }
 0x968   :  { %v3628_v15 = vmul.f32 0.03125, %v3565_v16 }
 0x969   :  { %v3567_v36 = vpop.xlane.xlu1 %3566 }
 0x96a   :  { %v3660_v46 = vadd.f32 1.1920929e-07, %v3628_v15  ;;  %v3629_v55 = vmul.f32 0.03125, %v3567_v36 }
 0x96b   :  { %v3569_v26 = vpop.xlane.xlu0 %3568 }
 0x96c   :  { %7736 = vrsqrt.f32 %v3660_v46  ;;  %v3661_v27 = vadd.f32 1.1920929e-07, %v3629_v55  ;;  %v3630_v24 = vmul.f32 0.03125, %v3569_v26 }
 0x96d   :  { %v3571_v20 = vpop.xlane.xlu1 %3570 }
 0x96e   :  { %7738 = vrsqrt.f32 %v3661_v27  ;;  %v3662_v23 = vadd.f32 1.1920929e-07, %v3630_v24  ;;  %v3631_v60 = vmul.f32 0.03125, %v3571_v20 }
 0x970   :  { %7740 = vrsqrt.f32 %v3662_v23  ;;  %v3663_v28 = vadd.f32 1.1920929e-07, %v3631_v60 }
 0x972   :  { %7742 = vrsqrt.f32 %v3663_v28 }
 0x976   :  { %v7737_v3 = vpop.eup %7736 }
 0x977   :  { %v3724_v57 = vmul.f32 %v7737_v3, %v9709_v13 }
 0x978   :  { %v7739_v62 = vpop.eup %7738  ;;  %v3573_v11 = vpop.xlane.xlu0 %3572 }
 0x979   :  { %v3632_v44 = vmul.f32 0.03125, %v3573_v11  ;;  %v3725_v45 = vmul.f32 %v7739_v62, %v9717_v53  ;;  %v3764_v1 = vmul.f32 %v9903_v35, %v3724_v57 }
 0x97a   :  { %v7741_v40 = vpop.eup %7740  ;;  %v3575_v38 = vpop.xlane.xlu1 %3574 }
 0x97b   :  { %v3726_v34 = vmul.f32 %v7741_v40, %v9714_v31  ;;  %v3664_v30 = vadd.f32 1.1920929e-07, %v3632_v44  ;;  %v3633_v0 = vmul.f32 0.03125, %v3575_v38  ;;  %v3765_v19 = vmul.f32 %v9903_v35, %v3725_v45 }
 0x97c   :  { %v7743_v8 = vpop.eup %7742  ;;  %v3577_v54 = vpop.xlane.xlu0 %3576 }
 0x97d   :  { %v3727_v59 = vmul.f32 %v7743_v8, %v9722_v47  ;;  %7744 = vrsqrt.f32 %v3664_v30  ;;  %v3665_v61 = vadd.f32 1.1920929e-07, %v3633_v0  ;;  %v3634_v9 = vmul.f32 0.03125, %v3577_v54 }
 0x97e   :  { %v3579_v49 = vpop.xlane.xlu1 %3578  ;;  %v3796_v16 = vpack.c.bf16 %v3765_v19, %v3764_v1  ;;  %v3766_v15 = vmul.f32 %v9903_v35, %v3726_v34 }
 0x97f   :  { %7746 = vrsqrt.f32 %v3665_v61  ;;  %v3666_v36 = vadd.f32 1.1920929e-07, %v3634_v9  ;;  %v3635_v46 = vmul.f32 0.03125, %v3579_v49  ;;  %v3767_v55 = vmul.f32 %v9903_v35, %v3727_v59 }
 0x980   :  { %v3581_v26 = vpop.xlane.xlu0 %3580  ;;  %6813 = vmatprep.mubr.bf16.mxu1 %v3796_v16 }
 0x981   :  { %7748 = vrsqrt.f32 %v3666_v36  ;;  %v3667_v27 = vadd.f32 1.1920929e-07, %v3635_v46  ;;  %v3636_v24 = vmul.f32 0.03125, %v3581_v26  ;;  %v3797_v20 = vpack.c.bf16 %v3767_v55, %v3766_v15 }
 0x982   :  { %v3583_v23 = vpop.xlane.xlu1 %3582 }
 0x983   :  { %7750 = vrsqrt.f32 %v3667_v27  ;;  %v3668_v60 = vadd.f32 1.1920929e-07, %v3636_v24  ;;  %v3637_v28 = vmul.f32 0.03125, %v3583_v23  ;;  %6814 = vmatmul.mubr.bf16.vlgmr.msra.gmra.mrb[96].mxu1 %v3797_v20 }
 0x984   :  { %v3585_v3 = vpop.xlane.xlu0 %3584 }
 0x985   :  { %7752 = vrsqrt.f32 %v3668_v60  ;;  %v3669_v62 = vadd.f32 1.1920929e-07, %v3637_v28  ;;  %v3638_v11 = vmul.f32 0.03125, %v3585_v3 }
 0x986   :  { %v3587_v57 = vpop.xlane.xlu1 %3586 }
 0x987   :  { %v7745_v44 = vpop.eup %7744  ;;  %7754 = vrsqrt.f32 %v3669_v62  ;;  %v3670_v45 = vadd.f32 1.1920929e-07, %v3638_v11  ;;  %v3639_v40 = vmul.f32 0.03125, %v3587_v57 }
 0x988   :  { %v3728_v38 = vmul.f32 %v7745_v44, %v9733_v5 }
 0x989   :  { %v7747_v34 = vpop.eup %7746  ;;  %7756 = vrsqrt.f32 %v3670_v45  ;;  %v3671_v30 = vadd.f32 1.1920929e-07, %v3639_v40 }
 0x98a   :  { %v3729_v0 = vmul.f32 %v7747_v34, %v9741_v58  ;;  %v3768_v8 = vmul.f32 %v9903_v35, %v3728_v38 }
 0x98b   :  { %v7749_v19 = vpop.eup %7748  ;;  %7758 = vrsqrt.f32 %v3671_v30 }
 0x98c   :  { %v3769_v54 = vmul.f32 %v9903_v35, %v3729_v0  ;;  %v3730_v1 = vmul.f32 %v7749_v19, %v9738_v29 }
 0x98d   :  { %v7751_v59 = vpop.eup %7750  ;;  %v3589_v61 = vpop.xlane.xlu0 %3588 }
 0x98e   :  { %v3640_v9 = vmul.f32 0.03125, %v3589_v61  ;;  %v3798_v49 = vpack.c.bf16 %v3769_v54, %v3768_v8  ;;  %v3731_v16 = vmul.f32 %v7751_v59, %v9746_v32  ;;  %v3770_v26 = vmul.f32 %v9903_v35, %v3730_v1 }
 0x98f   :  { %v7753_v15 = vpop.eup %7752  ;;  %v3591_v36 = vpop.xlane.xlu1 %3590 }
 0x990   :  { %v3672_v46 = vadd.f32 1.1920929e-07, %v3640_v9  ;;  %v3641_v55 = vmul.f32 0.03125, %v3591_v36  ;;  %6817 = vmatprep.mubr.bf16.mxu1 %v3798_v49  ;;  %v3771_v27 = vmul.f32 %v9903_v35, %v3731_v16  ;;  %v3732_v23 = vmul.f32 %v7753_v15, %v9755_v48 }
 0x991   :  { %v7755_v24 = vpop.eup %7754  ;;  %v3593_v20 = vpop.xlane.xlu0 %3592 }
 0x992   :  { %7760 = vrsqrt.f32 %v3672_v46  ;;  %v3673_v60 = vadd.f32 1.1920929e-07, %v3641_v55  ;;  %v3642_v28 = vmul.f32 0.03125, %v3593_v20  ;;  %v3799_v3 = vpack.c.bf16 %v3771_v27, %v3770_v26 }
 0x993   :  { %v7757_v62 = vpop.eup %7756  ;;  %v3595_v11 = vpop.xlane.xlu1 %3594  ;;  %v3733_v57 = vmul.f32 %v7755_v24, %v9765_v52  ;;  %v3772_v30 = vmul.f32 %v9903_v35, %v3732_v23 }
 0x994   :  { %7762 = vrsqrt.f32 %v3673_v60  ;;  %v3674_v44 = vadd.f32 1.1920929e-07, %v3642_v28  ;;  %v3643_v45 = vmul.f32 0.03125, %v3595_v11  ;;  %6818 = vmatmul.mubr.bf16.gmra.mrb[100].mxu1 %v3799_v3  ;;  %v3734_v40 = vmul.f32 %v7757_v62, %v9762_v50 }
 0x995   :  { %v7759_v38 = vpop.eup %7758  ;;  %v3597_v34 = vpop.xlane.xlu0 %3596  ;;  %v3773_v0 = vmul.f32 %v9903_v35, %v3733_v57 }
 0x996   :  { %7764 = vrsqrt.f32 %v3674_v44  ;;  %v3675_v19 = vadd.f32 1.1920929e-07, %v3643_v45  ;;  %v3644_v8 = vmul.f32 0.03125, %v3597_v34  ;;  %v3735_v54 = vmul.f32 %v7759_v38, %v9770_v43 }
 0x997   :  { %v3599_v1 = vpop.xlane.xlu1 %3598  ;;  %v3800_v59 = vpack.c.bf16 %v3773_v0, %v3772_v30  ;;  %v3774_v61 = vmul.f32 %v9903_v35, %v3734_v40 }
 0x998   :  { %7766 = vrsqrt.f32 %v3675_v19  ;;  %v3676_v9 = vadd.f32 1.1920929e-07, %v3644_v8  ;;  %v3645_v49 = vmul.f32 0.03125, %v3599_v1  ;;  %v3775_v16 = vmul.f32 %v9903_v35, %v3735_v54 }
 0x999   :  { %v3601_v15 = vpop.xlane.xlu0 %3600  ;;  %6821 = vmatprep.mubr.bf16.mxu1 %v3800_v59 }
 0x99a   :  { %7768 = vrsqrt.f32 %v3676_v9  ;;  %v3677_v36 = vadd.f32 1.1920929e-07, %v3645_v49  ;;  %v3646_v46 = vmul.f32 0.03125, %v3601_v15  ;;  %v3801_v55 = vpack.c.bf16 %v3775_v16, %v3774_v61 }
 0x99b   :  { %v3603_v26 = vpop.xlane.xlu1 %3602 }
 0x99c   :  { %v7761_v27 = vpop.eup %7760  ;;  %7770 = vrsqrt.f32 %v3677_v36  ;;  %v3678_v24 = vadd.f32 1.1920929e-07, %v3646_v46  ;;  %v3647_v20 = vmul.f32 0.03125, %v3603_v26  ;;  %6822 = vmatmul.mubr.bf16.gmra.mrb[104].mxu1 %v3801_v55 }
 0x99d   :  { %v3605_v23 = vpop.xlane.xlu0 %3604  ;;  %v3736_v60 = vmul.f32 %v7761_v27, %v9781_v6 }
 0x99e   :  { %v7763_v28 = vpop.eup %7762  ;;  %7772 = vrsqrt.f32 %v3678_v24  ;;  %v3679_v3 = vadd.f32 1.1920929e-07, %v3647_v20  ;;  %v3648_v62 = vmul.f32 0.03125, %v3605_v23 }
 0x99f   :  { %v3607_v11 = vpop.xlane.xlu1 %3606  ;;  %v3737_v57 = vmul.f32 %v7763_v28, %v9789_v14  ;;  %v3776_v34 = vmul.f32 %v9903_v35, %v3736_v60 }
 0x9a0   :  { %v7765_v44 = vpop.eup %7764  ;;  %7774 = vrsqrt.f32 %v3679_v3  ;;  %v3680_v45 = vadd.f32 1.1920929e-07, %v3648_v62  ;;  %v3649_v40 = vmul.f32 0.03125, %v3607_v11 }
 0x9a1   :  { %v3609_v38 = vpop.xlane.xlu0 %3608  ;;  %v3777_v30 = vmul.f32 %v9903_v35, %v3737_v57  ;;  %v3738_v0 = vmul.f32 %v7765_v44, %v9786_v17 }
 0x9a2   :  { %v7767_v19 = vpop.eup %7766  ;;  %7776 = vrsqrt.f32 %v3680_v45  ;;  %v3681_v8 = vadd.f32 1.1920929e-07, %v3649_v40  ;;  %v3650_v54 = vmul.f32 0.03125, %v3609_v38 }
 0x9a3   :  { %v3611_v1 = vpop.xlane.xlu1 %3610  ;;  %v3802_v59 = vpack.c.bf16 %v3777_v30, %v3776_v34  ;;  %v3739_v61 = vmul.f32 %v7767_v19, %v9794_v21  ;;  %v3778_v15 = vmul.f32 %v9903_v35, %v3738_v0 }
 0x9a4   :  { %v7769_v9 = vpop.eup %7768  ;;  %7778 = vrsqrt.f32 %v3681_v8  ;;  %v3682_v49 = vadd.f32 1.1920929e-07, %v3650_v54  ;;  %v3651_v16 = vmul.f32 0.03125, %v3611_v1 }
 0x9a5   :  { %6825 = vmatprep.mubr.bf16.mxu1 %v3802_v59  ;;  %v3779_v36 = vmul.f32 %v9903_v35, %v3739_v61  ;;  %v3740_v46 = vmul.f32 %v7769_v9, %v9803_v39 }
 0x9a6   :  { %v7771_v55 = vpop.eup %7770  ;;  %7780 = vrsqrt.f32 %v3682_v49  ;;  %v3683_v26 = vadd.f32 1.1920929e-07, %v3651_v16  ;;  %v3613_v27 = vpop.xlane.xlu0 %3612 }
 0x9a7   :  { %v3652_v24 = vmul.f32 0.03125, %v3613_v27  ;;  %v3803_v20 = vpack.c.bf16 %v3779_v36, %v3778_v15  ;;  %v3741_v23 = vmul.f32 %v7771_v55, %v9813_v7  ;;  %v3780_v11 = vmul.f32 %v9903_v35, %v3740_v46 }
 0x9a8   :  { %v7773_v60 = vpop.eup %7772  ;;  %7782 = vrsqrt.f32 %v3683_v26  ;;  %v3615_v28 = vpop.xlane.xlu1 %3614 }
 0x9a9   :  { %v3684_v3 = vadd.f32 1.1920929e-07, %v3652_v24  ;;  %v3653_v62 = vmul.f32 0.03125, %v3615_v28  ;;  %6826 = vmatmul.mubr.bf16.gmra.mrb[108].mxu1 %v3803_v20  ;;  %v3781_v57 = vmul.f32 %v9903_v35, %v3741_v23  ;;  %v3742_v40 = vmul.f32 %v7773_v60, %v9810_v33 }
 0x9aa   :  { %v7775_v44 = vpop.eup %7774  ;;  %v3617_v45 = vpop.xlane.xlu0 %3616 }
 0x9ab   :  { %7784 = vrsqrt.f32 %v3684_v3  ;;  %v3685_v38 = vadd.f32 1.1920929e-07, %v3653_v62  ;;  %v3654_v34 = vmul.f32 0.03125, %v3617_v45  ;;  %v3804_v30 = vpack.c.bf16 %v3781_v57, %v3780_v11 }
 0x9ac   :  { %v7777_v0 = vpop.eup %7776  ;;  %v3619_v19 = vpop.xlane.xlu1 %3618  ;;  %v3743_v8 = vmul.f32 %v7775_v44, %v9818_v41  ;;  %v3782_v49 = vmul.f32 %v9903_v35, %v3742_v40 }
 0x9ad   :  { %7786 = vrsqrt.f32 %v3685_v38  ;;  %v3686_v54 = vadd.f32 1.1920929e-07, %v3654_v34  ;;  %v3655_v1 = vmul.f32 0.03125, %v3619_v19  ;;  %6829 = vmatprep.mubr.bf16.mxu1 %v3804_v30  ;;  %v3744_v59 = vmul.f32 %v7777_v0, %v9827_v18 }
 0x9ae   :  { %v7779_v61 = vpop.eup %7778  ;;  %v3621_v9 = vpop.xlane.xlu0 %3620  ;;  %v3783_v16 = vmul.f32 %v9903_v35, %v3743_v8 }
 0x9af   :  { %7788 = vrsqrt.f32 %v3686_v54  ;;  %v3687_v15 = vadd.f32 1.1920929e-07, %v3655_v1  ;;  %v3656_v36 = vmul.f32 0.03125, %v3621_v9  ;;  %v3745_v46 = vmul.f32 %v7779_v61, %v9837_v10 }
 0x9b0   :  { %v7781_v55 = vpop.eup %7780  ;;  %v3623_v26 = vpop.xlane.xlu1 %3622  ;;  %v3805_v27 = vpack.c.bf16 %v3783_v16, %v3782_v49  ;;  %v3784_v24 = vmul.f32 %v9903_v35, %v3744_v59 }
 0x9b1   :  { %7790 = vrsqrt.f32 %v3687_v15  ;;  %v3688_v20 = vadd.f32 1.1920929e-07, %v3656_v36  ;;  %v3657_v23 = vmul.f32 0.03125, %v3623_v26  ;;  %v3785_v60 = vmul.f32 %v9903_v35, %v3745_v46 }
 0x9b2   :  { %v7783_v28 = vpop.eup %7782  ;;  %6830 = vmatmul.mubr.bf16.gmra.mrb[112].mxu1 %v3805_v27  ;;  %v3625_v3 = vpop.xlane.xlu0 %3624  ;;  %v3746_v62 = vmul.f32 %v7781_v55, %v9834_v4 }
 0x9b3   :  { %7792 = vrsqrt.f32 %v3688_v20  ;;  %v3689_v11 = vadd.f32 1.1920929e-07, %v3657_v23  ;;  %v3658_v57 = vmul.f32 0.03125, %v3625_v3  ;;  %v3806_v44 = vpack.c.bf16 %v3785_v60, %v3784_v24 }
 0x9b4   :  { %v3627_v45 = vpop.xlane.xlu1 %3626  ;;  %v3747_v40 = vmul.f32 %v7783_v28, %v9842_v37  ;;  %v3786_v0 = vmul.f32 %v9903_v35, %v3746_v62 }
 0x9b5   :  { %v7785_v38 = vpop.eup %7784  ;;  %7794 = vrsqrt.f32 %v3689_v11  ;;  %v3690_v34 = vadd.f32 1.1920929e-07, %v3658_v57  ;;  %v3659_v30 = vmul.f32 0.03125, %v3627_v45  ;;  %6833 = vmatprep.mubr.bf16.mxu1 %v3806_v44 }
 0x9b6   :  { %v3787_v19 = vmul.f32 %v9903_v35, %v3747_v40  ;;  %v3748_v8 = vmul.f32 %v7785_v38, %v9853_v63 }
 0x9b7   :  { %v7787_v54 = vpop.eup %7786  ;;  %7796 = vrsqrt.f32 %v3690_v34  ;;  %v3691_v1 = vadd.f32 1.1920929e-07, %v3659_v30 }
 0x9b8   :  { %v3807_v59 = vpack.c.bf16 %v3787_v19, %v3786_v0  ;;  %v3749_v61 = vmul.f32 %v7787_v54, %v9861_v12  ;;  %v3788_v49 = vmul.f32 %v9903_v35, %v3748_v8  ;;  %v7132_v0 = vld [vmem:[#allocation10 + $0xe0] sm:$0xff]   ;;  %v7133_v19 = vld [vmem:[#allocation10 + $0xe8] sm:$0xff]   ;;  %v7134_v8 = vld [vmem:[#allocation10 + $0xf0] sm:$0xff]  }
 0x9b9   :  { %v7789_v9 = vpop.eup %7788  ;;  %7798 = vrsqrt.f32 %v3691_v1  ;;  %6853 = vmatprep.subr.bf16.mxu0 %v7132_v0  ;;  %v7135_v54 = vld [vmem:[#allocation10 + $0xf8] sm:$0xff]   ;;  %v9970_v1 = vld [vmem:[%s10666_s5 + $0x3] ss:$0 sm:$0xff] }
 0x9ba   :  { %6834 = vmatmul.mubr.bf16.gmra.mrb[116].mxu1 %v3807_v59  ;;  %v3789_v16 = vmul.f32 %v9903_v35, %v3749_v61  ;;  %v3750_v15 = vmul.f32 %v7789_v9, %v9858_v42  ;;  %6854 = vmatpush3.bf16.msra.mxu0 %v7132_v0 }
 0x9bb   :  { %v7791_v36 = vpop.eup %7790  ;;  %6855 = vmatprep.subr.bf16.mxu0 %v7133_v19 }
 0x9bc   :  { %v3808_v46 = vpack.c.bf16 %v3789_v16, %v3788_v49  ;;  %v3751_v55 = vmul.f32 %v7791_v36, %v9866_v25  ;;  %v3790_v27 = vmul.f32 %v9903_v35, %v3750_v15 }
 0x9bd   :  { %v7793_v26 = vpop.eup %7792 }
 0x9be   :  { %6837 = vmatprep.mubr.bf16.mxu1 %v3808_v46  ;;  %v3791_v24 = vmul.f32 %v9903_v35, %v3751_v55  ;;  %v3752_v20 = vmul.f32 %v7793_v26, %v9875_v22  ;;  %6856 = vmatpush3.bf16.msra.mxu0 %v7133_v19 }
 0x9bf   :  { %v7795_v23 = vpop.eup %7794  ;;  %6857 = vmatprep.subr.bf16.mxu0 %v7134_v8 }
 0x9c0   :  { %v3809_v60 = vpack.c.bf16 %v3791_v24, %v3790_v27  ;;  %v3753_v28 = vmul.f32 %v7795_v23, %v9885_v56  ;;  %v3792_v62 = vmul.f32 %v9903_v35, %v3752_v20 }
 0x9c1   :  { %v7797_v3 = vpop.eup %7796 }
 0x9c2   :  { %6838 = vmatmul.mubr.bf16.gmra.mrb[120].mxu1 %v3809_v60  ;;  %v3793_v11 = vmul.f32 %v9903_v35, %v3753_v28  ;;  %v3754_v57 = vmul.f32 %v7797_v3, %v9882_v51  ;;  %6858 = vmatpush3.bf16.msra.mxu0 %v7134_v8 }
 0x9c3   :  { %v7799_v44 = vpop.eup %7798  ;;  %6859 = vmatprep.subr.bf16.mxu0 %v7135_v54 }
 0x9c4   :  { %v3810_v45 = vpack.c.bf16 %v3793_v11, %v3792_v62  ;;  %v3755_v40 = vmul.f32 %v7799_v44, %v9890_v2  ;;  %v3794_v38 = vmul.f32 %v9903_v35, %v3754_v57 }
 0x9c6   :  { %6841 = vmatprep.mubr.bf16.mxu1 %v3810_v45  ;;  %v3795_v34 = vmul.f32 %v9903_v35, %v3755_v40  ;;  %6860 = vmatpush3.bf16.msra.mxu0 %v7135_v54 }
 0x9c8   :  { %v3811_v30 = vpack.c.bf16 %v3795_v34, %v3794_v38 }
 0x9ca   :  { %6842 = vmatmul.mubr.bf16.gmra.mrb[124].mxu1 %v3811_v30 }
 0xa56   :  { %v6815_v35 = vpop.f32.mrb[96].mxu1 }
 0xa57   :  { %v3928_v59 = vadd.f32 %v6815_v35, %v9970_v1  ;;  %v3919_v61 = vpop.f32.mrb[97].mxu1 }
 0xa58   :  { %v3920_v9 = vadd.f32 %v9970_v1, %v3919_v61  ;;  %v6816_v49 = vpop.f32.mrb[98].mxu1 }
 0xa59   :  { %v6070_v16 = vmul.f32 -1.442695, %v3928_v59  ;;  %v3931_v15 = vadd.f32 %v6816_v49, %v9970_v1  ;;  %v3922_v36 = vpop.f32.mrb[99].mxu1 }
 0xa5a   :  { %v6068_v46 = vmul.f32 -1.442695, %v3920_v9  ;;  %v3923_v55 = vadd.f32 %v9970_v1, %v3922_v36 }
 0xa5b   :  { %7800 = vpow2.f32 %v6070_v16  ;;  %v6071_v26 = vmul.f32 -1.442695, %v3931_v15 }
 0xa5c   :  { %7802 = vpow2.f32 %v6068_v46  ;;  %v6069_v27 = vmul.f32 -1.442695, %v3923_v55 }
 0xa5d   :  { %7804 = vpow2.f32 %v6071_v26 }
 0xa5e   :  { %7806 = vpow2.f32 %v6069_v27 }
 0xa65   :  { %v7801_v24 = vpop.eup %7800 }
 0xa66   :  { %v7803_v20 = vpop.eup %7802  ;;  %v4144_v23 = vadd.f32 1.0, %v7801_v24 }
 0xa67   :  { %v7805_v60 = vpop.eup %7804  ;;  %v4142_v28 = vadd.f32 1.0, %v7803_v20  ;;  %v6819_v3 = vpop.f32.mrb[100].mxu1 }
 0xa68   :  { %v7807_v62 = vpop.eup %7806  ;;  %7808 = vrcp.f32 %v4144_v23  ;;  %v4145_v11 = vadd.f32 1.0, %v7805_v60  ;;  %v9977_v57 = vadd.f32 %v6819_v3, %v9970_v1  ;;  %v3935_v44 = vpop.f32.mrb[101].mxu1 }
 0xa69   :  { %7810 = vrcp.f32 %v4142_v28  ;;  %v4143_v45 = vadd.f32 1.0, %v7807_v62  ;;  %v9980_v40 = vadd.f32 %v9970_v1, %v3935_v44  ;;  %v6820_v38 = vpop.f32.mrb[102].mxu1 }
 0xa6a   :  { %7812 = vrcp.f32 %v4145_v11  ;;  %v6074_v34 = vmul.f32 -1.442695, %v9977_v57  ;;  %v9984_v30 = vadd.f32 %v6820_v38, %v9970_v1  ;;  %v3938_v0 = vpop.f32.mrb[103].mxu1 }
 0xa6b   :  { %7814 = vrcp.f32 %v4143_v45  ;;  %v6072_v19 = vmul.f32 -1.442695, %v9980_v40  ;;  %v9988_v8 = vadd.f32 %v9970_v1, %v3938_v0 }
 0xa6c   :  { %7816 = vpow2.f32 %v6074_v34  ;;  %v6075_v54 = vmul.f32 -1.442695, %v9984_v30 }
 0xa6d   :  { %7818 = vpow2.f32 %v6072_v19  ;;  %v6073_v35 = vmul.f32 -1.442695, %v9988_v8 }
 0xa6e   :  { %7820 = vpow2.f32 %v6075_v54 }
 0xa6f   :  { %7822 = vpow2.f32 %v6073_v35  ;;  %v6823_v61 = vpop.f32.mrb[104].mxu1 }
 0xa70   :  { %v9993_v49 = vadd.f32 %v6823_v61, %v9970_v1  ;;  %v3951_v16 = vpop.f32.mrb[105].mxu1 }
 0xa71   :  { %v9996_v36 = vadd.f32 %v9970_v1, %v3951_v16  ;;  %v6824_v46 = vpop.f32.mrb[106].mxu1 }
 0xa72   :  { %v7809_v26 = vpop.eup %7808  ;;  %v6078_v27 = vmul.f32 -1.442695, %v9993_v49  ;;  %v10000_v24 = vadd.f32 %v6824_v46, %v9970_v1  ;;  %v3954_v20 = vpop.f32.mrb[107].mxu1 }
 0xa73   :  { %v7811_v23 = vpop.eup %7810  ;;  %v6076_v60 = vmul.f32 -1.442695, %v9996_v36  ;;  %v10004_v28 = vadd.f32 %v9970_v1, %v3954_v20  ;;  %v4240_v44 = vmul.f32 %v7809_v26, %v3928_v59 }
 0xa74   :  { %v7813_v3 = vpop.eup %7812  ;;  %7824 = vpow2.f32 %v6078_v27  ;;  %v6079_v62 = vmul.f32 -1.442695, %v10000_v24  ;;  %v4238_v0 = vmul.f32 %v7811_v23, %v3920_v9 }
 0xa75   :  { %v7815_v11 = vpop.eup %7814  ;;  %v4241_v45 = vmul.f32 %v7813_v3, %v3931_v15  ;;  %7826 = vpow2.f32 %v6076_v60  ;;  %v6077_v38 = vmul.f32 -1.442695, %v10004_v28 }
 0xa76   :  { %v7817_v34 = vpop.eup %7816  ;;  %v4239_v19 = vmul.f32 %v7815_v11, %v3923_v55  ;;  %7828 = vpow2.f32 %v6079_v62 }
 0xa77   :  { %v7819_v54 = vpop.eup %7818  ;;  %v4271_v35 = vpack.c.bf16 %v4241_v45, %v4240_v44  ;;  %v4148_v61 = vadd.f32 1.0, %v7817_v34  ;;  %7830 = vpow2.f32 %v6077_v38 }
 0xa78   :  { %v7821_v16 = vpop.eup %7820  ;;  %v4146_v46 = vadd.f32 1.0, %v7819_v54  ;;  %v4270_v20 = vpack.c.bf16 %v4239_v19, %v4238_v0 }
 0xa79   :  { %v7823_v27 = vpop.eup %7822  ;;  %7832 = vrcp.f32 %v4148_v61  ;;  %v4149_v2 = vadd.f32 1.0, %v7821_v16 }
 0xa7a   :  { %7834 = vrcp.f32 %v4146_v46  ;;  %v4147_v59 = vadd.f32 1.0, %v7823_v27  ;;  %6861 = vmatprep.mubr.bf16.mxu0 %v4270_v20 }
 0xa7b   :  { %7836 = vrcp.f32 %v4149_v2  ;;  %6862 = vmatmul.mubr.bf16.vlgmr.msra.gmra.mrb[128].mxu0 %v4271_v35 }
 0xa7c   :  { %7838 = vrcp.f32 %v4147_v59  ;;  %v6827_v15 = vpop.f32.mrb[108].mxu1 }
 0xa7d   :  { %v10009_v9 = vadd.f32 %v6827_v15, %v9970_v1  ;;  %v3967_v55 = vpop.f32.mrb[109].mxu1 }
 0xa7e   :  { %v7825_v26 = vpop.eup %7824  ;;  %v10012_v23 = vadd.f32 %v9970_v1, %v3967_v55  ;;  %v6828_v60 = vpop.f32.mrb[110].mxu1 }
 0xa7f   :  { %v7827_v3 = vpop.eup %7826  ;;  %v4152_v62 = vadd.f32 1.0, %v7825_v26  ;;  %v10015_v11 = vadd.f32 %v6828_v60, %v9970_v1  ;;  %v3970_v44 = vpop.f32.mrb[111].mxu1  ;;  %v6082_v19 = vmul.f32 -1.442695, %v10009_v9 }
 0xa80   :  { %v7829_v45 = vpop.eup %7828  ;;  %v4150_v2 = vadd.f32 1.0, %v7827_v3  ;;  %v10018_v38 = vadd.f32 %v9970_v1, %v3970_v44  ;;  %v6080_v35 = vmul.f32 -1.442695, %v10012_v23 }
 0xa81   :  { %v7831_v34 = vpop.eup %7830  ;;  %7840 = vrcp.f32 %v4152_v62  ;;  %v4153_v0 = vadd.f32 1.0, %v7829_v45  ;;  %v6083_v16 = vmul.f32 -1.442695, %v10015_v11 }
 0xa82   :  { %7842 = vrcp.f32 %v4150_v2  ;;  %v4151_v54 = vadd.f32 1.0, %v7831_v34  ;;  %v6081_v20 = vmul.f32 -1.442695, %v10018_v38 }
 0xa83   :  { %v7833_v61 = vpop.eup %7832  ;;  %7844 = vrcp.f32 %v4153_v0 }
 0xa84   :  { %v7835_v46 = vpop.eup %7834  ;;  %7846 = vrcp.f32 %v4151_v54  ;;  %v4244_v55 = vmul.f32 %v7833_v61, %v9977_v57 }
 0xa85   :  { %v7837_v27 = vpop.eup %7836  ;;  %7848 = vpow2.f32 %v6082_v19  ;;  %v6831_v59 = vpop.f32.mrb[112].mxu1  ;;  %v4242_v62 = vmul.f32 %v7835_v46, %v9980_v40 }
 0xa86   :  { %v7839_v15 = vpop.eup %7838  ;;  %v4245_v26 = vmul.f32 %v7837_v27, %v9984_v30  ;;  %7850 = vpow2.f32 %v6080_v35  ;;  %v10027_v60 = vadd.f32 %v6831_v59, %v9970_v1  ;;  %v3983_v3 = vpop.f32.mrb[113].mxu1 }
 0xa87   :  { %v4243_v44 = vmul.f32 %v7839_v15, %v9988_v8  ;;  %7852 = vpow2.f32 %v6083_v16  ;;  %v10032_v45 = vadd.f32 %v9970_v1, %v3983_v3  ;;  %v6832_v2 = vpop.f32.mrb[114].mxu1 }
 0xa88   :  { %7854 = vpow2.f32 %v6081_v20  ;;  %v6086_v34 = vmul.f32 -1.442695, %v10027_v60  ;;  %v10036_v57 = vadd.f32 %v6832_v2, %v9970_v1  ;;  %v3986_v30 = vpop.f32.mrb[115].mxu1  ;;  %v4273_v0 = vpack.c.bf16 %v4245_v26, %v4244_v55 }
 0xa89   :  { %v6084_v19 = vmul.f32 -1.442695, %v10032_v45  ;;  %v10040_v54 = vadd.f32 %v9970_v1, %v3986_v30  ;;  %v4272_v40 = vpack.c.bf16 %v4243_v44, %v4242_v62 }
 0xa8a   :  { %7856 = vpow2.f32 %v6086_v34  ;;  %v6087_v8 = vmul.f32 -1.442695, %v10036_v57 }
 0xa8b   :  { %v7841_v35 = vpop.eup %7840  ;;  %7858 = vpow2.f32 %v6084_v19  ;;  %v6085_v61 = vmul.f32 -1.442695, %v10040_v54  ;;  %6865 = vmatprep.mubr.bf16.mxu0 %v4272_v40 }
 0xa8c   :  { %v7843_v16 = vpop.eup %7842  ;;  %7860 = vpow2.f32 %v6087_v8  ;;  %6866 = vmatmul.mubr.bf16.gmra.mrb[132].mxu0 %v4273_v0  ;;  %v4248_v59 = vmul.f32 %v7841_v35, %v9993_v49 }
 0xa8d   :  { %v7845_v46 = vpop.eup %7844  ;;  %7862 = vpow2.f32 %v6085_v61  ;;  %v6835_v20 = vpop.f32.mrb[116].mxu1  ;;  %v4246_v62 = vmul.f32 %v7843_v16, %v9996_v36 }
 0xa8e   :  { %v7847_v27 = vpop.eup %7846  ;;  %v4249_v15 = vmul.f32 %v7845_v46, %v10000_v24  ;;  %v10047_v55 = vadd.f32 %v6835_v20, %v9970_v1  ;;  %v3999_v26 = vpop.f32.mrb[117].mxu1 }
 0xa8f   :  { %v7849_v3 = vpop.eup %7848  ;;  %v4247_v44 = vmul.f32 %v7847_v27, %v10004_v28  ;;  %v6836_v2 = vpop.f32.mrb[118].mxu1  ;;  %v10053_v20 = vadd.f32 %v9970_v1, %v3999_v26 }
 0xa90   :  { %v7851_v34 = vpop.eup %7850  ;;  %v4156_v30 = vadd.f32 1.0, %v7849_v3  ;;  %v4002_v0 = vpop.f32.mrb[119].mxu1  ;;  %v4275_v19 = vpack.c.bf16 %v4249_v15, %v4248_v59  ;;  %v6090_v35 = vmul.f32 -1.442695, %v10047_v55  ;;  %v10056_v28 = vadd.f32 %v6836_v2, %v9970_v1 }
 0xa91   :  { %v7853_v40 = vpop.eup %7852  ;;  %v4154_v8 = vadd.f32 1.0, %v7851_v34  ;;  %v4274_v61 = vpack.c.bf16 %v4247_v44, %v4246_v62  ;;  %v10059_v59 = vadd.f32 %v9970_v1, %v4002_v0  ;;  %v6088_v2 = vmul.f32 -1.442695, %v10053_v20 }
 0xa92   :  { %v7855_v49 = vpop.eup %7854  ;;  %7864 = vrcp.f32 %v4156_v30  ;;  %v4157_v24 = vadd.f32 1.0, %v7853_v40 }
 0xa93   :  { %7866 = vrcp.f32 %v4154_v8  ;;  %v4155_v46 = vadd.f32 1.0, %v7855_v49  ;;  %6869 = vmatprep.mubr.bf16.mxu0 %v4274_v61  ;;  %v6091_v8 = vmul.f32 -1.442695, %v10056_v28 }
 0xa94   :  { %v7857_v36 = vpop.eup %7856  ;;  %7868 = vrcp.f32 %v4157_v24  ;;  %6870 = vmatmul.mubr.bf16.gmra.mrb[136].mxu0 %v4275_v19  ;;  %v6089_v24 = vmul.f32 -1.442695, %v10059_v59 }
 0xa95   :  { %v7859_v16 = vpop.eup %7858  ;;  %7870 = vrcp.f32 %v4155_v46  ;;  %v4160_v27 = vadd.f32 1.0, %v7857_v36  ;;  %v6839_v15 = vpop.f32.mrb[120].mxu1 }
 0xa96   :  { %v7861_v3 = vpop.eup %7860  ;;  %v4158_v62 = vadd.f32 1.0, %v7859_v16  ;;  %7872 = vpow2.f32 %v6090_v35  ;;  %v10062_v26 = vadd.f32 %v6839_v15, %v9970_v1  ;;  %v4015_v44 = vpop.f32.mrb[121].mxu1 }
 0xa97   :  { %v7863_v34 = vpop.eup %7862  ;;  %7874 = vrcp.f32 %v4160_v27  ;;  %v4161_v30 = vadd.f32 1.0, %v7861_v3  ;;  %v10066_v19 = vadd.f32 %v9970_v1, %v4015_v44  ;;  %v6840_v40 = vpop.f32.mrb[122].mxu1 }
 0xa98   :  { %7876 = vrcp.f32 %v4158_v62  ;;  %v4159_v0 = vadd.f32 1.0, %v7863_v34  ;;  %v10070_v61 = vadd.f32 %v6840_v40, %v9970_v1  ;;  %v4018_v49 = vpop.f32.mrb[123].mxu1  ;;  %v6094_v46 = vmul.f32 -1.442695, %v10062_v26 }
 0xa99   :  { %7878 = vrcp.f32 %v4161_v30  ;;  %v10074_v35 = vadd.f32 %v9970_v1, %v4018_v49  ;;  %v6092_v36 = vmul.f32 -1.442695, %v10066_v19 }
 0xa9a   :  { %7880 = vrcp.f32 %v4159_v0  ;;  %v6095_v27 = vmul.f32 -1.442695, %v10070_v61 }
 0xa9b   :  { %7882 = vpow2.f32 %v6088_v2  ;;  %v6093_v3 = vmul.f32 -1.442695, %v10074_v35 }
 0xa9c   :  { %v7865_v16 = vpop.eup %7864  ;;  %7884 = vpow2.f32 %v6091_v8 }
 0xa9d   :  { %v7867_v15 = vpop.eup %7866  ;;  %7886 = vpow2.f32 %v6089_v24  ;;  %v6843_v62 = vpop.f32.mrb[124].mxu1 }
 0xa9e   :  { %v7869_v44 = vpop.eup %7868  ;;  %7888 = vpow2.f32 %v6094_v46  ;;  %v10081_v34 = vadd.f32 %v6843_v62, %v9970_v1  ;;  %v4031_v30 = vpop.f32.mrb[125].mxu1  ;;  %v4250_v2 = vmul.f32 %v7867_v15, %v10012_v23  ;;  %v4252_v23 = vmul.f32 %v7865_v16, %v10009_v9 }
 0xa9f   :  { %v7871_v40 = vpop.eup %7870  ;;  %v4253_v0 = vmul.f32 %v7869_v44, %v10015_v11  ;;  %7890 = vpow2.f32 %v6092_v36  ;;  %v10086_v8 = vadd.f32 %v9970_v1, %v4031_v30  ;;  %v6844_v49 = vpop.f32.mrb[126].mxu1 }
 0xaa0   :  { %v7873_v24 = vpop.eup %7872  ;;  %v4251_v56 = vmul.f32 %v7871_v40, %v10018_v38  ;;  %7892 = vpow2.f32 %v6095_v27  ;;  %v6098_v46 = vmul.f32 -1.442695, %v10081_v34  ;;  %v10091_v62 = vadd.f32 %v6844_v49, %v9970_v1  ;;  %v4034_v51 = vpop.f32.mrb[127].mxu1 }
 0xaa1   :  { %v7875_v22 = vpop.eup %7874  ;;  %7894 = vpow2.f32 %v6093_v3  ;;  %v6096_v11 = vmul.f32 -1.442695, %v10086_v8  ;;  %v10096_v36 = vadd.f32 %v9970_v1, %v4034_v51  ;;  %v4164_v30 = vadd.f32 1.0, %v7873_v24 }
 0xaa2   :  { %v7877_v15 = vpop.eup %7876  ;;  %7896 = vpow2.f32 %v6098_v46  ;;  %v6099_v38 = vmul.f32 -1.442695, %v10091_v62  ;;  %v4276_v27 = vpack.c.bf16 %v4251_v56, %v4250_v2  ;;  %v4277_v49 = vpack.c.bf16 %v4253_v0, %v4252_v23 }
 0xaa3   :  { %v7879_v44 = vpop.eup %7878  ;;  %v6097_v40 = vmul.f32 -1.442695, %v10096_v36  ;;  %v4256_v12 = vmul.f32 %v7875_v22, %v10027_v60  ;;  %7898 = vpow2.f32 %v6096_v11  ;;  %v4254_v51 = vmul.f32 %v7877_v15, %v10032_v45 }
 0xaa4   :  { %v7881_v25 = vpop.eup %7880  ;;  %v4257_v9 = vmul.f32 %v7879_v44, %v10036_v57  ;;  %6873 = vmatprep.mubr.bf16.mxu0 %v4276_v27  ;;  %7900 = vpow2.f32 %v6099_v38 }
 0xaa5   :  { %v7883_v16 = vpop.eup %7882  ;;  %v4255_v1 = vmul.f32 %v7881_v25, %v10040_v54  ;;  %6874 = vmatmul.mubr.bf16.gmra.mrb[140].mxu0 %v4277_v49  ;;  %7902 = vpow2.f32 %v6097_v40 }
 0xaa6   :  { %v7885_v56 = vpop.eup %7884  ;;  %v4162_v3 = vadd.f32 1.0, %v7883_v16  ;;  %v4279_v2 = vpack.c.bf16 %v4257_v9, %v4256_v12  ;;  %7904 = vrcp.f32 %v4164_v30 }
 0xaa7   :  { %v7887_v24 = vpop.eup %7886  ;;  %v4165_v0 = vadd.f32 1.0, %v7885_v56  ;;  %v4278_v46 = vpack.c.bf16 %v4255_v1, %v4254_v51 }
 0xaa8   :  { %v7889_v22 = vpop.eup %7888  ;;  %7906 = vrcp.f32 %v4162_v3  ;;  %v4163_v60 = vadd.f32 1.0, %v7887_v24 }
 0xaa9   :  { %v7891_v57 = vpop.eup %7890  ;;  %7908 = vrcp.f32 %v4165_v0  ;;  %v4168_v23 = vadd.f32 1.0, %v7889_v22  ;;  %6877 = vmatprep.mubr.bf16.mxu0 %v4278_v46 }
 0xaaa   :  { %v7893_v45 = vpop.eup %7892  ;;  %7910 = vrcp.f32 %v4163_v60  ;;  %v4166_v25 = vadd.f32 1.0, %v7891_v57 }
 0xaab   :  { %v7895_v54 = vpop.eup %7894  ;;  %7912 = vrcp.f32 %v4168_v23  ;;  %v4169_v11 = vadd.f32 1.0, %v7893_v45 }
 0xaac   :  { %v7897_v15 = vpop.eup %7896  ;;  %7914 = vrcp.f32 %v4166_v25  ;;  %v4167_v12 = vadd.f32 1.0, %v7895_v54 }
 0xaad   :  { %7916 = vrcp.f32 %v4169_v11  ;;  %v4172_v38 = vadd.f32 1.0, %v7897_v15  ;;  %6878 = vmatmul.mubr.bf16.gmra.mrb[144].mxu0 %v4279_v2  ;;  %v7899_v27 = vpop.eup %7898 }
 0xaae   :  { %7918 = vrcp.f32 %v4167_v12  ;;  %v7901_v44 = vpop.eup %7900  ;;  %v4170_v30 = vadd.f32 1.0, %v7899_v27 }
 0xaaf   :  { %v7903_v40 = vpop.eup %7902  ;;  %7920 = vrcp.f32 %v4172_v38  ;;  %v4173_v49 = vadd.f32 1.0, %v7901_v44 }
 0xab0   :  { %v7905_v9 = vpop.eup %7904  ;;  %7922 = vrcp.f32 %v4170_v30  ;;  %v4171_v16 = vadd.f32 1.0, %v7903_v40  ;;  %v7137_v40 = vld [vmem:[#allocation8 + $0x108] sm:$0xff]  }
 0xab1   :  { %7924 = vrcp.f32 %v4173_v49  ;;  %v4260_v3 = vmul.f32 %v7905_v9, %v10047_v55  ;;  %v7138_v49 = vld [vmem:[#allocation8 + $0x110] sm:$0xff]  }
 0xab2   :  { %v7907_v51 = vpop.eup %7906  ;;  %7926 = vrcp.f32 %v4171_v16 }
 0xab3   :  { %v7909_v1 = vpop.eup %7908  ;;  %v4258_v0 = vmul.f32 %v7907_v51, %v10053_v20 }
 0xab4   :  { %v7911_v56 = vpop.eup %7910  ;;  %v4261_v24 = vmul.f32 %v7909_v1, %v10056_v28 }
 0xab5   :  { %v7913_v2 = vpop.eup %7912  ;;  %v4259_v46 = vmul.f32 %v7911_v56, %v10059_v59 }
 0xab6   :  { %v7915_v22 = vpop.eup %7914  ;;  %v4281_v60 = vpack.c.bf16 %v4261_v24, %v4260_v3  ;;  %v4264_v25 = vmul.f32 %v7913_v2, %v10062_v26 }
 0xab7   :  { %v7917_v57 = vpop.eup %7916  ;;  %v4280_v23 = vpack.c.bf16 %v4259_v46, %v4258_v0  ;;  %v4262_v11 = vmul.f32 %v7915_v22, %v10066_v19 }
 0xab8   :  { %v7919_v45 = vpop.eup %7918  ;;  %v4265_v54 = vmul.f32 %v7917_v57, %v10070_v61 }
 0xab9   :  { %v4263_v55 = vmul.f32 %v7919_v45, %v10074_v35  ;;  %6881 = vmatprep.mubr.bf16.mxu0 %v4280_v23  ;;  %v7921_v28 = vpop.eup %7920  ;;  %v7136_v35 = vld [vmem:[#allocation8 + $0x100] sm:$0xff]  }
 0xaba   :  { %6882 = vmatmul.mubr.bf16.gmra.mrb[148].mxu0 %v4281_v60  ;;  %v4283_v15 = vpack.c.bf16 %v4265_v54, %v4264_v25  ;;  %v7923_v20 = vpop.eup %7922  ;;  %v4268_v27 = vmul.f32 %v7921_v28, %v10081_v34  ;;  %6893 = vmatprep.subr.bf16.mxu1 %v7136_v35  ;;  %v7139_v34 = vld [vmem:[#allocation8 + $0x118] sm:$0xff]  }
 0xabb   :  { %v4282_v12 = vpack.c.bf16 %v4263_v55, %v4262_v11  ;;  %v7925_v59 = vpop.eup %7924  ;;  %v4266_v26 = vmul.f32 %v7923_v20, %v10086_v8  ;;  %6894 = vmatpush3.bf16.msra.mxu1 %v7136_v35  ;;  %v10119_v8 = vld [vmem:[%s10668_s7 + $0x3] ss:$0 sm:$0xff] }
 0xabc   :  { %v7927_v38 = vpop.eup %7926  ;;  %v4269_v44 = vmul.f32 %v7925_v59, %v10091_v62  ;;  %6895 = vmatprep.subr.bf16.mxu1 %v7137_v40  ;;  %v7140_v62 = vld [vmem:[#allocation8 + $0x120] sm:$0xff]  }
 0xabd   :  { %6885 = vmatprep.mubr.bf16.mxu0 %v4282_v12  ;;  %v4267_v61 = vmul.f32 %v7927_v38, %v10096_v36 }
 0xabe   :  { %v4285_v19 = vpack.c.bf16 %v4269_v44, %v4268_v27 }
 0xabf   :  { %v4284_v30 = vpack.c.bf16 %v4267_v61, %v4266_v26  ;;  %6896 = vmatpush3.bf16.msra.mxu1 %v7137_v40 }
 0xac0   :  { %6897 = vmatprep.subr.bf16.mxu1 %v7138_v49 }
 0xac2   :  { %6886 = vmatmul.mubr.bf16.gmra.mrb[152].mxu0 %v4283_v15 }
 0xac3   :  { %6889 = vmatprep.mubr.bf16.mxu0 %v4284_v30  ;;  %6898 = vmatpush3.bf16.msra.mxu1 %v7138_v49 }
 0xac4   :  { %6899 = vmatprep.subr.bf16.mxu1 %v7139_v34 }
 0xac7   :  { %6900 = vmatpush3.bf16.msra.mxu1 %v7139_v34 }
 0xac8   :  { %6901 = vmatprep.subr.bf16.mxu1 %v7140_v62 }
 0xaca   :  { %6890 = vmatmul.mubr.bf16.gmra.mrb[156].mxu0 %v4285_v19  ;;  %v7141_v19 = vld [vmem:[#allocation8 + $0x128] sm:$0xff]  }
 0xacb   :  { %6902 = vmatpush3.bf16.msra.mxu1 %v7140_v62 }
 0xacc   :  { %6903 = vmatprep.subr.bf16.mxu1 %v7141_v19 }
 0xacf   :  { %6904 = vmatpush3.bf16.msra.mxu1 %v7141_v19 }
 0xb4e   :  { %v6863_v36 = vpop.f32.mrb[128].mxu0 }
 0xb4f   :  { %v4393_v9 = vpop.f32.mrb[129].mxu0  ;;  %v4402_v16 = vadd.f32 %v6863_v36, %v10119_v8 }
 0xb50   :  { %v4394_v51 = vadd.f32 %v10119_v8, %v4393_v9  ;;  %v6864_v1 = vpop.f32.mrb[130].mxu0 }
 0xb51   :  { %v4396_v56 = vpop.f32.mrb[131].mxu0  ;;  %v4405_v24 = vadd.f32 %v6864_v1, %v10119_v8  ;;  %v10129_v0 = vadd.f32 %v4402_v16, %v9714_v31 }
 0xb52   :  { %v10124_v3 = vadd.f32 %v4394_v51, %v9709_v13  ;;  %v4397_v2 = vadd.f32 %v10119_v8, %v4396_v56 }
 0xb53   :  { %v10137_v60 = vadd.f32 %v4405_v24, %v9722_v47  ;;  %v4554_v57 = vmul.f32 %v10129_v0, %v10129_v0  ;;  %v7142_v24 = vld [vmem:[#allocation8 + $0x130] sm:$0xff]  }
 0xb54   :  { %v10132_v46 = vadd.f32 %v4397_v2, %v9717_v53  ;;  %v4552_v22 = vmul.f32 %v10124_v3, %v10124_v3  ;;  %6905 = vmatprep.subr.bf16.mxu1 %v7142_v24 }
 0xb55   :  { %v4555_v31 = vmul.f32 %v10137_v60, %v10137_v60  ;;  %6906 = vmatpush3.bf16.msra.mxu1 %v7142_v24 }
 0xb56   :  { %4584 = vadd.xlane.f32.xlu0 %v4552_v22  ;;  %v4553_v13 = vmul.f32 %v10132_v46, %v10132_v46 }
 0xb58   :  { %4586 = vadd.xlane.f32.xlu1 %v4553_v13 }
 0xb5a   :  { %4588 = vadd.xlane.f32.xlu0 %v4554_v57 }
 0xb5c   :  { %4590 = vadd.xlane.f32.xlu1 %v4555_v31 }
 0xb5f   :  { %v6867_v53 = vpop.f32.mrb[132].mxu0 }
 0xb60   :  { %v4409_v23 = vpop.f32.mrb[133].mxu0  ;;  %v4418_v45 = vadd.f32 %v6867_v53, %v10119_v8 }
 0xb61   :  { %v4410_v47 = vadd.f32 %v10119_v8, %v4409_v23  ;;  %v6868_v25 = vpop.f32.mrb[134].mxu0 }
 0xb62   :  { %v4412_v54 = vpop.f32.mrb[135].mxu0  ;;  %v4421_v55 = vadd.f32 %v6868_v25, %v10119_v8  ;;  %v10153_v15 = vadd.f32 %v4418_v45, %v9738_v29 }
 0xb63   :  { %v10148_v11 = vadd.f32 %v4410_v47, %v9733_v5  ;;  %v4413_v28 = vadd.f32 %v10119_v8, %v4412_v54 }
 0xb64   :  { %v10161_v59 = vadd.f32 %v4421_v55, %v9746_v32 }
 0xb65   :  { %v10156_v20 = vadd.f32 %v4413_v28, %v9741_v58  ;;  %v4556_v12 = vmul.f32 %v10148_v11, %v10148_v11  ;;  %v4558_v58 = vmul.f32 %v10153_v15, %v10153_v15  ;;  %v7143_v28 = vld [vmem:[#allocation8 + $0x138] sm:$0xff]  }
 0xb66   :  { %v4559_v40 = vmul.f32 %v10161_v59, %v10161_v59  ;;  %6907 = vmatprep.subr.bf16.mxu1 %v7143_v28 }
 0xb67   :  { %4592 = vadd.xlane.f32.xlu0 %v4556_v12  ;;  %v6871_v38 = vpop.f32.mrb[136].mxu0  ;;  %v4557_v5 = vmul.f32 %v10156_v20, %v10156_v20  ;;  %6908 = vmatpush3.bf16.msra.mxu1 %v7143_v28 }
 0xb68   :  { %v4425_v27 = vpop.f32.mrb[137].mxu0  ;;  %v4434_v44 = vadd.f32 %v6871_v38, %v10119_v8 }
 0xb69   :  { %v4426_v29 = vadd.f32 %v10119_v8, %v4425_v27  ;;  %4594 = vadd.xlane.f32.xlu1 %v4557_v5  ;;  %v6872_v26 = vpop.f32.mrb[138].mxu0 }
 0xb6a   :  { %v4428_v61 = vpop.f32.mrb[139].mxu0  ;;  %v4437_v30 = vadd.f32 %v6872_v26, %v10119_v8  ;;  %v10177_v49 = vadd.f32 %v4434_v44, %v9762_v50 }
 0xb6b   :  { %v10170_v32 = vadd.f32 %v4426_v29, %v9755_v48  ;;  %v4429_v35 = vadd.f32 %v10119_v8, %v4428_v61  ;;  %4596 = vadd.xlane.f32.xlu0 %v4558_v58 }
 0xb6c   :  { %v10185_v62 = vadd.f32 %v4437_v30, %v9770_v43  ;;  %v4562_v50 = vmul.f32 %v10177_v49, %v10177_v49 }
 0xb6d   :  { %v10180_v34 = vadd.f32 %v4429_v35, %v9765_v52  ;;  %4598 = vadd.xlane.f32.xlu1 %v4559_v40  ;;  %v4560_v48 = vmul.f32 %v10170_v32, %v10170_v32 }
 0xb6e   :  { %v4563_v52 = vmul.f32 %v10185_v62, %v10185_v62 }
 0xb6f   :  { %4600 = vadd.xlane.f32.xlu0 %v4560_v48  ;;  %v4561_v36 = vmul.f32 %v10180_v34, %v10180_v34 }
 0xb71   :  { %4602 = vadd.xlane.f32.xlu1 %v4561_v36 }
 0xb73   :  { %4604 = vadd.xlane.f32.xlu0 %v4562_v50 }
 0xb75   :  { %4606 = vadd.xlane.f32.xlu1 %v4563_v52 }
 0xb78   :  { %v6875_v9 = vpop.f32.mrb[140].mxu0 }
 0xb79   :  { %v4441_v16 = vpop.f32.mrb[141].mxu0  ;;  %v4450_v51 = vadd.f32 %v6875_v9, %v10119_v8 }
 0xb7a   :  { %v4442_v43 = vadd.f32 %v10119_v8, %v4441_v16  ;;  %v6876_v1 = vpop.f32.mrb[142].mxu0 }
 0xb7b   :  { %v4444_v56 = vpop.f32.mrb[143].mxu0  ;;  %v4453_v22 = vadd.f32 %v6876_v1, %v10119_v8  ;;  %v10201_v57 = vadd.f32 %v4450_v51, %v9786_v17 }
 0xb7c   :  { %v10196_v2 = vadd.f32 %v4442_v43, %v9781_v6  ;;  %v4445_v13 = vadd.f32 %v10119_v8, %v4444_v56 }
 0xb7d   :  { %v10209_v23 = vadd.f32 %v4453_v22, %v9794_v21  ;;  %v4566_v54 = vmul.f32 %v10201_v57, %v10201_v57 }
 0xb7e   :  { %v10204_v31 = vadd.f32 %v4445_v13, %v9789_v14  ;;  %v4564_v53 = vmul.f32 %v10196_v2, %v10196_v2 }
 0xb7f   :  { %v4567_v5 = vmul.f32 %v10209_v23, %v10209_v23 }
 0xb80   :  { %4608 = vadd.xlane.f32.xlu0 %v4564_v53  ;;  %v6879_v6 = vpop.f32.mrb[144].mxu0  ;;  %v4565_v45 = vmul.f32 %v10204_v31, %v10204_v31 }
 0xb81   :  { %v4457_v47 = vpop.f32.mrb[145].mxu0  ;;  %v4466_v25 = vadd.f32 %v6879_v6, %v10119_v8 }
 0xb82   :  { %v4458_v17 = vadd.f32 %v10119_v8, %v4457_v47  ;;  %4610 = vadd.xlane.f32.xlu1 %v4565_v45  ;;  %v6880_v14 = vpop.f32.mrb[146].mxu0  ;;  %v10737_v45 = vld [vmem:[#allocation24_spill] sm:$0xff] }
 0xb83   :  { %v4460_v55 = vpop.f32.mrb[147].mxu0  ;;  %v4469_v12 = vadd.f32 %v6880_v14, %v10119_v8  ;;  %v10225_v27 = vadd.f32 %v4466_v25, %v9810_v33 }
 0xb84   :  { %v10218_v21 = vadd.f32 %v4458_v17, %v9803_v39  ;;  %v4461_v38 = vadd.f32 %v10119_v8, %v4460_v55  ;;  %4612 = vadd.xlane.f32.xlu0 %v4566_v54 }
 0xb85   :  { %v10233_v29 = vadd.f32 %v4469_v12, %v9818_v41  ;;  %v4570_v33 = vmul.f32 %v10225_v27, %v10225_v27 }
 0xb86   :  { %v10228_v44 = vadd.f32 %v4461_v38, %v9813_v7  ;;  %4614 = vadd.xlane.f32.xlu1 %v4567_v5  ;;  %v4568_v39 = vmul.f32 %v10218_v21, %v10218_v21 }
 0xb87   :  { %v4571_v7 = vmul.f32 %v10233_v29, %v10233_v29 }
 0xb88   :  { %4616 = vadd.xlane.f32.xlu0 %v4568_v39  ;;  %v4569_v26 = vmul.f32 %v10228_v44, %v10228_v44  ;;  %v10739_v39 = vld [vmem:[#allocation19_spill] sm:$0xff] }
 0xb8a   :  { %4618 = vadd.xlane.f32.xlu1 %v4569_v26 }
 0xb8c   :  { %4620 = vadd.xlane.f32.xlu0 %v4570_v33 }
 0xb8d   :  { %v6883_v58 = vpop.f32.mrb[148].mxu0 }
 0xb8e   :  { %v4473_v61 = vpop.f32.mrb[149].mxu0  ;;  %4622 = vadd.xlane.f32.xlu1 %v4571_v7  ;;  %v4482_v19 = vadd.f32 %v6883_v58, %v10119_v8 }
 0xb8f   :  { %v4474_v41 = vadd.f32 %v10119_v8, %v4473_v61  ;;  %v6884_v30 = vpop.f32.mrb[150].mxu0  ;;  %v10741_v61 = vld [vmem:[#allocation20_spill] sm:$0xff] }
 0xb90   :  { %v4476_v35 = vpop.f32.mrb[151].mxu0  ;;  %v4485_v48 = vadd.f32 %v6884_v30, %v10119_v8  ;;  %v10249_v50 = vadd.f32 %v4482_v19, %v9834_v4 }
 0xb91   :  { %v10244_v40 = vadd.f32 %v4474_v41, %v9827_v18  ;;  %v4477_v36 = vadd.f32 %v10119_v8, %v4476_v35  ;;  %v10742_v41 = vld [vmem:[#allocation21_spill] sm:$0xff] }
 0xb92   :  { %v10257_v16 = vadd.f32 %v4485_v48, %v9842_v37  ;;  %v10744_v48 = vld [vmem:[#allocation22_spill] sm:$0xff] }
 0xb93   :  { %v10252_v52 = vadd.f32 %v4477_v36, %v9837_v10  ;;  %v4572_v9 = vmul.f32 %v10244_v40, %v10244_v40  ;;  %v4574_v10 = vmul.f32 %v10249_v50, %v10249_v50 }
 0xb94   :  { %v4575_v53 = vmul.f32 %v10257_v16, %v10257_v16 }
 0xb95   :  { %4624 = vadd.xlane.f32.xlu0 %v4572_v9  ;;  %v6887_v51 = vpop.f32.mrb[152].mxu0  ;;  %v4573_v18 = vmul.f32 %v10252_v52, %v10252_v52 }
 0xb96   :  { %v4489_v43 = vpop.f32.mrb[153].mxu0  ;;  %v4498_v1 = vadd.f32 %v6887_v51, %v10119_v8 }
 0xb97   :  { %v4490_v4 = vadd.f32 %v10119_v8, %v4489_v43  ;;  %4626 = vadd.xlane.f32.xlu1 %v4573_v18  ;;  %v6888_v56 = vpop.f32.mrb[154].mxu0  ;;  %v7144_v18 = vld [vmem:[#allocation10 + $0x100] sm:$0xff]   ;;  %v7145_v43 = vld [vmem:[#allocation10 + $0x108] sm:$0xff]  }
 0xb98   :  { %v4492_v24 = vpop.f32.mrb[155].mxu0  ;;  %v4501_v37 = vadd.f32 %v6888_v56, %v10119_v8  ;;  %v10273_v6 = vadd.f32 %v4498_v1, %v9858_v42  ;;  %6941 = vmatprep.subr.bf16.mxu0 %v7144_v18  ;;  %v7146_v1 = vld [vmem:[#allocation10 + $0x110] sm:$0xff]  }
 0xb99   :  { %v10266_v22 = vadd.f32 %v4490_v4, %v9853_v63  ;;  %v4493_v13 = vadd.f32 %v10119_v8, %v4492_v24  ;;  %4628 = vadd.xlane.f32.xlu0 %v4574_v10  ;;  %v10738_v63 = vld [vmem:[#allocation25_spill] sm:$0xff]  ;;  %6942 = vmatpush3.bf16.msra.mxu0 %v7144_v18  ;;  %v7147_v4 = vld [vmem:[#allocation10 + $0x118] sm:$0xff]  }
 0xb9a   :  { %v10281_v17 = vadd.f32 %v4501_v37, %v10738_v63  ;;  %v4578_v38 = vmul.f32 %v10273_v6, %v10273_v6  ;;  %6943 = vmatprep.subr.bf16.mxu0 %v7145_v43 }
 0xb9b   :  { %v10276_v47 = vadd.f32 %v4493_v13, %v10737_v45  ;;  %4630 = vadd.xlane.f32.xlu1 %v4575_v53  ;;  %v4576_v25 = vmul.f32 %v10266_v22, %v10266_v22 }
 0xb9c   :  { %v4579_v58 = vmul.f32 %v10281_v17, %v10281_v17 }
 0xb9d   :  { %4632 = vadd.xlane.f32.xlu0 %v4576_v25  ;;  %v6891_v14 = vpop.f32.mrb[156].mxu0  ;;  %v4577_v54 = vmul.f32 %v10276_v47, %v10276_v47  ;;  %6944 = vmatpush3.bf16.msra.mxu0 %v7145_v43 }
 0xb9e   :  { %v4505_v55 = vpop.f32.mrb[157].mxu0  ;;  %v4514_v28 = vadd.f32 %v6891_v14, %v10119_v8  ;;  %6945 = vmatprep.subr.bf16.mxu0 %v7146_v1 }
 0xb9f   :  { %v4506_v42 = vadd.f32 %v10119_v8, %v4505_v55  ;;  %4634 = vadd.xlane.f32.xlu1 %v4577_v54  ;;  %v6892_v12 = vpop.f32.mrb[158].mxu0 }
 0xba0   :  { %v4508_v5 = vpop.f32.mrb[159].mxu0  ;;  %v4517_v33 = vadd.f32 %v6892_v12, %v10119_v8  ;;  %v10297_v19 = vadd.f32 %v4514_v28, %v10741_v61 }
 0xba1   :  { %v10290_v26 = vadd.f32 %v4506_v42, %v10739_v39  ;;  %v4509_v7 = vadd.f32 %v10119_v8, %v4508_v5  ;;  %4636 = vadd.xlane.f32.xlu0 %v4578_v38  ;;  %6946 = vmatpush3.bf16.msra.mxu0 %v7146_v1 }
 0xba2   :  { %v10305_v36 = vadd.f32 %v4517_v33, %v10744_v48  ;;  %v4582_v9 = vmul.f32 %v10297_v19, %v10297_v19  ;;  %6947 = vmatprep.subr.bf16.mxu0 %v7147_v4  ;;  %v10318_v33 = vld [vmem:[%s10664_s3 + $0x4] ss:$0 sm:$0xff] }
 0xba3   :  { %10740 = vst [vmem:[#allocation23_spill] sm:$0xff] %v10290_v26  ;;  %v10300_v30 = vadd.f32 %v4509_v7, %v10742_v41  ;;  %4638 = vadd.xlane.f32.xlu1 %v4579_v58  ;;  %v4580_v35 = vmul.f32 %v10290_v26, %v10290_v26 }
 0xba4   :  { %v4583_v51 = vmul.f32 %v10305_v36, %v10305_v36 }
 0xba5   :  { %10743 = vst [vmem:[#allocation24_spill] sm:$0xff] %v10300_v30  ;;  %4640 = vadd.xlane.f32.xlu0 %v4580_v35  ;;  %v4581_v8 = vmul.f32 %v10300_v30, %v10300_v30  ;;  %6948 = vmatpush3.bf16.msra.mxu0 %v7147_v4 }
 0xba7   :  { %4642 = vadd.xlane.f32.xlu1 %v4581_v8 }
 0xba9   :  { %4644 = vadd.xlane.f32.xlu0 %v4582_v9 }
 0xbab   :  { %4646 = vadd.xlane.f32.xlu1 %v4583_v51 }
 0xbe3   :  { %v4585_v56 = vpop.xlane.xlu0 %4584 }
 0xbe4   :  { %v4648_v10 = vmul.f32 0.03125, %v4585_v56 }
 0xbe5   :  { %v4587_v24 = vpop.xlane.xlu1 %4586 }
 0xbe6   :  { %v4680_v37 = vadd.f32 1.1920929e-07, %v4648_v10  ;;  %v4649_v13 = vmul.f32 0.03125, %v4587_v24 }
 0xbe7   :  { %v4589_v53 = vpop.xlane.xlu0 %4588 }
 0xbe8   :  { %7928 = vrsqrt.f32 %v4680_v37  ;;  %v4681_v45 = vadd.f32 1.1920929e-07, %v4649_v13  ;;  %v4650_v25 = vmul.f32 0.03125, %v4589_v53 }
 0xbe9   :  { %v4591_v63 = vpop.xlane.xlu1 %4590 }
 0xbea   :  { %7930 = vrsqrt.f32 %v4681_v45  ;;  %v4682_v14 = vadd.f32 1.1920929e-07, %v4650_v25  ;;  %v4651_v54 = vmul.f32 0.03125, %v4591_v63 }
 0xbec   :  { %7932 = vrsqrt.f32 %v4682_v14  ;;  %v4683_v55 = vadd.f32 1.1920929e-07, %v4651_v54 }
 0xbee   :  { %7934 = vrsqrt.f32 %v4683_v55 }
 0xbf2   :  { %v7929_v28 = vpop.eup %7928 }
 0xbf3   :  { %v4744_v38 = vmul.f32 %v7929_v28, %v10124_v3 }
 0xbf4   :  { %v7931_v42 = vpop.eup %7930  ;;  %v4593_v12 = vpop.xlane.xlu0 %4592 }
 0xbf5   :  { %v4652_v5 = vmul.f32 0.03125, %v4593_v12  ;;  %v4745_v39 = vmul.f32 %v7931_v42, %v10132_v46  ;;  %v4784_v51 = vmul.f32 %v10318_v33, %v4744_v38 }
 0xbf6   :  { %v7933_v7 = vpop.eup %7932  ;;  %v4595_v58 = vpop.xlane.xlu1 %4594 }
 0xbf7   :  { %v4746_v61 = vmul.f32 %v7933_v7, %v10129_v0  ;;  %v4684_v41 = vadd.f32 1.1920929e-07, %v4652_v5  ;;  %v4653_v35 = vmul.f32 0.03125, %v4595_v58  ;;  %v4785_v48 = vmul.f32 %v10318_v33, %v4745_v39 }
 0xbf8   :  { %v7935_v8 = vpop.eup %7934  ;;  %v4597_v9 = vpop.xlane.xlu0 %4596 }
 0xbf9   :  { %v4747_v18 = vmul.f32 %v7935_v8, %v10137_v60  ;;  %7936 = vrsqrt.f32 %v4684_v41  ;;  %v4685_v43 = vadd.f32 1.1920929e-07, %v4653_v35  ;;  %v4654_v1 = vmul.f32 0.03125, %v4597_v9 }
 0xbfa   :  { %v4599_v4 = vpop.xlane.xlu1 %4598  ;;  %v4816_v56 = vpack.c.bf16 %v4785_v48, %v4784_v51  ;;  %v4786_v10 = vmul.f32 %v10318_v33, %v4746_v61 }
 0xbfb   :  { %7938 = vrsqrt.f32 %v4685_v43  ;;  %v4686_v24 = vadd.f32 1.1920929e-07, %v4654_v1  ;;  %v4655_v37 = vmul.f32 0.03125, %v4599_v4  ;;  %v4787_v13 = vmul.f32 %v10318_v33, %v4747_v18 }
 0xbfc   :  { %v4601_v53 = vpop.xlane.xlu0 %4600  ;;  %6909 = vmatprep.mubr.bf16.mxu1 %v4816_v56 }
 0xbfd   :  { %7940 = vrsqrt.f32 %v4686_v24  ;;  %v4687_v45 = vadd.f32 1.1920929e-07, %v4655_v37  ;;  %v4656_v25 = vmul.f32 0.03125, %v4601_v53  ;;  %v4817_v63 = vpack.c.bf16 %v4787_v13, %v4786_v10 }
 0xbfe   :  { %v4603_v14 = vpop.xlane.xlu1 %4602 }
 0xbff   :  { %7942 = vrsqrt.f32 %v4687_v45  ;;  %v4688_v54 = vadd.f32 1.1920929e-07, %v4656_v25  ;;  %v4657_v55 = vmul.f32 0.03125, %v4603_v14  ;;  %6910 = vmatmul.mubr.bf16.vlgmr.msra.gmra.mrb[128].mxu1 %v4817_v63 }
 0xc00   :  { %v4605_v28 = vpop.xlane.xlu0 %4604 }
 0xc01   :  { %7944 = vrsqrt.f32 %v4688_v54  ;;  %v4689_v42 = vadd.f32 1.1920929e-07, %v4657_v55  ;;  %v4658_v12 = vmul.f32 0.03125, %v4605_v28 }
 0xc02   :  { %v4607_v38 = vpop.xlane.xlu1 %4606 }
 0xc03   :  { %v7937_v5 = vpop.eup %7936  ;;  %7946 = vrsqrt.f32 %v4689_v42  ;;  %v4690_v39 = vadd.f32 1.1920929e-07, %v4658_v12  ;;  %v4659_v7 = vmul.f32 0.03125, %v4607_v38 }
 0xc04   :  { %v4748_v58 = vmul.f32 %v7937_v5, %v10148_v11 }
 0xc05   :  { %v7939_v61 = vpop.eup %7938  ;;  %7948 = vrsqrt.f32 %v4690_v39  ;;  %v4691_v41 = vadd.f32 1.1920929e-07, %v4659_v7 }
 0xc06   :  { %v4749_v35 = vmul.f32 %v7939_v61, %v10156_v20  ;;  %v4788_v8 = vmul.f32 %v10318_v33, %v4748_v58 }
 0xc07   :  { %v7941_v48 = vpop.eup %7940  ;;  %7950 = vrsqrt.f32 %v4691_v41 }
 0xc08   :  { %v4789_v9 = vmul.f32 %v10318_v33, %v4749_v35  ;;  %v4750_v51 = vmul.f32 %v7941_v48, %v10153_v15 }
 0xc09   :  { %v7943_v18 = vpop.eup %7942 }
 0xc0a   :  { %v4818_v43 = vpack.c.bf16 %v4789_v9, %v4788_v8  ;;  %v4751_v1 = vmul.f32 %v7943_v18, %v10161_v59  ;;  %v4790_v56 = vmul.f32 %v10318_v33, %v4750_v51 }
 0xc0b   :  { %v7945_v4 = vpop.eup %7944 }
 0xc0c   :  { %6913 = vmatprep.mubr.bf16.mxu1 %v4818_v43  ;;  %v4791_v10 = vmul.f32 %v10318_v33, %v4751_v1  ;;  %v4752_v24 = vmul.f32 %v7945_v4, %v10170_v32 }
 0xc0d   :  { %v7947_v37 = vpop.eup %7946  ;;  %v4609_v13 = vpop.xlane.xlu0 %4608 }
 0xc0e   :  { %v4660_v53 = vmul.f32 0.03125, %v4609_v13  ;;  %v4819_v45 = vpack.c.bf16 %v4791_v10, %v4790_v56  ;;  %v4753_v25 = vmul.f32 %v7947_v37, %v10180_v34  ;;  %v4792_v28 = vmul.f32 %v10318_v33, %v4752_v24 }
 0xc0f   :  { %v7949_v63 = vpop.eup %7948  ;;  %v4611_v14 = vpop.xlane.xlu1 %4610 }
 0xc10   :  { %v4692_v54 = vadd.f32 1.1920929e-07, %v4660_v53  ;;  %v4661_v55 = vmul.f32 0.03125, %v4611_v14  ;;  %6914 = vmatmul.mubr.bf16.gmra.mrb[132].mxu1 %v4819_v45  ;;  %v4793_v42 = vmul.f32 %v10318_v33, %v4753_v25  ;;  %v4754_v5 = vmul.f32 %v7949_v63, %v10177_v49 }
 0xc11   :  { %v7951_v12 = vpop.eup %7950  ;;  %v4613_v38 = vpop.xlane.xlu0 %4612 }
 0xc12   :  { %7952 = vrsqrt.f32 %v4692_v54  ;;  %v4693_v39 = vadd.f32 1.1920929e-07, %v4661_v55  ;;  %v4662_v7 = vmul.f32 0.03125, %v4613_v38  ;;  %v4820_v58 = vpack.c.bf16 %v4793_v42, %v4792_v28 }
 0xc13   :  { %v4615_v61 = vpop.xlane.xlu1 %4614  ;;  %v4755_v41 = vmul.f32 %v7951_v12, %v10185_v62  ;;  %v4794_v9 = vmul.f32 %v10318_v33, %v4754_v5 }
 0xc14   :  { %7954 = vrsqrt.f32 %v4693_v39  ;;  %v4694_v35 = vadd.f32 1.1920929e-07, %v4662_v7  ;;  %v4663_v48 = vmul.f32 0.03125, %v4615_v61  ;;  %6917 = vmatprep.mubr.bf16.mxu1 %v4820_v58 }
 0xc15   :  { %v4617_v8 = vpop.xlane.xlu0 %4616  ;;  %v4795_v51 = vmul.f32 %v10318_v33, %v4755_v41 }
 0xc16   :  { %7956 = vrsqrt.f32 %v4694_v35  ;;  %v4695_v18 = vadd.f32 1.1920929e-07, %v4663_v48  ;;  %v4664_v43 = vmul.f32 0.03125, %v4617_v8 }
 0xc17   :  { %v4619_v1 = vpop.xlane.xlu1 %4618  ;;  %v4821_v4 = vpack.c.bf16 %v4795_v51, %v4794_v9 }
 0xc18   :  { %7958 = vrsqrt.f32 %v4695_v18  ;;  %v4696_v56 = vadd.f32 1.1920929e-07, %v4664_v43  ;;  %v4665_v10 = vmul.f32 0.03125, %v4619_v1 }
 0xc19   :  { %v4621_v24 = vpop.xlane.xlu0 %4620  ;;  %6918 = vmatmul.mubr.bf16.gmra.mrb[136].mxu1 %v4821_v4 }
 0xc1a   :  { %7960 = vrsqrt.f32 %v4696_v56  ;;  %v4697_v37 = vadd.f32 1.1920929e-07, %v4665_v10  ;;  %v4666_v13 = vmul.f32 0.03125, %v4621_v24 }
 0xc1b   :  { %v4623_v53 = vpop.xlane.xlu1 %4622 }
 0xc1c   :  { %v7953_v45 = vpop.eup %7952  ;;  %7962 = vrsqrt.f32 %v4697_v37  ;;  %v4698_v25 = vadd.f32 1.1920929e-07, %v4666_v13  ;;  %v4667_v63 = vmul.f32 0.03125, %v4623_v53 }
 0xc1d   :  { %v4756_v14 = vmul.f32 %v7953_v45, %v10196_v2 }
 0xc1e   :  { %v7955_v54 = vpop.eup %7954  ;;  %7964 = vrsqrt.f32 %v4698_v25  ;;  %v4699_v55 = vadd.f32 1.1920929e-07, %v4667_v63 }
 0xc1f   :  { %v4757_v28 = vmul.f32 %v7955_v54, %v10204_v31  ;;  %v4796_v12 = vmul.f32 %v10318_v33, %v4756_v14 }
 0xc20   :  { %v7957_v42 = vpop.eup %7956  ;;  %7966 = vrsqrt.f32 %v4699_v55 }
 0xc21   :  { %v4797_v38 = vmul.f32 %v10318_v33, %v4757_v28  ;;  %v4758_v5 = vmul.f32 %v7957_v42, %v10201_v57 }
 0xc22   :  { %v7959_v39 = vpop.eup %7958  ;;  %v4625_v7 = vpop.xlane.xlu0 %4624 }
 0xc23   :  { %v4668_v58 = vmul.f32 0.03125, %v4625_v7  ;;  %v4822_v61 = vpack.c.bf16 %v4797_v38, %v4796_v12  ;;  %v4759_v41 = vmul.f32 %v7959_v39, %v10209_v23  ;;  %v4798_v51 = vmul.f32 %v10318_v33, %v4758_v5 }
 0xc24   :  { %v7961_v35 = vpop.eup %7960  ;;  %v4627_v48 = vpop.xlane.xlu1 %4626 }
 0xc25   :  { %v4700_v8 = vadd.f32 1.1920929e-07, %v4668_v58  ;;  %v4669_v9 = vmul.f32 0.03125, %v4627_v48  ;;  %6921 = vmatprep.mubr.bf16.mxu1 %v4822_v61  ;;  %v4799_v18 = vmul.f32 %v10318_v33, %v4759_v41  ;;  %v4760_v4 = vmul.f32 %v7961_v35, %v10218_v21 }
 0xc26   :  { %v7963_v43 = vpop.eup %7962  ;;  %v4629_v1 = vpop.xlane.xlu0 %4628 }
 0xc27   :  { %7968 = vrsqrt.f32 %v4700_v8  ;;  %v4701_v56 = vadd.f32 1.1920929e-07, %v4669_v9  ;;  %v4670_v10 = vmul.f32 0.03125, %v4629_v1  ;;  %v4823_v24 = vpack.c.bf16 %v4799_v18, %v4798_v51 }
 0xc28   :  { %v7965_v37 = vpop.eup %7964  ;;  %v4631_v13 = vpop.xlane.xlu1 %4630  ;;  %v4761_v53 = vmul.f32 %v7963_v43, %v10228_v44  ;;  %v4800_v55 = vmul.f32 %v10318_v33, %v4760_v4 }
 0xc29   :  { %7970 = vrsqrt.f32 %v4701_v56  ;;  %v4702_v45 = vadd.f32 1.1920929e-07, %v4670_v10  ;;  %v4671_v25 = vmul.f32 0.03125, %v4631_v13  ;;  %6922 = vmatmul.mubr.bf16.gmra.mrb[140].mxu1 %v4823_v24  ;;  %v4762_v63 = vmul.f32 %v7965_v37, %v10225_v27 }
 0xc2a   :  { %v7967_v14 = vpop.eup %7966  ;;  %v4633_v54 = vpop.xlane.xlu0 %4632  ;;  %v4801_v28 = vmul.f32 %v10318_v33, %v4761_v53 }
 0xc2b   :  { %7972 = vrsqrt.f32 %v4702_v45  ;;  %v4703_v42 = vadd.f32 1.1920929e-07, %v4671_v25  ;;  %v4672_v12 = vmul.f32 0.03125, %v4633_v54  ;;  %v4763_v38 = vmul.f32 %v7967_v14, %v10233_v29 }
 0xc2c   :  { %v4635_v5 = vpop.xlane.xlu1 %4634  ;;  %v4824_v39 = vpack.c.bf16 %v4801_v28, %v4800_v55  ;;  %v4802_v7 = vmul.f32 %v10318_v33, %v4762_v63 }
 0xc2d   :  { %7974 = vrsqrt.f32 %v4703_v42  ;;  %v4704_v58 = vadd.f32 1.1920929e-07, %v4672_v12  ;;  %v4673_v61 = vmul.f32 0.03125, %v4635_v5  ;;  %v4803_v41 = vmul.f32 %v10318_v33, %v4763_v38 }
 0xc2e   :  { %v4637_v35 = vpop.xlane.xlu0 %4636  ;;  %6925 = vmatprep.mubr.bf16.mxu1 %v4824_v39 }
 0xc2f   :  { %7976 = vrsqrt.f32 %v4704_v58  ;;  %v4705_v48 = vadd.f32 1.1920929e-07, %v4673_v61  ;;  %v4674_v8 = vmul.f32 0.03125, %v4637_v35  ;;  %v4825_v9 = vpack.c.bf16 %v4803_v41, %v4802_v7 }
 0xc30   :  { %v4639_v51 = vpop.xlane.xlu1 %4638 }
 0xc31   :  { %v7969_v18 = vpop.eup %7968  ;;  %7978 = vrsqrt.f32 %v4705_v48  ;;  %v4706_v43 = vadd.f32 1.1920929e-07, %v4674_v8  ;;  %v4675_v1 = vmul.f32 0.03125, %v4639_v51  ;;  %6926 = vmatmul.mubr.bf16.gmra.mrb[144].mxu1 %v4825_v9 }
 0xc32   :  { %v4641_v4 = vpop.xlane.xlu0 %4640  ;;  %v4764_v56 = vmul.f32 %v7969_v18, %v10244_v40 }
 0xc33   :  { %v7971_v10 = vpop.eup %7970  ;;  %7980 = vrsqrt.f32 %v4706_v43  ;;  %v4707_v24 = vadd.f32 1.1920929e-07, %v4675_v1  ;;  %v4676_v37 = vmul.f32 0.03125, %v4641_v4 }
 0xc34   :  { %v4643_v13 = vpop.xlane.xlu1 %4642  ;;  %v4765_v53 = vmul.f32 %v7971_v10, %v10252_v52  ;;  %v4804_v54 = vmul.f32 %v10318_v33, %v4764_v56 }
 0xc35   :  { %v7973_v45 = vpop.eup %7972  ;;  %7982 = vrsqrt.f32 %v4707_v24  ;;  %v4708_v25 = vadd.f32 1.1920929e-07, %v4676_v37  ;;  %v4677_v63 = vmul.f32 0.03125, %v4643_v13 }
 0xc36   :  { %v4645_v14 = vpop.xlane.xlu0 %4644  ;;  %v4805_v55 = vmul.f32 %v10318_v33, %v4765_v53  ;;  %v4766_v28 = vmul.f32 %v7973_v45, %v10249_v50 }
 0xc37   :  { %v7975_v42 = vpop.eup %7974  ;;  %7984 = vrsqrt.f32 %v4708_v25  ;;  %v4709_v12 = vadd.f32 1.1920929e-07, %v4677_v63  ;;  %v4678_v38 = vmul.f32 0.03125, %v4645_v14 }
 0xc38   :  { %v4647_v5 = vpop.xlane.xlu1 %4646  ;;  %v4826_v39 = vpack.c.bf16 %v4805_v55, %v4804_v54  ;;  %v4767_v7 = vmul.f32 %v7975_v42, %v10257_v16  ;;  %v4806_v35 = vmul.f32 %v10318_v33, %v4766_v28 }
 0xc39   :  { %v7977_v58 = vpop.eup %7976  ;;  %7986 = vrsqrt.f32 %v4709_v12  ;;  %v4710_v61 = vadd.f32 1.1920929e-07, %v4678_v38  ;;  %v4679_v41 = vmul.f32 0.03125, %v4647_v5 }
 0xc3a   :  { %6929 = vmatprep.mubr.bf16.mxu1 %v4826_v39  ;;  %v4807_v48 = vmul.f32 %v10318_v33, %v4767_v7  ;;  %v4768_v8 = vmul.f32 %v7977_v58, %v10266_v22 }
 0xc3b   :  { %v7979_v9 = vpop.eup %7978  ;;  %7988 = vrsqrt.f32 %v4710_v61  ;;  %v4711_v51 = vadd.f32 1.1920929e-07, %v4679_v41 }
 0xc3c   :  { %v4827_v18 = vpack.c.bf16 %v4807_v48, %v4806_v35  ;;  %v4769_v43 = vmul.f32 %v7979_v9, %v10276_v47  ;;  %v4808_v4 = vmul.f32 %v10318_v33, %v4768_v8  ;;  %v7148_v35 = vld [vmem:[#allocation10 + $0x120] sm:$0xff]   ;;  %v7149_v48 = vld [vmem:[#allocation10 + $0x128] sm:$0xff]   ;;  %v7150_v8 = vld [vmem:[#allocation10 + $0x130] sm:$0xff]  }
 0xc3d   :  { %v7981_v1 = vpop.eup %7980  ;;  %7990 = vrsqrt.f32 %v4711_v51  ;;  %6949 = vmatprep.subr.bf16.mxu0 %v7148_v35  ;;  %v7151_v9 = vld [vmem:[#allocation10 + $0x138] sm:$0xff]   ;;  %v7152_v51 = vld [vmem:[#allocation11] sm:$0xff]  }
 0xc3e   :  { %6930 = vmatmul.mubr.bf16.gmra.mrb[148].mxu1 %v4827_v18  ;;  %v4809_v56 = vmul.f32 %v10318_v33, %v4769_v43  ;;  %v4770_v10 = vmul.f32 %v7981_v1, %v10273_v6  ;;  %6950 = vmatpush3.bf16.msra.mxu0 %v7148_v35  ;;  %v7153_v18 = vld [vmem:[#allocation11 + $0x8] sm:$0xff]   ;;  %v7154_v1 = vld [vmem:[#allocation11 + $0x10] sm:$0xff]  }
 0xc3f   :  { %v7983_v24 = vpop.eup %7982  ;;  %6951 = vmatprep.subr.bf16.mxu0 %v7149_v48  ;;  %6989 = vmatprep.subr.bf16.mxu1 %v7152_v51 }
 0xc40   :  { %v4828_v37 = vpack.c.bf16 %v4809_v56, %v4808_v4  ;;  %v4771_v13 = vmul.f32 %v7983_v24, %v10281_v17  ;;  %v4810_v45 = vmul.f32 %v10318_v33, %v4770_v10  ;;  %6990 = vmatpush3.bf16.msra.mxu1 %v7152_v51 }
 0xc41   :  { %v7985_v53 = vpop.eup %7984  ;;  %6991 = vmatprep.subr.bf16.mxu1 %v7153_v18 }
 0xc42   :  { %6933 = vmatprep.mubr.bf16.mxu1 %v4828_v37  ;;  %v4811_v25 = vmul.f32 %v10318_v33, %v4771_v13  ;;  %v4772_v63 = vmul.f32 %v7985_v53, %v10290_v26  ;;  %6952 = vmatpush3.bf16.msra.mxu0 %v7149_v48 }
 0xc43   :  { %v7987_v14 = vpop.eup %7986  ;;  %6953 = vmatprep.subr.bf16.mxu0 %v7150_v8 }
 0xc44   :  { %v4829_v54 = vpack.c.bf16 %v4811_v25, %v4810_v45  ;;  %v4773_v55 = vmul.f32 %v7987_v14, %v10300_v30  ;;  %v4812_v42 = vmul.f32 %v10318_v33, %v4772_v63  ;;  %6992 = vmatpush3.bf16.msra.mxu1 %v7153_v18  ;;  %v7155_v63 = vld [vmem:[#allocation11 + $0x18] sm:$0xff]  }
 0xc45   :  { %v7989_v28 = vpop.eup %7988  ;;  %6993 = vmatprep.subr.bf16.mxu1 %v7154_v1 }
 0xc46   :  { %6934 = vmatmul.mubr.bf16.gmra.mrb[152].mxu1 %v4829_v54  ;;  %v4813_v12 = vmul.f32 %v10318_v33, %v4773_v55  ;;  %v4774_v38 = vmul.f32 %v7989_v28, %v10297_v19  ;;  %6954 = vmatpush3.bf16.msra.mxu0 %v7150_v8  ;;  %v7156_v55 = vld [vmem:[#allocation11 + $0x20] sm:$0xff]   ;;  %v7157_v28 = vld [vmem:[#allocation11 + $0x28] sm:$0xff]  }
 0xc47   :  { %v7991_v5 = vpop.eup %7990  ;;  %6955 = vmatprep.subr.bf16.mxu0 %v7151_v9 }
 0xc48   :  { %v4830_v39 = vpack.c.bf16 %v4813_v12, %v4812_v42  ;;  %v4775_v7 = vmul.f32 %v7991_v5, %v10305_v36  ;;  %v4814_v58 = vmul.f32 %v10318_v33, %v4774_v38  ;;  %6994 = vmatpush3.bf16.msra.mxu1 %v7154_v1  ;;  %v7158_v5 = vld [vmem:[#allocation11 + $0x30] sm:$0xff]  }
 0xc49   :  { %6995 = vmatprep.subr.bf16.mxu1 %v7155_v63 }
 0xc4a   :  { %6937 = vmatprep.mubr.bf16.mxu1 %v4830_v39  ;;  %v4815_v61 = vmul.f32 %v10318_v33, %v4775_v7  ;;  %6956 = vmatpush3.bf16.msra.mxu0 %v7151_v9  ;;  %v10385_v33 = vld [vmem:[%s10666_s5 + $0x4] ss:$0 sm:$0xff] }
 0xc4c   :  { %v4831_v41 = vpack.c.bf16 %v4815_v61, %v4814_v58  ;;  %6996 = vmatpush3.bf16.msra.mxu1 %v7155_v63 }
 0xc4d   :  { %6997 = vmatprep.subr.bf16.mxu1 %v7156_v55 }
 0xc4e   :  { %6938 = vmatmul.mubr.bf16.gmra.mrb[156].mxu1 %v4831_v41 }
 0xc50   :  { %6998 = vmatpush3.bf16.msra.mxu1 %v7156_v55 }
 0xc51   :  { %6999 = vmatprep.subr.bf16.mxu1 %v7157_v28 }
 0xc54   :  { %7000 = vmatpush3.bf16.msra.mxu1 %v7157_v28 }
 0xc55   :  { %7001 = vmatprep.subr.bf16.mxu1 %v7158_v5 }
 0xc58   :  { %7002 = vmatpush3.bf16.msra.mxu1 %v7158_v5 }
 0xcd2   :  { %v6911_v43 = vpop.f32.mrb[128].mxu1 }
 0xcd3   :  { %v10388_v4 = vadd.f32 %v6911_v43, %v10385_v33  ;;  %v4939_v56 = vpop.f32.mrb[129].mxu1 }
 0xcd4   :  { %v10391_v10 = vadd.f32 %v10385_v33, %v4939_v56  ;;  %v6912_v24 = vpop.f32.mrb[130].mxu1 }
 0xcd5   :  { %v6124_v37 = vmul.f32 -1.442695, %v10388_v4  ;;  %v10395_v13 = vadd.f32 %v6912_v24, %v10385_v33  ;;  %v4942_v53 = vpop.f32.mrb[131].mxu1 }
 0xcd6   :  { %v6122_v45 = vmul.f32 -1.442695, %v10391_v10  ;;  %v10399_v25 = vadd.f32 %v10385_v33, %v4942_v53 }
 0xcd7   :  { %7992 = vpow2.f32 %v6124_v37  ;;  %v6125_v14 = vmul.f32 -1.442695, %v10395_v13 }
 0xcd8   :  { %7994 = vpow2.f32 %v6122_v45  ;;  %v6123_v54 = vmul.f32 -1.442695, %v10399_v25 }
 0xcd9   :  { %7996 = vpow2.f32 %v6125_v14 }
 0xcda   :  { %7998 = vpow2.f32 %v6123_v54 }
 0xce1   :  { %v7993_v42 = vpop.eup %7992 }
 0xce2   :  { %v7995_v12 = vpop.eup %7994  ;;  %v5164_v38 = vadd.f32 1.0, %v7993_v42 }
 0xce3   :  { %v7997_v39 = vpop.eup %7996  ;;  %v5162_v7 = vadd.f32 1.0, %v7995_v12  ;;  %v6915_v58 = vpop.f32.mrb[132].mxu1 }
 0xce4   :  { %v7999_v61 = vpop.eup %7998  ;;  %8000 = vrcp.f32 %v5164_v38  ;;  %v5165_v41 = vadd.f32 1.0, %v7997_v39  ;;  %v10404_v35 = vadd.f32 %v6915_v58, %v10385_v33  ;;  %v4955_v48 = vpop.f32.mrb[133].mxu1 }
 0xce5   :  { %8002 = vrcp.f32 %v5162_v7  ;;  %v5163_v8 = vadd.f32 1.0, %v7999_v61  ;;  %v10407_v9 = vadd.f32 %v10385_v33, %v4955_v48  ;;  %v6916_v51 = vpop.f32.mrb[134].mxu1 }
 0xce6   :  { %8004 = vrcp.f32 %v5165_v41  ;;  %v6128_v18 = vmul.f32 -1.442695, %v10404_v35  ;;  %v10411_v43 = vadd.f32 %v6916_v51, %v10385_v33  ;;  %v4958_v1 = vpop.f32.mrb[135].mxu1 }
 0xce7   :  { %8006 = vrcp.f32 %v5163_v8  ;;  %v6126_v56 = vmul.f32 -1.442695, %v10407_v9  ;;  %v10415_v24 = vadd.f32 %v10385_v33, %v4958_v1 }
 0xce8   :  { %8008 = vpow2.f32 %v6128_v18  ;;  %v6129_v37 = vmul.f32 -1.442695, %v10411_v43 }
 0xce9   :  { %8010 = vpow2.f32 %v6126_v56  ;;  %v6127_v53 = vmul.f32 -1.442695, %v10415_v24 }
 0xcea   :  { %8012 = vpow2.f32 %v6129_v37 }
 0xceb   :  { %8014 = vpow2.f32 %v6127_v53 }
 0xcec   :  { %v6919_v45 = vpop.f32.mrb[136].mxu1 }
 0xced   :  { %v10420_v63 = vadd.f32 %v6919_v45, %v10385_v33  ;;  %v4971_v14 = vpop.f32.mrb[137].mxu1 }
 0xcee   :  { %v8001_v54 = vpop.eup %8000  ;;  %v10423_v55 = vadd.f32 %v10385_v33, %v4971_v14  ;;  %v6920_v28 = vpop.f32.mrb[138].mxu1 }
 0xcef   :  { %v8003_v42 = vpop.eup %8002  ;;  %v6132_v12 = vmul.f32 -1.442695, %v10420_v63  ;;  %v10427_v38 = vadd.f32 %v6920_v28, %v10385_v33  ;;  %v4974_v39 = vpop.f32.mrb[139].mxu1  ;;  %v5260_v41 = vmul.f32 %v8001_v54, %v10388_v4 }
 0xcf0   :  { %v8005_v5 = vpop.eup %8004  ;;  %v6130_v7 = vmul.f32 -1.442695, %v10423_v55  ;;  %v10431_v58 = vadd.f32 %v10385_v33, %v4974_v39  ;;  %v5258_v18 = vmul.f32 %v8003_v42, %v10391_v10 }
 0xcf1   :  { %v8007_v61 = vpop.eup %8006  ;;  %v5261_v48 = vmul.f32 %v8005_v5, %v10395_v13  ;;  %8016 = vpow2.f32 %v6132_v12  ;;  %v6133_v8 = vmul.f32 -1.442695, %v10427_v38 }
 0xcf2   :  { %v8009_v51 = vpop.eup %8008  ;;  %v5259_v1 = vmul.f32 %v8007_v61, %v10399_v25  ;;  %8018 = vpow2.f32 %v6130_v7  ;;  %v6131_v56 = vmul.f32 -1.442695, %v10431_v58 }
 0xcf3   :  { %v8011_v37 = vpop.eup %8010  ;;  %v5291_v53 = vpack.c.bf16 %v5261_v48, %v5260_v41  ;;  %v5168_v45 = vadd.f32 1.0, %v8009_v51  ;;  %8020 = vpow2.f32 %v6133_v8 }
 0xcf4   :  { %v8013_v14 = vpop.eup %8012  ;;  %v5166_v28 = vadd.f32 1.0, %v8011_v37  ;;  %8022 = vpow2.f32 %v6131_v56  ;;  %v5290_v4 = vpack.c.bf16 %v5259_v1, %v5258_v18 }
 0xcf5   :  { %v8015_v13 = vpop.eup %8014  ;;  %8024 = vrcp.f32 %v5168_v45  ;;  %v5169_v54 = vadd.f32 1.0, %v8013_v14 }
 0xcf6   :  { %8026 = vrcp.f32 %v5166_v28  ;;  %v5167_v12 = vadd.f32 1.0, %v8015_v13  ;;  %6957 = vmatprep.mubr.bf16.mxu0 %v5290_v4 }
 0xcf7   :  { %8028 = vrcp.f32 %v5169_v54  ;;  %6958 = vmatmul.mubr.bf16.vlgmr.msra.gmra.mrb[160].mxu0 %v5291_v53 }
 0xcf8   :  { %8030 = vrcp.f32 %v5167_v12 }
 0xcfb   :  { %v8017_v10 = vpop.eup %8016 }
 0xcfc   :  { %v8019_v25 = vpop.eup %8018  ;;  %v5172_v42 = vadd.f32 1.0, %v8017_v10  ;;  %v6923_v39 = vpop.f32.mrb[140].mxu1 }
 0xcfd   :  { %v8021_v5 = vpop.eup %8020  ;;  %v5170_v7 = vadd.f32 1.0, %v8019_v25  ;;  %v10440_v61 = vadd.f32 %v6923_v39, %v10385_v33  ;;  %v4987_v41 = vpop.f32.mrb[141].mxu1 }
 0xcfe   :  { %v8023_v48 = vpop.eup %8022  ;;  %8032 = vrcp.f32 %v5172_v42  ;;  %v5173_v8 = vadd.f32 1.0, %v8021_v5  ;;  %v10443_v51 = vadd.f32 %v10385_v33, %v4987_v41  ;;  %v6924_v18 = vpop.f32.mrb[142].mxu1 }
 0xcff   :  { %v8025_v1 = vpop.eup %8024  ;;  %8034 = vrcp.f32 %v5170_v7  ;;  %v5171_v56 = vadd.f32 1.0, %v8023_v48  ;;  %v6136_v37 = vmul.f32 -1.442695, %v10440_v61  ;;  %v10447_v53 = vadd.f32 %v6924_v18, %v10385_v33  ;;  %v4990_v45 = vpop.f32.mrb[143].mxu1 }
 0xd00   :  { %v8027_v14 = vpop.eup %8026  ;;  %8036 = vrcp.f32 %v5173_v8  ;;  %v6134_v28 = vmul.f32 -1.442695, %v10443_v51  ;;  %v10451_v4 = vadd.f32 %v10385_v33, %v4990_v45  ;;  %v5264_v10 = vmul.f32 %v8025_v1, %v10404_v35 }
 0xd01   :  { %v8029_v13 = vpop.eup %8028  ;;  %8038 = vrcp.f32 %v5171_v56  ;;  %v6137_v54 = vmul.f32 -1.442695, %v10447_v53  ;;  %v5262_v39 = vmul.f32 %v8027_v14, %v10407_v9 }
 0xd02   :  { %v8031_v12 = vpop.eup %8030  ;;  %v5265_v25 = vmul.f32 %v8029_v13, %v10411_v43  ;;  %8040 = vpow2.f32 %v6136_v37  ;;  %v6135_v42 = vmul.f32 -1.442695, %v10451_v4 }
 0xd03   :  { %v5263_v5 = vmul.f32 %v8031_v12, %v10415_v24  ;;  %8042 = vpow2.f32 %v6134_v28 }
 0xd04   :  { %8044 = vpow2.f32 %v6137_v54  ;;  %v6927_v7 = vpop.f32.mrb[144].mxu1  ;;  %v5293_v41 = vpack.c.bf16 %v5265_v25, %v5264_v10 }
 0xd05   :  { %8046 = vpow2.f32 %v6135_v42  ;;  %v10460_v48 = vadd.f32 %v6927_v7, %v10385_v33  ;;  %v5003_v8 = vpop.f32.mrb[145].mxu1  ;;  %v5292_v18 = vpack.c.bf16 %v5263_v5, %v5262_v39 }
 0xd06   :  { %v10463_v35 = vadd.f32 %v10385_v33, %v5003_v8  ;;  %v6928_v43 = vpop.f32.mrb[146].mxu1 }
 0xd07   :  { %v6140_v1 = vmul.f32 -1.442695, %v10460_v48  ;;  %v10467_v9 = vadd.f32 %v6928_v43, %v10385_v33  ;;  %v5006_v24 = vpop.f32.mrb[147].mxu1  ;;  %6961 = vmatprep.mubr.bf16.mxu0 %v5292_v18 }
 0xd08   :  { %v8033_v56 = vpop.eup %8032  ;;  %v6138_v37 = vmul.f32 -1.442695, %v10463_v35  ;;  %v10471_v45 = vadd.f32 %v10385_v33, %v5006_v24  ;;  %6962 = vmatmul.mubr.bf16.gmra.mrb[164].mxu0 %v5293_v41 }
 0xd09   :  { %v8035_v14 = vpop.eup %8034  ;;  %8048 = vpow2.f32 %v6140_v1  ;;  %v6141_v28 = vmul.f32 -1.442695, %v10467_v9  ;;  %v5268_v10 = vmul.f32 %v8033_v56, %v10420_v63 }
 0xd0a   :  { %v8037_v13 = vpop.eup %8036  ;;  %8050 = vpow2.f32 %v6138_v37  ;;  %v6139_v54 = vmul.f32 -1.442695, %v10471_v45  ;;  %v5266_v39 = vmul.f32 %v8035_v14, %v10423_v55 }
 0xd0b   :  { %v8039_v12 = vpop.eup %8038  ;;  %v5269_v25 = vmul.f32 %v8037_v13, %v10427_v38  ;;  %8052 = vpow2.f32 %v6141_v28 }
 0xd0c   :  { %v8041_v42 = vpop.eup %8040  ;;  %v5267_v5 = vmul.f32 %v8039_v12, %v10431_v58  ;;  %8054 = vpow2.f32 %v6139_v54 }
 0xd0d   :  { %v8043_v7 = vpop.eup %8042  ;;  %v5176_v41 = vadd.f32 1.0, %v8041_v42  ;;  %v5295_v8 = vpack.c.bf16 %v5269_v25, %v5268_v10 }
 0xd0e   :  { %v8045_v18 = vpop.eup %8044  ;;  %v5174_v43 = vadd.f32 1.0, %v8043_v7  ;;  %v5294_v1 = vpack.c.bf16 %v5267_v5, %v5266_v39 }
 0xd0f   :  { %v8047_v24 = vpop.eup %8046  ;;  %8056 = vrcp.f32 %v5176_v41  ;;  %v5177_v37 = vadd.f32 1.0, %v8045_v18 }
 0xd10   :  { %8058 = vrcp.f32 %v5174_v43  ;;  %v5175_v63 = vadd.f32 1.0, %v8047_v24  ;;  %6965 = vmatprep.mubr.bf16.mxu0 %v5294_v1 }
 0xd11   :  { %8060 = vrcp.f32 %v5177_v37  ;;  %v6931_v38 = vpop.f32.mrb[148].mxu1  ;;  %6966 = vmatmul.mubr.bf16.gmra.mrb[168].mxu0 %v5295_v8 }
 0xd12   :  { %8062 = vrcp.f32 %v5175_v63  ;;  %v10480_v55 = vadd.f32 %v6931_v38, %v10385_v33  ;;  %v5019_v58 = vpop.f32.mrb[149].mxu1 }
 0xd13   :  { %v8049_v56 = vpop.eup %8048  ;;  %v10483_v14 = vadd.f32 %v10385_v33, %v5019_v58  ;;  %v6932_v28 = vpop.f32.mrb[150].mxu1 }
 0xd14   :  { %v8051_v13 = vpop.eup %8050  ;;  %v5180_v54 = vadd.f32 1.0, %v8049_v56  ;;  %v10486_v12 = vadd.f32 %v6932_v28, %v10385_v33  ;;  %v5022_v10 = vpop.f32.mrb[151].mxu1  ;;  %v6144_v41 = vmul.f32 -1.442695, %v10480_v55 }
 0xd15   :  { %v8053_v25 = vpop.eup %8052  ;;  %v5178_v42 = vadd.f32 1.0, %v8051_v13  ;;  %v10489_v39 = vadd.f32 %v10385_v33, %v5022_v10  ;;  %v6142_v18 = vmul.f32 -1.442695, %v10483_v14 }
 0xd16   :  { %v8055_v5 = vpop.eup %8054  ;;  %8064 = vrcp.f32 %v5180_v54  ;;  %v5181_v7 = vadd.f32 1.0, %v8053_v25  ;;  %v6145_v43 = vmul.f32 -1.442695, %v10486_v12 }
 0xd17   :  { %8066 = vrcp.f32 %v5178_v42  ;;  %v5179_v8 = vadd.f32 1.0, %v8055_v5  ;;  %v6143_v24 = vmul.f32 -1.442695, %v10489_v39 }
 0xd18   :  { %8068 = vrcp.f32 %v5181_v7 }
 0xd19   :  { %v8057_v1 = vpop.eup %8056  ;;  %8070 = vrcp.f32 %v5179_v8  ;;  %v6935_v37 = vpop.f32.mrb[152].mxu1 }
 0xd1a   :  { %v8059_v63 = vpop.eup %8058  ;;  %8072 = vpow2.f32 %v6144_v41  ;;  %v10496_v38 = vadd.f32 %v6935_v37, %v10385_v33  ;;  %v5035_v58 = vpop.f32.mrb[153].mxu1  ;;  %v5272_v28 = vmul.f32 %v8057_v1, %v10440_v61 }
 0xd1b   :  { %v8061_v56 = vpop.eup %8060  ;;  %v5270_v13 = vmul.f32 %v8059_v63, %v10443_v51  ;;  %8074 = vpow2.f32 %v6142_v18  ;;  %v10501_v54 = vadd.f32 %v10385_v33, %v5035_v58  ;;  %v6936_v10 = vpop.f32.mrb[154].mxu1 }
 0xd1c   :  { %v8063_v25 = vpop.eup %8062  ;;  %v5273_v42 = vmul.f32 %v8061_v56, %v10447_v53  ;;  %8076 = vpow2.f32 %v6145_v43  ;;  %v6148_v5 = vmul.f32 -1.442695, %v10496_v38  ;;  %v10506_v7 = vadd.f32 %v6936_v10, %v10385_v33  ;;  %v5038_v41 = vpop.f32.mrb[155].mxu1 }
 0xd1d   :  { %v5271_v8 = vmul.f32 %v8063_v25, %v10451_v4  ;;  %8078 = vpow2.f32 %v6143_v24  ;;  %v6146_v61 = vmul.f32 -1.442695, %v10501_v54  ;;  %v10511_v51 = vadd.f32 %v10385_v33, %v5038_v41 }
 0xd1e   :  { %8080 = vpow2.f32 %v6148_v5  ;;  %v6149_v18 = vmul.f32 -1.442695, %v10506_v7  ;;  %v5297_v1 = vpack.c.bf16 %v5273_v42, %v5272_v28 }
 0xd1f   :  { %8082 = vpow2.f32 %v6146_v61  ;;  %v6147_v53 = vmul.f32 -1.442695, %v10511_v51  ;;  %v5296_v43 = vpack.c.bf16 %v5271_v8, %v5270_v13 }
 0xd20   :  { %v8065_v37 = vpop.eup %8064  ;;  %8084 = vpow2.f32 %v6149_v18 }
 0xd21   :  { %v8067_v63 = vpop.eup %8066  ;;  %8086 = vpow2.f32 %v6147_v53  ;;  %v6939_v58 = vpop.f32.mrb[156].mxu1  ;;  %6969 = vmatprep.mubr.bf16.mxu0 %v5296_v43  ;;  %v5276_v25 = vmul.f32 %v8065_v37, %v10460_v48 }
 0xd22   :  { %v8069_v4 = vpop.eup %8068  ;;  %v10516_v24 = vadd.f32 %v6939_v58, %v10385_v33  ;;  %v5051_v56 = vpop.f32.mrb[157].mxu1  ;;  %6970 = vmatmul.mubr.bf16.gmra.mrb[172].mxu0 %v5297_v1  ;;  %v5274_v13 = vmul.f32 %v8067_v63, %v10463_v35 }
 0xd23   :  { %v8071_v10 = vpop.eup %8070  ;;  %v5277_v28 = vmul.f32 %v8069_v4, %v10467_v9  ;;  %v6940_v42 = vpop.f32.mrb[158].mxu1  ;;  %v10524_v9 = vadd.f32 %v10385_v33, %v5051_v56 }
 0xd24   :  { %v8073_v5 = vpop.eup %8072  ;;  %v5275_v41 = vmul.f32 %v8071_v10, %v10471_v45  ;;  %v6152_v8 = vmul.f32 -1.442695, %v10516_v24  ;;  %v5054_v61 = vpop.f32.mrb[159].mxu1  ;;  %v10527_v45 = vadd.f32 %v6940_v42, %v10385_v33 }
 0xd25   :  { %v8075_v18 = vpop.eup %8074  ;;  %v5184_v53 = vadd.f32 1.0, %v8073_v5  ;;  %v5299_v43 = vpack.c.bf16 %v5277_v28, %v5276_v25  ;;  %v5055_v10 = vadd.f32 %v10385_v33, %v5054_v61 }
 0xd26   :  { %v8077_v58 = vpop.eup %8076  ;;  %v5182_v30 = vadd.f32 1.0, %v8075_v18  ;;  %8088 = vpow2.f32 %v6152_v8  ;;  %v5298_v1 = vpack.c.bf16 %v5275_v41, %v5274_v13  ;;  %v6150_v13 = vmul.f32 -1.442695, %v10524_v9 }
 0xd27   :  { %v8079_v26 = vpop.eup %8078  ;;  %8090 = vrcp.f32 %v5184_v53  ;;  %v5185_v48 = vadd.f32 1.0, %v8077_v58  ;;  %v6151_v42 = vmul.f32 -1.442695, %v5055_v10 }
 0xd28   :  { %v8081_v37 = vpop.eup %8080  ;;  %8092 = vrcp.f32 %v5182_v30  ;;  %v5183_v35 = vadd.f32 1.0, %v8079_v26  ;;  %6973 = vmatprep.mubr.bf16.mxu0 %v5298_v1  ;;  %v6153_v30 = vmul.f32 -1.442695, %v10527_v45 }
 0xd29   :  { %v8083_v63 = vpop.eup %8082  ;;  %8094 = vrcp.f32 %v5185_v48  ;;  %v5188_v4 = vadd.f32 1.0, %v8081_v37 }
 0xd2a   :  { %v8085_v25 = vpop.eup %8084  ;;  %8096 = vrcp.f32 %v5183_v35  ;;  %v5186_v28 = vadd.f32 1.0, %v8083_v63  ;;  %6974 = vmatmul.mubr.bf16.gmra.mrb[176].mxu0 %v5299_v43 }
 0xd2b   :  { %v8087_v5 = vpop.eup %8086  ;;  %8098 = vrcp.f32 %v5188_v4  ;;  %v5189_v56 = vadd.f32 1.0, %v8085_v25 }
 0xd2c   :  { %8100 = vrcp.f32 %v5186_v28  ;;  %v5187_v26 = vadd.f32 1.0, %v8087_v5 }
 0xd2d   :  { %8102 = vrcp.f32 %v5189_v56 }
 0xd2e   :  { %8104 = vrcp.f32 %v5187_v26 }
 0xd2f   :  { %8106 = vpow2.f32 %v6150_v13 }
 0xd30   :  { %v8089_v41 = vpop.eup %8088  ;;  %8108 = vpow2.f32 %v6153_v30 }
 0xd31   :  { %v8091_v33 = vpop.eup %8090  ;;  %8110 = vpow2.f32 %v6151_v42  ;;  %v5192_v4 = vadd.f32 1.0, %v8089_v41 }
 0xd32   :  { %v8093_v8 = vpop.eup %8092  ;;  %v5280_v53 = vmul.f32 %v8091_v33, %v10480_v55 }
 0xd33   :  { %v8095_v61 = vpop.eup %8094  ;;  %v5278_v1 = vmul.f32 %v8093_v8, %v10483_v14  ;;  %8112 = vrcp.f32 %v5192_v4 }
 0xd34   :  { %v8097_v18 = vpop.eup %8096  ;;  %v5281_v43 = vmul.f32 %v8095_v61, %v10486_v12 }
 0xd35   :  { %v8099_v58 = vpop.eup %8098  ;;  %v5279_v48 = vmul.f32 %v8097_v18, %v10489_v39 }
 0xd36   :  { %v8101_v37 = vpop.eup %8100  ;;  %v5301_v35 = vpack.c.bf16 %v5281_v43, %v5280_v53  ;;  %v5284_v5 = vmul.f32 %v8099_v58, %v10496_v38 }
 0xd37   :  { %v8103_v63 = vpop.eup %8102  ;;  %v5300_v25 = vpack.c.bf16 %v5279_v48, %v5278_v1  ;;  %v5282_v55 = vmul.f32 %v8101_v37, %v10501_v54  ;;  %v7159_v1 = vld [vmem:[#allocation11 + $0x38] sm:$0xff]   ;;  %v10546_v48 = vld [vmem:[%s10668_s7 + $0x4] ss:$0 sm:$0xff] }
 0xd38   :  { %v8105_v28 = vpop.eup %8104  ;;  %v5285_v56 = vmul.f32 %v8103_v63, %v10506_v7  ;;  %7003 = vmatprep.subr.bf16.mxu1 %v7159_v1 }
 0xd39   :  { %v8107_v13 = vpop.eup %8106  ;;  %v5283_v12 = vmul.f32 %v8105_v28, %v10511_v51  ;;  %6977 = vmatprep.mubr.bf16.mxu0 %v5300_v25  ;;  %7004 = vmatpush3.bf16.msra.mxu1 %v7159_v1 }
 0xd3a   :  { %v8109_v26 = vpop.eup %8108  ;;  %v5190_v14 = vadd.f32 1.0, %v8107_v13  ;;  %6978 = vmatmul.mubr.bf16.gmra.mrb[180].mxu0 %v5301_v35  ;;  %v5303_v39 = vpack.c.bf16 %v5285_v56, %v5284_v5 }
 0xd3b   :  { %v8111_v30 = vpop.eup %8110  ;;  %v5193_v42 = vadd.f32 1.0, %v8109_v26  ;;  %v5302_v41 = vpack.c.bf16 %v5283_v12, %v5282_v55 }
 0xd3c   :  { %8114 = vrcp.f32 %v5190_v14  ;;  %v5191_v33 = vadd.f32 1.0, %v8111_v30 }
 0xd3d   :  { %8116 = vrcp.f32 %v5193_v42  ;;  %6981 = vmatprep.mubr.bf16.mxu0 %v5302_v41  ;;  %v8113_v38 = vpop.eup %8112 }
 0xd3e   :  { %8118 = vrcp.f32 %v5191_v33  ;;  %v5288_v51 = vmul.f32 %v8113_v38, %v10516_v24 }
 0xd42   :  { %6982 = vmatmul.mubr.bf16.gmra.mrb[184].mxu0 %v5303_v39 }
 0xd46   :  { %v8115_v7 = vpop.eup %8114 }
 0xd47   :  { %v8117_v54 = vpop.eup %8116  ;;  %v5286_v18 = vmul.f32 %v8115_v7, %v10524_v9 }
 0xd48   :  { %v8119_v8 = vpop.eup %8118  ;;  %v5289_v61 = vmul.f32 %v8117_v54, %v10527_v45 }
 0xd49   :  { %v5287_v53 = vmul.f32 %v8119_v8, %v5055_v10 }
 0xd4a   :  { %v5305_v43 = vpack.c.bf16 %v5289_v61, %v5288_v51 }
 0xd4b   :  { %v5304_v58 = vpack.c.bf16 %v5287_v53, %v5286_v18 }
 0xd4d   :  { %6985 = vmatprep.mubr.bf16.mxu0 %v5304_v58 }
 0xd4e   :  { %6986 = vmatmul.mubr.bf16.gmra.mrb[188].mxu0 %v5305_v43 }
 0xdca   :  { %v6959_v37 = vpop.f32.mrb[160].mxu0 }
 0xdcb   :  { %v5422_v24 = vadd.f32 %v6959_v37, %v10546_v48  ;;  %v5413_v35 = vpop.f32.mrb[161].mxu0 }
 0xdcc   :  { %v5414_v45 = vadd.f32 %v10546_v48, %v5413_v35  ;;  %v6960_v9 = vpop.f32.mrb[162].mxu0 }
 0xdcd   :  { %v5425_v10 = vadd.f32 %v6960_v9, %v10546_v48  ;;  %v5416_v63 = vpop.f32.mrb[163].mxu0  ;;  %v5542_v25 = vadd.f32 %v5422_v24, %v10129_v0 }
 0xdce   :  { %v5417_v4 = vadd.f32 %v10546_v48, %v5416_v63  ;;  %v5540_v5 = vadd.f32 %v5414_v45, %v10124_v3 }
 0xdcf   :  { %v5543_v28 = vadd.f32 %v5425_v10, %v10137_v60 }
 0xdd0   :  { %v5541_v56 = vadd.f32 %v5417_v4, %v10132_v46 }
 0xdd1   :  { %v5573_v13 = vpack.c.bf16 %v5543_v28, %v5542_v25 }
 0xdd2   :  { %v5572_v55 = vpack.c.bf16 %v5541_v56, %v5540_v5 }
 0xdd4   :  { %7005 = vmatprep.mubr.bf16.mxu1 %v5572_v55 }
 0xdd5   :  { %7006 = vmatmul.mubr.bf16.vlgmr.msra.gmra.mrb[160].mxu1 %v5573_v13 }
 0xddb   :  { %v6963_v12 = vpop.f32.mrb[164].mxu0 }
 0xddc   :  { %v5438_v26 = vadd.f32 %v6963_v12, %v10546_v48  ;;  %v5429_v14 = vpop.f32.mrb[165].mxu0 }
 0xddd   :  { %v5430_v39 = vadd.f32 %v10546_v48, %v5429_v14  ;;  %v6964_v30 = vpop.f32.mrb[166].mxu0 }
 0xdde   :  { %v5441_v42 = vadd.f32 %v6964_v30, %v10546_v48  ;;  %v5432_v0 = vpop.f32.mrb[167].mxu0  ;;  %v5546_v3 = vadd.f32 %v5438_v26, %v10153_v15 }
 0xddf   :  { %v5433_v60 = vadd.f32 %v10546_v48, %v5432_v0  ;;  %v5544_v41 = vadd.f32 %v5430_v39, %v10148_v11 }
 0xde0   :  { %v5547_v46 = vadd.f32 %v5441_v42, %v10161_v59 }
 0xde1   :  { %v5545_v33 = vadd.f32 %v5433_v60, %v10156_v20 }
 0xde2   :  { %v5575_v38 = vpack.c.bf16 %v5547_v46, %v5546_v3 }
 0xde3   :  { %v5574_v7 = vpack.c.bf16 %v5545_v33, %v5544_v41 }
 0xde4   :  { %v6967_v54 = vpop.f32.mrb[168].mxu0 }
 0xde5   :  { %v5454_v8 = vadd.f32 %v6967_v54, %v10546_v48  ;;  %v5445_v51 = vpop.f32.mrb[169].mxu0  ;;  %7009 = vmatprep.mubr.bf16.mxu1 %v5574_v7 }
 0xde6   :  { %v5446_v61 = vadd.f32 %v10546_v48, %v5445_v51  ;;  %v6968_v18 = vpop.f32.mrb[170].mxu0  ;;  %7010 = vmatmul.mubr.bf16.gmra.mrb[164].mxu1 %v5575_v38 }
 0xde7   :  { %v5457_v53 = vadd.f32 %v6968_v18, %v10546_v48  ;;  %v5448_v15 = vpop.f32.mrb[171].mxu0  ;;  %v5550_v11 = vadd.f32 %v5454_v8, %v10177_v49 }
 0xde8   :  { %v5449_v59 = vadd.f32 %v10546_v48, %v5448_v15  ;;  %v5548_v43 = vadd.f32 %v5446_v61, %v10170_v32 }
 0xde9   :  { %v5551_v20 = vadd.f32 %v5457_v53, %v10185_v62 }
 0xdea   :  { %v5549_v58 = vadd.f32 %v5449_v59, %v10180_v34 }
 0xdeb   :  { %v5577_v1 = vpack.c.bf16 %v5551_v20, %v5550_v11 }
 0xdec   :  { %v5576_v37 = vpack.c.bf16 %v5549_v58, %v5548_v43 }
 0xdee   :  { %7013 = vmatprep.mubr.bf16.mxu1 %v5576_v37 }
 0xdef   :  { %7014 = vmatmul.mubr.bf16.gmra.mrb[168].mxu1 %v5577_v1 }
 0xdf5   :  { %v6971_v24 = vpop.f32.mrb[172].mxu0 }
 0xdf6   :  { %v5470_v35 = vadd.f32 %v6971_v24, %v10546_v48  ;;  %v5461_v45 = vpop.f32.mrb[173].mxu0 }
 0xdf7   :  { %v5462_v9 = vadd.f32 %v10546_v48, %v5461_v45  ;;  %v6972_v10 = vpop.f32.mrb[174].mxu0 }
 0xdf8   :  { %v5473_v63 = vadd.f32 %v6972_v10, %v10546_v48  ;;  %v5464_v49 = vpop.f32.mrb[175].mxu0  ;;  %v5554_v32 = vadd.f32 %v5470_v35, %v10201_v57 }
 0xdf9   :  { %v5465_v62 = vadd.f32 %v10546_v48, %v5464_v49  ;;  %v5552_v4 = vadd.f32 %v5462_v9, %v10196_v2 }
 0xdfa   :  { %v5555_v34 = vadd.f32 %v5473_v63, %v10209_v23  ;;  %v10745_v63 = vld [vmem:[#allocation23_spill] sm:$0xff] }
 0xdfb   :  { %v5553_v25 = vadd.f32 %v5465_v62, %v10204_v31  ;;  %v10746_v62 = vld [vmem:[#allocation24_spill] sm:$0xff] }
 0xdfc   :  { %v5579_v28 = vpack.c.bf16 %v5555_v34, %v5554_v32 }
 0xdfd   :  { %v6975_v5 = vpop.f32.mrb[176].mxu0  ;;  %v5578_v56 = vpack.c.bf16 %v5553_v25, %v5552_v4  ;;  %v10615_v25 = vld [vmem:[%s10670_s9] ss:$0 sm:$0xff]  ;;  %s8292_s9 = smov [#allocation13]  }
 0xdfe   :  { %v5486_v13 = vadd.f32 %v6975_v5, %v10546_v48  ;;  %v5477_v55 = vpop.f32.mrb[177].mxu0  ;;  %s5857_s27 = sshll.u32 %s8292_s9, 4  ;;  %s5858_s27 = int_to_ptr.vmem [resolvable:$true] %s5857_s27 }
 0xdff   :  { %v5478_v12 = vadd.f32 %v10546_v48, %v5477_v55  ;;  %v6976_v26 = vpop.f32.mrb[178].mxu0  ;;  %7017 = vmatprep.mubr.bf16.mxu1 %v5578_v56  ;;  %s8252_s28 = scalar_lea.vmem %s5858_s27, 4096  ;;  %p8257_p7 = scmp.lt.s32.totalorder %s5858_s27, %s5858_s27 }
 0xe00   :  { %v5489_v14 = vadd.f32 %v6976_v26, %v10546_v48  ;;  %v5480_v39 = vpop.f32.mrb[179].mxu0  ;;  %7018 = vmatmul.mubr.bf16.gmra.mrb[172].mxu1 %v5579_v28  ;;  %v5558_v2 = vadd.f32 %v5486_v13, %v10225_v27  ;;  %p8253_p6 = scmp.ne.s32.totalorder %s5858_s27, %s8252_s28  ;;  %p8258_p8 = scmp.lt.s32.totalorder %s8252_s28, %s8252_s28 }
 0xe01   :  { %v5481_v57 = vadd.f32 %v10546_v48, %v5480_v39  ;;  %v5556_v23 = vadd.f32 %v5478_v12, %v10218_v21 }
 0xe02   :  { %v5559_v31 = vadd.f32 %v5489_v14, %v10233_v29  ;;  %p8259_p9 = por %p8258_p8, %p8257_p7 }
 0xe03   :  { %v5557_v30 = vadd.f32 %v5481_v57, %v10228_v44 }
 0xe04   :  { %v5581_v42 = vpack.c.bf16 %v5559_v31, %v5558_v2  ;;  %p8260_p10 = pnand %p8259_p9, %p8253_p6 }
 0xe05   :  { %v5580_v0 = vpack.c.bf16 %v5557_v30, %v5556_v23 }
 0xe07   :  { %7021 = vmatprep.mubr.bf16.mxu1 %v5580_v0 }
 0xe08   :  { %7022 = vmatmul.mubr.bf16.gmra.mrb[176].mxu1 %v5581_v42 }
 0xe0d   :  { %v6979_v60 = vpop.f32.mrb[180].mxu0 }
 0xe0e   :  { %v5502_v3 = vadd.f32 %v6979_v60, %v10546_v48  ;;  %v5493_v46 = vpop.f32.mrb[181].mxu0 }
 0xe0f   :  { %v5494_v41 = vadd.f32 %v10546_v48, %v5493_v46  ;;  %v6980_v33 = vpop.f32.mrb[182].mxu0 }
 0xe10   :  { %v5505_v38 = vadd.f32 %v6980_v33, %v10546_v48  ;;  %v5496_v27 = vpop.f32.mrb[183].mxu0  ;;  %v5562_v21 = vadd.f32 %v5502_v3, %v10249_v50 }
 0xe11   :  { %v5497_v29 = vadd.f32 %v10546_v48, %v5496_v27  ;;  %v5560_v7 = vadd.f32 %v5494_v41, %v10244_v40 }
 0xe12   :  { %v5563_v44 = vadd.f32 %v5505_v38, %v10257_v16 }
 0xe13   :  { %v5561_v54 = vadd.f32 %v5497_v29, %v10252_v52 }
 0xe14   :  { %v5583_v8 = vpack.c.bf16 %v5563_v44, %v5562_v21 }
 0xe15   :  { %v6983_v51 = vpop.f32.mrb[184].mxu0  ;;  %v5582_v61 = vpack.c.bf16 %v5561_v54, %v5560_v7 }
 0xe16   :  { %v5518_v18 = vadd.f32 %v6983_v51, %v10546_v48  ;;  %v5509_v53 = vpop.f32.mrb[185].mxu0 }
 0xe17   :  { %v5510_v15 = vadd.f32 %v10546_v48, %v5509_v53  ;;  %v6984_v59 = vpop.f32.mrb[186].mxu0  ;;  %7025 = vmatprep.mubr.bf16.mxu1 %v5582_v61 }
 0xe18   :  { %v5521_v11 = vadd.f32 %v6984_v59, %v10546_v48  ;;  %v5512_v20 = vpop.f32.mrb[187].mxu0  ;;  %7026 = vmatmul.mubr.bf16.gmra.mrb[180].mxu1 %v5583_v8  ;;  %v5566_v40 = vadd.f32 %v5518_v18, %v10273_v6 }
 0xe19   :  { %v5513_v50 = vadd.f32 %v10546_v48, %v5512_v20  ;;  %v5564_v16 = vadd.f32 %v5510_v15, %v10266_v22 }
 0xe1a   :  { %v5567_v52 = vadd.f32 %v5521_v11, %v10281_v17 }
 0xe1b   :  { %v5565_v43 = vadd.f32 %v5513_v50, %v10276_v47 }
 0xe1c   :  { %v5585_v58 = vpack.c.bf16 %v5567_v52, %v5566_v40 }
 0xe1d   :  { %v5584_v1 = vpack.c.bf16 %v5565_v43, %v5564_v16 }
 0xe1f   :  { %7029 = vmatprep.mubr.bf16.mxu1 %v5584_v1 }
 0xe20   :  { %7030 = vmatmul.mubr.bf16.gmra.mrb[184].mxu1 %v5585_v58 }
 0xe21   :  { %v6987_v37 = vpop.f32.mrb[188].mxu0 }
 0xe22   :  { %v5534_v24 = vadd.f32 %v6987_v37, %v10546_v48  ;;  %v5525_v35 = vpop.f32.mrb[189].mxu0 }
 0xe23   :  { %v5526_v45 = vadd.f32 %v10546_v48, %v5525_v35  ;;  %v6988_v9 = vpop.f32.mrb[190].mxu0 }
 0xe24   :  { %v5537_v10 = vadd.f32 %v6988_v9, %v10546_v48  ;;  %v5528_v6 = vpop.f32.mrb[191].mxu0  ;;  %v5570_v22 = vadd.f32 %v5534_v24, %v10297_v19 }
 0xe25   :  { %v5529_v17 = vadd.f32 %v10546_v48, %v5528_v6  ;;  %v5568_v49 = vadd.f32 %v5526_v45, %v10745_v63 }
 0xe26   :  { %v5571_v47 = vadd.f32 %v5537_v10, %v10305_v36 }
 0xe27   :  { %v5569_v32 = vadd.f32 %v5529_v17, %v10746_v62 }
 0xe28   :  { %v5587_v34 = vpack.c.bf16 %v5571_v47, %v5570_v22 }
 0xe29   :  { %v5586_v4 = vpack.c.bf16 %v5569_v32, %v5568_v49 }
 0xe2b   :  { %7033 = vmatprep.mubr.bf16.mxu1 %v5586_v4 }
 0xe2c   :  { %7034 = vmatmul.mubr.bf16.gmra.mrb[188].mxu1 %v5587_v34 }
 0xea8   :  { %v7007_v28 = vpop.f32.mrb[160].mxu1 }
 0xea9   :  { %v5702_v48 = vadd.f32 %v7007_v28, %v10615_v25  ;;  %v5693_v5 = vpop.f32.mrb[161].mxu1 }
 0xeaa   :  { %v5694_v19 = vadd.f32 %v10615_v25, %v5693_v5  ;;  %v7008_v36 = vpop.f32.mrb[162].mxu1 }
 0xeab   :  { %5822 = vst [vmem:[#allocation13 + $0x10] sm:$0xff] %v5702_v48  ;;  %v5705_v56 = vadd.f32 %v7008_v36, %v10615_v25  ;;  %v5696_v13 = vpop.f32.mrb[163].mxu1 }
 0xeac   :  { %5820 = vst [vmem:[#allocation13] sm:$0xff] %v5694_v19  ;;  %v5697_v55 = vadd.f32 %v10615_v25, %v5696_v13 }
 0xead   :  { %5823 = vst [vmem:[#allocation13 + $0x18] sm:$0xff] %v5705_v56 }
 0xeae   :  { %5821 = vst [vmem:[#allocation13 + $0x8] sm:$0xff] %v5697_v55 }
 0xeb9   :  { %v7011_v12 = vpop.f32.mrb[164].mxu1 }
 0xeba   :  { %v5718_v26 = vadd.f32 %v7011_v12, %v10615_v25  ;;  %v5709_v14 = vpop.f32.mrb[165].mxu1 }
 0xebb   :  { %v5710_v39 = vadd.f32 %v10615_v25, %v5709_v14  ;;  %v7012_v57 = vpop.f32.mrb[166].mxu1 }
 0xebc   :  { %5826 = vst [vmem:[#allocation13 + $0x30] sm:$0xff] %v5718_v26  ;;  %v5721_v2 = vadd.f32 %v7012_v57, %v10615_v25  ;;  %v5712_v31 = vpop.f32.mrb[167].mxu1 }
 0xebd   :  { %5824 = vst [vmem:[#allocation13 + $0x20] sm:$0xff] %v5710_v39  ;;  %v5713_v23 = vadd.f32 %v10615_v25, %v5712_v31 }
 0xebe   :  { %5827 = vst [vmem:[#allocation13 + $0x38] sm:$0xff] %v5721_v2 }
 0xebf   :  { %5825 = vst [vmem:[#allocation13 + $0x28] sm:$0xff] %v5713_v23 }
 0xec2   :  { %v7015_v30 = vpop.f32.mrb[168].mxu1 }
 0xec3   :  { %v5734_v42 = vadd.f32 %v7015_v30, %v10615_v25  ;;  %v5725_v0 = vpop.f32.mrb[169].mxu1 }
 0xec4   :  { %v5726_v60 = vadd.f32 %v10615_v25, %v5725_v0  ;;  %v7016_v3 = vpop.f32.mrb[170].mxu1 }
 0xec5   :  { %5830 = vst [vmem:[#allocation13 + $0x50] sm:$0xff] %v5734_v42  ;;  %v5737_v46 = vadd.f32 %v7016_v3, %v10615_v25  ;;  %v5728_v41 = vpop.f32.mrb[171].mxu1 }
 0xec6   :  { %5828 = vst [vmem:[#allocation13 + $0x40] sm:$0xff] %v5726_v60  ;;  %v5729_v33 = vadd.f32 %v10615_v25, %v5728_v41 }
 0xec7   :  { %5831 = vst [vmem:[#allocation13 + $0x58] sm:$0xff] %v5737_v46 }
 0xec8   :  { %5829 = vst [vmem:[#allocation13 + $0x48] sm:$0xff] %v5729_v33 }
 0xed3   :  { %v7019_v38 = vpop.f32.mrb[172].mxu1 }
 0xed4   :  { %v5750_v27 = vadd.f32 %v7019_v38, %v10615_v25  ;;  %v5741_v29 = vpop.f32.mrb[173].mxu1 }
 0xed5   :  { %v5742_v21 = vadd.f32 %v10615_v25, %v5741_v29  ;;  %v7020_v44 = vpop.f32.mrb[174].mxu1 }
 0xed6   :  { %5834 = vst [vmem:[#allocation13 + $0x70] sm:$0xff] %v5750_v27  ;;  %v5753_v7 = vadd.f32 %v7020_v44, %v10615_v25  ;;  %v5744_v54 = vpop.f32.mrb[175].mxu1 }
 0xed7   :  { %5832 = vst [vmem:[#allocation13 + $0x60] sm:$0xff] %v5742_v21  ;;  %v5745_v8 = vadd.f32 %v10615_v25, %v5744_v54 }
 0xed8   :  { %5835 = vst [vmem:[#allocation13 + $0x78] sm:$0xff] %v5753_v7 }
 0xed9   :  { %5833 = vst [vmem:[#allocation13 + $0x68] sm:$0xff] %v5745_v8 }
 0xedb   :  { %v7023_v51 = vpop.f32.mrb[176].mxu1 }
 0xedc   :  { %v5766_v61 = vadd.f32 %v7023_v51, %v10615_v25  ;;  %v5757_v18 = vpop.f32.mrb[177].mxu1 }
 0xedd   :  { %v5758_v53 = vadd.f32 %v10615_v25, %v5757_v18  ;;  %v7024_v15 = vpop.f32.mrb[178].mxu1 }
 0xede   :  { %5838 = vst [vmem:[#allocation13 + $0x90] sm:$0xff] %v5766_v61  ;;  %v5769_v59 = vadd.f32 %v7024_v15, %v10615_v25  ;;  %v5760_v11 = vpop.f32.mrb[179].mxu1 }
 0xedf   :  { %5836 = vst [vmem:[#allocation13 + $0x80] sm:$0xff] %v5758_v53  ;;  %v5761_v20 = vadd.f32 %v10615_v25, %v5760_v11 }
 0xee0   :  { %5839 = vst [vmem:[#allocation13 + $0x98] sm:$0xff] %v5769_v59 }
 0xee1   :  { %5837 = vst [vmem:[#allocation13 + $0x88] sm:$0xff] %v5761_v20 }
 0xeeb   :  { %v7027_v50 = vpop.f32.mrb[180].mxu1 }
 0xeec   :  { %v5782_v40 = vadd.f32 %v7027_v50, %v10615_v25  ;;  %v5773_v52 = vpop.f32.mrb[181].mxu1 }
 0xeed   :  { %v5774_v16 = vadd.f32 %v10615_v25, %v5773_v52  ;;  %v7028_v43 = vpop.f32.mrb[182].mxu1 }
 0xeee   :  { %5842 = vst [vmem:[#allocation13 + $0xb0] sm:$0xff] %v5782_v40  ;;  %v5785_v58 = vadd.f32 %v7028_v43, %v10615_v25  ;;  %v5776_v1 = vpop.f32.mrb[183].mxu1 }
 0xeef   :  { %5840 = vst [vmem:[#allocation13 + $0xa0] sm:$0xff] %v5774_v16  ;;  %v5777_v37 = vadd.f32 %v10615_v25, %v5776_v1 }
 0xef0   :  { %5843 = vst [vmem:[#allocation13 + $0xb8] sm:$0xff] %v5785_v58 }
 0xef1   :  { %5841 = vst [vmem:[#allocation13 + $0xa8] sm:$0xff] %v5777_v37 }
 0xef3   :  { %v7031_v24 = vpop.f32.mrb[184].mxu1 }
 0xef4   :  { %v5798_v35 = vadd.f32 %v7031_v24, %v10615_v25  ;;  %v5789_v45 = vpop.f32.mrb[185].mxu1 }
 0xef5   :  { %v5790_v9 = vadd.f32 %v10615_v25, %v5789_v45  ;;  %v7032_v10 = vpop.f32.mrb[186].mxu1 }
 0xef6   :  { %5846 = vst [vmem:[#allocation13 + $0xd0] sm:$0xff] %v5798_v35  ;;  %v5801_v6 = vadd.f32 %v7032_v10, %v10615_v25  ;;  %v5792_v17 = vpop.f32.mrb[187].mxu1 }
 0xef7   :  { %5844 = vst [vmem:[#allocation13 + $0xc0] sm:$0xff] %v5790_v9  ;;  %v5793_v22 = vadd.f32 %v10615_v25, %v5792_v17 }
 0xef8   :  { %5847 = vst [vmem:[#allocation13 + $0xd8] sm:$0xff] %v5801_v6 }
 0xef9   :  { %5845 = vst [vmem:[#allocation13 + $0xc8] sm:$0xff] %v5793_v22 }
 0xeff   :  { %v7035_v47 = vpop.f32.mrb[188].mxu1 }
 0xf00   :  { %v5814_v63 = vadd.f32 %v7035_v47, %v10615_v25  ;;  %v5805_v49 = vpop.f32.mrb[189].mxu1 }
 0xf01   :  { %v5806_v62 = vadd.f32 %v10615_v25, %v5805_v49  ;;  %v7036_v32 = vpop.f32.mrb[190].mxu1 }
 0xf02   :  { %5850 = vst [vmem:[#allocation13 + $0xf0] sm:$0xff] %v5814_v63  ;;  %v5817_v34 = vadd.f32 %v7036_v32, %v10615_v25  ;;  %v5808_v4 = vpop.f32.mrb[191].mxu1 }
 0xf03   :  { %5848 = vst [vmem:[#allocation13 + $0xe0] sm:$0xff] %v5806_v62  ;;  %v5809_v28 = vadd.f32 %v10615_v25, %v5808_v4 }
 0xf04   :  { %5851 = vst [vmem:[#allocation13 + $0xf8] sm:$0xff] %v5817_v34 }
 0xf05   :  { %5849 = vst [vmem:[#allocation13 + $0xe8] sm:$0xff] %v5809_v28 }
 0xf06   :  { %8263 = shalt.err (!%p8260_p10)
}
 0xf07   :  { %s8264_s11 = scalar_lea.hbm %s10671_s10, 4096 }
 0xf08   :  { %p8265_p11 = scmp.ne.s32.totalorder %s10671_s10, %s8264_s11  ;;  %p8268_p12 = scmp.lt.u32.totalorder %s8264_s11, %s10671_s10 }
 0xf0a   :  { %p8270_p13 = pnand %p8268_p12, %p8265_p11 }
 0xf0c   :  { %8273 = shalt.err (!%p8270_p13)
}
 0xf0d   :  { %s8293_s15 = smov 128   ;;  %s8294_s2 = smov 8  }
 0xf0e   :  { %5863 = dma.vmem_to_hbm [thread:$0]  %s5858_s27, 4096, %s10671_s10, [#allocation4], %s8293_s15, %s8293_s15, %s8294_s2  }
 0xf0f   :  { %8282 = dma.done.wait [#allocation4], 4096  }
 0xf10   :  { %8283 = vsyncadd [#allocation4], 4294963200 }
 0xf11   :  { %5867 = vsyncpa [#allocation3], 1 }
 0xf12   :  { %5868 = vsyncpa [#allocation6], 1 }
 0xf13   :  { %5869 = vsyncpa [#allocation9], 1 }
 0xf14   :  { %5870 = vsyncpa [#allocation12], 1 }
 0xf15   :  { %5871 = vsyncpa [#allocation4], 1 }

</bundles_post_ra>
